<compile_context>
chip_gen: v5e
topology: v5e:2x2
jax: 0.10.0
libtpu: 0.0.40
codegen_flags: <defaults>
</compile_context>

<pallas_src>
import jax
import jax.numpy as jnp
from jax import lax
from jax.experimental import pallas as pl
from jax.experimental.pallas import tpu as pltpu

FILTERS = 64


def _swish(t):
    # t * sigmoid(t); the reciprocal goes to the EUP (approx) instead of the
    # VPU divide.
    return t * pl.reciprocal(1.0 + jnp.exp(-t), approx=True)


def _conv3x3_swish(src_ref, w_ref, b_ref):
    """3x3 SAME conv (+bias, +swish) as a single im2col matmul on the MXU.

    src_ref: (BB, H+2, W+2, Cin) padded activations (f32, halo already zero).
    w_ref:   (9*Cin, Cout) bf16, tap order (dy, dx, cin).
    b_ref:   (1, Cout) f32.
    Returns  (BB, H, W, Cout) f32.
    """
    bb, hp, wp, cin = src_ref.shape
    h, w = hp - 2, wp - 2
    cout = w_ref.shape[-1]
    # 3 dx (sublane-shift) views, computed once and reused across the dy taps.
    views = [src_ref[:, :, dx:dx + w, :].astype(jnp.bfloat16) for dx in range(3)]
    taps = [views[dx][:, dy:dy + h, :, :] for dy in range(3) for dx in range(3)]
    patches = jnp.concatenate(taps, axis=-1).reshape(bb * h * w, 9 * cin)
    y = jnp.dot(patches, w_ref[...], preferred_element_type=jnp.float32)
    y = _swish(y + b_ref[...])
    return y.reshape(bb, h, w, cout)


def _cond_res_block_kernel(xp_ref, w1_ref, b1_ref, w2_ref, b2_ref,
                           wd_ref, bd_ref, out_ref, hpad_ref, pool_ref):
    bb, hp, wp, c = xp_ref.shape
    h, w = hp - 2, wp - 2
    ho, wo = h // 2, w // 2
    c2 = wd_ref.shape[-1]
    f32 = jnp.float32

    # Zero the 1-pixel halo of the padded activation scratch (the interior is
    # always fully overwritten below).  Scratch is per-core and persists
    # across grid steps, so this is done every step (it is tiny).
    hpad_ref[:, 0:1, :, :] = jnp.zeros((bb, 1, wp, c), f32)
    hpad_ref[:, hp - 1:hp, :, :] = jnp.zeros((bb, 1, wp, c), f32)
    hpad_ref[:, :, 0:1, :] = jnp.zeros((bb, hp, 1, c), f32)
    hpad_ref[:, :, wp - 1:wp, :] = jnp.zeros((bb, hp, 1, c), f32)
    # W-halo of the pooling scratch.
    pool_ref[:, :, 0:1, :] = jnp.zeros((bb, ho, 1, c2), f32)
    pool_ref[:, :, wp - 1:wp, :] = jnp.zeros((bb, ho, 1, c2), f32)

    # Residual trunk.
    h1 = _conv3x3_swish(xp_ref, w1_ref, b1_ref)            # (bb, h, w, c)
    hpad_ref[:, 1:h + 1, 1:w + 1, :] = h1

    h2 = _conv3x3_swish(hpad_ref, w2_ref, b2_ref)          # (bb, h, w, c)
    x_int = xp_ref[:, 1:h + 1, 1:w + 1, :]                 # original x (f32)
    hpad_ref[:, 1:h + 1, 1:w + 1, :] = x_int + h2          # x_out

    # Downsample branch: conv (c -> 2c) + swish.
    d = _conv3x3_swish(hpad_ref, wd_ref, bd_ref)           # (bb, h, w, c2)

    # AvgPool2d(3, stride=2, padding=1), count_include_pad=True (divide by 9).
    # Row direction: pooled row i sums d rows {2i-1, 2i, 2i+1} (zero padded).
    dg = d.reshape(bb, ho, 2, w, c2)                       # leading-dim split, free
    even = dg[:, :, 0, :, :]                               # d[2i]
    odd = dg[:, :, 1, :, :]                                # d[2i+1]
    odd_up = jnp.concatenate(
        [jnp.zeros((bb, 1, w, c2), f32), odd[:, :ho - 1, :, :]], axis=1)  # d[2i-1]
    rows = even + odd + odd_up                             # (bb, ho, w, c2)

    # Column direction via 3 sublane-strided loads from a padded scratch:
    # scratch column s holds rows[..., s-1, :]; pooled column j sums scratch
    # columns {2j, 2j+1, 2j+2}.
    pool_ref[:, :, 1:w + 1, :] = rows
    pooled = (pool_ref[:, :, pl.ds(0, wo, stride=2), :]
              + pool_ref[:, :, pl.ds(1, wo, stride=2), :]
              + pool_ref[:, :, pl.ds(2, wo, stride=2), :]) * (1.0 / 9.0)
    out_ref[...] = pooled


def cond_res_block_no_latent(x, params, *, block_b=8):
    """x: (B, H, W, C) NHWC float32 -> (B, H//2, W//2, 2*C) NHWC float32."""
    w1, b1, w2, b2, wd, bd = params
    B, H, W, C = x.shape
    assert w1.shape == (3, 3, C, C), w1.shape
    assert H % 2 == 0 and W % 2 == 0
    C2 = wd.shape[-1]
    Ho, Wo = H // 2, W // 2

    # im2col weight layout (9*Cin, Cout), tap order (dy, dx, cin); bf16 for the
    # MXU (accumulation stays f32 via preferred_element_type).
    w1f = w1.reshape(9 * C, C).astype(jnp.bfloat16)
    w2f = w2.reshape(9 * C, C).astype(jnp.bfloat16)
    wdf = wd.reshape(9 * C, C2).astype(jnp.bfloat16)
    b1r = b1.reshape(1, C).astype(jnp.float32)
    b2r = b2.reshape(1, C).astype(jnp.float32)
    bdr = bd.reshape(1, C2).astype(jnp.float32)

    # Pad spatially once in the wrapper so the kernel blocks carry the halo and
    # the kernel never concatenates zeros.
    xp = jnp.pad(x.astype(jnp.float32), ((0, 0), (1, 1), (1, 1), (0, 0)))
    Hp, Wp = H + 2, W + 2

    # Batch block: aim for >=4 grid steps (megacore + DMA/compute overlap) and
    # keep the per-step working set small vs. the 64 MiB/TC v7x VMEM budget.
    bb = max(1, min(block_b, B // 4 if B >= 4 else max(1, B // 2)))
    per_b_bytes = (
        H * W * 9 * C * 2            # bf16 im2col patches
        + 3 * Hp * Wp * C * 4        # input block (x2 buffers) + padded scratch
        + Ho * Wp * C2 * 4           # pooling scratch
        + H * W * C2 * 4             # conv_downsample output
        + 2 * Ho * Wo * C2 * 4)      # output block (x2 buffers)
    vmem_budget = 12 * 1024 * 1024
    bb = max(1, min(bb, vmem_budget // max(per_b_bytes, 1)))
    while B % bb:
        bb -= 1
    grid = (B // bb,)

    flops = 2 * B * H * W * 9 * C * (C + C + C2)
    transcendentals = B * H * W * (C + C + C2)
    bytes_accessed = (xp.size * 4 + B * Ho * Wo * C2 * 4
                      + (w1f.size + w2f.size + wdf.size) * 2
                      + (b1r.size + b2r.size + bdr.size) * 4)

    return pl.pallas_call(
        _cond_res_block_kernel,
        out_shape=jax.ShapeDtypeStruct((B, Ho, Wo, C2), jnp.float32),
        grid=grid,
        in_specs=[
            pl.BlockSpec((bb, Hp, Wp, C), lambda i: (i, 0, 0, 0)),
            pl.BlockSpec((9 * C, C), lambda i: (0, 0)),
            pl.BlockSpec((1, C), lambda i: (0, 0)),
            pl.BlockSpec((9 * C, C), lambda i: (0, 0)),
            pl.BlockSpec((1, C), lambda i: (0, 0)),
            pl.BlockSpec((9 * C, C2), lambda i: (0, 0)),
            pl.BlockSpec((1, C2), lambda i: (0, 0)),
        ],
        out_specs=pl.BlockSpec((bb, Ho, Wo, C2), lambda i: (i, 0, 0, 0)),
        scratch_shapes=[
            pltpu.VMEM((bb, Hp, Wp, C), jnp.float32),    # padded activations
            pltpu.VMEM((bb, Ho, Wp, C2), jnp.float32),   # pooling row sums
        ],
        compiler_params=pltpu.CompilerParams(
            dimension_semantics=("parallel",),
            vmem_limit_bytes=32 * 1024 * 1024),
        cost_estimate=pl.CostEstimate(
            flops=flops, transcendentals=transcendentals,
            bytes_accessed=bytes_accessed),
    )(xp, w1f, b1r, w2f, b2r, wdf, bdr)


def init_params(key, filters=FILTERS, rescale=True):
    """Deterministic synthetic parameters matching the module's __init__ shapes."""
    ks = jax.random.split(key, 6)

    def conv_w(k, ci, co):
        scale = 1.0 / jnp.sqrt(jnp.float32(9 * ci))
        return jax.random.normal(k, (3, 3, ci, co), jnp.float32) * scale

    co_d = 2 * filters if rescale else filters
    w1 = conv_w(ks[0], filters, filters)
    b1 = jax.random.normal(ks[1], (1, filters), jnp.float32) * 0.01
    w2 = conv_w(ks[2], filters, filters)
    b2 = jax.random.normal(ks[3], (1, filters), jnp.float32) * 0.01
    wd = conv_w(ks[4], filters, co_d)
    bd = jax.random.normal(ks[5], (1, co_d), jnp.float32) * 0.01
    return (w1, b1, w2, b2, wd, bd)


def reference(x, params):
    """Pure-JAX (f32 XLA conv) reference of the same forward pass, NHWC."""
    w1, b1, w2, b2, wd, bd = params
    dn = lax.conv_dimension_numbers(x.shape, w1.shape, ('NHWC', 'HWIO', 'NHWC'))

    def conv(t, w, b):
        y = lax.conv_general_dilated(t, w, (1, 1), 'SAME', dimension_numbers=dn)
        return y + b.reshape(1, 1, 1, -1)

    def swish(t):
        return t * jax.nn.sigmoid(t)

    h = swish(conv(x, w1, b1))
    h = swish(conv(h, w2, b2))
    xo = x + h
    d = swish(conv(xo, wd, bd))
    dp = jnp.pad(d, ((0, 0), (1, 1), (1, 1), (0, 0)))
    out = lax.reduce_window(dp, 0.0, lax.add,
                            (1, 3, 3, 1), (1, 2, 2, 1), 'VALID') / 9.0
    return out


if __name__ == "__main__":
    key = jax.random.PRNGKey(0)
    pkey, xkey = jax.random.split(key)
    params = init_params(pkey, filters=FILTERS, rescale=True)
    x = jax.random.normal(xkey, (2, 16, 16, FILTERS), jnp.float32)

    out = cond_res_block_no_latent(x, params)
    out = jax.block_until_ready(out)

    ref = reference(x, params)
    assert out.shape == (2, 8, 8, 2 * FILTERS), out.shape
    max_err = float(jnp.max(jnp.abs(out - ref)))
    # bf16 MXU operands + approx-EUP reciprocal in swish -> loosened tolerance
    # vs. the pure-f32 reference (see perf review).
    assert jnp.allclose(out, ref, atol=5e-2, rtol=5e-2), max_err
    print("KERNEL_OK")
</pallas_src>

<mosaic_0001>
module attributes {stable_mosaic.version = 11 : i64} {
  func.func @_cond_res_block_kernel(%arg0: i32, %arg1: memref<1x18x18x64xf32, #tpu.memory_space<vmem>>, %arg2: memref<576x64xbf16, #tpu.memory_space<vmem>>, %arg3: memref<1x64xf32, #tpu.memory_space<vmem>>, %arg4: memref<576x64xbf16, #tpu.memory_space<vmem>>, %arg5: memref<1x64xf32, #tpu.memory_space<vmem>>, %arg6: memref<576x128xbf16, #tpu.memory_space<vmem>>, %arg7: memref<1x128xf32, #tpu.memory_space<vmem>>, %arg8: memref<1x8x8x128xf32, #tpu.memory_space<vmem>>, %arg9: memref<1x18x18x64xf32, #tpu.memory_space<vmem>>, %arg10: memref<1x8x18x128xf32, #tpu.memory_space<vmem>>) attributes {dimension_semantics = [#tpu.dimension_semantics<parallel>], iteration_bounds = array<i64: 2>, scalar_prefetch = 0 : i64, scratch_operands = 2 : i64, tpu.core_type = #tpu.core_type<tc>, window_params = [{transform_indices = @transform_0, window_bounds = array<i64: 1, 18, 18, 64>}, {pipeline_mode = #tpu.pipeline_mode<synchronous>, transform_indices = @transform_1, window_bounds = array<i64: 576, 64>}, {pipeline_mode = #tpu.pipeline_mode<synchronous>, transform_indices = @transform_2, window_bounds = array<i64: 1, 64>}, {pipeline_mode = #tpu.pipeline_mode<synchronous>, transform_indices = @transform_3, window_bounds = array<i64: 576, 64>}, {pipeline_mode = #tpu.pipeline_mode<synchronous>, transform_indices = @transform_4, window_bounds = array<i64: 1, 64>}, {pipeline_mode = #tpu.pipeline_mode<synchronous>, transform_indices = @transform_5, window_bounds = array<i64: 576, 128>}, {pipeline_mode = #tpu.pipeline_mode<synchronous>, transform_indices = @transform_6, window_bounds = array<i64: 1, 128>}, {transform_indices = @transform_7, window_bounds = array<i64: 1, 8, 8, 128>}]} {
    %cst = arith.constant 0.000000e+00 : f32
    %0 = vector.broadcast %cst : f32 to vector<1x1x18x64xf32>
    %c0 = arith.constant 0 : index
    %c0_0 = arith.constant 0 : index
    %c0_1 = arith.constant 0 : index
    %c0_2 = arith.constant 0 : index
    %1 = vector.load %arg9[%c0, %c0_0, %c0_1, %c0_2] : memref<1x18x18x64xf32, #tpu.memory_space<vmem>>, vector<1x1x18x64xf32>
    tpu.vector_store %arg9[%c0, %c0_0, %c0_1, %c0_2], %0 {strides = array<i32>} : memref<1x18x18x64xf32, #tpu.memory_space<vmem>>, vector<1x1x18x64xf32>,
    %cst_3 = arith.constant 0.000000e+00 : f32
    %2 = vector.broadcast %cst_3 : f32 to vector<1x1x18x64xf32>
    %c0_4 = arith.constant 0 : index
    %c17 = arith.constant 17 : index
    %c0_5 = arith.constant 0 : index
    %c0_6 = arith.constant 0 : index
    %3 = vector.load %arg9[%c0_4, %c17, %c0_5, %c0_6] : memref<1x18x18x64xf32, #tpu.memory_space<vmem>>, vector<1x1x18x64xf32>
    tpu.vector_store %arg9[%c0_4, %c17, %c0_5, %c0_6], %2 {strides = array<i32>} : memref<1x18x18x64xf32, #tpu.memory_space<vmem>>, vector<1x1x18x64xf32>,
    %cst_7 = arith.constant 0.000000e+00 : f32
    %4 = vector.broadcast %cst_7 : f32 to vector<1x18x1x64xf32>
    %c0_8 = arith.constant 0 : index
    %c0_9 = arith.constant 0 : index
    %c0_10 = arith.constant 0 : index
    %c0_11 = arith.constant 0 : index
    %5 = vector.load %arg9[%c0_8, %c0_9, %c0_10, %c0_11] : memref<1x18x18x64xf32, #tpu.memory_space<vmem>>, vector<1x18x1x64xf32>
    tpu.vector_store %arg9[%c0_8, %c0_9, %c0_10, %c0_11], %4 {strides = array<i32>} : memref<1x18x18x64xf32, #tpu.memory_space<vmem>>, vector<1x18x1x64xf32>,
    %cst_12 = arith.constant 0.000000e+00 : f32
    %6 = vector.broadcast %cst_12 : f32 to vector<1x18x1x64xf32>
    %c0_13 = arith.constant 0 : index
    %c0_14 = arith.constant 0 : index
    %c17_15 = arith.constant 17 : index
    %c0_16 = arith.constant 0 : index
    %7 = vector.load %arg9[%c0_13, %c0_14, %c17_15, %c0_16] : memref<1x18x18x64xf32, #tpu.memory_space<vmem>>, vector<1x18x1x64xf32>
    tpu.vector_store %arg9[%c0_13, %c0_14, %c17_15, %c0_16], %6 {strides = array<i32>} : memref<1x18x18x64xf32, #tpu.memory_space<vmem>>, vector<1x18x1x64xf32>,
    %cst_17 = arith.constant 0.000000e+00 : f32
    %8 = vector.broadcast %cst_17 : f32 to vector<1x8x1x128xf32>
    %c0_18 = arith.constant 0 : index
    %c0_19 = arith.constant 0 : index
    %c0_20 = arith.constant 0 : index
    %c0_21 = arith.constant 0 : index
    %9 = vector.load %arg10[%c0_18, %c0_19, %c0_20, %c0_21] : memref<1x8x18x128xf32, #tpu.memory_space<vmem>>, vector<1x8x1x128xf32>
    tpu.vector_store %arg10[%c0_18, %c0_19, %c0_20, %c0_21], %8 {strides = array<i32>} : memref<1x8x18x128xf32, #tpu.memory_space<vmem>>, vector<1x8x1x128xf32>,
    %cst_22 = arith.constant 0.000000e+00 : f32
    %10 = vector.broadcast %cst_22 : f32 to vector<1x8x1x128xf32>
    %c0_23 = arith.constant 0 : index
    %c0_24 = arith.constant 0 : index
    %c17_25 = arith.constant 17 : index
    %c0_26 = arith.constant 0 : index
    %11 = vector.load %arg10[%c0_23, %c0_24, %c17_25, %c0_26] : memref<1x8x18x128xf32, #tpu.memory_space<vmem>>, vector<1x8x1x128xf32>
    tpu.vector_store %arg10[%c0_23, %c0_24, %c17_25, %c0_26], %10 {strides = array<i32>} : memref<1x8x18x128xf32, #tpu.memory_space<vmem>>, vector<1x8x1x128xf32>,
    %c0_27 = arith.constant 0 : index
    %c0_28 = arith.constant 0 : index
    %c0_29 = arith.constant 0 : index
    %c0_30 = arith.constant 0 : index
    %12 = vector.load %arg1[%c0_27, %c0_28, %c0_29, %c0_30] : memref<1x18x18x64xf32, #tpu.memory_space<vmem>>, vector<1x18x16x64xf32>
    %13 = arith.truncf %12 : vector<1x18x16x64xf32> to vector<1x18x16x64xbf16>
    %c0_31 = arith.constant 0 : index
    %c0_32 = arith.constant 0 : index
    %c1 = arith.constant 1 : index
    %c0_33 = arith.constant 0 : index
    %14 = vector.load %arg1[%c0_31, %c0_32, %c1, %c0_33] : memref<1x18x18x64xf32, #tpu.memory_space<vmem>>, vector<1x18x16x64xf32>
    %15 = arith.truncf %14 : vector<1x18x16x64xf32> to vector<1x18x16x64xbf16>
    %c0_34 = arith.constant 0 : index
    %c0_35 = arith.constant 0 : index
    %c2 = arith.constant 2 : index
    %c0_36 = arith.constant 0 : index
    %16 = vector.load %arg1[%c0_34, %c0_35, %c2, %c0_36] : memref<1x18x18x64xf32, #tpu.memory_space<vmem>>, vector<1x18x16x64xf32>
    %17 = arith.truncf %16 : vector<1x18x16x64xf32> to vector<1x18x16x64xbf16>
    %18 = vector.extract_strided_slice %13 {offsets = [0, 0, 0, 0], sizes = [1, 16, 16, 64], strides = [1, 1, 1, 1]} : vector<1x18x16x64xbf16> to vector<1x16x16x64xbf16>
    %19 = vector.extract_strided_slice %15 {offsets = [0, 0, 0, 0], sizes = [1, 16, 16, 64], strides = [1, 1, 1, 1]} : vector<1x18x16x64xbf16> to vector<1x16x16x64xbf16>
    %20 = vector.extract_strided_slice %17 {offsets = [0, 0, 0, 0], sizes = [1, 16, 16, 64], strides = [1, 1, 1, 1]} : vector<1x18x16x64xbf16> to vector<1x16x16x64xbf16>
    %21 = vector.extract_strided_slice %13 {offsets = [0, 1, 0, 0], sizes = [1, 16, 16, 64], strides = [1, 1, 1, 1]} : vector<1x18x16x64xbf16> to vector<1x16x16x64xbf16>
    %22 = vector.extract_strided_slice %15 {offsets = [0, 1, 0, 0], sizes = [1, 16, 16, 64], strides = [1, 1, 1, 1]} : vector<1x18x16x64xbf16> to vector<1x16x16x64xbf16>
    %23 = vector.extract_strided_slice %17 {offsets = [0, 1, 0, 0], sizes = [1, 16, 16, 64], strides = [1, 1, 1, 1]} : vector<1x18x16x64xbf16> to vector<1x16x16x64xbf16>
    %24 = vector.extract_strided_slice %13 {offsets = [0, 2, 0, 0], sizes = [1, 16, 16, 64], strides = [1, 1, 1, 1]} : vector<1x18x16x64xbf16> to vector<1x16x16x64xbf16>
    %25 = vector.extract_strided_slice %15 {offsets = [0, 2, 0, 0], sizes = [1, 16, 16, 64], strides = [1, 1, 1, 1]} : vector<1x18x16x64xbf16> to vector<1x16x16x64xbf16>
    %26 = vector.extract_strided_slice %17 {offsets = [0, 2, 0, 0], sizes = [1, 16, 16, 64], strides = [1, 1, 1, 1]} : vector<1x18x16x64xbf16> to vector<1x16x16x64xbf16>
    %27 = tpu.concatenate %18, %19, %20, %21, %22, %23, %24, %25, %26 in 3 : vector<1x16x16x64xbf16>, vector<1x16x16x64xbf16>, vector<1x16x16x64xbf16>, vector<1x16x16x64xbf16>, vector<1x16x16x64xbf16>, vector<1x16x16x64xbf16>, vector<1x16x16x64xbf16>, vector<1x16x16x64xbf16>, vector<1x16x16x64xbf16> -> vector<1x16x16x576xbf16>
    %28 = vector.shape_cast %27 : vector<1x16x16x576xbf16> to vector<256x576xbf16>
    %c0_37 = arith.constant 0 : index
    %c0_38 = arith.constant 0 : index
    %29 = vector.load %arg2[%c0_37, %c0_38] : memref<576x64xbf16, #tpu.memory_space<vmem>>, vector<576x64xbf16>
    %cst_39 = arith.constant dense<0.000000e+00> : vector<256x64xf32>
    %30 = tpu.matmul %28, %29, %cst_39 {dimension_numbers = #tpu.dot_dimension_numbers<[1], [0], [0], [1], [0, 0, 1, 1], [], []>} : vector<256x576xbf16>, vector<576x64xbf16>, vector<256x64xf32> -> vector<256x64xf32>
    %c0_40 = arith.constant 0 : index
    %c0_41 = arith.constant 0 : index
    %31 = vector.load %arg3[%c0_40, %c0_41] : memref<1x64xf32, #tpu.memory_space<vmem>>, vector<1x64xf32>
    %32 = vector.broadcast %31 : vector<1x64xf32> to vector<256x64xf32>
    %33 = arith.addf %30, %32 : vector<256x64xf32>
    %cst_42 = arith.constant 0.000000e+00 : f32
    %34 = vector.broadcast %cst_42 : f32 to vector<256x64xf32>
    %35 = arith.subf %34, %33 : vector<256x64xf32>
    %36 = math.exp %35 : vector<256x64xf32>
    %cst_43 = arith.constant 1.000000e+00 : f32
    %37 = vector.broadcast %cst_43 : f32 to vector<256x64xf32>
    %38 = arith.addf %37, %36 : vector<256x64xf32>
    %39 = tpu.reciprocal %38 {approx = true} : vector<256x64xf32> -> vector<256x64xf32>
    %40 = arith.mulf %33, %39 : vector<256x64xf32>
    %41 = vector.shape_cast %40 : vector<256x64xf32> to vector<1x16x16x64xf32>
    %c0_44 = arith.constant 0 : index
    %c1_45 = arith.constant 1 : index
    %c1_46 = arith.constant 1 : index
    %c0_47 = arith.constant 0 : index
    %42 = vector.load %arg9[%c0_44, %c1_45, %c1_46, %c0_47] : memref<1x18x18x64xf32, #tpu.memory_space<vmem>>, vector<1x16x16x64xf32>
    tpu.vector_store %arg9[%c0_44, %c1_45, %c1_46, %c0_47], %41 {strides = array<i32>} : memref<1x18x18x64xf32, #tpu.memory_space<vmem>>, vector<1x16x16x64xf32>,
    %c0_48 = arith.constant 0 : index
    %c0_49 = arith.constant 0 : index
    %c0_50 = arith.constant 0 : index
    %c0_51 = arith.constant 0 : index
    %43 = vector.load %arg9[%c0_48, %c0_49, %c0_50, %c0_51] : memref<1x18x18x64xf32, #tpu.memory_space<vmem>>, vector<1x18x16x64xf32>
    %44 = arith.truncf %43 : vector<1x18x16x64xf32> to vector<1x18x16x64xbf16>
    %c0_52 = arith.constant 0 : index
    %c0_53 = arith.constant 0 : index
    %c1_54 = arith.constant 1 : index
    %c0_55 = arith.constant 0 : index
    %45 = vector.load %arg9[%c0_52, %c0_53, %c1_54, %c0_55] : memref<1x18x18x64xf32, #tpu.memory_space<vmem>>, vector<1x18x16x64xf32>
    %46 = arith.truncf %45 : vector<1x18x16x64xf32> to vector<1x18x16x64xbf16>
    %c0_56 = arith.constant 0 : index
    %c0_57 = arith.constant 0 : index
    %c2_58 = arith.constant 2 : index
    %c0_59 = arith.constant 0 : index
    %47 = vector.load %arg9[%c0_56, %c0_57, %c2_58, %c0_59] : memref<1x18x18x64xf32, #tpu.memory_space<vmem>>, vector<1x18x16x64xf32>
    %48 = arith.truncf %47 : vector<1x18x16x64xf32> to vector<1x18x16x64xbf16>
    %49 = vector.extract_strided_slice %44 {offsets = [0, 0, 0, 0], sizes = [1, 16, 16, 64], strides = [1, 1, 1, 1]} : vector<1x18x16x64xbf16> to vector<1x16x16x64xbf16>
    %50 = vector.extract_strided_slice %46 {offsets = [0, 0, 0, 0], sizes = [1, 16, 16, 64], strides = [1, 1, 1, 1]} : vector<1x18x16x64xbf16> to vector<1x16x16x64xbf16>
    %51 = vector.extract_strided_slice %48 {offsets = [0, 0, 0, 0], sizes = [1, 16, 16, 64], strides = [1, 1, 1, 1]} : vector<1x18x16x64xbf16> to vector<1x16x16x64xbf16>
    %52 = vector.extract_strided_slice %44 {offsets = [0, 1, 0, 0], sizes = [1, 16, 16, 64], strides = [1, 1, 1, 1]} : vector<1x18x16x64xbf16> to vector<1x16x16x64xbf16>
    %53 = vector.extract_strided_slice %46 {offsets = [0, 1, 0, 0], sizes = [1, 16, 16, 64], strides = [1, 1, 1, 1]} : vector<1x18x16x64xbf16> to vector<1x16x16x64xbf16>
    %54 = vector.extract_strided_slice %48 {offsets = [0, 1, 0, 0], sizes = [1, 16, 16, 64], strides = [1, 1, 1, 1]} : vector<1x18x16x64xbf16> to vector<1x16x16x64xbf16>
    %55 = vector.extract_strided_slice %44 {offsets = [0, 2, 0, 0], sizes = [1, 16, 16, 64], strides = [1, 1, 1, 1]} : vector<1x18x16x64xbf16> to vector<1x16x16x64xbf16>
    %56 = vector.extract_strided_slice %46 {offsets = [0, 2, 0, 0], sizes = [1, 16, 16, 64], strides = [1, 1, 1, 1]} : vector<1x18x16x64xbf16> to vector<1x16x16x64xbf16>
    %57 = vector.extract_strided_slice %48 {offsets = [0, 2, 0, 0], sizes = [1, 16, 16, 64], strides = [1, 1, 1, 1]} : vector<1x18x16x64xbf16> to vector<1x16x16x64xbf16>
    %58 = tpu.concatenate %49, %50, %51, %52, %53, %54, %55, %56, %57 in 3 : vector<1x16x16x64xbf16>, vector<1x16x16x64xbf16>, vector<1x16x16x64xbf16>, vector<1x16x16x64xbf16>, vector<1x16x16x64xbf16>, vector<1x16x16x64xbf16>, vector<1x16x16x64xbf16>, vector<1x16x16x64xbf16>, vector<1x16x16x64xbf16> -> vector<1x16x16x576xbf16>
    %59 = vector.shape_cast %58 : vector<1x16x16x576xbf16> to vector<256x576xbf16>
    %c0_60 = arith.constant 0 : index
    %c0_61 = arith.constant 0 : index
    %60 = vector.load %arg4[%c0_60, %c0_61] : memref<576x64xbf16, #tpu.memory_space<vmem>>, vector<576x64xbf16>
    %cst_62 = arith.constant dense<0.000000e+00> : vector<256x64xf32>
    %61 = tpu.matmul %59, %60, %cst_62 {dimension_numbers = #tpu.dot_dimension_numbers<[1], [0], [0], [1], [0, 0, 1, 1], [], []>} : vector<256x576xbf16>, vector<576x64xbf16>, vector<256x64xf32> -> vector<256x64xf32>
    %c0_63 = arith.constant 0 : index
    %c0_64 = arith.constant 0 : index
    %62 = vector.load %arg5[%c0_63, %c0_64] : memref<1x64xf32, #tpu.memory_space<vmem>>, vector<1x64xf32>
    %63 = vector.broadcast %62 : vector<1x64xf32> to vector<256x64xf32>
    %64 = arith.addf %61, %63 : vector<256x64xf32>
    %cst_65 = arith.constant 0.000000e+00 : f32
    %65 = vector.broadcast %cst_65 : f32 to vector<256x64xf32>
    %66 = arith.subf %65, %64 : vector<256x64xf32>
    %67 = math.exp %66 : vector<256x64xf32>
    %cst_66 = arith.constant 1.000000e+00 : f32
    %68 = vector.broadcast %cst_66 : f32 to vector<256x64xf32>
    %69 = arith.addf %68, %67 : vector<256x64xf32>
    %70 = tpu.reciprocal %69 {approx = true} : vector<256x64xf32> -> vector<256x64xf32>
    %71 = arith.mulf %64, %70 : vector<256x64xf32>
    %72 = vector.shape_cast %71 : vector<256x64xf32> to vector<1x16x16x64xf32>
    %c0_67 = arith.constant 0 : index
    %c1_68 = arith.constant 1 : index
    %c1_69 = arith.constant 1 : index
    %c0_70 = arith.constant 0 : index
    %73 = vector.load %arg1[%c0_67, %c1_68, %c1_69, %c0_70] : memref<1x18x18x64xf32, #tpu.memory_space<vmem>>, vector<1x16x16x64xf32>
    %74 = arith.addf %73, %72 : vector<1x16x16x64xf32>
    %c0_71 = arith.constant 0 : index
    %c1_72 = arith.constant 1 : index
    %c1_73 = arith.constant 1 : index
    %c0_74 = arith.constant 0 : index
    %75 = vector.load %arg9[%c0_71, %c1_72, %c1_73, %c0_74] : memref<1x18x18x64xf32, #tpu.memory_space<vmem>>, vector<1x16x16x64xf32>
    tpu.vector_store %arg9[%c0_71, %c1_72, %c1_73, %c0_74], %74 {strides = array<i32>} : memref<1x18x18x64xf32, #tpu.memory_space<vmem>>, vector<1x16x16x64xf32>,
    %c0_75 = arith.constant 0 : index
    %c0_76 = arith.constant 0 : index
    %c0_77 = arith.constant 0 : index
    %c0_78 = arith.constant 0 : index
    %76 = vector.load %arg9[%c0_75, %c0_76, %c0_77, %c0_78] : memref<1x18x18x64xf32, #tpu.memory_space<vmem>>, vector<1x18x16x64xf32>
    %77 = arith.truncf %76 : vector<1x18x16x64xf32> to vector<1x18x16x64xbf16>
    %c0_79 = arith.constant 0 : index
    %c0_80 = arith.constant 0 : index
    %c1_81 = arith.constant 1 : index
    %c0_82 = arith.constant 0 : index
    %78 = vector.load %arg9[%c0_79, %c0_80, %c1_81, %c0_82] : memref<1x18x18x64xf32, #tpu.memory_space<vmem>>, vector<1x18x16x64xf32>
    %79 = arith.truncf %78 : vector<1x18x16x64xf32> to vector<1x18x16x64xbf16>
    %c0_83 = arith.constant 0 : index
    %c0_84 = arith.constant 0 : index
    %c2_85 = arith.constant 2 : index
    %c0_86 = arith.constant 0 : index
    %80 = vector.load %arg9[%c0_83, %c0_84, %c2_85, %c0_86] : memref<1x18x18x64xf32, #tpu.memory_space<vmem>>, vector<1x18x16x64xf32>
    %81 = arith.truncf %80 : vector<1x18x16x64xf32> to vector<1x18x16x64xbf16>
    %82 = vector.extract_strided_slice %77 {offsets = [0, 0, 0, 0], sizes = [1, 16, 16, 64], strides = [1, 1, 1, 1]} : vector<1x18x16x64xbf16> to vector<1x16x16x64xbf16>
    %83 = vector.extract_strided_slice %79 {offsets = [0, 0, 0, 0], sizes = [1, 16, 16, 64], strides = [1, 1, 1, 1]} : vector<1x18x16x64xbf16> to vector<1x16x16x64xbf16>
    %84 = vector.extract_strided_slice %81 {offsets = [0, 0, 0, 0], sizes = [1, 16, 16, 64], strides = [1, 1, 1, 1]} : vector<1x18x16x64xbf16> to vector<1x16x16x64xbf16>
    %85 = vector.extract_strided_slice %77 {offsets = [0, 1, 0, 0], sizes = [1, 16, 16, 64], strides = [1, 1, 1, 1]} : vector<1x18x16x64xbf16> to vector<1x16x16x64xbf16>
    %86 = vector.extract_strided_slice %79 {offsets = [0, 1, 0, 0], sizes = [1, 16, 16, 64], strides = [1, 1, 1, 1]} : vector<1x18x16x64xbf16> to vector<1x16x16x64xbf16>
    %87 = vector.extract_strided_slice %81 {offsets = [0, 1, 0, 0], sizes = [1, 16, 16, 64], strides = [1, 1, 1, 1]} : vector<1x18x16x64xbf16> to vector<1x16x16x64xbf16>
    %88 = vector.extract_strided_slice %77 {offsets = [0, 2, 0, 0], sizes = [1, 16, 16, 64], strides = [1, 1, 1, 1]} : vector<1x18x16x64xbf16> to vector<1x16x16x64xbf16>
    %89 = vector.extract_strided_slice %79 {offsets = [0, 2, 0, 0], sizes = [1, 16, 16, 64], strides = [1, 1, 1, 1]} : vector<1x18x16x64xbf16> to vector<1x16x16x64xbf16>
    %90 = vector.extract_strided_slice %81 {offsets = [0, 2, 0, 0], sizes = [1, 16, 16, 64], strides = [1, 1, 1, 1]} : vector<1x18x16x64xbf16> to vector<1x16x16x64xbf16>
    %91 = tpu.concatenate %82, %83, %84, %85, %86, %87, %88, %89, %90 in 3 : vector<1x16x16x64xbf16>, vector<1x16x16x64xbf16>, vector<1x16x16x64xbf16>, vector<1x16x16x64xbf16>, vector<1x16x16x64xbf16>, vector<1x16x16x64xbf16>, vector<1x16x16x64xbf16>, vector<1x16x16x64xbf16>, vector<1x16x16x64xbf16> -> vector<1x16x16x576xbf16>
    %92 = vector.shape_cast %91 : vector<1x16x16x576xbf16> to vector<256x576xbf16>
    %c0_87 = arith.constant 0 : index
    %c0_88 = arith.constant 0 : index
    %93 = vector.load %arg6[%c0_87, %c0_88] : memref<576x128xbf16, #tpu.memory_space<vmem>>, vector<576x128xbf16>
    %cst_89 = arith.constant dense<0.000000e+00> : vector<256x128xf32>
    %94 = tpu.matmul %92, %93, %cst_89 {dimension_numbers = #tpu.dot_dimension_numbers<[1], [0], [0], [1], [0, 0, 1, 1], [], []>} : vector<256x576xbf16>, vector<576x128xbf16>, vector<256x128xf32> -> vector<256x128xf32>
    %c0_90 = arith.constant 0 : index
    %c0_91 = arith.constant 0 : index
    %95 = vector.load %arg7[%c0_90, %c0_91] : memref<1x128xf32, #tpu.memory_space<vmem>>, vector<1x128xf32>
    %96 = vector.broadcast %95 : vector<1x128xf32> to vector<256x128xf32>
    %97 = arith.addf %94, %96 : vector<256x128xf32>
    %cst_92 = arith.constant 0.000000e+00 : f32
    %98 = vector.broadcast %cst_92 : f32 to vector<256x128xf32>
    %99 = arith.subf %98, %97 : vector<256x128xf32>
    %100 = math.exp %99 : vector<256x128xf32>
    %cst_93 = arith.constant 1.000000e+00 : f32
    %101 = vector.broadcast %cst_93 : f32 to vector<256x128xf32>
    %102 = arith.addf %101, %100 : vector<256x128xf32>
    %103 = tpu.reciprocal %102 {approx = true} : vector<256x128xf32> -> vector<256x128xf32>
    %104 = arith.mulf %97, %103 : vector<256x128xf32>
    %105 = vector.shape_cast %104 : vector<256x128xf32> to vector<1x16x16x128xf32>
    %106 = vector.shape_cast %105 : vector<1x16x16x128xf32> to vector<1x8x2x16x128xf32>
    %107 = vector.extract_strided_slice %106 {offsets = [0, 0, 0, 0, 0], sizes = [1, 8, 1, 16, 128], strides = [1, 1, 1, 1, 1]} : vector<1x8x2x16x128xf32> to vector<1x8x1x16x128xf32>
    %108 = vector.shape_cast %107 : vector<1x8x1x16x128xf32> to vector<1x8x16x128xf32>
    %109 = vector.extract_strided_slice %106 {offsets = [0, 0, 1, 0, 0], sizes = [1, 8, 1, 16, 128], strides = [1, 1, 1, 1, 1]} : vector<1x8x2x16x128xf32> to vector<1x8x1x16x128xf32>
    %110 = vector.shape_cast %109 : vector<1x8x1x16x128xf32> to vector<1x8x16x128xf32>
    %cst_94 = arith.constant 0.000000e+00 : f32
    %111 = vector.broadcast %cst_94 : f32 to vector<1x1x16x128xf32>
    %112 = vector.extract_strided_slice %110 {offsets = [0, 0, 0, 0], sizes = [1, 7, 16, 128], strides = [1, 1, 1, 1]} : vector<1x8x16x128xf32> to vector<1x7x16x128xf32>
    %113 = tpu.concatenate %111, %112 in 1 : vector<1x1x16x128xf32>, vector<1x7x16x128xf32> -> vector<1x8x16x128xf32>
    %114 = arith.addf %108, %110 : vector<1x8x16x128xf32>
    %115 = arith.addf %114, %113 : vector<1x8x16x128xf32>
    %c0_95 = arith.constant 0 : index
    %c0_96 = arith.constant 0 : index
    %c1_97 = arith.constant 1 : index
    %c0_98 = arith.constant 0 : index
    %116 = vector.load %arg10[%c0_95, %c0_96, %c1_97, %c0_98] : memref<1x8x18x128xf32, #tpu.memory_space<vmem>>, vector<1x8x16x128xf32>
    tpu.vector_store %arg10[%c0_95, %c0_96, %c1_97, %c0_98], %115 {strides = array<i32>} : memref<1x8x18x128xf32, #tpu.memory_space<vmem>>, vector<1x8x16x128xf32>,
    %c0_99 = arith.constant 0 : index
    %c0_100 = arith.constant 0 : index
    %c0_101 = arith.constant 0 : index
    %c0_102 = arith.constant 0 : index
    %117 = tpu.strided_load %arg10[%c0_99, %c0_100, %c0_101, %c0_102] {strides = array<i32: 1, 1, 2, 1>} : memref<1x8x18x128xf32, #tpu.memory_space<vmem>>, vector<1x8x8x128xf32>
    %c0_103 = arith.constant 0 : index
    %c0_104 = arith.constant 0 : index
    %c1_105 = arith.constant 1 : index
    %c0_106 = arith.constant 0 : index
    %118 = tpu.strided_load %arg10[%c0_103, %c0_104, %c1_105, %c0_106] {strides = array<i32: 1, 1, 2, 1>} : memref<1x8x18x128xf32, #tpu.memory_space<vmem>>, vector<1x8x8x128xf32>
    %119 = arith.addf %117, %118 : vector<1x8x8x128xf32>
    %c0_107 = arith.constant 0 : index
    %c0_108 = arith.constant 0 : index
    %c2_109 = arith.constant 2 : index
    %c0_110 = arith.constant 0 : index
    %120 = tpu.strided_load %arg10[%c0_107, %c0_108, %c2_109, %c0_110] {strides = array<i32: 1, 1, 2, 1>} : memref<1x8x18x128xf32, #tpu.memory_space<vmem>>, vector<1x8x8x128xf32>
    %121 = arith.addf %119, %120 : vector<1x8x8x128xf32>
    %cst_111 = arith.constant 0.111111112 : f32
    %122 = vector.broadcast %cst_111 : f32 to vector<1x8x8x128xf32>
    %123 = arith.mulf %121, %122 : vector<1x8x8x128xf32>
    %c0_112 = arith.constant 0 : index
    %c0_113 = arith.constant 0 : index
    %c0_114 = arith.constant 0 : index
    %c0_115 = arith.constant 0 : index
    %124 = vector.load %arg8[%c0_112, %c0_113, %c0_114, %c0_115] : memref<1x8x8x128xf32, #tpu.memory_space<vmem>>, vector<1x8x8x128xf32>
    tpu.vector_store %arg8[%c0_112, %c0_113, %c0_114, %c0_115], %123 {strides = array<i32>} : memref<1x8x8x128xf32, #tpu.memory_space<vmem>>, vector<1x8x8x128xf32>,
    return
  }
  func.func @transform_0(%arg0: i32) -> (i32, i32, i32, i32) {
    %c0_i32 = arith.constant 0 : i32
    %c0_i32_0 = arith.constant 0 : i32
    %c0_i32_1 = arith.constant 0 : i32
    %c0_i32_2 = arith.constant 0 : i32
    return %arg0, %c0_i32, %c0_i32_0, %c0_i32_1 : i32, i32, i32, i32
  }
  func.func @transform_1(%arg0: i32) -> (i32, i32) {
    %c0_i32 = arith.constant 0 : i32
    %c0_i32_0 = arith.constant 0 : i32
    %c0_i32_1 = arith.constant 0 : i32
    return %c0_i32, %c0_i32_0 : i32, i32
  }
  func.func @transform_2(%arg0: i32) -> (i32, i32) {
    %c0_i32 = arith.constant 0 : i32
    %c0_i32_0 = arith.constant 0 : i32
    %c0_i32_1 = arith.constant 0 : i32
    return %c0_i32, %c0_i32_0 : i32, i32
  }
  func.func @transform_3(%arg0: i32) -> (i32, i32) {
    %c0_i32 = arith.constant 0 : i32
    %c0_i32_0 = arith.constant 0 : i32
    %c0_i32_1 = arith.constant 0 : i32
    return %c0_i32, %c0_i32_0 : i32, i32
  }
  func.func @transform_4(%arg0: i32) -> (i32, i32) {
    %c0_i32 = arith.constant 0 : i32
    %c0_i32_0 = arith.constant 0 : i32
    %c0_i32_1 = arith.constant 0 : i32
    return %c0_i32, %c0_i32_0 : i32, i32
  }
  func.func @transform_5(%arg0: i32) -> (i32, i32) {
    %c0_i32 = arith.constant 0 : i32
    %c0_i32_0 = arith.constant 0 : i32
    %c0_i32_1 = arith.constant 0 : i32
    return %c0_i32, %c0_i32_0 : i32, i32
  }
  func.func @transform_6(%arg0: i32) -> (i32, i32) {
    %c0_i32 = arith.constant 0 : i32
    %c0_i32_0 = arith.constant 0 : i32
    %c0_i32_1 = arith.constant 0 : i32
    return %c0_i32, %c0_i32_0 : i32, i32
  }
  func.func @transform_7(%arg0: i32) -> (i32, i32, i32, i32) {
    %c0_i32 = arith.constant 0 : i32
    %c0_i32_0 = arith.constant 0 : i32
    %c0_i32_1 = arith.constant 0 : i32
    %c0_i32_2 = arith.constant 0 : i32
    return %arg0, %c0_i32, %c0_i32_0, %c0_i32_1 : i32, i32, i32, i32
  }
}

</mosaic_0001>

<bundles_post_ra>
// kernel: tpu_custom_call.1
= control target key start
LH: loop header
LB: loop body
LE: loop exit
PB: predicated region body
PF: predicated region fallthrough
CT: control target
= control target key end

     0   :  { %12 = vsyncpa [#allocation5], 0  ;;  %s10079_s0 = inlined_call_operand.vmem [shape: f32[2,18,18,64], index: 0, kind: input, shape index: {}]   ;;  %s10080_s1 = inlined_call_operand.vmem [shape: bf16[576,64], index: 1, kind: input, shape index: {}]   ;;  %s10081_s2 = inlined_call_operand.vmem [shape: f32[1,64], index: 2, kind: input, shape index: {}]   ;;  %s10082_s3 = inlined_call_operand.vmem [shape: bf16[576,64], index: 3, kind: input, shape index: {}]   ;;  %s10083_s4 = inlined_call_operand.vmem [shape: f32[1,64], index: 4, kind: input, shape index: {}]   ;;  %s10084_s5 = inlined_call_operand.vmem [shape: bf16[576,128], index: 5, kind: input, shape index: {}]   ;;  %s10085_s6 = inlined_call_operand.vmem [shape: f32[1,128], index: 6, kind: input, shape index: {}]   ;;  %s10086_s7 = inlined_call_operand.hbm [shape: f32[2,8,8,128], index: 7, kind: output, shape index: {}]  }
   0x1   :  { %14 = vsyncpa [#allocation5 + $0x1], 0  ;;  %s7121_s24 = smov 0   ;;  %s7123_s25 = smov 0  }
   0x2   :  { %s7125_s26 = smov 0   ;;  %s7127_s27 = smov 0  }
   0x3 LB: > { %s7142_s28 = sadd.s32 4294967295, %s7075_s27   ;;  %s5922_s29 = sadd.s32 4294967294, %s7075_s27   ;;  %s7075_s27 = sphi %s7127_s27, %s10183_s27   ;;  %s7071_s26 = sphi %s7125_s26, %s10182_s26   ;;  %s7067_s25 = sphi %s7123_s25, %s10181_s25   ;;  %s7063_s24 = sphi %s7121_s24, %s10180_s24  }
   0x4   : > { %s7146_s30 = sadd.s32 1, %s7075_s27   ;;  %s179_s8 = sadd.s32 1, %s7071_s26 }
   0x5   : > { %s176_s9 = ssub.s32 %s7075_s27, %s7146_s30  ;;  %p189_p0 = scmp.ne.s32.totalorder %s7071_s26, %s7067_s25 }
   0x6   : > { %p177_p1 = scmp.eq.s32.totalorder %s176_s9, 0  ;;  %p190_p2 = scmp.eq.s32.totalorder %s7142_s28, 1 }
   0x7   : > { %p195_p3 = scmp.ne.s32.totalorder %s7067_s25, %s7063_s24  ;;  %p196_p4 = scmp.eq.s32.totalorder %s5922_s29, 1 }
   0x8   : > { %s7157_s10 = scalar_select %p177_p1, %s7071_s26, %s179_s8  }
   0x9   : > { %p7159_p5 = por %p190_p2, %p189_p0  ;;  %p7163_p6 = por %p196_p4, %p195_p3 }
   0xa   : > { %p5925_p7 = scmp.ge.s32.totalorder %s7075_s27, 1  ;;  %p240_p8 = scmp.lt.s32.totalorder %s7075_s27, 3 }
   0xc   : > { %p241_p9 = pnand %p5925_p7, %p240_p8 }
   0xe   : > { %244 = sbr.rel (%p241_p9) target bundleno = 1869 (0x74d), region = 48 }
  0x13   : > { %p272_p10 = scmp.lt.s32.totalorder %s7142_s28, 1  ;;  %s7077_s18 = smov 64   ;;  %vm278_vm0 = vcmask 523264   ;;  %vm281_vm1 = vcmask 517120   ;;  %vm287_vm2 = vcmask 516096  }
  0x14   : > { %s6553_s22 = sshll.u32 %s7142_s28, 6  ;;  %s7033_s20 = scalar_lea.hbm %s10086_s7, 128 }
  0x15   : > { %s273_s13 = scalar_select %p272_p10, %s7142_s28, 1 }
  0x16   : > { %s5856_s8 = scalar_lea.hbm %s10086_s7, %s6553_s22 }
  0x17   : > { %s6578_s14 = smul.u32 432, %s273_s13  ;;  %s5859_s13 = sshll.u32 %s5856_s8, 4  ;;  %s5860_s13 = int_to_ptr.hbm [resolvable:$true] %s5859_s13 }
  0x18   : > { %s7027_s15 = sshra.s32 %s5860_s13, 4  ;;  %s7028_s15 = int_to_ptr.hbm [resolvable:$true] %s7027_s15 }
  0x19   : > { %s7174_s17 = scalar_lea.vmem %s10079_s0, %s6578_s14  ;;  %s7029_s28 = scalar_lea.hbm %s7028_s15, 64 }
  0x1a   : > { %v438_v0 = vld [vmem:[%s7174_s17 + $0x139] sm:$0xff]  ;;  %v439_v1 = vld [vmem:[%s7174_s17 + $0x141] sm:$0xff]  ;;  %v437_v5 = vld [vmem:[%s7174_s17 + $0x129] sm:$0xff]  ;;  %p7030_p11 = scmp.ne.s32.totalorder %s7028_s15, %s7029_s28  ;;  %p7034_p0 = scmp.lt.s32.totalorder %s7028_s15, %s10086_s7 }
  0x1b   : > { %v436_v2 = vld [vmem:[%s7174_s17 + $0x121] sm:$0xff]  ;;  %v474_v3 = vpack.c.bf16 %v438_v0, %v438_v0  ;;  %v475_v4 = vpack.c.bf16 %v439_v1, %v439_v1  ;;  %v414_v7 = vld [vmem:[%s7174_s17 + $0x19] sm:$0xff]  ;;  %v473_v9 = vpack.c.bf16 %v437_v5, %v437_v5  ;;  %v413_v12 = vld [vmem:[%s7174_s17 + $0x9] sm:$0xff]  ;;  %p7035_p1 = scmp.lt.s32.totalorder %s7033_s20, %s7029_s28 }
  0x1c   : > { %v472_v6 = vpack.c.bf16 %v436_v2, %v436_v2  ;;  %v415_v8 = vld [vmem:[%s7174_s17 + $0x21] sm:$0xff]  ;;  %v450_v10 = vpack.c.bf16 %v414_v7, %v414_v7  ;;  %v449_v19 = vpack.c.bf16 %v413_v12, %v413_v12  ;;  %v418_v26 = vld [vmem:[%s7174_s17 + $0x49] sm:$0xff]  ;;  %v419_v27 = vld [vmem:[%s7174_s17 + $0x51] sm:$0xff]  ;;  %p7031_p12 = pnand %p7030_p11, %p7159_p5 }
  0x1d   : > { %v412_v11 = vld [vmem:[%s7174_s17 + $0x1] sm:$0xff]  ;;  %v694_v13 = vunpack.c.l.b16 %v474_v3  ;;  %v695_v14 = vunpack.c.l.b16 %v475_v4  ;;  %v451_v16 = vpack.c.bf16 %v415_v8, %v415_v8  ;;  %v693_v17 = vunpack.c.l.b16 %v473_v9  ;;  %v442_v28 = vld [vmem:[%s7174_s17 + $0x169] sm:$0xff]  ;;  %v443_v29 = vld [vmem:[%s7174_s17 + $0x171] sm:$0xff]  ;;  %p7036_p2 = por %p7035_p1, %p7034_p0 }
  0x1e   : > { %v692_v15 = vunpack.c.l.b16 %v472_v6  ;;  %v448_v18 = vpack.c.bf16 %v412_v11, %v412_v11  ;;  %v670_v22 = vunpack.c.l.b16 %v450_v10  ;;  %v669_v25 = vunpack.c.l.b16 %v449_v19  ;;  %v440_v30 = vld [vmem:[%s7174_s17 + $0x151] sm:$0xff]  ;;  %v441_v31 = vld [vmem:[%s7174_s17 + $0x159] sm:$0xff]  ;;  %v420_v50 = vld [vmem:[%s7174_s17 + $0x61] sm:$0xff]  ;;  %p7032_p13 = pneg %p7031_p12 }
  0x1f   : > { %v7184_v20 = vpack.c.b16 %v695_v14, %v694_v13  ;;  %v671_v23 = vunpack.c.l.b16 %v451_v16  ;;  %v454_v33 = vpack.c.bf16 %v418_v26, %v418_v26  ;;  %v455_v34 = vpack.c.bf16 %v419_v27, %v419_v27  ;;  %v368_v43 = vld [vmem:[%s7174_s17 + $0x150] sm:$0xff]  ;;  %v369_v47 = vld [vmem:[%s7174_s17 + $0x158] sm:$0xff]  ;;  %v370_v1 = vld [vmem:[%s7174_s17 + $0x168] sm:$0xff] }
  0x20   : > { %v7186_v21 = vpack.c.b16 %v693_v17, %v692_v15  ;;  %v668_v24 = vunpack.c.l.b16 %v448_v18  ;;  %v478_v36 = vpack.c.bf16 %v442_v28, %v442_v28  ;;  %v479_v37 = vpack.c.bf16 %v443_v29, %v443_v29  ;;  %v416_v48 = vld [vmem:[%s7174_s17 + $0x31] sm:$0xff]  ;;  %v417_v49 = vld [vmem:[%s7174_s17 + $0x39] sm:$0xff]  ;;  %v421_v51 = vld [vmem:[%s7174_s17 + $0x69] sm:$0xff]  ;;  %p7037_p3 = pnand %p7036_p2, %p7032_p13 }
  0x21   : > { %742 = vrot.lane.b32.xlu1 %v7184_v20, %s7077_s18  ;;  %v7198_v32 = vpack.c.b16 %v671_v23, %v670_v22  ;;  %v476_v38 = vpack.c.bf16 %v440_v30, %v440_v30  ;;  %v477_v39 = vpack.c.bf16 %v441_v31, %v441_v31  ;;  %v674_v41 = vunpack.c.l.b16 %v454_v33  ;;  %v371_v2 = vld [vmem:[%s7174_s17 + $0x170] sm:$0xff]  ;;  %v425_v7 = vld [vmem:[%s7174_s17 + $0x99] sm:$0xff]  ;;  %v511_v29 = vld [vmem:[%s7174_s17 + $0x142] sm:$0xff] }
  0x22   : > { %10106 = vst [vmem:[#allocation7_spill] sm:$0xff] %v7186_v21  ;;  %740 = vrot.lane.b32.xlu0 %v7186_v21, %s7077_s18  ;;  %v700_v35 = vpack.c.b16 %v669_v25, %v668_v24  ;;  %v675_v42 = vunpack.c.l.b16 %v455_v34  ;;  %v698_v45 = vunpack.c.l.b16 %v478_v36  ;;  %v699_v46 = vunpack.c.l.b16 %v479_v37  ;;  %v424_v6 = vld [vmem:[%s7174_s17 + $0x91] sm:$0xff]  ;;  %v367_v11 = vld [vmem:[%s7174_s17 + $0x140] sm:$0xff]  ;;  %v426_v27 = vld [vmem:[%s7174_s17 + $0xa9] sm:$0xff] }
  0x23   : > { %v696_v40 = vunpack.c.l.b16 %v476_v38  ;;  %v697_v44 = vunpack.c.l.b16 %v477_v39  ;;  %v452_v53 = vpack.c.bf16 %v416_v48, %v416_v48  ;;  %v453_v54 = vpack.c.bf16 %v417_v49, %v417_v49  ;;  %v366_v8 = vld [vmem:[%s7174_s17 + $0x138] sm:$0xff]  ;;  %v423_v33 = vld [vmem:[%s7174_s17 + $0x81] sm:$0xff] }
  0x24   : > { %v7211_v55 = vpack.c.b16 %v675_v42, %v674_v41  ;;  %v404_v56 = vpack.c.bf16 %v368_v43, %v368_v43  ;;  %v405_v57 = vpack.c.bf16 %v369_v47, %v369_v47  ;;  %v7215_v59 = vpack.c.b16 %v699_v46, %v698_v45  ;;  %v510_v28 = vld [vmem:[%s7174_s17 + $0x13a] sm:$0xff]  ;;  %v427_v30 = vld [vmem:[%s7174_s17 + $0xb1] sm:$0xff] }
  0x25   : > { %v7209_v52 = vpack.c.b16 %v697_v44, %v696_v40  ;;  %v672_v58 = vunpack.c.l.b16 %v452_v53  ;;  %v456_v60 = vpack.c.bf16 %v420_v50, %v420_v50  ;;  %v457_v61 = vpack.c.bf16 %v421_v51, %v421_v51  ;;  %v422_v31 = vld [vmem:[%s7174_s17 + $0x79] sm:$0xff]  ;;  %v431_v50 = vld [vmem:[%s7174_s17 + $0xe1] sm:$0xff] }
  0x26   : > { %v673_v62 = vunpack.c.l.b16 %v453_v54  ;;  %v616_v63 = vunpack.c.l.b16 %v404_v56  ;;  %v617_v0 = vunpack.c.l.b16 %v405_v57  ;;  %v406_v9 = vpack.c.bf16 %v370_v1, %v370_v1  ;;  %v430_v46 = vld [vmem:[%s7174_s17 + $0xd9] sm:$0xff]  ;;  %v373_v53 = vld [vmem:[%s7174_s17 + $0x188] sm:$0xff] }
  0x27   : > { %744 = vrot.lane.b32.xlu2 %v7209_v52, %s7077_s18  ;;  %v676_v4 = vunpack.c.l.b16 %v456_v60  ;;  %v677_v5 = vunpack.c.l.b16 %v457_v61  ;;  %v407_v10 = vpack.c.bf16 %v371_v2, %v371_v2  ;;  %v402_v12 = vpack.c.bf16 %v366_v8, %v366_v8  ;;  %v372_v51 = vld [vmem:[%s7174_s17 + $0x180] sm:$0xff]  ;;  %v512_v54 = vld [vmem:[%s7174_s17 + $0x152] sm:$0xff] }
  0x28   : > { %v7221_v3 = vpack.c.b16 %v673_v62, %v672_v58  ;;  %v7229_v13 = vpack.c.b16 %v617_v0, %v616_v63  ;;  %v460_v14 = vpack.c.bf16 %v424_v6, %v424_v6  ;;  %v461_v15 = vpack.c.bf16 %v425_v7, %v425_v7  ;;  %v513_v56 = vld [vmem:[%s7174_s17 + $0x15a] sm:$0xff]  ;;  %v429_v6 = vld [vmem:[%s7174_s17 + $0xc9] sm:$0xff] }
  0x29   : > { %718 = vrot.lane.b32.xlu1 %v7198_v32, %s7077_s18  ;;  %v403_v16 = vpack.c.bf16 %v367_v11, %v367_v11  ;;  %v7233_v17 = vpack.c.b16 %v677_v5, %v676_v4  ;;  %v614_v18 = vunpack.c.l.b16 %v402_v12  ;;  %v618_v22 = vunpack.c.l.b16 %v406_v9  ;;  %v428_v5 = vld [vmem:[%s7174_s17 + $0xc1] sm:$0xff] }
  0x2a   : > { %716 = vrot.lane.b32.xlu0 %v700_v35, %s7077_s18  ;;  %v619_v23 = vunpack.c.l.b16 %v407_v10  ;;  %v680_v24 = vunpack.c.l.b16 %v460_v14  ;;  %v681_v25 = vunpack.c.l.b16 %v461_v15  ;;  %v458_v34 = vpack.c.bf16 %v422_v31, %v422_v31  ;;  %v516_v9 = vld [vmem:[%s7174_s17 + $0x182] sm:$0xff] }
  0x2b   : > { %v615_v19 = vunpack.c.l.b16 %v403_v16  ;;  %v459_v35 = vpack.c.bf16 %v423_v33, %v423_v33  ;;  %v546_v38 = vpack.c.bf16 %v510_v28, %v510_v28  ;;  %v547_v39 = vpack.c.bf16 %v511_v29, %v511_v29  ;;  %v517_v16 = vld [vmem:[%s7174_s17 + $0x18a] sm:$0xff] }
  0x2c   : > { %v7247_v36 = vpack.c.b16 %v619_v23, %v618_v22  ;;  %v7249_v37 = vpack.c.b16 %v681_v25, %v680_v24  ;;  %v462_v40 = vpack.c.bf16 %v426_v27, %v426_v27  ;;  %v463_v41 = vpack.c.bf16 %v427_v30, %v427_v30  ;;  %v433_v22 = vld [vmem:[%s7174_s17 + $0xf9] sm:$0xff]  ;;  %v6451_v24 = vld [vmem:[%s10080_s1 + $0x30] sm:$0xff] }
  0x2d   : > { %v7237_v26 = vpack.c.b16 %v615_v19, %v614_v18  ;;  %v678_v42 = vunpack.c.l.b16 %v458_v34  ;;  %v679_v43 = vunpack.c.l.b16 %v459_v35  ;;  %v806_v44 = vunpack.c.l.b16 %v546_v38  ;;  %v6452_v18 = vld [vmem:[%s10080_s1 + $0x38] sm:$0xff]  ;;  %v514_v34 = vld [vmem:[%s7174_s17 + $0x16a] sm:$0xff] }
  0x2e   : > { %v807_v45 = vunpack.c.l.b16 %v547_v39  ;;  %v682_v48 = vunpack.c.l.b16 %v462_v40  ;;  %v683_v49 = vunpack.c.l.b16 %v463_v41  ;;  %v408_v57 = vpack.c.bf16 %v372_v51, %v372_v51  ;;  %v432_v19 = vld [vmem:[%s7174_s17 + $0xf1] sm:$0xff]  ;;  %6554 = vmatpush.bf16.msra.mxu3 %v6452_v18  ;;  %1452 = vmatpush.bf16.msra.mxu0 %v6452_v18  ;;  %v6450_v39 = vld [vmem:[%s10080_s1 + $0x28] sm:$0xff] }
  0x2f   : > { %720 = vrot.lane.b32.xlu2 %v7221_v3, %s7077_s18  ;;  %v7256_v47 = vpack.c.b16 %v679_v43, %v678_v42  ;;  %v409_v58 = vpack.c.bf16 %v373_v53, %v373_v53  ;;  %v466_v60 = vpack.c.bf16 %v430_v46, %v430_v46  ;;  %v467_v62 = vpack.c.bf16 %v431_v50, %v431_v50  ;;  %v515_v35 = vld [vmem:[%s7174_s17 + $0x172] sm:$0xff]  ;;  %v343_v42 = vld [vmem:[%s7174_s17 + $0x20] sm:$0xff] }
  0x30   : > { %v7265_v61 = vpack.c.b16 %v807_v45, %v806_v44  ;;  %v830_v63 = vunpack.c.l.b16 %v408_v57  ;;  %v7269_v1 = vpack.c.b16 %v683_v49, %v682_v48  ;;  %v548_v2 = vpack.c.bf16 %v512_v54, %v512_v54  ;;  %v342_v41 = vld [vmem:[%s7174_s17 + $0x18] sm:$0xff]  ;;  %v487_v50 = vld [vmem:[%s7174_s17 + $0x22] sm:$0xff] }
  0x31   : > { %722 = vrot.lane.b32.xlu1 %v7211_v55, %s7077_s18  ;;  %v831_v0 = vunpack.c.l.b16 %v409_v58  ;;  %v549_v4 = vpack.c.bf16 %v513_v56, %v513_v56  ;;  %v686_v7 = vunpack.c.l.b16 %v466_v60  ;;  %v687_v8 = vunpack.c.l.b16 %v467_v62  ;;  %v486_v49 = vld [vmem:[%s7174_s17 + $0x1a] sm:$0xff] }
  0x32   : > { %746 = vrot.lane.b32.xlu0 %v7215_v59, %s7077_s18  ;;  %v464_v11 = vpack.c.bf16 %v428_v5, %v428_v5  ;;  %v465_v12 = vpack.c.bf16 %v429_v6, %v429_v6  ;;  %v808_v14 = vunpack.c.l.b16 %v548_v2  ;;  %v552_v23 = vpack.c.bf16 %v516_v9, %v516_v9  ;;  %6555 = vmatpush.bf16.msra.mxu3 %v6451_v24  ;;  %v6449_v54 = vld [vmem:[%s10080_s1 + $0x20] sm:$0xff]  ;;  %v435_v2 = vld [vmem:[%s7174_s17 + $0x111] sm:$0xff] }
  0x33   : > { %v7276_v10 = vpack.c.b16 %v831_v0, %v830_v63  ;;  %v809_v15 = vunpack.c.l.b16 %v549_v4  ;;  %v7289_v25 = vpack.c.b16 %v687_v8, %v686_v7  ;;  %v553_v27 = vpack.c.bf16 %v517_v16, %v517_v16  ;;  %1453 = vmatpush.bf16.msra.mxu0 %v6451_v24  ;;  %v434_v0 = vld [vmem:[%s7174_s17 + $0x109] sm:$0xff]  ;;  %v6448_v6 = vld [vmem:[%s10080_s1 + $0x18] sm:$0xff] }
  0x34   : > { %v684_v28 = vunpack.c.l.b16 %v464_v11  ;;  %v685_v29 = vunpack.c.l.b16 %v465_v12  ;;  %v468_v31 = vpack.c.bf16 %v432_v19, %v432_v19  ;;  %v469_v33 = vpack.c.bf16 %v433_v22, %v433_v22  ;;  %v344_v16 = vld [vmem:[%s7174_s17 + $0x30] sm:$0xff]  ;;  %v345_v18 = vld [vmem:[%s7174_s17 + $0x38] sm:$0xff] }
  0x35   : > { %10107 = vst [vmem:[#allocation8_spill] sm:$0xff] %v7276_v10  ;;  %v7293_v30 = vpack.c.b16 %v809_v15, %v808_v14  ;;  %v872_v38 = vunpack.c.l.b16 %v552_v23  ;;  %v873_v40 = vunpack.c.l.b16 %v553_v27  ;;  %v550_v44 = vpack.c.bf16 %v514_v34, %v514_v34  ;;  %v490_v14 = vld [vmem:[%s7174_s17 + $0x4a] sm:$0xff]  ;;  %v491_v15 = vld [vmem:[%s7174_s17 + $0x52] sm:$0xff] }
  0x36   : > { %10108 = vst [vmem:[#allocation9_spill] sm:$0xff] %v7289_v25  ;;  %v7304_v43 = vpack.c.b16 %v685_v29, %v684_v28  ;;  %v551_v45 = vpack.c.bf16 %v515_v35, %v515_v35  ;;  %v688_v46 = vunpack.c.l.b16 %v468_v31  ;;  %v689_v48 = vunpack.c.l.b16 %v469_v33  ;;  %6556 = vmatpush.bf16.msra.mxu3 %v6450_v39  ;;  %v6447_v22 = vld [vmem:[%s10080_s1 + $0x10] sm:$0xff]  ;;  %v489_v35 = vld [vmem:[%s7174_s17 + $0x3a] sm:$0xff] }
  0x37   : > { %857 = vrot.lane.b32.xlu2 %v7237_v26, %s7077_s18  ;;  %v378_v51 = vpack.c.bf16 %v342_v41, %v342_v41  ;;  %v379_v53 = vpack.c.bf16 %v343_v42, %v343_v42  ;;  %1454 = vmatpush.bf16.msra.mxu0 %v6450_v39  ;;  %v7313_v56 = vpack.c.b16 %v873_v40, %v872_v38  ;;  %v810_v57 = vunpack.c.l.b16 %v550_v44  ;;  %v488_v29 = vld [vmem:[%s7174_s17 + $0x32] sm:$0xff]  ;;  %v6446_v39 = vld [vmem:[%s10080_s1 + $0x8] sm:$0xff] }
  0x38   : > { %v811_v58 = vunpack.c.l.b16 %v551_v45  ;;  %v7317_v60 = vpack.c.b16 %v689_v48, %v688_v46  ;;  %v522_v62 = vpack.c.bf16 %v486_v49, %v486_v49  ;;  %v523_v63 = vpack.c.bf16 %v487_v50, %v487_v50  ;;  %v348_v48 = vld [vmem:[%s7174_s17 + $0x60] sm:$0xff]  ;;  %v349_v49 = vld [vmem:[%s7174_s17 + $0x68] sm:$0xff] }
  0x39   : > { %859 = vrot.lane.b32.xlu1 %v7229_v13, %s7077_s18  ;;  %10109 = vst [vmem:[#allocation10_spill] sm:$0xff] %v7313_v56  ;;  %v590_v4 = vunpack.c.l.b16 %v378_v51  ;;  %v591_v5 = vunpack.c.l.b16 %v379_v53  ;;  %v470_v8 = vpack.c.bf16 %v434_v0, %v434_v0  ;;  %v471_v9 = vpack.c.bf16 %v435_v2, %v435_v2  ;;  %v492_v50 = vld [vmem:[%s7174_s17 + $0x62] sm:$0xff]  ;;  %v493_v51 = vld [vmem:[%s7174_s17 + $0x6a] sm:$0xff] }
  0x3a   : > { %724 = vrot.lane.b32.xlu0 %v7233_v17, %s7077_s18  ;;  %10110 = vst [vmem:[#allocation11_spill] sm:$0xff] %v7317_v60  ;;  %6557 = vmatpush.bf16.msra.mxu3 %v6449_v54  ;;  %v7326_v7 = vpack.c.b16 %v811_v58, %v810_v57  ;;  %v782_v11 = vunpack.c.l.b16 %v522_v62  ;;  %v783_v12 = vunpack.c.l.b16 %v523_v63  ;;  %v526_v27 = vpack.c.bf16 %v490_v14, %v490_v14 }
  0x3b   : > { %1455 = vmatpush.bf16.msra.mxu0 %v6449_v54  ;;  %v7334_v19 = vpack.c.b16 %v591_v5, %v590_v4  ;;  %v690_v23 = vunpack.c.l.b16 %v470_v8  ;;  %v691_v24 = vunpack.c.l.b16 %v471_v9  ;;  %v527_v28 = vpack.c.bf16 %v491_v15, %v491_v15  ;;  %v6445_v54 = vld [vmem:[%s10080_s1] sm:$0xff]  ;;  %v346_v15 = vld [vmem:[%s7174_s17 + $0x48] sm:$0xff] }
  0x3c   : > { %v7342_v31 = vpack.c.b16 %v783_v12, %v782_v11  ;;  %v380_v33 = vpack.c.bf16 %v344_v16, %v344_v16  ;;  %v381_v34 = vpack.c.bf16 %v345_v18, %v345_v18  ;;  %v524_v38 = vpack.c.bf16 %v488_v29, %v488_v29  ;;  %v347_v16 = vld [vmem:[%s7174_s17 + $0x50] sm:$0xff]  ;;  %v350_v29 = vld [vmem:[%s7174_s17 + $0x78] sm:$0xff] }
  0x3d   : > { %v7350_v40 = vpack.c.b16 %v691_v24, %v690_v23  ;;  %v786_v41 = vunpack.c.l.b16 %v526_v27  ;;  %v787_v42 = vunpack.c.l.b16 %v527_v28  ;;  %v525_v44 = vpack.c.bf16 %v489_v35, %v489_v35  ;;  %v6460_v23 = vld [vmem:[%s10080_s1 + $0x78] sm:$0xff] }
  0x3e   : > { %6558 = vmatpush.bf16.msra.mxu3 %v6448_v6  ;;  %v592_v45 = vunpack.c.l.b16 %v380_v33  ;;  %v593_v46 = vunpack.c.l.b16 %v381_v34  ;;  %v784_v53 = vunpack.c.l.b16 %v524_v38  ;;  %v384_v62 = vpack.c.bf16 %v348_v48, %v348_v48  ;;  %1541 = vmatpush.bf16.msra.mxu1 %v6460_v23  ;;  %v351_v33 = vld [vmem:[%s7174_s17 + $0x80] sm:$0xff]  ;;  %v6459_v38 = vld [vmem:[%s10080_s1 + $0x70] sm:$0xff]  ;;  %v6458_v48 = vld [vmem:[%s10080_s1 + $0x68] sm:$0xff] }
  0x3f   : > { %726 = vrot.lane.b32.xlu2 %v7256_v47, %s7077_s18  ;;  %1456 = vmatpush.bf16.msra.mxu0 %v6448_v6  ;;  %10111 = vst [vmem:[#allocation12_spill] sm:$0xff] %v7350_v40  ;;  %v7363_v57 = vpack.c.b16 %v787_v42, %v786_v41  ;;  %v785_v58 = vunpack.c.l.b16 %v525_v44  ;;  %v385_v63 = vpack.c.bf16 %v349_v49, %v349_v49 }
  0x40   : > { %v7365_v0 = vpack.c.b16 %v593_v46, %v592_v45  ;;  %v528_v2 = vpack.c.bf16 %v492_v50, %v492_v50  ;;  %v529_v4 = vpack.c.bf16 %v493_v51, %v493_v51  ;;  %v596_v6 = vunpack.c.l.b16 %v384_v62  ;;  %v364_v45 = vld [vmem:[%s7174_s17 + $0x120] sm:$0xff]  ;;  %v365_v46 = vld [vmem:[%s7174_s17 + $0x128] sm:$0xff]  ;;  %v496_v51 = vld [vmem:[%s7174_s17 + $0x92] sm:$0xff] }
  0x41   : > { %728 = vrot.lane.b32.xlu1 %v7249_v37, %s7077_s18  ;;  %v7369_v5 = vpack.c.b16 %v785_v58, %v784_v53  ;;  %v597_v8 = vunpack.c.l.b16 %v385_v63  ;;  %v382_v18 = vpack.c.bf16 %v346_v15, %v346_v15  ;;  %v386_v34 = vpack.c.bf16 %v350_v29, %v350_v29  ;;  %v497_v53 = vld [vmem:[%s7174_s17 + $0x9a] sm:$0xff] }
  0x42   : > { %861 = vrot.lane.b32.xlu0 %v7247_v36, %s7077_s18  ;;  %6559 = vmatpush.bf16.msra.mxu3 %v6447_v22  ;;  %v788_v9 = vunpack.c.l.b16 %v528_v2  ;;  %v789_v11 = vunpack.c.l.b16 %v529_v4  ;;  %v387_v35 = vpack.c.bf16 %v351_v33, %v351_v33  ;;  %v400_v49 = vpack.c.bf16 %v364_v45, %v364_v45  ;;  %v340_v2 = vld [vmem:[%s7174_s17] sm:$0xff]  ;;  %v341_v4 = vld [vmem:[%s7174_s17 + $0x8] sm:$0xff] }
  0x43   : > { %1457 = vmatpush.bf16.msra.mxu0 %v6447_v22  ;;  %v7375_v12 = vpack.c.b16 %v597_v8, %v596_v6  ;;  %v383_v22 = vpack.c.bf16 %v347_v16, %v347_v16  ;;  %v594_v24 = vunpack.c.l.b16 %v382_v18  ;;  %v598_v41 = vunpack.c.l.b16 %v386_v34  ;;  %1542 = vmatpush.bf16.msra.mxu1 %v6459_v38  ;;  %v6457_v6 = vld [vmem:[%s10080_s1 + $0x60] sm:$0xff] }
  0x44   : > { %v7377_v14 = vpack.c.b16 %v789_v11, %v788_v9  ;;  %v599_v42 = vunpack.c.l.b16 %v387_v35  ;;  %v401_v50 = vpack.c.bf16 %v365_v46, %v365_v46  ;;  %v533_v58 = vpack.c.bf16 %v497_v53, %v497_v53 }
  0x45   : > { %v595_v27 = vunpack.c.l.b16 %v383_v22  ;;  %v612_v62 = vunpack.c.l.b16 %v400_v49  ;;  %v376_v18 = vpack.c.bf16 %v340_v2, %v340_v2  ;;  %v377_v22 = vpack.c.bf16 %v341_v4, %v341_v4 }
  0x46   : > { %6560 = vmatpush.bf16.msra.mxu3 %v6446_v39  ;;  %v7400_v44 = vpack.c.b16 %v599_v42, %v598_v41  ;;  %v613_v63 = vunpack.c.l.b16 %v401_v50  ;;  %v793_v9 = vunpack.c.l.b16 %v533_v58  ;;  %v7433_v41 = vld [vmem:[%s10080_s1 + $0xb8] sm:$0xff] }
  0x47   : > { %863 = vrot.lane.b32.xlu2 %v7276_v10, %s7077_s18  ;;  %1458 = vmatpush.bf16.msra.mxu0 %v6446_v39  ;;  %v7388_v28 = vpack.c.b16 %v595_v27, %v594_v24  ;;  %v6480_v39 = vld [vmem:[%s10080_s1 + $0x118] sm:$0xff]  ;;  %v495_v27 = vld [vmem:[%s7174_s17 + $0x82] sm:$0xff]  ;;  %v485_v10 = vld [vmem:[%s7174_s17 + $0xa] sm:$0xff] }
  0x48   : > { %1543 = vmatpush.bf16.msra.mxu1 %v6458_v48  ;;  %v7420_v16 = vpack.c.b16 %v613_v63, %v612_v62  ;;  %v494_v24 = vld [vmem:[%s7174_s17 + $0x7a] sm:$0xff]  ;;  %v531_v34 = vpack.c.bf16 %v495_v27, %v495_v27  ;;  %1630 = vmatpush.bf16.msra.mxu2 %v7433_v41  ;;  %v499_v58 = vld [vmem:[%s7174_s17 + $0xb2] sm:$0xff]  ;;  %v354_v62 = vld [vmem:[%s7174_s17 + $0xa8] sm:$0xff]  ;;  %v521_v21 = vpack.c.bf16 %v485_v10, %v485_v10 }
  0x49   : > { %899 = vrot.lane.b32.xlu1 %v7265_v61, %s7077_s18  ;;  %v530_v33 = vpack.c.bf16 %v494_v24, %v494_v24  ;;  %v6456_v42 = vld [vmem:[%s10080_s1 + $0x58] sm:$0xff]  ;;  %v535_v4 = vpack.c.bf16 %v499_v58, %v499_v58  ;;  %v6455_v24 = vld [vmem:[%s10080_s1 + $0x50] sm:$0xff] }
  0x4a   : > { %730 = vrot.lane.b32.xlu0 %v7269_v1, %s7077_s18  ;;  %6561 = vmatpush.bf16.msra.mxu3 %v6445_v54  ;;  %v791_v46 = vunpack.c.l.b16 %v531_v34  ;;  %v360_v10 = vld [vmem:[%s7174_s17 + $0xf0] sm:$0xff] }
  0x4b   : > { %1459 = vmatpush.bf16.msra.mxu0 %v6445_v54  ;;  %v532_v54 = vpack.c.bf16 %v496_v51, %v496_v51  ;;  %v790_v45 = vunpack.c.l.b16 %v530_v33 }
  0x4c   : > { %1544 = vmatpush.bf16.msra.mxu1 %v6457_v6 }
  0x4d   : > { %v792_v8 = vunpack.c.l.b16 %v532_v54  ;;  %v7445_v49 = vpack.c.b16 %v791_v46, %v790_v45  ;;  %v498_v54 = vld [vmem:[%s7174_s17 + $0xaa] sm:$0xff] }
  0x4e   : > { %6562 = vmatpush.bf16.msrb.mxu3 %v6460_v23  ;;  %v534_v2 = vpack.c.bf16 %v498_v54, %v498_v54  ;;  %v353_v54 = vld [vmem:[%s7174_s17 + $0x98] sm:$0xff] }
  0x4f   : > { %732 = vrot.lane.b32.xlu2 %v7304_v43, %s7077_s18  ;;  %1812 = vmatpush.bf16.msrb.mxu0 %v6480_v39  ;;  %v7418_v15 = vpack.c.b16 %v793_v9, %v792_v8  ;;  %v589_v39 = vunpack.c.l.b16 %v377_v22  ;;  %v7460_v9 = vld [vmem:[%s10080_s1 + $0xa8] sm:$0xff] }
  0x50   : > { %1545 = vmatpush.bf16.msra.mxu1 %v6456_v42  ;;  %v794_v27 = vunpack.c.l.b16 %v534_v2  ;;  %v389_v2 = vpack.c.bf16 %v353_v54, %v353_v54  ;;  %v6462_v54 = vld [vmem:[%s10080_s1 + $0x88] sm:$0xff] }
  0x51   : > { %734 = vrot.lane.b32.xlu1 %v7289_v25, %s7077_s18 }
  0x52   : > { %901 = vrot.lane.b32.xlu0 %v7293_v30, %s7077_s18  ;;  %6563 = vmatpush.bf16.msrb.mxu3 %v6459_v38  ;;  %v588_v38 = vunpack.c.l.b16 %v376_v18  ;;  %v390_v18 = vpack.c.bf16 %v354_v62, %v354_v62 }
  0x54   : > { %v620_v50 = vpack.c.b16 %v589_v39, %v588_v38  ;;  %v602_v33 = vunpack.c.l.b16 %v390_v18  ;;  %v7469_v38 = vld [vmem:[%s10080_s1 + $0xa0] sm:$0xff]  ;;  %1546 = vmatpush.bf16.msra.mxu1 %v6455_v24 }
  0x56   : > { %6564 = vmatpush.bf16.msrb.mxu3 %v6458_v48  ;;  %v7443_v48 = vld [vmem:[%s10080_s1 + $0xb0] sm:$0xff] }
  0x57   : > { %903 = vrot.lane.b32.xlu2 %v7326_v7, %s7077_s18  ;;  %1631 = vmatpush.bf16.msra.mxu2 %v7443_v48 }
  0x59   : > { %905 = vrot.lane.b32.xlu1 %v7313_v56, %s7077_s18 }
  0x5a   : > { %736 = vrot.lane.b32.xlu0 %v7317_v60, %s7077_s18  ;;  %6565 = vmatpush.bf16.msrb.mxu3 %v6457_v6  ;;  %v355_v6 = vld [vmem:[%s7174_s17 + $0xb0] sm:$0xff]  ;;  %v361_v60 = vld [vmem:[%s7174_s17 + $0xf8] sm:$0xff] }
  0x5b   : > { %v391_v22 = vpack.c.bf16 %v355_v6, %v355_v6  ;;  %1632 = vmatpush.bf16.msra.mxu2 %v7460_v9  ;;  %v601_v6 = vunpack.c.l.b16 %v389_v2  ;;  %v6453_v2 = vld [vmem:[%s10080_s1 + $0x40] sm:$0xff] }
  0x5d   : > { %v603_v34 = vunpack.c.l.b16 %v391_v22 }
  0x5e   : > { %6566 = vmatpush.bf16.msrb.mxu3 %v6456_v42 }
  0x5f   : > { %738 = vrot.lane.b32.xlu2 %v7350_v40, %s7077_s18  ;;  %v7473_v42 = vpack.c.b16 %v603_v34, %v602_v33  ;;  %1633 = vmatpush.bf16.msra.mxu2 %v7469_v38 }
  0x61   : > { %833 = vrot.lane.b32.xlu1 %v7334_v19, %s7077_s18 }
  0x62   : > { %875 = vrot.lane.b32.xlu0 %v7342_v31, %s7077_s18  ;;  %6567 = vmatpush.bf16.msrb.mxu3 %v6455_v24 }
  0x67   : > { %877 = vrot.lane.b32.xlu2 %v7369_v5, %s7077_s18 }
  0x69   : > { %879 = vrot.lane.b32.xlu1 %v7363_v57, %s7077_s18 }
  0x6a   : > { %835 = vrot.lane.b32.xlu0 %v7365_v0, %s7077_s18 }
  0x6f   : > { %837 = vrot.lane.b32.xlu2 %v7388_v28, %s7077_s18 }
  0x71   : > { %839 = vrot.lane.b32.xlu1 %v7375_v12, %s7077_s18 }
  0x72   : > { %881 = vrot.lane.b32.xlu0 %v7377_v14, %s7077_s18 }
  0x77   : > { %883 = vrot.lane.b32.xlu2 %v7445_v49, %s7077_s18 }
  0x79   : > { %885 = vrot.lane.b32.xlu1 %v7418_v15, %s7077_s18 }
  0x7a   : > { %841 = vrot.lane.b32.xlu0 %v7400_v44, %s7077_s18 }
  0x81   : > { %v7416_v11 = vpop.permute.xlu2 %744  ;;  %845 = vrot.lane.b32.xlu1 %v7473_v42, %s7077_s18 }
  0x89   : > { %v7447_v51 = vpop.permute.xlu2 %720 }
  0x91   : > { %v7490_v62 = vpop.permute.xlu2 %857 }
  0x93   : > { %v743_v23 = vpop.permute.xlu1 %742 }
  0x94   : > { %v741_v29 = vpop.permute.xlu0 %740  ;;  %v7481_v46 = vsel %vm278_vm0, %v7237_v26, %v743_v23  ;;  %v6464_v26 = vld [vmem:[%s10080_s1 + $0x98] sm:$0xff]  ;;  %v6454_v23 = vld [vmem:[%s10080_s1 + $0x48] sm:$0xff] }
  0x95   : > { %v7428_v35 = vsel %vm278_vm0, %v7420_v16, %v741_v29  ;;  %v795_v29 = vunpack.c.l.b16 %v535_v4  ;;  %10113 = vst [vmem:[#allocation14_spill] sm:$0xff] %v7481_v46  ;;  %1634 = vmatpush.bf16.msra.mxu2 %v6464_v26  ;;  %6568 = vmatpush.bf16.msrb.mxu3 %v6454_v23 }
  0x96   : > { %10112 = vst [vmem:[#allocation13_spill] sm:$0xff] %v7428_v35  ;;  %1520 = vmatmul.bf16.vlgmr.msra.gmra.mxu3 %v7428_v35  ;;  %1547 = vmatpush.bf16.msra.mxu1 %v6454_v23 }
  0x97   : > { %v7471_v39 = vpack.c.b16 %v795_v29, %v794_v27  ;;  %v356_v27 = vld [vmem:[%s7174_s17 + $0xc0] sm:$0xff]  ;;  %v357_v29 = vld [vmem:[%s7174_s17 + $0xc8] sm:$0xff] }
  0x98   : > { %v392_v34 = vpack.c.bf16 %v356_v27, %v356_v27  ;;  %v7540_v27 = vsel %vm278_vm0, %v7229_v13, %v7416_v11  ;;  %v502_v13 = vld [vmem:[%s7174_s17 + $0xda] sm:$0xff]  ;;  %v503_v11 = vld [vmem:[%s7174_s17 + $0xe2] sm:$0xff] }
  0x99   : > { %887 = vrot.lane.b32.xlu0 %v7471_v39, %s7077_s18  ;;  %6569 = vmatpush.bf16.msrb.mxu3 %v6453_v2  ;;  %10114 = vst [vmem:[#allocation15_spill] sm:$0xff] %v7540_v27 }
  0x9a   : > { %1548 = vmatpush.bf16.msra.mxu1 %v6453_v2 }
  0x9b   : > { %v719_v53 = vpop.permute.xlu1 %718 }
  0x9c   : > { %v717_v63 = vpop.permute.xlu0 %716  ;;  %v932_v24 = vsel %vm278_vm0, %v7334_v19, %v719_v53  ;;  %v6479_v19 = vld [vmem:[%s10080_s1 + $0x110] sm:$0xff]  ;;  %v604_v53 = vunpack.c.l.b16 %v392_v34 }
  0x9d   : > { %v928_v8 = vsel %vm278_vm0, %v620_v50, %v717_v63  ;;  %v352_v50 = vld [vmem:[%s7174_s17 + $0x90] sm:$0xff]  ;;  %1813 = vmatpush.bf16.msrb.mxu0 %v6479_v19  ;;  %6570 = vmatpush.bf16.msra.mxu3 %v7433_v41  ;;  %v539_v19 = vpack.c.bf16 %v503_v11, %v503_v11 }
  0x9e   : > { %1460 = vmatmul.bf16.vlgmr.msra.gmra.mxu0 %v928_v8  ;;  %v388_v63 = vpack.c.bf16 %v352_v50, %v352_v50  ;;  %v6463_v8 = vld [vmem:[%s10080_s1 + $0x90] sm:$0xff]  ;;  %v393_v50 = vpack.c.bf16 %v357_v29, %v357_v29 }
  0x9f   : > { %1635 = vmatpush.bf16.msra.mxu2 %v6463_v8  ;;  %v501_v11 = vld [vmem:[%s7174_s17 + $0xca] sm:$0xff] }
  0xa0   : > { %v600_v4 = vunpack.c.l.b16 %v388_v63  ;;  %v7517_v63 = vpop.permute.xlu2 %726  ;;  %v605_v23 = vunpack.c.l.b16 %v393_v50  ;;  %v7555_v50 = vsel %vm278_vm0, %v7365_v0, %v7447_v51  ;;  %v537_v56 = vpack.c.bf16 %v501_v11, %v501_v11 }
  0xa1   : > { %6571 = vmatpush.bf16.msra.mxu3 %v7443_v48  ;;  %10115 = vst [vmem:[#allocation16_spill] sm:$0xff] %v7555_v50  ;;  %v538_v48 = vpack.c.bf16 %v502_v13, %v502_v13 }
  0xa2   : > { %v7502_v18 = vpack.c.b16 %v601_v6, %v600_v4  ;;  %v7528_v4 = vld [vmem:[%s10080_s1 + $0x80] sm:$0xff]  ;;  %v7530_v6 = vpack.c.b16 %v605_v23, %v604_v53  ;;  %v799_v53 = vunpack.c.l.b16 %v539_v19 }
  0xa3   : > { %v7477_v45 = vpop.permute.xlu1 %722  ;;  %1636 = vmatpush.bf16.msra.mxu2 %v6462_v54  ;;  %v484_v19 = vld [vmem:[%s7174_s17 + $0x2] sm:$0xff] }
  0xa4   : > { %v7488_v58 = vpop.permute.xlu0 %746  ;;  %843 = vrot.lane.b32.xlu2 %v7502_v18, %s7077_s18  ;;  %847 = vrot.lane.b32.xlu0 %v7530_v6, %s7077_s18 }
  0xa5   : > { %6572 = vmatpush.bf16.msra.mxu3 %v7460_v9  ;;  %v798_v9 = vunpack.c.l.b16 %v538_v48  ;;  %v7574_v13 = vsel %vm278_vm0, %v7247_v36, %v7488_v58  ;;  %v520_v36 = vpack.c.bf16 %v484_v19, %v484_v19 }
  0xa6   : > { %1525 = vmatmul.bf16.gmra.mxu3 %v7481_v46  ;;  %10117 = vst [vmem:[#allocation18_spill] sm:$0xff] %v7574_v13  ;;  %v797_v46 = vunpack.c.l.b16 %v537_v56 }
  0xa7   : > { %1637 = vmatpush.bf16.msra.mxu2 %v7528_v4  ;;  %v7563_v0 = vpack.c.b16 %v799_v53, %v798_v9  ;;  %v508_v9 = vld [vmem:[%s7174_s17 + $0x122] sm:$0xff]  ;;  %v509_v53 = vld [vmem:[%s7174_s17 + $0x12a] sm:$0xff]  ;;  %v780_v11 = vunpack.c.l.b16 %v520_v36 }
  0xa8   : > { %v7547_v34 = vpop.permute.xlu2 %863  ;;  %v544_v58 = vpack.c.bf16 %v508_v9, %v508_v9  ;;  %v545_v35 = vpack.c.bf16 %v509_v53, %v509_v53  ;;  %v504_v9 = vld [vmem:[%s7174_s17 + $0xf2] sm:$0xff]  ;;  %v505_v53 = vld [vmem:[%s7174_s17 + $0xfa] sm:$0xff] }
  0xa9   : > { %6573 = vmatpush.bf16.msra.mxu3 %v7469_v38  ;;  %10116 = vst [vmem:[#allocation17_spill] sm:$0xff] %v7563_v0  ;;  %891 = vrot.lane.b32.xlu1 %v7563_v0, %s7077_s18  ;;  %v500_v38 = vld [vmem:[%s7174_s17 + $0xc2] sm:$0xff]  ;;  %v396_v0 = vpack.c.bf16 %v360_v10, %v360_v10 }
  0xaa   : > { %v804_v56 = vunpack.c.l.b16 %v544_v58  ;;  %v805_v19 = vunpack.c.l.b16 %v545_v35 }
  0xab   : > { %v7506_v22 = vpop.permute.xlu1 %859 }
  0xac   : > { %v7512_v33 = vpop.permute.xlu0 %724  ;;  %v7606_v36 = vpack.c.b16 %v805_v19, %v804_v56 }
  0xad   : > { %6574 = vmatpush.bf16.msra.mxu3 %v6464_v26  ;;  %v536_v26 = vpack.c.bf16 %v500_v38, %v500_v38 }
  0xae   : > { %1465 = vmatmul.bf16.gmra.mxu0 %v932_v24 }
  0xb0   : > { %v7565_v51 = vpop.permute.xlu2 %732 }
  0xb1   : > { %6575 = vmatpush.bf16.msra.mxu3 %v6463_v8  ;;  %v7594_v8 = vsel %vm278_vm0, %v7388_v28, %v7477_v45  ;;  %v608_v45 = vunpack.c.l.b16 %v396_v0  ;;  %v358_v0 = vld [vmem:[%s7174_s17 + $0xd8] sm:$0xff] }
  0xb2   : > { %v394_v56 = vpack.c.bf16 %v358_v0, %v358_v0  ;;  %v1044_v0 = vsel %vm278_vm0, %v7265_v61, %v7506_v22 }
  0xb3   : > { %v7535_v24 = vpop.permute.xlu1 %728 }
  0xb4   : > { %v7543_v29 = vpop.permute.xlu0 %861 }
  0xb5   : > { %6576 = vmatpush.bf16.msra.mxu3 %v6462_v54  ;;  %v781_v54 = vunpack.c.l.b16 %v521_v21  ;;  %v1048_v22 = vsel %vm278_vm0, %v7293_v30, %v7543_v29 }
  0xb6   : > { %1530 = vmatmul.bf16.gmra.mxu3 %v7540_v27  ;;  %v796_v27 = vunpack.c.l.b16 %v536_v26  ;;  %v540_v26 = vpack.c.bf16 %v504_v9, %v504_v9 }
  0xb7   : > { %v812_v25 = vpack.c.b16 %v781_v54, %v780_v11  ;;  %v7629_v54 = vsel %vm278_vm0, %v7502_v18, %v7535_v24  ;;  %v6478_v18 = vld [vmem:[%s10080_s1 + $0x108] sm:$0xff] }
  0xb8   : > { %v7585_v40 = vpack.c.b16 %v797_v46, %v796_v27  ;;  %v7601_v27 = vpop.permute.xlu2 %903  ;;  %v800_v28 = vunpack.c.l.b16 %v540_v26  ;;  %1814 = vmatpush.bf16.msrb.mxu0 %v6478_v18  ;;  %v1052_v18 = vsel %vm278_vm0, %v7326_v7, %v7547_v34 }
  0xb9   : > { %6577 = vmatpush.bf16.msra.mxu3 %v7528_v4  ;;  %v1040_v4 = vsel %vm278_vm0, %v7606_v36, %v7490_v62  ;;  %v606_v62 = vunpack.c.l.b16 %v394_v56 }
  0xba   : > { %10118 = vst [vmem:[#allocation19_spill] sm:$0xff] %v7585_v40  ;;  %889 = vrot.lane.b32.xlu2 %v7585_v40, %s7077_s18 }
  0xbb   : > { %v7550_v41 = vpop.permute.xlu1 %899 }
  0xbc   : > { %v7559_v2 = vpop.permute.xlu0 %730 }
  0xbe   : > { %1470 = vmatmul.bf16.gmra.mxu0 %v7555_v50  ;;  %v397_v50 = vpack.c.bf16 %v361_v60, %v361_v60 }
  0xc0   : > { %v609_v58 = vunpack.c.l.b16 %v397_v50 }
  0xc2   : > { %v7610_v21 = vpack.c.b16 %v609_v58, %v608_v45 }
  0xc3   : > { %v7569_v23 = vpop.permute.xlu1 %734 }
  0xc4   : > { %v7578_v48 = vpop.permute.xlu0 %901  ;;  %851 = vrot.lane.b32.xlu1 %v7610_v21, %s7077_s18 }
  0xc6   : > { %1535 = vmatmul.bf16.gmra.mxu3 %v7574_v13  ;;  %v541_v13 = vpack.c.bf16 %v505_v53, %v505_v53  ;;  %v7624_v53 = vpop.permute.xlu2 %738 }
  0xc8   : > { %v801_v35 = vunpack.c.l.b16 %v541_v13  ;;  %v359_v13 = vld [vmem:[%s7174_s17 + $0xe0] sm:$0xff] }
  0xc9   : > { %v395_v19 = vpack.c.bf16 %v359_v13, %v359_v13 }
  0xca   : > { %v7608_v40 = vpack.c.b16 %v801_v35, %v800_v28  ;;  %v363_v28 = vld [vmem:[%s7174_s17 + $0x110] sm:$0xff] }
  0xcb   : > { %v7589_v38 = vpop.permute.xlu1 %905  ;;  %v607_v10 = vunpack.c.l.b16 %v395_v19  ;;  %v399_v45 = vpack.c.bf16 %v363_v28, %v363_v28  ;;  %v506_v19 = vld [vmem:[%s7174_s17 + $0x10a] sm:$0xff] }
  0xcc   : > { %v7599_v46 = vpop.permute.xlu0 %736  ;;  %893 = vrot.lane.b32.xlu0 %v7608_v40, %s7077_s18  ;;  %897 = vrot.lane.b32.xlu1 %v7606_v36, %s7077_s18 }
  0xcd   : > { %v7631_v26 = vpack.c.b16 %v607_v10, %v606_v62  ;;  %v611_v58 = vunpack.c.l.b16 %v399_v45  ;;  %v542_v62 = vpack.c.bf16 %v506_v19, %v506_v19 }
  0xce   : > { %1475 = vmatmul.bf16.gmra.mxu0 %v7594_v8 }
  0xcf   : > { %849 = vrot.lane.b32.xlu2 %v7631_v26, %s7077_s18 }
  0xd3   : > { %v834_v60 = vpop.permute.xlu1 %833 }
  0xd4   : > { %v876_v50 = vpop.permute.xlu0 %875  ;;  %v992_v11 = vsel %vm278_vm0, %v812_v25, %v834_v60  ;;  %v362_v25 = vld [vmem:[%s7174_s17 + $0x108] sm:$0xff] }
  0xd5   : > { %1549 = vmatmul.bf16.vlgmr.msra.gmra.mxu1 %v992_v11  ;;  %v1056_v9 = vsel %vm278_vm0, %v7198_v32, %v876_v50  ;;  %v7638_v32 = vsel %vm278_vm0, %v7375_v12, %v7512_v33  ;;  %v398_v35 = vpack.c.bf16 %v362_v25, %v362_v25  ;;  %v7662_v50 = vsel %vm278_vm0, %v7400_v44, %v7517_v63  ;;  %v6476_v44 = vld [vmem:[%s10080_s1 + $0xf8] sm:$0xff] }
  0xd6   : > { %1609 = vmatmul.bf16.vlgmr.msrb.gmra.mxu3 %v1040_v4  ;;  %1638 = vmatmul.bf16.vlgmr.msra.gmra.mxu2 %v1056_v9  ;;  %v878_v4 = vpop.permute.xlu2 %877  ;;  %v507_v9 = vld [vmem:[%s7174_s17 + $0x112] sm:$0xff]  ;;  %v802_v63 = vunpack.c.l.b16 %v542_v62 }
  0xd7   : > { %v610_v24 = vunpack.c.l.b16 %v398_v35  ;;  %v1060_v13 = vsel %vm278_vm0, %v7221_v3, %v878_v4  ;;  %v543_v10 = vpack.c.bf16 %v507_v9, %v507_v9  ;;  %1719 = vmatpush.bf16.msrb.mxu3 %v6476_v44 }
  0xd9   : > { %v7648_v12 = vpack.c.b16 %v611_v58, %v610_v24  ;;  %v803_v25 = vunpack.c.l.b16 %v543_v10  ;;  %v6474_v58 = vld [vmem:[%s10080_s1 + $0xe8] sm:$0xff] }
  0xdb   : > { %853 = vrot.lane.b32.xlu0 %v7648_v12, %s7077_s18  ;;  %v880_v11 = vpop.permute.xlu1 %879  ;;  %v7677_v28 = vpack.c.b16 %v803_v25, %v802_v63  ;;  %v1108_v63 = vsel %vm278_vm0, %v7209_v52, %v7578_v48  ;;  %v6469_v52 = vld [vmem:[%s10080_s1 + $0xc0] sm:$0xff] }
  0xdc   : > { %v836_v60 = vpop.permute.xlu0 %835  ;;  %v1064_v3 = vsel %vm278_vm0, %v7211_v55, %v880_v11  ;;  %v6475_v55 = vld [vmem:[%s10080_s1 + $0xf0] sm:$0xff]  ;;  %v7726_v11 = vsel %vm278_vm0, %v7530_v6, %v7565_v51 }
  0xdd   : > { %v996_v33 = vsel %vm278_vm0, %v7342_v31, %v836_v60  ;;  %895 = vrot.lane.b32.xlu2 %v7677_v28, %s7077_s18  ;;  %1720 = vmatpush.bf16.msrb.mxu3 %v6475_v55  ;;  %v7700_v60 = vsel %vm278_vm0, %v7473_v42, %v7559_v2  ;;  %v1104_v2 = vsel %vm278_vm0, %v7184_v20, %v7550_v41  ;;  %v6471_v20 = vld [vmem:[%s10080_s1 + $0xd0] sm:$0xff]  ;;  %v6470_v55 = vld [vmem:[%s10080_s1 + $0xc8] sm:$0xff] }
  0xde   : > { %1480 = vmatmul.bf16.gmra.mxu0 %v7638_v32  ;;  %v838_v31 = vpop.permute.xlu2 %837  ;;  %v445_v41 = vld [vmem:[%s7174_s17 + $0x189] sm:$0xff] }
  0xdf   : > { %v1000_v56 = vsel %vm278_vm0, %v7369_v5, %v838_v31 }
  0xe1   : > { %1721 = vmatpush.bf16.msrb.mxu3 %v6474_v58 }
  0xe3   : > { %v840_v29 = vpop.permute.xlu1 %839 }
  0xe4   : > { %v882_v35 = vpop.permute.xlu0 %881  ;;  %v1004_v45 = vsel %vm278_vm0, %v7363_v57, %v840_v29 }
  0xe5   : > { %1554 = vmatmul.bf16.gmra.mxu1 %v996_v33  ;;  %855 = vrot.lane.b32.xlu2 %v7420_v16, %s7077_s18  ;;  %v1068_v24 = vsel %vm278_vm0, %v7233_v17, %v882_v35  ;;  %v6473_v16 = vld [vmem:[%s10080_s1 + $0xe0] sm:$0xff] }
  0xe6   : > { %1614 = vmatmul.bf16.gmra.mxu3 %v1044_v0  ;;  %1643 = vmatmul.bf16.gmra.mxu2 %v1060_v13  ;;  %v6477_v17 = vld [vmem:[%s10080_s1 + $0x100] sm:$0xff]  ;;  %v884_v4 = vpop.permute.xlu2 %883  ;;  %v6472_v0 = vld [vmem:[%s10080_s1 + $0xd8] sm:$0xff] }
  0xe7   : > { %1722 = vmatpush.bf16.msrb.mxu3 %v6473_v16  ;;  %1815 = vmatpush.bf16.msrb.mxu0 %v6477_v17  ;;  %v1072_v33 = vsel %vm278_vm0, %v7256_v47, %v884_v4  ;;  %v444_v47 = vld [vmem:[%s7174_s17 + $0x181] sm:$0xff] }
  0xeb   : > { %1723 = vmatpush.bf16.msrb.mxu3 %v6472_v0  ;;  %v886_v19 = vpop.permute.xlu1 %885  ;;  %v7790_v0 = vsel %vm278_vm0, %v7648_v12, %v7624_v53  ;;  %v10121_v53 = vld [vmem:[#allocation16_spill] sm:$0xff] }
  0xec   : > { %v842_v34 = vpop.permute.xlu0 %841  ;;  %v1076_v44 = vsel %vm278_vm0, %v7249_v37, %v886_v19  ;;  %v7754_v37 = vsel %vm278_vm0, %v7631_v26, %v7569_v23  ;;  %v1112_v23 = vsel %vm278_vm0, %v7215_v59, %v7601_v27  ;;  %v7802_v19 = vld [vmem:[%s10081_s2] ss:$0 sm:$0xff] }
  0xed   : > { %v1008_v42 = vsel %vm278_vm0, %v7377_v14, %v842_v34  ;;  %v7774_v34 = vsel %vm278_vm0, %v7610_v21, %v7599_v46 }
  0xee   : > { %1485 = vmatmul.bf16.gmra.mxu0 %v7662_v50 }
  0xef   : > { %1724 = vmatpush.bf16.msrb.mxu3 %v6471_v20 }
  0xf3   : > { %1725 = vmatpush.bf16.msrb.mxu3 %v6470_v55  ;;  %v846_v48 = vpop.permute.xlu1 %845 }
  0xf5   : > { %1559 = vmatmul.bf16.gmra.mxu1 %v1000_v56 }
  0xf6   : > { %1619 = vmatmul.bf16.gmra.mxu3 %v1048_v22  ;;  %1648 = vmatmul.bf16.gmra.mxu2 %v1064_v3  ;;  %v480_v22 = vpack.c.bf16 %v444_v47, %v444_v47  ;;  %v481_v3 = vpack.c.bf16 %v445_v41, %v445_v41 }
  0xf7   : > { %1726 = vmatpush.bf16.msrb.mxu3 %v6469_v52 }
  0xf8   : > { %v867_v62 = vunpack.c.l.b16 %v480_v22  ;;  %v868_v10 = vunpack.c.l.b16 %v481_v3  ;;  %v10120_v22 = vld [vmem:[#allocation9_spill] sm:$0xff] }
  0xfa   : > { %v869_v25 = vpack.c.b16 %v868_v10, %v867_v62 }
  0xfc   : > { %917 = vrot.lane.b32.xlu2 %v869_v25, %s7077_s18 }
  0xfe   : > { %1490 = vmatmul.bf16.gmra.mxu0 %v7629_v54  ;;  %v844_v56 = vpop.permute.xlu2 %843 }
  0xff   : > { %v1012_v6 = vsel %vm278_vm0, %v7445_v49, %v844_v56 }
 0x105   : > { %1564 = vmatmul.bf16.gmra.mxu1 %v1004_v45 }
 0x106   : > { %1624 = vmatmul.bf16.gmra.mxu3 %v1052_v18  ;;  %1653 = vmatmul.bf16.gmra.mxu2 %v1068_v24  ;;  %v1016_v24 = vsel %vm278_vm0, %v7418_v15, %v846_v48  ;;  %v10122_v48 = vld [vmem:[#allocation17_spill] sm:$0xff] }
 0x10b   : > { %v888_v45 = vpop.permute.xlu0 %887 }
 0x10c   : > { %v1080_v16 = vsel %vm278_vm0, %v7269_v1, %v888_v45 }
 0x10e   : > { %1495 = vmatmul.bf16.gmra.mxu0 %v7700_v60 }
 0x115   : > { %1569 = vmatmul.bf16.gmra.mxu1 %v1008_v42  ;;  %v890_v42 = vpop.permute.xlu2 %889 }
 0x116   : > { %1658 = vmatmul.bf16.gmra.mxu2 %v1072_v33  ;;  %1698 = vmatmul.bf16.vlgmr.msra.gmra.mxu3 %v1104_v2  ;;  %v848_v4 = vpop.permute.xlu0 %847  ;;  %v1084_v27 = vsel %vm278_vm0, %v7304_v43, %v890_v42  ;;  %v1116_v33 = vsel %vm278_vm0, %v869_v25, %v7589_v38  ;;  %v10119_v43 = vld [vmem:[#allocation19_spill] sm:$0xff] }
 0x117   : > { %v1020_v2 = vsel %vm278_vm0, %v7471_v39, %v848_v4 }
 0x119   : > { %v7719_v13 = vpop.f32.mrf.mxu3 }
 0x11a   : > { %v1522_v12 = vadd.f32 %v7802_v19, %v7719_v13  ;;  %v10123_v13 = vld [vmem:[#allocation11_spill] sm:$0xff] }
 0x11b   : > { %v7721_v31 = vpop.f32.mrf.mxu0  ;;  %v892_v47 = vpop.permute.xlu1 %891 }
 0x11c   : > { %v1088_v3 = vsel %vm278_vm0, %v10120_v22, %v892_v47 }
 0x11e   : > { %1500 = vmatmul.bf16.gmra.mxu0 %v7726_v11 }
 0x121   : > { %v7734_v9 = vpop.f32.mrf.mxu3 }
 0x123   : > { %v7738_v51 = vpop.f32.mrf.mxu0 }
 0x125   : > { %1574 = vmatmul.bf16.gmra.mxu1 %v1012_v6 }
 0x126   : > { %1663 = vmatmul.bf16.gmra.mxu2 %v1076_v44  ;;  %1703 = vmatmul.bf16.gmra.mxu3 %v1108_v63  ;;  %v1524_v63 = vadd.f32 %v7802_v19, %v7734_v9 }
 0x129   : > { %v1526_v29 = vpop.f32.mrf.mxu3  ;;  %v850_v20 = vpop.permute.xlu2 %849 }
 0x12a   : > { %v1024_v56 = vsel %vm278_vm0, %v10119_v43, %v850_v20 }
 0x12b   : > { %v7749_v35 = vpop.f32.mrf.mxu0 }
 0x12e   : > { %1505 = vmatmul.bf16.gmra.mxu0 %v7754_v37 }
 0x131   : > { %v1528_v18 = vpop.f32.mrf.mxu3 }
 0x133   : > { %v7762_v58 = vpop.f32.mrf.mxu0 }
 0x135   : > { %1579 = vmatmul.bf16.gmra.mxu1 %v1016_v24 }
 0x136   : > { %1668 = vmatmul.bf16.gmra.mxu2 %v1080_v16  ;;  %1708 = vmatmul.bf16.gmra.mxu3 %v1112_v23  ;;  %v852_v44 = vpop.permute.xlu1 %851 }
 0x137   : > { %v1028_v45 = vsel %vm278_vm0, %v10122_v48, %v852_v44 }
 0x139   : > { %v1531_v26 = vpop.f32.mrf.mxu3 }
 0x13b   : > { %v7769_v17 = vpop.f32.mrf.mxu0 }
 0x13e   : > { %1510 = vmatmul.bf16.gmra.mxu0 %v7774_v34  ;;  %v894_v25 = vpop.permute.xlu0 %893 }
 0x13f   : > { %v1092_v16 = vsel %vm278_vm0, %v10123_v13, %v894_v25 }
 0x141   : > { %v1533_v1 = vpop.f32.mrf.mxu3 }
 0x143   : > { %v7779_v59 = vpop.f32.mrf.mxu0 }
 0x145   : > { %1584 = vmatmul.bf16.gmra.mxu1 %v1020_v2  ;;  %v1529_v2 = vadd.f32 %v7802_v19, %v1528_v18 }
 0x146   : > { %1673 = vmatmul.bf16.gmra.mxu2 %v1084_v27  ;;  %1713 = vmatmul.bf16.gmra.mxu3 %v1116_v33  ;;  %v896_v27 = vpop.permute.xlu2 %895 }
 0x149   : > { %v1536_v46 = vpop.f32.mrf.mxu3 }
 0x14b   : > { %v7785_v21 = vpop.f32.mrf.mxu0 }
 0x14d   : > { %v854_v42 = vpop.permute.xlu0 %853 }
 0x14e   : > { %1515 = vmatmul.bf16.gmra.mxu0 %v7790_v0  ;;  %v1032_v47 = vsel %vm278_vm0, %v7608_v40, %v854_v42 }
 0x151   : > { %v1538_v41 = vpop.f32.mrf.mxu3 }
 0x153   : > { %v7795_v38 = vpop.f32.mrf.mxu0 }
 0x155   : > { %1589 = vmatmul.bf16.gmra.mxu1 %v1024_v56 }
 0x156   : > { %1678 = vmatmul.bf16.gmra.mxu2 %v1088_v3  ;;  %1727 = vmatmul.bf16.vlgmr.msrb.gmra.mxu3 %v10121_v53  ;;  %v856_v53 = vpop.permute.xlu2 %855 }
 0x157   : > { %v1036_v25 = vsel %vm278_vm0, %v7677_v28, %v856_v53 }
 0x159   : > { %v1610_v62 = vpop.f32.mrf.mxu3 }
 0x15a   : > { %v1611_v10 = vadd.f32 %v1610_v62, %v1522_v12  ;;  %v1534_v12 = vadd.f32 %v7802_v19, %v1533_v1  ;;  %v898_v62 = vpop.permute.xlu1 %897 }
 0x15b   : > { %v7807_v6 = vpop.f32.mrf.mxu0 }
 0x15e   : > { %6072 = vmatmul.msk.bf16.vlgmr.msrb.gmra.mxu0 %vm278_vm0, %v7369_v5  ;;  %v1527_v5 = vadd.f32 %v7802_v19, %v1526_v29 }
 0x161   : > { %v1612_v55 = vpop.f32.mrf.mxu3 }
 0x162   : > { %v1613_v52 = vadd.f32 %v1612_v55, %v1524_v63 }
 0x163   : > { %v7815_v24 = vpop.f32.mrf.mxu0 }
 0x165   : > { %1594 = vmatmul.bf16.gmra.mxu1 %v1028_v45 }
 0x166   : > { %1683 = vmatmul.bf16.gmra.mxu2 %v1092_v16  ;;  %1732 = vmatmul.bf16.gmra.mxu3 %v7594_v8  ;;  %v10124_v8 = vld [vmem:[#allocation12_spill] sm:$0xff] }
 0x167   : > { %v1096_v29 = vsel %vm278_vm0, %v10124_v8, %v896_v27  ;;  %v6488_v16 = vld [vmem:[%s10082_s3 + $0x38] sm:$0xff]  ;;  %v7874_v8 = vpop.f32.mrf.mxu2 }
 0x168   : > { %3234 = vmatpush.bf16.msrb.mxu1 %v6488_v16 }
 0x169   : > { %v1615_v23 = vpop.f32.mrf.mxu3 }
 0x16a   : > { %v1616_v4 = vadd.f32 %v1615_v23, %v1527_v5  ;;  %v1539_v5 = vadd.f32 %v7802_v19, %v1538_v41 }
 0x16b   : > { %v7821_v9 = vpop.f32.mrf.mxu0 }
 0x16e   : > { %6073 = vmatmul.msk.bf16.gmra.mxu0 %vm278_vm0, %v7363_v57  ;;  %v1532_v57 = vadd.f32 %v7802_v19, %v1531_v26 }
 0x171   : > { %v1617_v33 = vpop.f32.mrf.mxu3 }
 0x172   : > { %v1618_v20 = vadd.f32 %v1617_v33, %v1529_v2 }
 0x173   : > { %v7828_v56 = vpop.f32.mrf.mxu0 }
 0x175   : > { %1599 = vmatmul.bf16.gmra.mxu1 %v1032_v47  ;;  %v1550_v47 = vpop.f32.mrf.mxu1 }
 0x176   : > { %1688 = vmatmul.bf16.gmra.mxu2 %v1096_v29  ;;  %1737 = vmatmul.bf16.gmra.mxu3 %v7638_v32  ;;  %v10125_v32 = vld [vmem:[#allocation7_spill] sm:$0xff] }
 0x177   : > { %v1100_v26 = vsel %vm278_vm0, %v10125_v32, %v898_v62 }
 0x179   : > { %v1620_v22 = vpop.f32.mrf.mxu3 }
 0x17a   : > { %v1621_v3 = vadd.f32 %v1620_v22, %v1532_v57 }
 0x17b   : > { %v7834_v18 = vpop.f32.mrf.mxu0 }
 0x17e   : > { %6074 = vmatmul.msk.bf16.gmra.mxu0 %vm278_vm0, %v7377_v14  ;;  %v1537_v14 = vadd.f32 %v7802_v19, %v1536_v46 }
 0x181   : > { %v1622_v44 = vpop.f32.mrf.mxu3 }
 0x182   : > { %v1623_v63 = vadd.f32 %v1622_v44, %v1534_v12 }
 0x183   : > { %v7841_v55 = vpop.f32.mrf.mxu0 }
 0x185   : > { %1604 = vmatmul.bf16.gmra.mxu1 %v1036_v25 }
 0x186   : > { %1693 = vmatmul.bf16.gmra.mxu2 %v1100_v26  ;;  %1742 = vmatmul.bf16.gmra.mxu3 %v7662_v50 }
 0x189   : > { %v1625_v45 = vpop.f32.mrf.mxu3 }
 0x18a   : > { %v1626_v13 = vadd.f32 %v1625_v45, %v1537_v14 }
 0x18b   : > { %v7847_v1 = vpop.f32.mrf.mxu0 }
 0x18e   : > { %6075 = vmatmul.msk.bf16.gmra.mxu0 %vm278_vm0, %v7445_v49 }
 0x191   : > { %v1627_v23 = vpop.f32.mrf.mxu3 }
 0x192   : > { %v7855_v42 = vadd.f32 %v1627_v23, %v1539_v5 }
 0x193   : > { %v7857_v50 = vpop.f32.mrf.mxu0 }
 0x196   : > { %1747 = vmatmul.bf16.gmra.mxu3 %v7629_v54  ;;  %v6487_v54 = vld [vmem:[%s10082_s3 + $0x30] sm:$0xff] }
 0x197   : > { %3235 = vmatpush.bf16.msrb.mxu1 %v6487_v54 }
 0x199   : > { %v1699_v46 = vpop.f32.mrf.mxu3 }
 0x19a   : > { %v7860_v2 = vadd.f32 %v1699_v46, %v1611_v10 }
 0x19b   : > { %v7862_v27 = vpop.f32.mrf.mxu0 }
 0x19e   : > { %6076 = vmatmul.msk.bf16.gmra.mxu0 %vm278_vm0, %v7418_v15  ;;  %v7882_v15 = vpop.f32.mrf.mxu1 }
 0x1a1   : > { %v1701_v49 = vpop.f32.mrf.mxu3 }
 0x1a2   : > { %v7866_v33 = vadd.f32 %v1701_v49, %v1613_v52  ;;  %v7884_v52 = vpop.f32.mrf.mxu2 }
 0x1a3   : > { %v7868_v41 = vpop.f32.mrf.mxu0 }
 0x1a6   : > { %1752 = vmatmul.bf16.gmra.mxu3 %v7700_v60  ;;  %v7891_v12 = vpop.f32.mrf.mxu1 }
 0x1a9   : > { %v1704_v10 = vpop.f32.mrf.mxu3 }
 0x1aa   : > { %v7876_v29 = vadd.f32 %v1704_v10, %v1616_v4  ;;  %v7895_v44 = vpop.f32.mrf.mxu2 }
 0x1ab   : > { %v7878_v57 = vpop.f32.mrf.mxu0 }
 0x1ae   : > { %6077 = vmatmul.msk.bf16.gmra.mxu0 %vm278_vm0, %v7471_v39 }
 0x1b1   : > { %v1706_v60 = vpop.f32.mrf.mxu3 }
 0x1b2   : > { %v7886_v22 = vadd.f32 %v1706_v60, %v1618_v20  ;;  %v7903_v20 = vpop.f32.mrf.mxu1 }
 0x1b3   : > { %v7888_v53 = vpop.f32.mrf.mxu0 }
 0x1b6   : > { %1757 = vmatmul.bf16.gmra.mxu3 %v7726_v11  ;;  %v7078_v11 = vmov 0.0  }
 0x1b7   : > { %279 = vst.msk [vmem:[#allocation2] sm:$0xff] %vm278_vm0, %v7078_v11 }
 0x1b8   : > { %280 = vst.msk [vmem:[#allocation2 + $0x8] sm:$0xff] %vm278_vm0, %v7078_v11 }
 0x1b9   : > { %v1709_v4 = vpop.f32.mrf.mxu3  ;;  %282 = vst.msk [vmem:[#allocation2 + $0x10] sm:$0x3] %vm281_vm1, %v7078_v11 }
 0x1ba   : > { %v7893_v62 = vadd.f32 %v1709_v4, %v1621_v3  ;;  %v7909_v3 = vpop.f32.mrf.mxu2  ;;  %286 = vst.msk [vmem:[#allocation2 + $0x1a8] sm:$0x3] %vm281_vm1, %v7078_v11  ;;  %v7927_v45 = vpop.f32.mrf.mxu1 }
 0x1bb   : > { %v7897_v25 = vpop.f32.mrf.mxu0  ;;  %284 = vst.msk [vmem:[#allocation2 + $0x198] sm:$0xff] %vm278_vm0, %v7078_v11 }
 0x1bc   : > { %285 = vst.msk [vmem:[#allocation2 + $0x1a0] sm:$0xff] %vm278_vm0, %v7078_v11 }
 0x1bd   : > { %324 = vst [vmem:[#allocation3] sm:$0x1] %v7078_v11 }
 0x1be   : > { %6078 = vmatmul.msk.bf16.gmra.mxu0 %vm278_vm0, %v10119_v43  ;;  %325 = vst [vmem:[#allocation3 + $0x18] sm:$0x1] %v7078_v11 }
 0x1bf   : > { %326 = vst [vmem:[#allocation3 + $0x30] sm:$0x1] %v7078_v11 }
 0x1c0   : > { %v2195_v16 = vld [vmem:[#allocation2 + $0x9] sm:$0xff]  ;;  %327 = vst [vmem:[#allocation3 + $0x48] sm:$0x1] %v7078_v11 }
 0x1c1   : > { %v1711_v39 = vpop.f32.mrf.mxu3  ;;  %328 = vst [vmem:[#allocation3 + $0x60] sm:$0x1] %v7078_v11 }
 0x1c2   : > { %v7901_v32 = vadd.f32 %v1711_v39, %v1623_v63  ;;  %v7933_v23 = vpop.f32.mrf.mxu2  ;;  %329 = vst [vmem:[#allocation3 + $0x78] sm:$0x1] %v7078_v11  ;;  %v6486_v39 = vld [vmem:[%s10082_s3 + $0x28] sm:$0xff] }
 0x1c3   : > { %v7905_v26 = vpop.f32.mrf.mxu0  ;;  %330 = vst [vmem:[#allocation3 + $0x90] sm:$0x1] %v7078_v11  ;;  %3236 = vmatpush.bf16.msrb.mxu1 %v6486_v39 }
 0x1c4   : > { %331 = vst [vmem:[#allocation3 + $0xa8] sm:$0x1] %v7078_v11 }
 0x1c5   : > { %288 = vst.msk [vmem:[#allocation2] sm:$0x1] %vm287_vm2, %v7078_v11 }
 0x1c6   : > { %1762 = vmatmul.bf16.gmra.mxu3 %v7754_v37  ;;  %v2194_v37 = vld [vmem:[#allocation2 + $0x1] sm:$0xff]  ;;  %289 = vst.msk [vmem:[#allocation2 + $0x18] sm:$0x1] %vm287_vm2, %v7078_v11 }
 0x1c7   : > { %v2230_v5 = vpack.c.bf16 %v2194_v37, %v2194_v37  ;;  %v7950_v37 = vpop.f32.mrf.mxu1  ;;  %290 = vst.msk [vmem:[#allocation2 + $0x30] sm:$0x1] %vm287_vm2, %v7078_v11 }
 0x1c8   : > { %291 = vst.msk [vmem:[#allocation2 + $0x48] sm:$0x1] %vm287_vm2, %v7078_v11 }
 0x1c9   : > { %v1714_v43 = vpop.f32.mrf.mxu3  ;;  %v2450_v46 = vunpack.c.l.b16 %v2230_v5  ;;  %292 = vst.msk [vmem:[#allocation2 + $0x60] sm:$0x1] %vm287_vm2, %v7078_v11 }
 0x1ca   : > { %v7920_v63 = vadd.f32 %v1714_v43, %v1626_v13  ;;  %v2231_v13 = vpack.c.bf16 %v2195_v16, %v2195_v16  ;;  %v7953_v16 = vpop.f32.mrf.mxu2  ;;  %293 = vst.msk [vmem:[#allocation2 + $0x78] sm:$0x1] %vm287_vm2, %v7078_v11 }
 0x1cb   : > { %v7923_v14 = vpop.f32.mrf.mxu0  ;;  %294 = vst.msk [vmem:[#allocation2 + $0x90] sm:$0x1] %vm287_vm2, %v7078_v11 }
 0x1cc   : > { %v2451_v49 = vunpack.c.l.b16 %v2231_v13  ;;  %295 = vst.msk [vmem:[#allocation2 + $0xa8] sm:$0x1] %vm287_vm2, %v7078_v11 }
 0x1cd   : > { %296 = vst.msk [vmem:[#allocation2 + $0xc0] sm:$0x1] %vm287_vm2, %v7078_v11 }
 0x1ce   : > { %6079 = vmatmul.msk.bf16.gmra.mxu0 %vm278_vm0, %v10122_v48  ;;  %v2482_v60 = vpack.c.b16 %v2451_v49, %v2450_v46  ;;  %v1462_v48 = vadd.f32 %v7802_v19, %v7721_v31  ;;  %297 = vst.msk [vmem:[#allocation2 + $0xd8] sm:$0x1] %vm287_vm2, %v7078_v11 }
 0x1cf   : > { %298 = vst.msk [vmem:[#allocation2 + $0xf0] sm:$0x1] %vm287_vm2, %v7078_v11 }
 0x1d0   : > { %2498 = vrot.lane.b32.xlu0 %v2482_v60, %s7077_s18  ;;  %v1551_v43 = vadd.f32 %v1550_v47, %v1462_v48  ;;  %299 = vst.msk [vmem:[#allocation2 + $0x108] sm:$0x1] %vm287_vm2, %v7078_v11 }
 0x1d1   : > { %v1716_v54 = vpop.f32.mrf.mxu3  ;;  %300 = vst.msk [vmem:[#allocation2 + $0x120] sm:$0x1] %vm287_vm2, %v7078_v11 }
 0x1d2   : > { %v7939_v10 = vadd.f32 %v1716_v54, %v7855_v42  ;;  %v1640_v42 = vadd.f32 %v7874_v8, %v1551_v43  ;;  %v7978_v54 = vpop.f32.mrf.mxu1  ;;  %v7984_v60 = vpop.f32.mrf.mxu2  ;;  %301 = vst.msk [vmem:[#allocation2 + $0x138] sm:$0x1] %vm287_vm2, %v7078_v11 }
 0x1d3   : > { %v7941_v4 = vpop.f32.mrf.mxu0  ;;  %302 = vst.msk [vmem:[#allocation2 + $0x150] sm:$0x1] %vm287_vm2, %v7078_v11 }
 0x1d4   : > { %303 = vst.msk [vmem:[#allocation2 + $0x168] sm:$0x1] %vm287_vm2, %v7078_v11 }
 0x1d5   : > { %304 = vst.msk [vmem:[#allocation2 + $0x180] sm:$0x1] %vm287_vm2, %v7078_v11 }
 0x1d6   : > { %1767 = vmatmul.bf16.gmra.mxu3 %v7774_v34  ;;  %v1464_v34 = vadd.f32 %v7802_v19, %v7738_v51  ;;  %305 = vst.msk [vmem:[#allocation2 + $0x198] sm:$0x1] %vm287_vm2, %v7078_v11 }
 0x1d7   : > { %306 = vst.msk [vmem:[#allocation2 + $0x11] sm:$0x1] %vm287_vm2, %v7078_v11 }
 0x1d8   : > { %v1553_v8 = vadd.f32 %v7882_v15, %v1464_v34  ;;  %307 = vst.msk [vmem:[#allocation2 + $0x29] sm:$0x1] %vm287_vm2, %v7078_v11 }
 0x1d9   : > { %v1728_v5 = vpop.f32.mrf.mxu3  ;;  %308 = vst.msk [vmem:[#allocation2 + $0x41] sm:$0x1] %vm287_vm2, %v7078_v11 }
 0x1da   : > { %v1729_v13 = vadd.f32 %v1728_v5, %v1640_v42  ;;  %v1642_v51 = vadd.f32 %v7884_v52, %v1553_v8  ;;  %v1467_v52 = vadd.f32 %v7802_v19, %v7749_v35  ;;  %309 = vst.msk [vmem:[#allocation2 + $0x59] sm:$0x1] %vm287_vm2, %v7078_v11 }
 0x1db   : > { %v1817_v31 = vpop.f32.mrf.mxu0  ;;  %310 = vst.msk [vmem:[#allocation2 + $0x71] sm:$0x1] %vm287_vm2, %v7078_v11 }
 0x1dc   : > { %v7961_v47 = vadd.f32 %v1817_v31, %v1729_v13  ;;  %v1556_v43 = vadd.f32 %v7891_v12, %v1467_v52  ;;  %v8010_v12 = vpop.f32.mrf.mxu1  ;;  %311 = vst.msk [vmem:[#allocation2 + $0x89] sm:$0x1] %vm287_vm2, %v7078_v11 }
 0x1dd   : > { %312 = vst.msk [vmem:[#allocation2 + $0xa1] sm:$0x1] %vm287_vm2, %v7078_v11 }
 0x1de   : > { %v1897_v46 = vsub.f32 0.0, %v7961_v47  ;;  %6080 = vmatmul.msk.bf16.gmra.mxu0 %vm278_vm0, %v7608_v40  ;;  %v1645_v5 = vadd.f32 %v7895_v44, %v1556_v43  ;;  %v1469_v44 = vadd.f32 %v7802_v19, %v7762_v58  ;;  %313 = vst.msk [vmem:[#allocation2 + $0xb9] sm:$0x1] %vm287_vm2, %v7078_v11 }
 0x1df   : > { %314 = vst.msk [vmem:[#allocation2 + $0xd1] sm:$0x1] %vm287_vm2, %v7078_v11 }
 0x1e0   : > { %v1929_v49 = vmul.f32 1.442695, %v1897_v46  ;;  %315 = vst.msk [vmem:[#allocation2 + $0xe9] sm:$0x1] %vm287_vm2, %v7078_v11 }
 0x1e1   : > { %v1730_v15 = vpop.f32.mrf.mxu3  ;;  %316 = vst.msk [vmem:[#allocation2 + $0x101] sm:$0x1] %vm287_vm2, %v7078_v11 }
 0x1e2   : > { %6625 = vpow2.f32 %v1929_v49  ;;  %v1731_v40 = vadd.f32 %v1730_v15, %v1642_v51  ;;  %v6485_v51 = vld [vmem:[%s10082_s3 + $0x20] sm:$0xff]  ;;  %v8023_v49 = vpop.f32.mrf.mxu2  ;;  %v1558_v15 = vadd.f32 %v7903_v20, %v1469_v44  ;;  %317 = vst.msk [vmem:[#allocation2 + $0x119] sm:$0x1] %vm287_vm2, %v7078_v11 }
 0x1e3   : > { %v1819_v48 = vpop.f32.mrf.mxu0  ;;  %3237 = vmatpush.bf16.msrb.mxu1 %v6485_v51  ;;  %318 = vst.msk [vmem:[#allocation2 + $0x131] sm:$0x1] %vm287_vm2, %v7078_v11 }
 0x1e4   : > { %v7990_v39 = vadd.f32 %v1819_v48, %v1731_v40  ;;  %v1647_v48 = vadd.f32 %v7909_v3, %v1558_v15  ;;  %v1472_v3 = vadd.f32 %v7802_v19, %v7769_v17  ;;  %319 = vst.msk [vmem:[#allocation2 + $0x149] sm:$0x1] %vm287_vm2, %v7078_v11 }
 0x1e5   : > { %320 = vst.msk [vmem:[#allocation2 + $0x161] sm:$0x1] %vm287_vm2, %v7078_v11 }
 0x1e6   : > { %v1898_v42 = vsub.f32 0.0, %v7990_v39  ;;  %1772 = vmatmul.bf16.gmra.mxu3 %v7790_v0  ;;  %321 = vst.msk [vmem:[#allocation2 + $0x179] sm:$0x1] %vm287_vm2, %v7078_v11 }
 0x1e7   : > { %322 = vst.msk [vmem:[#allocation2 + $0x191] sm:$0x1] %vm287_vm2, %v7078_v11 }
 0x1e8   : > { %v6626_v35 = vpop.eup %6625  ;;  %v1931_v13 = vmul.f32 1.442695, %v1898_v42  ;;  %323 = vst.msk [vmem:[#allocation2 + $0x1a9] sm:$0x1] %vm287_vm2, %v7078_v11  ;;  %v1477_v11 = vadd.f32 %v7802_v19, %v7785_v21 }
 0x1e9   : > { %v1993_v31 = vadd.f32 1.0, %v6626_v35  ;;  %v1733_v34 = vpop.f32.mrf.mxu3 }
 0x1ea   : > { %6627 = vpow2.f32 %v1931_v13  ;;  %v1734_v0 = vadd.f32 %v1733_v34, %v1645_v5 }
 0x1eb   : > { %6629 = vrcp.f32 %v1993_v31  ;;  %v1822_v8 = vpop.f32.mrf.mxu0  ;;  %v8050_v31 = vpop.f32.mrf.mxu1 }
 0x1ec   : > { %v8016_v46 = vadd.f32 %v1822_v8, %v1734_v0  ;;  %v10126_v0 = vld [vmem:[#allocation13_spill] sm:$0xff]  ;;  %v8059_v8 = vpop.f32.mrf.mxu2 }
 0x1ee   : > { %v1899_v40 = vsub.f32 0.0, %v8016_v46  ;;  %6081 = vmatmul.msk.bf16.gmra.mxu0 %vm278_vm0, %v7677_v28 }
 0x1f0   : > { %v6628_v58 = vpop.eup %6627  ;;  %v1933_v52 = vmul.f32 1.442695, %v1899_v40 }
 0x1f1   : > { %v6630_v20 = vpop.eup %6629  ;;  %v1994_v43 = vadd.f32 1.0, %v6628_v58  ;;  %v1735_v42 = vpop.f32.mrf.mxu3 }
 0x1f2   : > { %v2057_v28 = vmul.f32 %v6630_v20, %v7961_v47  ;;  %6631 = vpow2.f32 %v1933_v52  ;;  %v1736_v35 = vadd.f32 %v1735_v42, %v1647_v48  ;;  %v1561_v47 = vadd.f32 %v7927_v45, %v1472_v3 }
 0x1f3   : > { %6633 = vrcp.f32 %v1994_v43  ;;  %v1824_v5 = vpop.f32.mrf.mxu0  ;;  %v8083_v42 = vpop.f32.mrf.mxu1 }
 0x1f4   : > { %2090 = vst.msk [vmem:[#allocation2 + $0x19] sm:$0xff] %vm278_vm0, %v2057_v28  ;;  %v8048_v13 = vadd.f32 %v1824_v5, %v1736_v35  ;;  %v1650_v44 = vadd.f32 %v7933_v23, %v1561_v47  ;;  %v1474_v23 = vadd.f32 %v7802_v19, %v7779_v59  ;;  %v8088_v47 = vpop.f32.mrf.mxu2 }
 0x1f6   : > { %v1900_v34 = vsub.f32 0.0, %v8048_v13  ;;  %1777 = vmatmul.bf16.gmra.mxu3 %v10126_v0 }
 0x1f8   : > { %v6632_v17 = vpop.eup %6631  ;;  %v1935_v51 = vmul.f32 1.442695, %v1900_v34 }
 0x1f9   : > { %v6634_v45 = vpop.eup %6633  ;;  %v1995_v15 = vadd.f32 1.0, %v6632_v17  ;;  %v1738_v40 = vpop.f32.mrf.mxu3 }
 0x1fa   : > { %v2058_v58 = vmul.f32 %v6634_v45, %v7990_v39  ;;  %6635 = vpow2.f32 %v1935_v51  ;;  %v1739_v48 = vadd.f32 %v1738_v40, %v1650_v44  ;;  %v1563_v39 = vadd.f32 %v7950_v37, %v1474_v23 }
 0x1fb   : > { %6637 = vrcp.f32 %v1995_v15  ;;  %v1827_v52 = vpop.f32.mrf.mxu0  ;;  %v2196_v28 = vld [vmem:[#allocation2 + $0x19] sm:$0xff]  ;;  %v1566_v40 = vadd.f32 %v7978_v54, %v1477_v11 }
 0x1fc   : > { %2091 = vst.msk [vmem:[#allocation2 + $0x21] sm:$0xff] %vm278_vm0, %v2058_v58  ;;  %v1828_v20 = vadd.f32 %v1827_v52, %v1739_v48  ;;  %v1652_v35 = vadd.f32 %v7953_v16, %v1563_v39  ;;  %v2232_v17 = vpack.c.bf16 %v2196_v28, %v2196_v28  ;;  %v6484_v15 = vld [vmem:[%s10082_s3 + $0x18] sm:$0xff]  ;;  %v10127_v58 = vld [vmem:[#allocation14_spill] sm:$0xff] }
 0x1fd   : > { %3238 = vmatpush.bf16.msrb.mxu1 %v6484_v15  ;;  %v1655_v39 = vadd.f32 %v7984_v60, %v1566_v40  ;;  %v1479_v60 = vadd.f32 %v7802_v19, %v7795_v38 }
 0x1fe   : > { %v1901_v43 = vsub.f32 0.0, %v1828_v20  ;;  %6082 = vmatmul.msk.bf16.gmra.mxu0 %vm278_vm0, %v7606_v36  ;;  %v2452_v48 = vunpack.c.l.b16 %v2232_v17 }
 0x200   : > { %v6636_v59 = vpop.eup %6635  ;;  %v1937_v5 = vmul.f32 1.442695, %v1901_v43 }
 0x201   : > { %v6638_v3 = vpop.eup %6637  ;;  %v1996_v37 = vadd.f32 1.0, %v6636_v59  ;;  %v1740_v34 = vpop.f32.mrf.mxu3 }
 0x202   : > { %v2059_v36 = vmul.f32 %v6638_v3, %v8016_v46  ;;  %6639 = vpow2.f32 %v1937_v5  ;;  %v1741_v0 = vadd.f32 %v1740_v34, %v1652_v35  ;;  %v8102_v59 = vpop.f32.mrf.mxu1 }
 0x203   : > { %6641 = vrcp.f32 %v1996_v37  ;;  %v1829_v44 = vpop.f32.mrf.mxu0  ;;  %v2197_v51 = vld [vmem:[#allocation2 + $0x21] sm:$0xff]  ;;  %v8107_v37 = vpop.f32.mrf.mxu2 }
 0x204   : > { %2092 = vst.msk [vmem:[#allocation2 + $0x31] sm:$0xff] %vm278_vm0, %v2059_v36  ;;  %v1830_v16 = vadd.f32 %v1829_v44, %v1741_v0  ;;  %v2233_v45 = vpack.c.bf16 %v2197_v51, %v2197_v51  ;;  %v1568_v0 = vadd.f32 %v8010_v12, %v1479_v60 }
 0x206   : > { %v1902_v46 = vsub.f32 0.0, %v1830_v16  ;;  %1782 = vmatmul.bf16.gmra.mxu3 %v10127_v58  ;;  %v2453_v52 = vunpack.c.l.b16 %v2233_v45  ;;  %v1657_v51 = vadd.f32 %v8023_v49, %v1568_v0 }
 0x208   : > { %v6640_v23 = vpop.eup %6639  ;;  %v1939_v21 = vmul.f32 1.442695, %v1902_v46  ;;  %v8100_v43 = vpack.c.b16 %v2453_v52, %v2452_v48 }
 0x209   : > { %v6642_v28 = vpop.eup %6641  ;;  %v1997_v35 = vadd.f32 1.0, %v6640_v23  ;;  %v1743_v5 = vpop.f32.mrf.mxu3 }
 0x20a   : > { %v2060_v3 = vmul.f32 %v6642_v28, %v8048_v13  ;;  %6643 = vpow2.f32 %v1939_v21  ;;  %v1744_v54 = vadd.f32 %v1743_v5, %v1655_v39  ;;  %2500 = vrot.lane.b32.xlu1 %v8100_v43, %s7077_s18  ;;  %v8116_v48 = vpop.f32.mrf.mxu1  ;;  %v10128_v28 = vld [vmem:[#allocation15_spill] sm:$0xff] }
 0x20b   : > { %6645 = vrcp.f32 %v1997_v35  ;;  %v1832_v34 = vpop.f32.mrf.mxu0  ;;  %v2198_v13 = vld [vmem:[#allocation2 + $0x31] sm:$0xff]  ;;  %v8123_v39 = vpop.f32.mrf.mxu2 }
 0x20c   : > { %2093 = vst.msk [vmem:[#allocation2 + $0x39] sm:$0xff] %vm278_vm0, %v2060_v3  ;;  %v1833_v36 = vadd.f32 %v1832_v34, %v1744_v54  ;;  %v2234_v58 = vpack.c.bf16 %v2198_v13, %v2198_v13 }
 0x20e   : > { %v1903_v17 = vsub.f32 0.0, %v1833_v36  ;;  %6083 = vmatmul.msk.bf16.gmra.mxu0 %vm278_vm0, %v7265_v61  ;;  %v1482_v61 = vadd.f32 %v7802_v19, %v7807_v6  ;;  %v2454_v35 = vunpack.c.l.b16 %v2234_v58 }
 0x210   : > { %v6644_v44 = vpop.eup %6643  ;;  %v1941_v11 = vmul.f32 1.442695, %v1903_v17 }
 0x211   : > { %v6646_v45 = vpop.eup %6645  ;;  %v1998_v15 = vadd.f32 1.0, %v6644_v44  ;;  %v1745_v40 = vpop.f32.mrf.mxu3 }
 0x212   : > { %v2061_v46 = vmul.f32 %v6646_v45, %v1828_v20  ;;  %6647 = vpow2.f32 %v1941_v11  ;;  %v1746_v38 = vadd.f32 %v1745_v40, %v1657_v51  ;;  %v1571_v20 = vadd.f32 %v8050_v31, %v1482_v61  ;;  %v6483_v11 = vld [vmem:[%s10082_s3 + $0x10] sm:$0xff]  ;;  %v8139_v45 = vpop.f32.mrf.mxu1 }
 0x213   : > { %6649 = vrcp.f32 %v1998_v15  ;;  %v1834_v12 = vpop.f32.mrf.mxu0  ;;  %v2199_v52 = vld [vmem:[#allocation2 + $0x39] sm:$0xff]  ;;  %v1484_v51 = vadd.f32 %v7802_v19, %v7815_v24  ;;  %3239 = vmatpush.bf16.msrb.mxu1 %v6483_v11  ;;  %v8144_v40 = vpop.f32.mrf.mxu2 }
 0x214   : > { %2094 = vst.msk [vmem:[#allocation2 + $0x49] sm:$0xff] %vm278_vm0, %v2061_v46  ;;  %v8121_v23 = vadd.f32 %v1834_v12, %v1746_v38  ;;  %v2235_v49 = vpack.c.bf16 %v2199_v52, %v2199_v52  ;;  %v1660_v54 = vadd.f32 %v8059_v8, %v1571_v20 }
 0x216   : > { %v1904_v21 = vsub.f32 0.0, %v8121_v23  ;;  %1787 = vmatmul.bf16.gmra.mxu3 %v10128_v28  ;;  %v2455_v5 = vunpack.c.l.b16 %v2235_v49 }
 0x218   : > { %v6648_v3 = vpop.eup %6647  ;;  %v1943_v34 = vmul.f32 1.442695, %v1904_v21  ;;  %v8129_v6 = vpack.c.b16 %v2455_v5, %v2454_v35 }
 0x219   : > { %v6650_v60 = vpop.eup %6649  ;;  %v1999_v0 = vadd.f32 1.0, %v6648_v3  ;;  %v1748_v17 = vpop.f32.mrf.mxu3 }
 0x21a   : > { %v2062_v13 = vmul.f32 %v6650_v60, %v1830_v16  ;;  %6651 = vpow2.f32 %v1943_v34  ;;  %v1749_v44 = vadd.f32 %v1748_v17, %v1660_v54  ;;  %2502 = vrot.lane.b32.xlu0 %v8129_v6, %s7077_s18  ;;  %v1573_v16 = vadd.f32 %v8083_v42, %v1484_v51  ;;  %v10129_v54 = vld [vmem:[#allocation18_spill] sm:$0xff]  ;;  %v8155_v60 = vpop.f32.mrf.mxu1 }
 0x21b   : > { %6653 = vrcp.f32 %v1999_v0  ;;  %v1837_v31 = vpop.f32.mrf.mxu0  ;;  %v2200_v46 = vld [vmem:[#allocation2 + $0x49] sm:$0xff] }
 0x21c   : > { %2095 = vst.msk [vmem:[#allocation2 + $0x51] sm:$0xff] %vm278_vm0, %v2062_v13  ;;  %v1838_v8 = vadd.f32 %v1837_v31, %v1749_v44  ;;  %v1662_v38 = vadd.f32 %v8088_v47, %v1573_v16  ;;  %v2236_v21 = vpack.c.bf16 %v2200_v46, %v2200_v46  ;;  %v8160_v31 = vpop.f32.mrf.mxu2 }
 0x21e   : > { %v1905_v15 = vsub.f32 0.0, %v1838_v8  ;;  %6084 = vmatmul.msk.bf16.gmra.mxu0 %vm278_vm0, %v7293_v30  ;;  %v1487_v30 = vadd.f32 %v7802_v19, %v7821_v9 }
 0x220   : > { %v6652_v24 = vpop.eup %6651  ;;  %v1945_v58 = vmul.f32 1.442695, %v1905_v15  ;;  %v1576_v47 = vadd.f32 %v8102_v59, %v1487_v30 }
 0x221   : > { %v6654_v12 = vpop.eup %6653  ;;  %v2000_v52 = vadd.f32 1.0, %v6652_v24  ;;  %v1750_v61 = vpop.f32.mrf.mxu3 }
 0x222   : > { %v2063_v49 = vmul.f32 %v6654_v12, %v1833_v36  ;;  %6655 = vpow2.f32 %v1945_v58  ;;  %v1751_v20 = vadd.f32 %v1750_v61, %v1662_v38  ;;  %v2456_v36 = vunpack.c.l.b16 %v2236_v21  ;;  %v918_v61 = vpop.permute.xlu2 %917 }
 0x223   : > { %6657 = vrcp.f32 %v2000_v52  ;;  %v1839_v42 = vpop.f32.mrf.mxu0  ;;  %v2201_v28 = vld [vmem:[#allocation2 + $0x51] sm:$0xff]  ;;  %v1665_v17 = vadd.f32 %v8107_v37, %v1576_v47  ;;  %v1489_v37 = vadd.f32 %v7802_v19, %v7828_v56 }
 0x224   : > { %2096 = vst.msk [vmem:[#allocation2 + $0x61] sm:$0xff] %vm278_vm0, %v2063_v49  ;;  %v8150_v35 = vadd.f32 %v1839_v42, %v1751_v20  ;;  %v2237_v5 = vpack.c.bf16 %v2201_v28, %v2201_v28  ;;  %v8175_v20 = vpop.f32.mrf.mxu1  ;;  %v8177_v30 = vpop.f32.mrf.mxu2 }
 0x225   : > { %v1578_v24 = vadd.f32 %v8116_v48, %v1489_v37 }
 0x226   : > { %v1906_v3 = vsub.f32 0.0, %v8150_v35  ;;  %1792 = vmatmul.bf16.gmra.mxu3 %v10129_v54  ;;  %v2457_v34 = vunpack.c.l.b16 %v2237_v5 }
 0x227   : > { %v1667_v12 = vadd.f32 %v8123_v39, %v1578_v24  ;;  %v1492_v39 = vadd.f32 %v7802_v19, %v7834_v18 }
 0x228   : > { %v6656_v0 = vpop.eup %6655  ;;  %v1947_v13 = vmul.f32 1.442695, %v1906_v3  ;;  %v8158_v9 = vpack.c.b16 %v2457_v34, %v2456_v36 }
 0x229   : > { %v6658_v44 = vpop.eup %6657  ;;  %v2001_v51 = vadd.f32 1.0, %v6656_v0  ;;  %v1753_v11 = vpop.f32.mrf.mxu3  ;;  %v1581_v34 = vadd.f32 %v8139_v45, %v1492_v39 }
 0x22a   : > { %v2064_v59 = vmul.f32 %v6658_v44, %v8121_v23  ;;  %6659 = vpow2.f32 %v1947_v13  ;;  %v1754_v16 = vadd.f32 %v1753_v11, %v1665_v17  ;;  %2504 = vrot.lane.b32.xlu1 %v8158_v9, %s7077_s18 }
 0x22b   : > { %6661 = vrcp.f32 %v2001_v51  ;;  %v1842_v15 = vpop.f32.mrf.mxu0  ;;  %v2202_v23 = vld [vmem:[#allocation2 + $0x61] sm:$0xff]  ;;  %v1670_v18 = vadd.f32 %v8144_v40, %v1581_v34  ;;  %v1494_v40 = vadd.f32 %v7802_v19, %v7841_v55 }
 0x22c   : > { %2097 = vst.msk [vmem:[#allocation2 + $0x69] sm:$0xff] %vm278_vm0, %v2064_v59  ;;  %v8168_v46 = vadd.f32 %v1842_v15, %v1754_v16  ;;  %v2238_v48 = vpack.c.bf16 %v2202_v23, %v2202_v23  ;;  %v8197_v45 = vpop.f32.mrf.mxu1 }
 0x22e   : > { %v1907_v38 = vsub.f32 0.0, %v8168_v46  ;;  %6085 = vmatmul.msk.bf16.gmra.mxu0 %vm278_vm0, %v7326_v7  ;;  %v10130_v7 = vld [vmem:[#allocation8_spill] sm:$0xff]  ;;  %v2458_v17 = vunpack.c.l.b16 %v2238_v48 }
 0x22f   : > { %v1120_v47 = vsel %vm278_vm0, %v10130_v7, %v918_v61  ;;  %v2122_v61 = vld [vmem:[#allocation2] sm:$0xff] }
 0x230   : > { %v6660_v58 = vpop.eup %6659  ;;  %v1949_v52 = vmul.f32 1.442695, %v1907_v38 }
 0x231   : > { %v6662_v49 = vpop.eup %6661  ;;  %v2002_v56 = vadd.f32 1.0, %v6660_v58  ;;  %v1755_v21 = vpop.f32.mrf.mxu3 }
 0x232   : > { %v2065_v42 = vmul.f32 %v6662_v49, %v1838_v8  ;;  %6663 = vpow2.f32 %v1949_v52  ;;  %v1756_v28 = vadd.f32 %v1755_v21, %v1667_v12  ;;  %v6482_v8 = vld [vmem:[%s10082_s3 + $0x8] sm:$0xff]  ;;  %v8204_v58 = vpop.f32.mrf.mxu2  ;;  %v2158_v21 = vpack.c.bf16 %v2122_v61, %v2122_v61 }
 0x233   : > { %6665 = vrcp.f32 %v2002_v56  ;;  %v1844_v5 = vpop.f32.mrf.mxu0  ;;  %v2203_v3 = vld [vmem:[#allocation2 + $0x69] sm:$0xff]  ;;  %3240 = vmatpush.bf16.msrb.mxu1 %v6482_v8 }
 0x234   : > { %2098 = vst.msk [vmem:[#allocation2 + $0x79] sm:$0xff] %vm278_vm0, %v2065_v42  ;;  %v8184_v54 = vadd.f32 %v1844_v5, %v1756_v28  ;;  %v2239_v36 = vpack.c.bf16 %v2203_v3, %v2203_v3  ;;  %v10131_v52 = vld [vmem:[#allocation10_spill] sm:$0xff]  ;;  %v2370_v3 = vunpack.c.l.b16 %v2158_v21 }
 0x235   : > { %v2123_v49 = vld [vmem:[#allocation2 + $0x8] sm:$0xff] }
 0x236   : > { %v1908_v0 = vsub.f32 0.0, %v8184_v54  ;;  %1797 = vmatmul.bf16.gmra.mxu3 %v1120_v47  ;;  %v2459_v13 = vunpack.c.l.b16 %v2239_v36  ;;  %v2159_v42 = vpack.c.bf16 %v2123_v49, %v2123_v49 }
 0x238   : > { %v6664_v44 = vpop.eup %6663  ;;  %v1951_v51 = vmul.f32 1.442695, %v1908_v0  ;;  %v8192_v11 = vpack.c.b16 %v2459_v13, %v2458_v17  ;;  %v2371_v39 = vunpack.c.l.b16 %v2159_v42  ;;  %v1497_v13 = vadd.f32 %v7802_v19, %v7847_v1 }
 0x239   : > { %v6666_v59 = vpop.eup %6665  ;;  %v2003_v16 = vadd.f32 1.0, %v6664_v44  ;;  %v1758_v15 = vpop.f32.mrf.mxu3  ;;  %v1499_v42 = vadd.f32 %v7802_v19, %v7857_v50 }
 0x23a   : > { %v2066_v37 = vmul.f32 %v6666_v59, %v8150_v35  ;;  %6667 = vpow2.f32 %v1951_v51  ;;  %v1759_v24 = vadd.f32 %v1758_v15, %v1670_v18  ;;  %2506 = vrot.lane.b32.xlu2 %v8192_v11, %s7077_s18  ;;  %v1583_v35 = vadd.f32 %v8155_v60, %v1494_v40  ;;  %v6481_v60 = vld [vmem:[%s10082_s3] sm:$0xff]  ;;  %v1590_v51 = vpop.f32.mrf.mxu1 }
 0x23b   : > { %6669 = vrcp.f32 %v2003_v16  ;;  %v1847_v38 = vpop.f32.mrf.mxu0  ;;  %v2204_v56 = vld [vmem:[#allocation2 + $0x79] sm:$0xff]  ;;  %3241 = vmatpush.bf16.msrb.mxu1 %v6481_v60  ;;  %v1586_v59 = vadd.f32 %v8175_v20, %v1497_v13 }
 0x23c   : > { %2099 = vst.msk [vmem:[#allocation2 + $0x81] sm:$0xff] %vm278_vm0, %v2066_v37  ;;  %v8202_v23 = vadd.f32 %v1847_v38, %v1759_v24  ;;  %v1672_v55 = vadd.f32 %v8160_v31, %v1583_v35  ;;  %v2240_v34 = vpack.c.bf16 %v2204_v56, %v2204_v56  ;;  %v2402_v31 = vpack.c.b16 %v2371_v39, %v2370_v3  ;;  %v1679_v24 = vpop.f32.mrf.mxu2 }
 0x23d   : > { %v1675_v35 = vadd.f32 %v8177_v30, %v1586_v59  ;;  %v6510_v59 = vld [vmem:[%s10082_s3 + $0xe8] sm:$0xff] }
 0x23e   : > { %v1909_v12 = vsub.f32 0.0, %v8202_v23  ;;  %6086 = vmatmul.msk.bf16.gmra.mxu0 %vm278_vm0, %v10131_v52  ;;  %v2460_v16 = vunpack.c.l.b16 %v2240_v34 }
 0x240   : > { %v6668_v28 = vpop.eup %6667  ;;  %v1953_v48 = vmul.f32 1.442695, %v1909_v12 }
 0x241   : > { %v6670_v5 = vpop.eup %6669  ;;  %v2004_v7 = vadd.f32 1.0, %v6668_v28  ;;  %v1760_v47 = vpop.f32.mrf.mxu3  ;;  %v6512_v28 = vld [vmem:[%s10082_s3 + $0xf8] sm:$0xff] }
 0x242   : > { %v2067_v36 = vmul.f32 %v6670_v5, %v8168_v46  ;;  %6671 = vpow2.f32 %v1953_v48  ;;  %v1761_v8 = vadd.f32 %v1760_v47, %v1672_v55  ;;  %v2499_v37 = vpop.permute.xlu0 %2498  ;;  %v1592_v48 = vpop.f32.mrf.mxu1  ;;  %3501 = vmatpush.bf16.msra.mxu0 %v6512_v28 }
 0x243   : > { %6673 = vrcp.f32 %v2004_v7  ;;  %v1849_v0 = vpop.f32.mrf.mxu0  ;;  %v2205_v17 = vld [vmem:[#allocation2 + $0x81] sm:$0xff]  ;;  %v2710_v38 = vsel %vm278_vm0, %v2402_v31, %v2499_v37 }
 0x244   : > { %2100 = vst.msk [vmem:[#allocation2 + $0x91] sm:$0xff] %vm278_vm0, %v2067_v36  ;;  %v8218_v44 = vadd.f32 %v1849_v0, %v1761_v8  ;;  %v2241_v18 = vpack.c.bf16 %v2205_v17, %v2205_v17  ;;  %3242 = vmatmul.bf16.vlgmr.msrb.gmra.mxu1 %v2710_v38  ;;  %v1681_v50 = vpop.f32.mrf.mxu2  ;;  %v6511_v36 = vld [vmem:[%s10082_s3 + $0xf0] sm:$0xff]  ;;  %v8247_v0 = vld [vmem:[%s10081_s2] ss:$0 sm:$0xff]  ;;  %v519_v38 = vld [vmem:[%s7174_s17 + $0x1a2] sm:$0xff] }
 0x245   : > { %v518_v37 = vld [vmem:[%s7174_s17 + $0x19a] sm:$0xff] }
 0x246   : > { %v1910_v46 = vsub.f32 0.0, %v8218_v44  ;;  %v2461_v15 = vunpack.c.l.b16 %v2241_v18  ;;  %3502 = vmatpush.bf16.msra.mxu0 %v6511_v36 }
 0x248   : > { %v6672_v40 = vpop.eup %6671  ;;  %v1955_v1 = vmul.f32 1.442695, %v1910_v46  ;;  %v8224_v12 = vpack.c.b16 %v2461_v15, %v2460_v16 }
 0x249   : > { %v6674_v52 = vpop.eup %6673  ;;  %v2005_v61 = vadd.f32 1.0, %v6672_v40  ;;  %v1763_v49 = vpop.f32.mrf.mxu3 }
 0x24a   : > { %v2068_v20 = vmul.f32 %v6674_v52, %v8184_v54  ;;  %6675 = vpow2.f32 %v1955_v1  ;;  %v1764_v56 = vadd.f32 %v1763_v49, %v1675_v35  ;;  %2508 = vrot.lane.b32.xlu0 %v8224_v12, %s7077_s18  ;;  %v1588_v54 = vadd.f32 %v8197_v45, %v1499_v42  ;;  %3503 = vmatpush.bf16.msra.mxu0 %v6510_v59 }
 0x24b   : > { %6677 = vrcp.f32 %v2005_v61  ;;  %v1852_v21 = vpop.f32.mrf.mxu0  ;;  %v2206_v5 = vld [vmem:[#allocation2 + $0x91] sm:$0xff]  ;;  %v554_v52 = vpack.c.bf16 %v518_v37, %v518_v37  ;;  %v555_v61 = vpack.c.bf16 %v519_v38, %v519_v38  ;;  %v6506_v38 = vld [vmem:[%s10082_s3 + $0xc8] sm:$0xff] }
 0x24c   : > { %2101 = vst.msk [vmem:[#allocation2 + $0x99] sm:$0xff] %vm278_vm0, %v2068_v20  ;;  %v8232_v30 = vadd.f32 %v1852_v21, %v1764_v56  ;;  %v1677_v47 = vadd.f32 %v8204_v58, %v1588_v54  ;;  %v2242_v34 = vpack.c.bf16 %v2206_v5, %v2206_v5  ;;  %v1502_v58 = vadd.f32 %v8247_v0, %v7862_v27  ;;  %v6509_v21 = vld [vmem:[%s10082_s3 + $0xe0] sm:$0xff]  ;;  %v1684_v54 = vpop.f32.mrf.mxu2  ;;  %v6516_v37 = vld [vmem:[%s10082_s3 + $0x118] sm:$0xff] }
 0x24d   : > { %v923_v28 = vunpack.c.l.b16 %v554_v52  ;;  %v924_v5 = vunpack.c.l.b16 %v555_v61  ;;  %3594 = vmatpush.bf16.msra.mxu1 %v6516_v37 }
 0x24e   : > { %v1911_v55 = vsub.f32 0.0, %v8232_v30  ;;  %v1591_v18 = vadd.f32 %v1590_v51, %v1502_v58  ;;  %v2462_v16 = vunpack.c.l.b16 %v2242_v34  ;;  %v1595_v51 = vpop.f32.mrf.mxu1  ;;  %3504 = vmatpush.bf16.msra.mxu0 %v6509_v21 }
 0x250   : > { %v6676_v7 = vpop.eup %6675  ;;  %v1957_v60 = vmul.f32 1.442695, %v1911_v55  ;;  %v1680_v27 = vadd.f32 %v1679_v24, %v1591_v18 }
 0x251   : > { %v6678_v19 = vpop.eup %6677  ;;  %v2006_v3 = vadd.f32 1.0, %v6676_v7  ;;  %v1765_v39 = vpop.f32.mrf.mxu3  ;;  %v1504_v7 = vadd.f32 %v8247_v0, %v7868_v41 }
 0x252   : > { %v2069_v8 = vmul.f32 %v6678_v19, %v8202_v23  ;;  %6679 = vpow2.f32 %v1957_v60  ;;  %v1766_v45 = vadd.f32 %v1765_v39, %v1677_v47  ;;  %v925_v60 = vpack.c.b16 %v924_v5, %v923_v28  ;;  %v6508_v19 = vld [vmem:[%s10082_s3 + $0xd8] sm:$0xff]  ;;  %v6505_v28 = vld [vmem:[%s10082_s3 + $0xc0] sm:$0xff] }
 0x253   : > { %6681 = vrcp.f32 %v2006_v3  ;;  %v1854_v17 = vpop.f32.mrf.mxu0  ;;  %v2207_v31 = vld [vmem:[#allocation2 + $0x99] sm:$0xff]  ;;  %v1593_v3 = vadd.f32 %v1592_v48, %v1504_v7  ;;  %3505 = vmatpush.bf16.msra.mxu0 %v6508_v19  ;;  %v1509_v5 = vadd.f32 %v8247_v0, %v7888_v53 }
 0x254   : > { %2102 = vst.msk [vmem:[#allocation2 + $0xa9] sm:$0xff] %vm278_vm0, %v2069_v8  ;;  %v8252_v23 = vadd.f32 %v1854_v17, %v1766_v45  ;;  %v2243_v13 = vpack.c.bf16 %v2207_v31, %v2207_v31  ;;  %6087 = vmatmul.msk.bf16.gmra.mxu0 %vm278_vm0, %v925_v60  ;;  %v6507_v31 = vld [vmem:[%s10082_s3 + $0xd0] sm:$0xff] }
 0x255   : > { %v1682_v8 = vadd.f32 %v1681_v50, %v1593_v3  ;;  %v1507_v50 = vadd.f32 %v8247_v0, %v7878_v57 }
 0x256   : > { %v1912_v46 = vsub.f32 0.0, %v8252_v23  ;;  %v2463_v15 = vunpack.c.l.b16 %v2243_v13  ;;  %v1597_v59 = vpop.f32.mrf.mxu1 }
 0x257   : > { %3506 = vmatpush.bf16.msra.mxu0 %v6507_v31  ;;  %v1598_v60 = vadd.f32 %v1597_v59, %v1509_v5  ;;  %v1514_v5 = vadd.f32 %v8247_v0, %v7905_v26 }
 0x258   : > { %v6680_v40 = vpop.eup %6679  ;;  %v1959_v35 = vmul.f32 1.442695, %v1912_v46  ;;  %v8260_v1 = vpack.c.b16 %v2463_v15, %v2462_v16 }
 0x259   : > { %v6682_v49 = vpop.eup %6681  ;;  %v2007_v20 = vadd.f32 1.0, %v6680_v40  ;;  %v1768_v56 = vpop.f32.mrf.mxu3  ;;  %v1596_v40 = vadd.f32 %v1595_v51, %v1507_v50 }
 0x25a   : > { %v2070_v42 = vmul.f32 %v6682_v49, %v8218_v44  ;;  %6683 = vpow2.f32 %v1959_v35  ;;  %v1769_v24 = vadd.f32 %v1768_v56, %v1680_v27  ;;  %2510 = vrot.lane.b32.xlu1 %v8260_v1, %s7077_s18  ;;  %v6504_v44 = vld [vmem:[%s10082_s3 + $0xb8] sm:$0xff] }
 0x25b   : > { %6685 = vrcp.f32 %v2007_v20  ;;  %v1857_v55 = vpop.f32.mrf.mxu0  ;;  %3412 = vmatpush.bf16.msra.mxu3 %v6504_v44  ;;  %v2208_v36 = vld [vmem:[#allocation2 + $0xa9] sm:$0xff]  ;;  %v1685_v49 = vadd.f32 %v1684_v54, %v1596_v40  ;;  %3507 = vmatpush.bf16.msra.mxu0 %v6506_v38 }
 0x25c   : > { %2103 = vst.msk [vmem:[#allocation2 + $0xb1] sm:$0xff] %vm278_vm0, %v2070_v42  ;;  %v8271_v47 = vadd.f32 %v1857_v55, %v1769_v24  ;;  %v2244_v18 = vpack.c.bf16 %v2208_v36, %v2208_v36 }
 0x25e   : > { %v1913_v39 = vsub.f32 0.0, %v8271_v47  ;;  %v2464_v52 = vunpack.c.l.b16 %v2244_v18  ;;  %v1600_v44 = vpop.f32.mrf.mxu1 }
 0x25f   : > { %3508 = vmatpush.bf16.msra.mxu0 %v6505_v28 }
 0x260   : > { %v6684_v41 = vpop.eup %6683  ;;  %v1961_v45 = vmul.f32 1.442695, %v1913_v39 }
 0x261   : > { %v6686_v34 = vpop.eup %6685  ;;  %v2008_v58 = vadd.f32 1.0, %v6684_v41  ;;  %v1770_v17 = vpop.f32.mrf.mxu3 }
 0x262   : > { %v2071_v13 = vmul.f32 %v6686_v34, %v8232_v30  ;;  %6687 = vpow2.f32 %v1961_v45  ;;  %v1771_v48 = vadd.f32 %v1770_v17, %v1682_v8  ;;  %v1686_v30 = vpop.f32.mrf.mxu2  ;;  %v2125_v8 = vld [vmem:[#allocation2 + $0x20] sm:$0xff] }
 0x263   : > { %6689 = vrcp.f32 %v2008_v58  ;;  %v1859_v46 = vpop.f32.mrf.mxu0  ;;  %v2209_v16 = vld [vmem:[#allocation2 + $0xb1] sm:$0xff]  ;;  %v1687_v36 = vadd.f32 %v1686_v30, %v1598_v60  ;;  %v2161_v59 = vpack.c.bf16 %v2125_v8, %v2125_v8 }
 0x264   : > { %2104 = vst.msk [vmem:[#allocation2 + $0xc1] sm:$0xff] %vm278_vm0, %v2071_v13  ;;  %v8288_v15 = vadd.f32 %v1859_v46, %v1771_v48  ;;  %v2245_v27 = vpack.c.bf16 %v2209_v16, %v2209_v16  ;;  %v2124_v13 = vld [vmem:[#allocation2 + $0x18] sm:$0xff]  ;;  %v1512_v46 = vadd.f32 %v8247_v0, %v7897_v25 }
 0x265   : > { %v2127_v8 = vld [vmem:[#allocation2 + $0x38] sm:$0xff] }
 0x266   : > { %v1914_v35 = vsub.f32 0.0, %v8288_v15  ;;  %v2465_v57 = vunpack.c.l.b16 %v2245_v27  ;;  %v2160_v27 = vpack.c.bf16 %v2124_v13, %v2124_v13  ;;  %v1601_v37 = vadd.f32 %v1600_v44, %v1512_v46  ;;  %v1602_v40 = vpop.f32.mrf.mxu1 }
 0x268   : > { %v6688_v61 = vpop.eup %6687  ;;  %v1963_v20 = vmul.f32 1.442695, %v1914_v35  ;;  %v8297_v56 = vpack.c.b16 %v2465_v57, %v2464_v52  ;;  %v2373_v35 = vunpack.c.l.b16 %v2161_v59 }
 0x269   : > { %v6690_v21 = vpop.eup %6689  ;;  %v2009_v42 = vadd.f32 1.0, %v6688_v61  ;;  %v1773_v24 = vpop.f32.mrf.mxu3 }
 0x26a   : > { %v2072_v51 = vmul.f32 %v6690_v21, %v8252_v23  ;;  %6691 = vpow2.f32 %v1963_v20  ;;  %v1774_v55 = vadd.f32 %v1773_v24, %v1685_v49  ;;  %2512 = vrot.lane.b32.xlu2 %v8297_v56, %s7077_s18  ;;  %v1689_v23 = vpop.f32.mrf.mxu2  ;;  %v2372_v24 = vunpack.c.l.b16 %v2160_v27 }
 0x26b   : > { %6693 = vrcp.f32 %v2009_v42  ;;  %v1862_v54 = vpop.f32.mrf.mxu0  ;;  %v2210_v3 = vld [vmem:[#allocation2 + $0xc1] sm:$0xff]  ;;  %v1690_v57 = vadd.f32 %v1689_v23, %v1601_v37  ;;  %v1603_v23 = vadd.f32 %v1602_v40, %v1514_v5  ;;  %v1517_v27 = vadd.f32 %v8247_v0, %v7923_v14 }
 0x26c   : > { %2105 = vst.msk [vmem:[#allocation2 + $0xc9] sm:$0xff] %vm278_vm0, %v2072_v51  ;;  %v8308_v7 = vadd.f32 %v1862_v54, %v1774_v55  ;;  %v2246_v31 = vpack.c.bf16 %v2210_v3, %v2210_v3  ;;  %v8323_v54 = vpack.c.b16 %v2373_v35, %v2372_v24 }
 0x26e   : > { %v1915_v19 = vsub.f32 0.0, %v8308_v7  ;;  %v2466_v30 = vunpack.c.l.b16 %v2246_v31 }
 0x270   : > { %v6692_v39 = vpop.eup %6691  ;;  %v1965_v41 = vmul.f32 1.442695, %v1915_v19 }
 0x271   : > { %v6694_v45 = vpop.eup %6693  ;;  %v2010_v34 = vadd.f32 1.0, %v6692_v39  ;;  %v1775_v58 = vpop.f32.mrf.mxu3 }
 0x272   : > { %v2073_v53 = vmul.f32 %v6694_v45, %v8271_v47  ;;  %6695 = vpow2.f32 %v1965_v41  ;;  %v1776_v17 = vadd.f32 %v1775_v58, %v1687_v36  ;;  %v1691_v25 = vpop.f32.mrf.mxu2 }
 0x273   : > { %6697 = vrcp.f32 %v2010_v34  ;;  %v1864_v48 = vpop.f32.mrf.mxu0  ;;  %v2211_v18 = vld [vmem:[#allocation2 + $0xc9] sm:$0xff]  ;;  %v1692_v26 = vadd.f32 %v1691_v25, %v1603_v23  ;;  %v1605_v34 = vpop.f32.mrf.mxu1 }
 0x274   : > { %2106 = vst.msk [vmem:[#allocation2 + $0xd9] sm:$0xff] %vm278_vm0, %v2073_v53  ;;  %v8315_v16 = vadd.f32 %v1864_v48, %v1776_v17  ;;  %v2247_v50 = vpack.c.bf16 %v2211_v18, %v2211_v18  ;;  %v2126_v48 = vld [vmem:[#allocation2 + $0x30] sm:$0xff] }
 0x276   : > { %v1916_v47 = vsub.f32 0.0, %v8315_v16  ;;  %v2467_v38 = vunpack.c.l.b16 %v2247_v50  ;;  %v2163_v50 = vpack.c.bf16 %v2127_v8, %v2127_v8 }
 0x278   : > { %v6696_v52 = vpop.eup %6695  ;;  %v1967_v61 = vmul.f32 1.442695, %v1916_v47  ;;  %v8318_v49 = vpack.c.b16 %v2467_v38, %v2466_v30  ;;  %v2162_v30 = vpack.c.bf16 %v2126_v48, %v2126_v48  ;;  %v1606_v38 = vadd.f32 %v1605_v34, %v1517_v27  ;;  %v2129_v34 = vld [vmem:[#allocation2 + $0x50] sm:$0xff]  ;;  %v6496_v27 = vld [vmem:[%s10082_s3 + $0x78] sm:$0xff] }
 0x279   : > { %v6698_v20 = vpop.eup %6697  ;;  %v2011_v21 = vadd.f32 1.0, %v6696_v52  ;;  %v1778_v42 = vpop.f32.mrf.mxu3  ;;  %v2375_v52 = vunpack.c.l.b16 %v2163_v50  ;;  %3323 = vmatpush.bf16.msrb.mxu2 %v6496_v27 }
 0x27a   : > { %v2074_v28 = vmul.f32 %v6698_v20, %v8288_v15  ;;  %6699 = vpow2.f32 %v1967_v61  ;;  %v1779_v51 = vadd.f32 %v1778_v42, %v1690_v57  ;;  %2514 = vrot.lane.b32.xlu0 %v8318_v49, %s7077_s18  ;;  %v6503_v15 = vld [vmem:[%s10082_s3 + $0xb0] sm:$0xff]  ;;  %v1694_v18 = vpop.f32.mrf.mxu2  ;;  %v2374_v24 = vunpack.c.l.b16 %v2162_v30 }
 0x27b   : > { %6701 = vrcp.f32 %v2011_v21  ;;  %v1867_v55 = vpop.f32.mrf.mxu0  ;;  %3413 = vmatpush.bf16.msra.mxu3 %v6503_v15  ;;  %v2212_v39 = vld [vmem:[#allocation2 + $0xd9] sm:$0xff]  ;;  %v1695_v61 = vadd.f32 %v1694_v18, %v1606_v38  ;;  %v1519_v15 = vadd.f32 %v8247_v0, %v7941_v4 }
 0x27c   : > { %2107 = vst.msk [vmem:[#allocation2 + $0xe1] sm:$0xff] %vm278_vm0, %v2074_v28  ;;  %v8328_v44 = vadd.f32 %v1867_v55, %v1779_v51  ;;  %v2501_v60 = vpop.permute.xlu1 %2500  ;;  %v2248_v13 = vpack.c.bf16 %v2212_v39, %v2212_v39  ;;  %v1607_v55 = vpop.f32.mrf.mxu1 }
 0x27d   : > { %v2714_v19 = vsel %vm278_vm0, %v8323_v54, %v2501_v60  ;;  %v8348_v60 = vpack.c.b16 %v2375_v52, %v2374_v24  ;;  %v1608_v39 = vadd.f32 %v1607_v55, %v1519_v15  ;;  %v446_v24 = vld [vmem:[%s7174_s17 + $0x199] sm:$0xff] }
 0x27e   : > { %v1917_v3 = vsub.f32 0.0, %v8328_v44  ;;  %3247 = vmatmul.bf16.gmra.mxu1 %v2714_v19  ;;  %v2468_v40 = vunpack.c.l.b16 %v2248_v13  ;;  %v2128_v13 = vld [vmem:[#allocation2 + $0x48] sm:$0xff] }
 0x280   : > { %v6700_v36 = vpop.eup %6699  ;;  %v1969_v41 = vmul.f32 1.442695, %v1917_v3 }
 0x281   : > { %v6702_v45 = vpop.eup %6701  ;;  %v2012_v58 = vadd.f32 1.0, %v6700_v36  ;;  %v1780_v53 = vpop.f32.mrf.mxu3 }
 0x282   : > { %v2075_v17 = vmul.f32 %v6702_v45, %v8308_v7  ;;  %6703 = vpow2.f32 %v1969_v41  ;;  %v1781_v31 = vadd.f32 %v1780_v53, %v1692_v26  ;;  %v1696_v3 = vpop.f32.mrf.mxu2 }
 0x283   : > { %6705 = vrcp.f32 %v2012_v58  ;;  %v1869_v59 = vpop.f32.mrf.mxu0  ;;  %v2213_v46 = vld [vmem:[#allocation2 + $0xe1] sm:$0xff]  ;;  %v1697_v8 = vadd.f32 %v1696_v3, %v1608_v39 }
 0x284   : > { %2108 = vst.msk [vmem:[#allocation2 + $0xf1] sm:$0xff] %vm278_vm0, %v2075_v17  ;;  %v8340_v37 = vadd.f32 %v1869_v59, %v1781_v31  ;;  %v2249_v47 = vpack.c.bf16 %v2213_v46, %v2213_v46  ;;  %v2165_v59 = vpack.c.bf16 %v2129_v34, %v2129_v34 }
 0x286   : > { %v1918_v7 = vsub.f32 0.0, %v8340_v37  ;;  %v2469_v35 = vunpack.c.l.b16 %v2249_v47  ;;  %v2164_v47 = vpack.c.bf16 %v2128_v13, %v2128_v13 }
 0x288   : > { %v6704_v57 = vpop.eup %6703  ;;  %v1971_v20 = vmul.f32 1.442695, %v1918_v7  ;;  %v8343_v25 = vpack.c.b16 %v2469_v35, %v2468_v40  ;;  %v2377_v7 = vunpack.c.l.b16 %v2165_v59 }
 0x289   : > { %v6706_v21 = vpop.eup %6705  ;;  %v2013_v42 = vadd.f32 1.0, %v6704_v57  ;;  %v1783_v14 = vpop.f32.mrf.mxu3 }
 0x28a   : > { %v2076_v28 = vmul.f32 %v6706_v21, %v8315_v16  ;;  %6707 = vpow2.f32 %v1971_v20  ;;  %v1784_v51 = vadd.f32 %v1783_v14, %v1695_v61  ;;  %2516 = vrot.lane.b32.xlu1 %v8343_v25, %s7077_s18  ;;  %v2376_v21 = vunpack.c.l.b16 %v2164_v47 }
 0x28b   : > { %6709 = vrcp.f32 %v2013_v42  ;;  %v1872_v5 = vpop.f32.mrf.mxu0  ;;  %v2214_v26 = vld [vmem:[#allocation2 + $0xf1] sm:$0xff] }
 0x28c   : > { %2109 = vst.msk [vmem:[#allocation2 + $0xf9] sm:$0xff] %vm278_vm0, %v2076_v28  ;;  %v8353_v19 = vadd.f32 %v1872_v5, %v1784_v51  ;;  %v2503_v23 = vpop.permute.xlu0 %2502  ;;  %v2250_v31 = vpack.c.bf16 %v2214_v26, %v2214_v26  ;;  %v447_v28 = vld [vmem:[%s7174_s17 + $0x1a1] sm:$0xff]  ;;  %v8374_v55 = vpack.c.b16 %v2377_v7, %v2376_v21 }
 0x28d   : > { %v2718_v16 = vsel %vm278_vm0, %v8348_v60, %v2503_v23  ;;  %v482_v23 = vpack.c.bf16 %v446_v24, %v446_v24  ;;  %v483_v3 = vpack.c.bf16 %v447_v28, %v447_v28 }
 0x28e   : > { %v1919_v36 = vsub.f32 0.0, %v8353_v19  ;;  %3252 = vmatmul.bf16.gmra.mxu1 %v2718_v16  ;;  %3509 = vmatmul.bf16.vlgmr.msra.gmra.mxu0 %v2718_v16  ;;  %v2470_v30 = vunpack.c.l.b16 %v2250_v31  ;;  %v2130_v31 = vld [vmem:[#allocation2 + $0x60] sm:$0xff] }
 0x28f   : > { %v2166_v27 = vpack.c.bf16 %v2130_v31, %v2130_v31 }
 0x290   : > { %v6708_v41 = vpop.eup %6707  ;;  %v1973_v45 = vmul.f32 1.442695, %v1919_v36 }
 0x291   : > { %v6710_v4 = vpop.eup %6709  ;;  %v2014_v0 = vadd.f32 1.0, %v6708_v41  ;;  %v1785_v58 = vpop.f32.mrf.mxu3  ;;  %v2131_v41 = vld [vmem:[#allocation2 + $0x68] sm:$0xff] }
 0x292   : > { %v2077_v53 = vmul.f32 %v6710_v4, %v8328_v44  ;;  %6711 = vpow2.f32 %v1973_v45  ;;  %v1786_v17 = vadd.f32 %v1785_v58, %v1697_v8  ;;  %v914_v4 = vunpack.c.l.b16 %v482_v23 }
 0x293   : > { %6713 = vrcp.f32 %v2014_v0  ;;  %v1874_v48 = vpop.f32.mrf.mxu0  ;;  %v2215_v18 = vld [vmem:[#allocation2 + $0xf9] sm:$0xff]  ;;  %v915_v0 = vunpack.c.l.b16 %v483_v3 }
 0x294   : > { %2110 = vst.msk [vmem:[#allocation2 + $0x109] sm:$0xff] %vm278_vm0, %v2077_v53  ;;  %v8360_v46 = vadd.f32 %v1874_v48, %v1786_v17  ;;  %v2251_v50 = vpack.c.bf16 %v2215_v18, %v2215_v18  ;;  %v2167_v18 = vpack.c.bf16 %v2131_v41, %v2131_v41  ;;  %v2133_v3 = vld [vmem:[#allocation2 + $0x80] sm:$0xff] }
 0x296   : > { %v1920_v44 = vsub.f32 0.0, %v8360_v46  ;;  %v2471_v38 = vunpack.c.l.b16 %v2251_v50 }
 0x298   : > { %v6712_v40 = vpop.eup %6711  ;;  %v1975_v35 = vmul.f32 1.442695, %v1920_v44  ;;  %v8366_v52 = vpack.c.b16 %v2471_v38, %v2470_v30  ;;  %v916_v44 = vpack.c.b16 %v915_v0, %v914_v4  ;;  %v2379_v30 = vunpack.c.l.b16 %v2167_v18 }
 0x299   : > { %v6714_v57 = vpop.eup %6713  ;;  %v2015_v61 = vadd.f32 1.0, %v6712_v40  ;;  %v1788_v20 = vpop.f32.mrf.mxu3  ;;  %v2169_v0 = vpack.c.bf16 %v2133_v3, %v2133_v3  ;;  %v6500_v3 = vld [vmem:[%s10082_s3 + $0x98] sm:$0xff] }
 0x29a   : > { %v2078_v42 = vmul.f32 %v6714_v57, %v8340_v37  ;;  %6715 = vpow2.f32 %v1975_v35  ;;  %v1789_v14 = vadd.f32 %v1788_v20, %v7860_v2  ;;  %2518 = vrot.lane.b32.xlu2 %v8366_v52, %s7077_s18  ;;  %v6502_v37 = vld [vmem:[%s10082_s3 + $0xa8] sm:$0xff]  ;;  %v2378_v20 = vunpack.c.l.b16 %v2166_v27 }
 0x29b   : > { %6717 = vrcp.f32 %v2015_v61  ;;  %v1877_v51 = vpop.f32.mrf.mxu0  ;;  %3414 = vmatpush.bf16.msra.mxu3 %v6502_v37  ;;  %v2216_v39 = vld [vmem:[#allocation2 + $0x109] sm:$0xff] }
 0x29c   : > { %2111 = vst.msk [vmem:[#allocation2 + $0x111] sm:$0xff] %vm278_vm0, %v2078_v42  ;;  %v8377_v5 = vadd.f32 %v1877_v51, %v1789_v14  ;;  %v2505_v15 = vpop.permute.xlu1 %2504  ;;  %v2252_v17 = vpack.c.bf16 %v2216_v39, %v2216_v39  ;;  %v2507_v42 = vpop.permute.xlu2 %2506  ;;  %v8403_v28 = vpack.c.b16 %v2379_v30, %v2378_v20 }
 0x29d   : > { %v2722_v2 = vsel %vm278_vm0, %v8374_v55, %v2505_v15 }
 0x29e   : > { %v1921_v16 = vsub.f32 0.0, %v8377_v5  ;;  %3257 = vmatmul.bf16.gmra.mxu1 %v2722_v2  ;;  %3514 = vmatmul.bf16.gmra.mxu0 %v2722_v2  ;;  %v2472_v47 = vunpack.c.l.b16 %v2252_v17 }
 0x2a0   : > { %v6716_v36 = vpop.eup %6715  ;;  %v1977_v26 = vmul.f32 1.442695, %v1921_v16 }
 0x2a1   : > { %v6718_v8 = vpop.eup %6717  ;;  %v2016_v45 = vadd.f32 1.0, %v6716_v36  ;;  %v1790_v34 = vpop.f32.mrf.mxu3 }
 0x2a2   : > { %v2079_v58 = vmul.f32 %v6718_v8, %v8353_v19  ;;  %6719 = vpow2.f32 %v1977_v26  ;;  %v1791_v53 = vadd.f32 %v1790_v34, %v7866_v33  ;;  %2615 = vrot.lane.b32.xlu2 %v8323_v54, %s7077_s18  ;;  %v6515_v19 = vld [vmem:[%s10082_s3 + $0x110] sm:$0xff] }
 0x2a3   : > { %6721 = vrcp.f32 %v2016_v45  ;;  %v1879_v13 = vpop.f32.mrf.mxu0  ;;  %v2217_v48 = vld [vmem:[#allocation2 + $0x111] sm:$0xff]  ;;  %3595 = vmatpush.bf16.msra.mxu1 %v6515_v19 }
 0x2a4   : > { %2112 = vst.msk [vmem:[#allocation2 + $0x121] sm:$0xff] %vm278_vm0, %v2079_v58  ;;  %v8390_v59 = vadd.f32 %v1879_v13, %v1791_v53  ;;  %v2253_v50 = vpack.c.bf16 %v2217_v48, %v2217_v48  ;;  %v2132_v45 = vld [vmem:[#allocation2 + $0x78] sm:$0xff] }
 0x2a5   : > { %v2168_v17 = vpack.c.bf16 %v2132_v45, %v2132_v45 }
 0x2a6   : > { %v1922_v33 = vsub.f32 0.0, %v8390_v59  ;;  %v2473_v54 = vunpack.c.l.b16 %v2253_v50 }
 0x2a8   : > { %v6720_v38 = vpop.eup %6719  ;;  %v1979_v7 = vmul.f32 1.442695, %v1922_v33  ;;  %v8396_v40 = vpack.c.b16 %v2473_v54, %v2472_v47  ;;  %v2380_v47 = vunpack.c.l.b16 %v2168_v17 }
 0x2a9   : > { %v6722_v35 = vpop.eup %6721  ;;  %v2017_v57 = vadd.f32 1.0, %v6720_v38  ;;  %v1793_v61 = vpop.f32.mrf.mxu3 }
 0x2aa   : > { %v2080_v21 = vmul.f32 %v6722_v35, %v8360_v46  ;;  %6723 = vpow2.f32 %v1979_v7  ;;  %v1794_v14 = vadd.f32 %v1793_v61, %v7876_v29  ;;  %2520 = vrot.lane.b32.xlu0 %v8396_v40, %s7077_s18  ;;  %919 = vrot.lane.b32.xlu2 %v916_v44, %s7077_s18  ;;  %v6495_v46 = vld [vmem:[%s10082_s3 + $0x70] sm:$0xff]  ;;  %v2726_v29 = vsel %vm278_vm0, %v8403_v28, %v2507_v42 }
 0x2ab   : > { %6725 = vrcp.f32 %v2017_v57  ;;  %v1882_v24 = vpop.f32.mrf.mxu0  ;;  %3324 = vmatpush.bf16.msrb.mxu2 %v6495_v46  ;;  %v2218_v37 = vld [vmem:[#allocation2 + $0x121] sm:$0xff] }
 0x2ac   : > { %2113 = vst.msk [vmem:[#allocation2 + $0x129] sm:$0xff] %vm278_vm0, %v2080_v21  ;;  %v8406_v51 = vadd.f32 %v1882_v24, %v1794_v14  ;;  %v2254_v8 = vpack.c.bf16 %v2218_v37, %v2218_v37  ;;  %v6501_v57 = vld [vmem:[%s10082_s3 + $0xa0] sm:$0xff]  ;;  %v2135_v14 = vld [vmem:[#allocation2 + $0x98] sm:$0xff] }
 0x2ad   : > { %3415 = vmatpush.bf16.msra.mxu3 %v6501_v57 }
 0x2ae   : > { %v1923_v15 = vsub.f32 0.0, %v8406_v51  ;;  %3262 = vmatmul.bf16.gmra.mxu1 %v2726_v29  ;;  %3519 = vmatmul.bf16.gmra.mxu0 %v2726_v29  ;;  %v2474_v13 = vunpack.c.l.b16 %v2254_v8  ;;  %v2269_v8 = vld [vmem:[#allocation2 + $0x22] sm:$0xff] }
 0x2b0   : > { %v6724_v2 = vpop.eup %6723  ;;  %v1981_v23 = vmul.f32 1.442695, %v1923_v15 }
 0x2b1   : > { %v6726_v16 = vpop.eup %6725  ;;  %v2018_v39 = vadd.f32 1.0, %v6724_v2  ;;  %v1795_v36 = vpop.f32.mrf.mxu3  ;;  %3416 = vmatpush.bf16.msra.mxu3 %v6500_v3 }
 0x2b2   : > { %v2081_v26 = vmul.f32 %v6726_v16, %v8377_v5  ;;  %6727 = vpow2.f32 %v1981_v23  ;;  %v1796_v41 = vadd.f32 %v1795_v36, %v7886_v22  ;;  %v2381_v5 = vunpack.c.l.b16 %v2169_v0  ;;  %v2134_v23 = vld [vmem:[#allocation2 + $0x90] sm:$0xff]  ;;  %v6493_v16 = vld [vmem:[%s10082_s3 + $0x60] sm:$0xff] }
 0x2b3   : > { %6729 = vrcp.f32 %v2018_v39  ;;  %v1884_v34 = vpop.f32.mrf.mxu0  ;;  %v2219_v4 = vld [vmem:[#allocation2 + $0x129] sm:$0xff] }
 0x2b4   : > { %2114 = vst.msk [vmem:[#allocation2 + $0x139] sm:$0xff] %vm278_vm0, %v2081_v26  ;;  %v8417_v58 = vadd.f32 %v1884_v34, %v1796_v41  ;;  %v2255_v53 = vpack.c.bf16 %v2219_v4, %v2219_v4  ;;  %v8426_v38 = vpack.c.b16 %v2381_v5, %v2380_v47  ;;  %v2268_v41 = vld [vmem:[#allocation2 + $0x1a] sm:$0xff] }
 0x2b6   : > { %v1924_v31 = vsub.f32 0.0, %v8417_v58  ;;  %v2475_v48 = vunpack.c.l.b16 %v2255_v53 }
 0x2b8   : > { %v6728_v18 = vpop.eup %6727  ;;  %v1983_v50 = vmul.f32 1.442695, %v1924_v31  ;;  %v8420_v22 = vpack.c.b16 %v2475_v48, %v2474_v13  ;;  %v2304_v13 = vpack.c.bf16 %v2268_v41, %v2268_v41  ;;  %v2305_v48 = vpack.c.bf16 %v2269_v8, %v2269_v8 }
 0x2b9   : > { %v6730_v19 = vpop.eup %6729  ;;  %v2019_v27 = vadd.f32 1.0, %v6728_v18  ;;  %v1798_v33 = vpop.f32.mrf.mxu3 }
 0x2ba   : > { %v2082_v54 = vmul.f32 %v6730_v19, %v8390_v59  ;;  %6731 = vpow2.f32 %v1983_v50  ;;  %v1799_v44 = vadd.f32 %v1798_v33, %v7893_v62  ;;  %2522 = vrot.lane.b32.xlu1 %v8420_v22, %s7077_s18  ;;  %v6494_v62 = vld [vmem:[%s10082_s3 + $0x68] sm:$0xff]  ;;  %v2564_v47 = vunpack.c.l.b16 %v2304_v13  ;;  %v2141_v13 = vld [vmem:[#allocation2 + $0xe0] sm:$0xff] }
 0x2bb   : > { %6733 = vrcp.f32 %v2019_v27  ;;  %v1887_v30 = vpop.f32.mrf.mxu0  ;;  %v2220_v20 = vld [vmem:[#allocation2 + $0x139] sm:$0xff]  ;;  %3325 = vmatpush.bf16.msrb.mxu2 %v6494_v62  ;;  %v2137_v62 = vld [vmem:[#allocation2 + $0xb0] sm:$0xff] }
 0x2bc   : > { %2115 = vst.msk [vmem:[#allocation2 + $0x141] sm:$0xff] %vm278_vm0, %v2082_v54  ;;  %v8429_v7 = vadd.f32 %v1887_v30, %v1799_v44  ;;  %v2509_v35 = vpop.permute.xlu0 %2508  ;;  %v2256_v2 = vpack.c.bf16 %v2220_v20, %v2220_v20  ;;  %v2565_v54 = vunpack.c.l.b16 %v2305_v48  ;;  %v6492_v30 = vld [vmem:[%s10082_s3 + $0x58] sm:$0xff] }
 0x2bd   : > { %v2730_v59 = vsel %vm278_vm0, %v8426_v38, %v2509_v35 }
 0x2be   : > { %v1925_v61 = vsub.f32 0.0, %v8429_v7  ;;  %3267 = vmatmul.bf16.gmra.mxu1 %v2730_v59  ;;  %3524 = vmatmul.bf16.gmra.mxu0 %v2730_v59  ;;  %v2476_v34 = vunpack.c.l.b16 %v2256_v2  ;;  %v8469_v57 = vpack.c.b16 %v2565_v54, %v2564_v47  ;;  %v2275_v2 = vld [vmem:[#allocation2 + $0x6a] sm:$0xff] }
 0x2bf   : > { %3326 = vmatpush.bf16.msrb.mxu2 %v6493_v16 }
 0x2c0   : > { %v6732_v21 = vpop.eup %6731  ;;  %v1985_v42 = vmul.f32 1.442695, %v1925_v61 }
 0x2c1   : > { %v6734_v24 = vpop.eup %6733  ;;  %v2020_v46 = vadd.f32 1.0, %v6732_v21  ;;  %v1800_v29 = vpop.f32.mrf.mxu3 }
 0x2c2   : > { %v2083_v15 = vmul.f32 %v6734_v24, %v8406_v51  ;;  %6735 = vpow2.f32 %v1985_v42  ;;  %v1801_v37 = vadd.f32 %v1800_v29, %v7901_v32  ;;  %2617 = vrot.lane.b32.xlu1 %v8348_v60, %s7077_s18  ;;  %v2171_v51 = vpack.c.bf16 %v2135_v14, %v2135_v14  ;;  %v2136_v42 = vld [vmem:[#allocation2 + $0xa8] sm:$0xff]  ;;  %v6491_v14 = vld [vmem:[%s10082_s3 + $0x50] sm:$0xff] }
 0x2c3   : > { %6737 = vrcp.f32 %v2020_v46  ;;  %v1889_v39 = vpop.f32.mrf.mxu0  ;;  %v2221_v36 = vld [vmem:[#allocation2 + $0x141] sm:$0xff]  ;;  %v2170_v60 = vpack.c.bf16 %v2134_v23, %v2134_v23  ;;  %3327 = vmatpush.bf16.msrb.mxu2 %v6492_v30  ;;  %v2173_v46 = vpack.c.bf16 %v2137_v62, %v2137_v62 }
 0x2c4   : > { %2116 = vst.msk [vmem:[#allocation2 + $0x151] sm:$0xff] %vm278_vm0, %v2083_v15  ;;  %v8451_v32 = vadd.f32 %v1889_v39, %v1801_v37  ;;  %v2257_v26 = vpack.c.bf16 %v2221_v36, %v2221_v36  ;;  %v2383_v0 = vunpack.c.l.b16 %v2171_v51  ;;  %v2172_v15 = vpack.c.bf16 %v2136_v42, %v2136_v42  ;;  %v2274_v37 = vld [vmem:[#allocation2 + $0x62] sm:$0xff]  ;;  %v2513_v8 = vpop.permute.xlu2 %2512  ;;  %v2281_v42 = vld [vmem:[#allocation2 + $0xb2] sm:$0xff] }
 0x2c5   : > { %v2382_v50 = vunpack.c.l.b16 %v2170_v60  ;;  %v2385_v16 = vunpack.c.l.b16 %v2173_v46  ;;  %v2310_v36 = vpack.c.bf16 %v2274_v37, %v2274_v37  ;;  %v2311_v51 = vpack.c.bf16 %v2275_v2, %v2275_v2 }
 0x2c6   : > { %v1926_v45 = vsub.f32 0.0, %v8451_v32  ;;  %v2477_v4 = vunpack.c.l.b16 %v2257_v26  ;;  %v2384_v60 = vunpack.c.l.b16 %v2172_v15  ;;  %v2317_v2 = vpack.c.bf16 %v2281_v42, %v2281_v42  ;;  %v2287_v42 = vld [vmem:[#allocation2 + $0xfa] sm:$0xff] }
 0x2c7   : > { %v2408_v27 = vpack.c.b16 %v2383_v0, %v2382_v50  ;;  %3328 = vmatpush.bf16.msrb.mxu2 %v6491_v14  ;;  %v2571_v0 = vunpack.c.l.b16 %v2311_v51 }
 0x2c8   : > { %v6736_v53 = vpop.eup %6735  ;;  %v1987_v17 = vmul.f32 1.442695, %v1926_v45  ;;  %v8454_v31 = vpack.c.b16 %v2477_v4, %v2476_v34  ;;  %v6489_v45 = vld [vmem:[%s10082_s3 + $0x40] sm:$0xff]  ;;  %v8490_v34 = vpack.c.b16 %v2385_v16, %v2384_v60  ;;  %v2570_v4 = vunpack.c.l.b16 %v2310_v36 }
 0x2c9   : > { %v6738_v5 = vpop.eup %6737  ;;  %v2021_v18 = vadd.f32 1.0, %v6736_v53  ;;  %v2270_v53 = vld [vmem:[#allocation2 + $0x32] sm:$0xff]  ;;  %v2276_v60 = vld [vmem:[#allocation2 + $0x7a] sm:$0xff] }
 0x2ca   : > { %v2084_v19 = vmul.f32 %v6738_v5, %v8417_v58  ;;  %6739 = vpow2.f32 %v1987_v17  ;;  %2524 = vrot.lane.b32.xlu0 %v8454_v31, %s7077_s18  ;;  %2619 = vrot.lane.b32.xlu1 %v8374_v55, %s7077_s18  ;;  %v6514_v58 = vld [vmem:[%s10082_s3 + $0x108] sm:$0xff]  ;;  %v2271_v17 = vld [vmem:[#allocation2 + $0x3a] sm:$0xff]  ;;  %v2306_v48 = vpack.c.bf16 %v2270_v53, %v2270_v53 }
 0x2cb   : > { %6741 = vrcp.f32 %v2021_v18  ;;  %v2222_v55 = vld [vmem:[#allocation2 + $0x151] sm:$0xff]  ;;  %3596 = vmatpush.bf16.msra.mxu1 %v6514_v58  ;;  %v2307_v5 = vpack.c.bf16 %v2271_v17, %v2271_v17  ;;  %v2266_v53 = vld [vmem:[#allocation2 + $0x2] sm:$0xff] }
 0x2cc   : > { %2117 = vst.msk [vmem:[#allocation2 + $0x159] sm:$0xff] %vm278_vm0, %v2084_v19  ;;  %v2511_v33 = vpop.permute.xlu1 %2510  ;;  %v2258_v21 = vpack.c.bf16 %v2222_v55, %v2222_v55  ;;  %v2140_v18 = vld [vmem:[#allocation2 + $0xd8] sm:$0xff]  ;;  %v8495_v19 = vpack.c.b16 %v2571_v0, %v2570_v4  ;;  %v2566_v58 = vunpack.c.l.b16 %v2306_v48  ;;  %v2272_v4 = vld [vmem:[#allocation2 + $0x4a] sm:$0xff]  ;;  %v2146_v48 = vld [vmem:[#allocation2 + $0x120] sm:$0xff] }
 0x2cd   : > { %v2734_v44 = vsel %vm278_vm0, %v2408_v27, %v2511_v33  ;;  %v2139_v33 = vld [vmem:[#allocation2 + $0xc8] sm:$0xff]  ;;  %v2176_v47 = vpack.c.bf16 %v2140_v18, %v2140_v18  ;;  %v2567_v30 = vunpack.c.l.b16 %v2307_v5  ;;  %v2273_v0 = vld [vmem:[#allocation2 + $0x52] sm:$0xff] }
 0x2ce   : > { %3272 = vmatmul.bf16.gmra.mxu1 %v2734_v44  ;;  %3529 = vmatmul.bf16.gmra.mxu0 %v2734_v44  ;;  %v2478_v23 = vunpack.c.l.b16 %v2258_v21  ;;  %v2138_v44 = vld [vmem:[#allocation2 + $0xc0] sm:$0xff]  ;;  %v2280_v21 = vld [vmem:[#allocation2 + $0xaa] sm:$0xff] }
 0x2cf   : > { %v8504_v46 = vpack.c.b16 %v2567_v30, %v2566_v58  ;;  %v2316_v37 = vpack.c.bf16 %v2280_v21, %v2280_v21  ;;  %v2267_v17 = vld [vmem:[#allocation2 + $0xa] sm:$0xff]  ;;  %v2286_v21 = vld [vmem:[#allocation2 + $0xf2] sm:$0xff] }
 0x2d0   : > { %v6740_v35 = vpop.eup %6739 }
 0x2d1   : > { %v6742_v59 = vpop.eup %6741  ;;  %v2022_v61 = vadd.f32 1.0, %v6740_v35  ;;  %v2175_v35 = vpack.c.bf16 %v2139_v33, %v2139_v33  ;;  %v2576_v51 = vunpack.c.l.b16 %v2316_v37  ;;  %v2302_v33 = vpack.c.bf16 %v2266_v53, %v2266_v53  ;;  %v2142_v37 = vld [vmem:[#allocation2 + $0xf0] sm:$0xff] }
 0x2d2   : > { %v2085_v20 = vmul.f32 %v6742_v59, %v8429_v7  ;;  %2657 = vrot.lane.b32.xlu1 %v8469_v57, %s7077_s18  ;;  %v6490_v7 = vld [vmem:[%s10082_s3 + $0x48] sm:$0xff] }
 0x2d3   : > { %6743 = vrcp.f32 %v2022_v61  ;;  %v2223_v24 = vld [vmem:[#allocation2 + $0x159] sm:$0xff]  ;;  %3329 = vmatpush.bf16.msrb.mxu2 %v6490_v7  ;;  %v6499_v61 = vld [vmem:[%s10082_s3 + $0x90] sm:$0xff] }
 0x2d4   : > { %2118 = vst.msk [vmem:[#allocation2 + $0x169] sm:$0xff] %vm278_vm0, %v2085_v20  ;;  %v2259_v29 = vpack.c.bf16 %v2223_v24, %v2223_v24  ;;  %v2174_v20 = vpack.c.bf16 %v2138_v44, %v2138_v44  ;;  %3417 = vmatpush.bf16.msra.mxu3 %v6499_v61  ;;  %v2562_v61 = vunpack.c.l.b16 %v2302_v33 }
 0x2d6   : > { %v2479_v3 = vunpack.c.l.b16 %v2259_v29  ;;  %v2387_v29 = vunpack.c.l.b16 %v2175_v35 }
 0x2d7   : > { %3330 = vmatpush.bf16.msrb.mxu2 %v6489_v45  ;;  %v2147_v45 = vld [vmem:[#allocation2 + $0x128] sm:$0xff] }
 0x2d8   : > { %v8481_v39 = vpack.c.b16 %v2479_v3, %v2478_v23  ;;  %v8510_v23 = vpop.f32.mrf.mxu1  ;;  %v2386_v3 = vunpack.c.l.b16 %v2174_v20  ;;  %v2183_v18 = vpack.c.bf16 %v2147_v45, %v2147_v45  ;;  %v2143_v20 = vld [vmem:[#allocation2 + $0xf8] sm:$0xff] }
 0x2d9   : > { %v6744_v26 = vpop.eup %6743 }
 0x2da   : > { %v2086_v41 = vmul.f32 %v6744_v26, %v8451_v32  ;;  %2526 = vrot.lane.b32.xlu0 %v8481_v39, %s7077_s18  ;;  %2625 = vrot.lane.b32.xlu1 %v2408_v27, %s7077_s18  ;;  %v2738_v32 = vsel %vm278_vm0, %v8490_v34, %v2513_v8  ;;  %v2177_v27 = vpack.c.bf16 %v2141_v13, %v2141_v13  ;;  %v2577_v26 = vunpack.c.l.b16 %v2317_v2 }
 0x2db   : > { %v2224_v50 = vld [vmem:[#allocation2 + $0x169] sm:$0xff]  ;;  %v8518_v16 = vpack.c.b16 %v2387_v29, %v2386_v3  ;;  %v2395_v35 = vunpack.c.l.b16 %v2183_v18  ;;  %v2322_v3 = vpack.c.bf16 %v2286_v21, %v2286_v21 }
 0x2dc   : > { %2119 = vst.msk [vmem:[#allocation2 + $0x171] sm:$0xff] %vm278_vm0, %v2086_v41  ;;  %v2260_v54 = vpack.c.bf16 %v2224_v50, %v2224_v50  ;;  %v2389_v62 = vunpack.c.l.b16 %v2177_v27  ;;  %v2277_v41 = vld [vmem:[#allocation2 + $0x82] sm:$0xff]  ;;  %v8522_v5 = vpack.c.b16 %v2577_v26, %v2576_v51  ;;  %v2308_v50 = vpack.c.bf16 %v2272_v4, %v2272_v4 }
 0x2dd   : > { %v2313_v13 = vpack.c.bf16 %v2277_v41, %v2277_v41  ;;  %v2309_v27 = vpack.c.bf16 %v2273_v0, %v2273_v0 }
 0x2de   : > { %3277 = vmatmul.bf16.gmra.mxu1 %v2738_v32  ;;  %3534 = vmatmul.bf16.gmra.mxu0 %v2738_v32  ;;  %v2480_v14 = vunpack.c.l.b16 %v2260_v54  ;;  %v2312_v32 = vpack.c.bf16 %v2276_v60, %v2276_v60  ;;  %v2182_v54 = vpack.c.bf16 %v2146_v48, %v2146_v48  ;;  %v2283_v48 = vld [vmem:[#allocation2 + $0xca] sm:$0xff] }
 0x2df   : > { %v2573_v30 = vunpack.c.l.b16 %v2313_v13  ;;  %v2282_v13 = vld [vmem:[#allocation2 + $0xc2] sm:$0xff] }
 0x2e0   : > { %v8528_v44 = vpop.f32.mrf.mxu1  ;;  %v2572_v58 = vunpack.c.l.b16 %v2312_v32 }
 0x2e2   : > { %2621 = vrot.lane.b32.xlu0 %v8403_v28, %s7077_s18  ;;  %2663 = vrot.lane.b32.xlu1 %v8495_v19, %s7077_s18  ;;  %v2388_v28 = vunpack.c.l.b16 %v2176_v47  ;;  %v2303_v47 = vpack.c.bf16 %v2267_v17, %v2267_v17  ;;  %v8536_v29 = vpack.c.b16 %v2573_v30, %v2572_v58  ;;  %v2582_v17 = vunpack.c.l.b16 %v2322_v3  ;;  %v2278_v58 = vld [vmem:[#allocation2 + $0x92] sm:$0xff]  ;;  %v2279_v30 = vld [vmem:[#allocation2 + $0x9a] sm:$0xff] }
 0x2e3   : > { %v2225_v55 = vld [vmem:[#allocation2 + $0x171] sm:$0xff] }
 0x2e4   : > { %v2261_v59 = vpack.c.bf16 %v2225_v55, %v2225_v55  ;;  %v8506_v7 = vpack.c.b16 %v2389_v62, %v2388_v28  ;;  %v2568_v62 = vunpack.c.l.b16 %v2308_v50  ;;  %v2394_v28 = vunpack.c.l.b16 %v2182_v54 }
 0x2e6   : > { %v2481_v24 = vunpack.c.l.b16 %v2261_v59  ;;  %v2569_v59 = vunpack.c.l.b16 %v2309_v27  ;;  %v8538_v2 = vpack.c.b16 %v2395_v35, %v2394_v28  ;;  %v2318_v35 = vpack.c.bf16 %v2282_v13, %v2282_v13 }
 0x2e7   : > { %v2315_v28 = vpack.c.bf16 %v2279_v30, %v2279_v30 }
 0x2e8   : > { %v8508_v15 = vpack.c.b16 %v2481_v24, %v2480_v14  ;;  %v374_v14 = vld [vmem:[%s7174_s17 + $0x198] sm:$0xff]  ;;  %v375_v24 = vld [vmem:[%s7174_s17 + $0x1a0] sm:$0xff]  ;;  %v8540_v51 = vpack.c.b16 %v2569_v59, %v2568_v62  ;;  %v2319_v62 = vpack.c.bf16 %v2283_v48, %v2283_v48  ;;  %v2152_v59 = vld [vmem:[#allocation2 + $0x168] sm:$0xff] }
 0x2e9   : > { %v410_v60 = vpack.c.bf16 %v374_v14, %v374_v14  ;;  %v411_v41 = vpack.c.bf16 %v375_v24, %v375_v24  ;;  %v2578_v24 = vunpack.c.l.b16 %v2318_v35 }
 0x2ea   : > { %2659 = vrot.lane.b32.xlu0 %v8504_v46, %s7077_s18  ;;  %2631 = vrot.lane.b32.xlu1 %v8506_v7, %s7077_s18 }
 0x2eb   : > { %2528 = vrot.lane.b32.xlu2 %v8508_v15, %s7077_s18  ;;  %v909_v27 = vunpack.c.l.b16 %v410_v60  ;;  %v910_v33 = vunpack.c.l.b16 %v411_v41  ;;  %v2575_v41 = vunpack.c.l.b16 %v2315_v28 }
 0x2ec   : > { %v2515_v36 = vpop.permute.xlu0 %2514 }
 0x2ed   : > { %v2742_v8 = vsel %vm278_vm0, %v8518_v16, %v2515_v36  ;;  %v2323_v36 = vpack.c.bf16 %v2287_v42, %v2287_v42  ;;  %v911_v21 = vpack.c.b16 %v910_v33, %v909_v27  ;;  %v2314_v42 = vpack.c.bf16 %v2278_v58, %v2278_v58  ;;  %v2144_v27 = vld [vmem:[#allocation2 + $0x108] sm:$0xff] }
 0x2ee   : > { %3282 = vmatmul.bf16.gmra.mxu1 %v2742_v8  ;;  %3539 = vmatmul.bf16.gmra.mxu0 %v2742_v8  ;;  %v2178_v8 = vpack.c.bf16 %v2142_v37, %v2142_v37  ;;  %v2579_v37 = vunpack.c.l.b16 %v2319_v62  ;;  %v2180_v30 = vpack.c.bf16 %v2144_v27, %v2144_v27 }
 0x2ef   : > { %v2583_v32 = vunpack.c.l.b16 %v2323_v36  ;;  %v6498_v36 = vld [vmem:[%s10082_s3 + $0x88] sm:$0xff]  ;;  %v2574_v60 = vunpack.c.l.b16 %v2314_v42 }
 0x2f0   : > { %v2390_v54 = vunpack.c.l.b16 %v2178_v8  ;;  %v2149_v8 = vld [vmem:[#allocation2 + $0x140] sm:$0xff]  ;;  %3418 = vmatpush.bf16.msra.mxu3 %v6498_v36  ;;  %v2392_v36 = vunpack.c.l.b16 %v2180_v30  ;;  %v2151_v30 = vld [vmem:[#allocation2 + $0x158] sm:$0xff] }
 0x2f1   : > { %v2185_v48 = vpack.c.bf16 %v2149_v8, %v2149_v8  ;;  %v8570_v33 = vpack.c.b16 %v2575_v41, %v2574_v60  ;;  %v6513_v41 = vld [vmem:[%s10082_s3 + $0x100] sm:$0xff] }
 0x2f2   : > { %2627 = vrot.lane.b32.xlu0 %v8490_v34, %s7077_s18  ;;  %2669 = vrot.lane.b32.xlu1 %v8522_v5, %s7077_s18  ;;  %v2563_v34 = vunpack.c.l.b16 %v2303_v47  ;;  %v2153_v47 = vld [vmem:[#allocation2 + $0x170] sm:$0xff] }
 0x2f3   : > { %2623 = vrot.lane.b32.xlu2 %v8426_v38, %s7077_s18  ;;  %v2179_v38 = vpack.c.bf16 %v2143_v20, %v2143_v20  ;;  %v2189_v20 = vpack.c.bf16 %v2153_v47, %v2153_v47  ;;  %v2397_v35 = vunpack.c.l.b16 %v2185_v48  ;;  %3597 = vmatpush.bf16.msra.mxu1 %v6513_v41 }
 0x2f4   : > { %v8532_v55 = vpop.permute.xlu2 %2518  ;;  %v2594_v26 = vpack.c.b16 %v2563_v34, %v2562_v61  ;;  %v8553_v34 = vpack.c.b16 %v2583_v32, %v2582_v17  ;;  %v8566_v17 = vpack.c.b16 %v2579_v37, %v2578_v24  ;;  %v2148_v32 = vld [vmem:[#allocation2 + $0x138] sm:$0xff] }
 0x2f5   : > { %v2391_v53 = vunpack.c.l.b16 %v2179_v38  ;;  %v2401_v3 = vunpack.c.l.b16 %v2189_v20  ;;  %v2288_v20 = vld [vmem:[#allocation2 + $0x10a] sm:$0xff]  ;;  %v2297_v24 = vld [vmem:[#allocation2 + $0x172] sm:$0xff] }
 0x2f7   : > { %v2412_v61 = vpack.c.b16 %v2391_v53, %v2390_v54  ;;  %v2184_v54 = vpack.c.bf16 %v2148_v32, %v2148_v32 }
 0x2f9   : > { %v2750_v42 = vsel %vm278_vm0, %v2412_v61, %v8532_v55  ;;  %v2396_v37 = vunpack.c.l.b16 %v2184_v54 }
 0x2fa   : > { %2665 = vrot.lane.b32.xlu0 %v8536_v29, %s7077_s18  ;;  %2637 = vrot.lane.b32.xlu1 %v8538_v2, %s7077_s18 }
 0x2fb   : > { %2661 = vrot.lane.b32.xlu2 %v8540_v51, %s7077_s18  ;;  %v8548_v45 = vpop.f32.mrf.mxu1  ;;  %v8585_v8 = vpack.c.b16 %v2397_v35, %v2396_v37 }
 0x2fc   : > { %v2517_v4 = vpop.permute.xlu1 %2516  ;;  %v2616_v0 = vpop.permute.xlu2 %2615 }
 0x2fd   : > { %v2774_v18 = vsel %vm278_vm0, %v2594_v26, %v2616_v0  ;;  %v2746_v50 = vsel %vm278_vm0, %v8506_v7, %v2517_v4  ;;  %v2188_v7 = vpack.c.bf16 %v2152_v59, %v2152_v59  ;;  %v2292_v4 = vld [vmem:[#allocation2 + $0x13a] sm:$0xff]  ;;  %v2293_v0 = vld [vmem:[#allocation2 + $0x142] sm:$0xff] }
 0x2fe   : > { %3287 = vmatmul.bf16.gmra.mxu1 %v2746_v50  ;;  %3331 = vmatmul.bf16.vlgmr.msrb.gmra.mxu2 %v2774_v18  ;;  %v2328_v18 = vpack.c.bf16 %v2292_v4, %v2292_v4 }
 0x2ff   : > { %3544 = vmatmul.bf16.gmra.mxu0 %v2746_v50  ;;  %v2400_v53 = vunpack.c.l.b16 %v2188_v7  ;;  %v2329_v50 = vpack.c.bf16 %v2293_v0, %v2293_v0  ;;  %v2296_v7 = vld [vmem:[#allocation2 + $0x16a] sm:$0xff] }
 0x300   : > { %v2588_v62 = vunpack.c.l.b16 %v2328_v18  ;;  %v2332_v55 = vpack.c.bf16 %v2296_v7, %v2296_v7 }
 0x301   : > { %v8568_v13 = vpack.c.b16 %v2401_v3, %v2400_v53  ;;  %v2589_v59 = vunpack.c.l.b16 %v2329_v50  ;;  %v2285_v3 = vld [vmem:[#allocation2 + $0xe2] sm:$0xff] }
 0x302   : > { %2633 = vrot.lane.b32.xlu0 %v2412_v61, %s7077_s18  ;;  %2675 = vrot.lane.b32.xlu1 %v8553_v34, %s7077_s18  ;;  %v2333_v61 = vpack.c.bf16 %v2297_v24, %v2297_v24  ;;  %v2592_v50 = vunpack.c.l.b16 %v2332_v55  ;;  %v6497_v55 = vld [vmem:[%s10082_s3 + $0x80] sm:$0xff] }
 0x303   : > { %2629 = vrot.lane.b32.xlu2 %v8518_v16, %s7077_s18  ;;  %v8560_v14 = vpop.f32.mrf.mxu1  ;;  %v2145_v16 = vld [vmem:[#allocation2 + $0x110] sm:$0xff]  ;;  %v8587_v4 = vpack.c.b16 %v2589_v59, %v2588_v62  ;;  %3419 = vmatpush.bf16.msra.mxu3 %v6497_v55 }
 0x304   : > { %v920_v38 = vpop.permute.xlu2 %919  ;;  %v2181_v47 = vpack.c.bf16 %v2145_v16, %v2145_v16  ;;  %v2321_v16 = vpack.c.bf16 %v2285_v3, %v2285_v3  ;;  %v2593_v27 = vunpack.c.l.b16 %v2333_v61  ;;  %v2150_v59 = vld [vmem:[#allocation2 + $0x150] sm:$0xff] }
 0x305   : > { %v1124_v26 = vsel %vm278_vm0, %v911_v21, %v920_v38  ;;  %v2289_v21 = vld [vmem:[#allocation2 + $0x112] sm:$0xff]  ;;  %v2284_v38 = vld [vmem:[#allocation2 + $0xda] sm:$0xff]  ;;  %v2291_v3 = vld [vmem:[#allocation2 + $0x12a] sm:$0xff] }
 0x306   : > { %1802 = vmatmul.bf16.gmra.mxu3 %v1124_v26  ;;  %v2393_v28 = vunpack.c.l.b16 %v2181_v47  ;;  %v2324_v26 = vpack.c.bf16 %v2288_v20, %v2288_v20  ;;  %v2325_v60 = vpack.c.bf16 %v2289_v21, %v2289_v21  ;;  %v2320_v53 = vpack.c.bf16 %v2284_v38, %v2284_v38  ;;  %v2290_v38 = vld [vmem:[#allocation2 + $0x122] sm:$0xff] }
 0x307   : > { %v2581_v54 = vunpack.c.l.b16 %v2321_v16  ;;  %v8598_v62 = vpack.c.b16 %v2593_v27, %v2592_v50  ;;  %v2187_v21 = vpack.c.bf16 %v2151_v30, %v2151_v30  ;;  %v2327_v41 = vpack.c.bf16 %v2291_v3, %v2291_v3  ;;  %v2294_v16 = vld [vmem:[#allocation2 + $0x152] sm:$0xff]  ;;  %v8623_v30 = vpop.f32.mrf.mxu0 }
 0x308   : > { %v2413_v0 = vpack.c.b16 %v2393_v28, %v2392_v36  ;;  %v2584_v48 = vunpack.c.l.b16 %v2324_v26  ;;  %v2585_v18 = vunpack.c.l.b16 %v2325_v60  ;;  %v2580_v47 = vunpack.c.l.b16 %v2320_v53 }
 0x309   : > { %v2186_v28 = vpack.c.bf16 %v2150_v59, %v2150_v59  ;;  %v2399_v37 = vunpack.c.l.b16 %v2187_v21  ;;  %v2326_v60 = vpack.c.bf16 %v2290_v38, %v2290_v38  ;;  %v2330_v50 = vpack.c.bf16 %v2294_v16, %v2294_v16 }
 0x30a   : > { %2671 = vrot.lane.b32.xlu0 %v8566_v17, %s7077_s18  ;;  %2643 = vrot.lane.b32.xlu1 %v8568_v13, %s7077_s18  ;;  %v8596_v35 = vpack.c.b16 %v2585_v18, %v2584_v48  ;;  %v8600_v20 = vpack.c.b16 %v2581_v54, %v2580_v47  ;;  %v2295_v48 = vld [vmem:[#allocation2 + $0x15a] sm:$0xff] }
 0x30b   : > { %2667 = vrot.lane.b32.xlu2 %v8570_v33, %s7077_s18  ;;  %v8578_v58 = vpop.f32.mrf.mxu1  ;;  %v2398_v36 = vunpack.c.l.b16 %v2186_v28  ;;  %v2586_v53 = vunpack.c.l.b16 %v2326_v60  ;;  %v2331_v27 = vpack.c.bf16 %v2295_v48, %v2295_v48  ;;  %v2590_v21 = vunpack.c.l.b16 %v2330_v50 }
 0x30d   : > { %v2416_v26 = vpack.c.b16 %v2399_v37, %v2398_v36  ;;  %v2591_v28 = vunpack.c.l.b16 %v2331_v27 }
 0x30e   : > { %3292 = vmatmul.bf16.gmra.mxu1 %v2750_v42 }
 0x30f   : > { %3549 = vmatmul.bf16.gmra.mxu0 %v2750_v42  ;;  %v8635_v3 = vpop.f32.mrf.mxu0 }
 0x312   : > { %2639 = vrot.lane.b32.xlu0 %v8585_v8, %s7077_s18  ;;  %2681 = vrot.lane.b32.xlu1 %v8587_v4, %s7077_s18 }
 0x313   : > { %2635 = vrot.lane.b32.xlu2 %v2413_v0, %s7077_s18  ;;  %v8594_v32 = vpop.f32.mrf.mxu1 }
 0x317   : > { %v8641_v55 = vpop.f32.mrf.mxu0 }
 0x31a   : > { %2677 = vrot.lane.b32.xlu0 %v8596_v35, %s7077_s18  ;;  %2685 = vrot.lane.b32.xlu1 %v8598_v62, %s7077_s18 }
 0x31b   : > { %2673 = vrot.lane.b32.xlu2 %v8600_v20, %s7077_s18  ;;  %v8608_v42 = vpop.f32.mrf.mxu1 }
 0x31c   : > { %v2521_v7 = vpop.permute.xlu0 %2520 }
 0x31d   : > { %v2754_v24 = vsel %vm278_vm0, %v2413_v0, %v2521_v7  ;;  %v2587_v0 = vunpack.c.l.b16 %v2327_v41  ;;  %v8627_v7 = vpack.c.b16 %v2591_v28, %v2590_v21 }
 0x31e   : > { %3297 = vmatmul.bf16.gmra.mxu1 %v2754_v24 }
 0x31f   : > { %3554 = vmatmul.bf16.gmra.mxu0 %v2754_v24  ;;  %v8617_v18 = vpack.c.b16 %v2587_v0, %v2586_v53  ;;  %v8649_v48 = vpop.f32.mrf.mxu0 }
 0x323   : > { %2641 = vrot.lane.b32.xlu2 %v2416_v26, %s7077_s18  ;;  %v8615_v61 = vpop.f32.mrf.mxu1 }
 0x327   : > { %v8656_v21 = vpop.f32.mrf.mxu0 }
 0x32b   : > { %2679 = vrot.lane.b32.xlu2 %v8617_v18, %s7077_s18  ;;  %v8621_v47 = vpop.f32.mrf.mxu1 }
 0x32c   : > { %v2523_v54 = vpop.permute.xlu1 %2522 }
 0x32d   : > { %v2758_v59 = vsel %vm278_vm0, %v8538_v2, %v2523_v54 }
 0x32e   : > { %3302 = vmatmul.bf16.gmra.mxu1 %v2758_v59 }
 0x32f   : > { %3559 = vmatmul.bf16.gmra.mxu0 %v2758_v59 }
 0x333   : > { %2683 = vrot.lane.b32.xlu2 %v8627_v7, %s7077_s18  ;;  %v8631_v24 = vpop.f32.mrf.mxu1 }
 0x334   : > { %v2618_v37 = vpop.permute.xlu1 %2617 }
 0x335   : > { %v2778_v38 = vsel %vm278_vm0, %v8469_v57, %v2618_v37 }
 0x336   : > { %3336 = vmatmul.bf16.gmra.mxu2 %v2778_v38 }
 0x33b   : > { %v8637_v36 = vpop.f32.mrf.mxu1 }
 0x33c   : > { %v2525_v2 = vpop.permute.xlu0 %2524  ;;  %v2620_v60 = vpop.permute.xlu1 %2619 }
 0x33d   : > { %v2762_v41 = vsel %vm278_vm0, %v8585_v8, %v2525_v2  ;;  %v2782_v16 = vsel %vm278_vm0, %v8504_v46, %v2620_v60  ;;  %v8666_v60 = vpop.f32.mrf.mxu0 }
 0x33e   : > { %3307 = vmatmul.bf16.gmra.mxu1 %v2762_v41 }
 0x33f   : > { %3564 = vmatmul.bf16.gmra.mxu0 %v2762_v41 }
 0x343   : > { %v8643_v53 = vpop.f32.mrf.mxu1 }
 0x344   : > { %v2658_v0 = vpop.permute.xlu1 %2657 }
 0x345   : > { %v2838_v57 = vsel %vm278_vm0, %v8100_v43, %v2658_v0  ;;  %v2529_v28 = vpop.permute.xlu2 %2528 }
 0x346   : > { %3341 = vmatmul.bf16.gmra.mxu2 %v2782_v16  ;;  %3420 = vmatmul.bf16.vlgmr.msra.gmra.mxu3 %v2838_v57  ;;  %v2770_v2 = vsel %vm278_vm0, %v8568_v13, %v2529_v28 }
 0x34b   : > { %v8651_v50 = vpop.f32.mrf.mxu1 }
 0x34c   : > { %v2527_v8 = vpop.permute.xlu0 %2526 }
 0x34d   : > { %v2766_v27 = vsel %vm278_vm0, %v2416_v26, %v2527_v8  ;;  %v2624_v41 = vpop.permute.xlu2 %2623 }
 0x34e   : > { %3312 = vmatmul.bf16.gmra.mxu1 %v2766_v27  ;;  %v2790_v57 = vsel %vm278_vm0, %v8495_v19, %v2624_v41 }
 0x34f   : > { %3569 = vmatmul.bf16.gmra.mxu0 %v2766_v27 }
 0x353   : > { %v8654_v54 = vpop.f32.mrf.mxu1 }
 0x354   : > { %v2622_v59 = vpop.permute.xlu0 %2621 }
 0x355   : > { %v2786_v43 = vsel %vm278_vm0, %v8540_v51, %v2622_v59  ;;  %v2662_v16 = vpop.permute.xlu2 %2661 }
 0x356   : > { %3346 = vmatmul.bf16.gmra.mxu2 %v2786_v43  ;;  %v2846_v13 = vsel %vm278_vm0, %v8158_v9, %v2662_v16 }
 0x35b   : > { %v8660_v37 = vpop.f32.mrf.mxu1 }
 0x35c   : > { %v2660_v38 = vpop.permute.xlu0 %2659 }
 0x35d   : > { %v2842_v26 = vsel %vm278_vm0, %v8129_v6, %v2660_v38  ;;  %v2626_v6 = vpop.permute.xlu1 %2625 }
 0x35e   : > { %3317 = vmatmul.bf16.gmra.mxu1 %v2770_v2  ;;  %3425 = vmatmul.bf16.gmra.mxu3 %v2842_v26  ;;  %v2794_v59 = vsel %vm278_vm0, %v8536_v29, %v2626_v6 }
 0x35f   : > { %3574 = vmatmul.bf16.gmra.mxu0 %v2770_v2 }
 0x363   : > { %v8668_v0 = vpop.f32.mrf.mxu1 }
 0x364   : > { %v2628_v9 = vpop.permute.xlu0 %2627 }
 0x365   : > { %v2664_v43 = vpop.permute.xlu1 %2663 }
 0x366   : > { %3351 = vmatmul.bf16.gmra.mxu2 %v2790_v57  ;;  %v2850_v38 = vsel %vm278_vm0, %v8192_v11, %v2664_v43  ;;  %v6524_v11 = vld [vmem:[%s10084_s5 + $0x38] sm:$0xff] }
 0x367   : > { %5080 = vmatpush.bf16.msra.mxu2 %v6524_v11 }
 0x36b   : > { %v8672_v8 = vpop.f32.mrf.mxu1 }
 0x36c   : > { %v2666_v41 = vpop.permute.xlu0 %2665 }
 0x36e   : > { %3430 = vmatmul.bf16.gmra.mxu3 %v2846_v13  ;;  %6232 = vmatmul.msk.bf16.vlgmr.msra.gmra.mxu1 %vm278_vm0, %v8504_v46  ;;  %v2798_v46 = vsel %vm278_vm0, %v8570_v33, %v2628_v9 }
 0x373   : > { %v8678_v27 = vpop.f32.mrf.mxu1 }
 0x376   : > { %3356 = vmatmul.bf16.gmra.mxu2 %v2794_v59  ;;  %v2630_v59 = vpop.permute.xlu2 %2629 }
 0x37b   : > { %v8682_v28 = vpop.f32.mrf.mxu1 }
 0x37e   : > { %3435 = vmatmul.bf16.gmra.mxu3 %v2850_v38  ;;  %6233 = vmatmul.msk.bf16.gmra.mxu1 %vm278_vm0, %v8540_v51  ;;  %v2854_v51 = vsel %vm278_vm0, %v8224_v12, %v2666_v41 }
 0x383   : > { %v8688_v2 = vpop.f32.mrf.mxu1 }
 0x386   : > { %3361 = vmatmul.bf16.gmra.mxu2 %v2798_v46  ;;  %v2802_v46 = vsel %vm278_vm0, %v8522_v5, %v2630_v59 }
 0x389   : > { %v1803_v26 = vpop.f32.mrf.mxu3 }
 0x38a   : > { %v1804_v57 = vadd.f32 %v1803_v26, %v7920_v63 }
 0x38b   : > { %v8693_v16 = vpop.f32.mrf.mxu1 }
 0x38c   : > { %v1893_v13 = vadd.f32 %v8623_v30, %v1804_v57 }
 0x38e   : > { %v1927_v6 = vsub.f32 0.0, %v1893_v13  ;;  %3440 = vmatmul.bf16.gmra.mxu3 %v2854_v51  ;;  %6234 = vmatmul.msk.bf16.gmra.mxu1 %vm278_vm0, %v8495_v19  ;;  %v2668_v19 = vpop.permute.xlu2 %2667  ;;  %v2632_v51 = vpop.permute.xlu1 %2631 }
 0x390   : > { %v1989_v43 = vmul.f32 1.442695, %v1927_v6 }
 0x391   : > { %v1805_v63 = vpop.f32.mrf.mxu3 }
 0x392   : > { %6745 = vpow2.f32 %v1989_v43  ;;  %v1806_v38 = vadd.f32 %v1805_v63, %v7939_v10  ;;  %v2858_v10 = vsel %vm278_vm0, %v8260_v1, %v2668_v19  ;;  %v6523_v63 = vld [vmem:[%s10084_s5 + $0x30] sm:$0xff]  ;;  %v2806_v1 = vsel %vm278_vm0, %v8566_v17, %v2632_v51  ;;  %v2634_v19 = vpop.permute.xlu0 %2633 }
 0x393   : > { %v8704_v30 = vpop.f32.mrf.mxu1  ;;  %5081 = vmatpush.bf16.msra.mxu2 %v6523_v63  ;;  %v2810_v63 = vsel %vm278_vm0, %v8600_v20, %v2634_v19 }
 0x394   : > { %v1895_v9 = vadd.f32 %v8635_v3, %v1806_v38 }
 0x396   : > { %v1928_v12 = vsub.f32 0.0, %v1895_v9  ;;  %3366 = vmatmul.bf16.gmra.mxu2 %v2802_v46 }
 0x398   : > { %v6746_v26 = vpop.eup %6745  ;;  %v1991_v41 = vmul.f32 1.442695, %v1928_v12  ;;  %v2670_v12 = vpop.permute.xlu1 %2669 }
 0x399   : > { %v2023_v57 = vadd.f32 1.0, %v6746_v26 }
 0x39a   : > { %6747 = vpow2.f32 %v1991_v41  ;;  %v2862_v41 = vsel %vm278_vm0, %v8297_v56, %v2670_v12 }
 0x39b   : > { %6749 = vrcp.f32 %v2023_v57  ;;  %v8709_v11 = vpop.f32.mrf.mxu1 }
 0x39c   : > { %10132 = vst [vmem:[#allocation19_spill] sm:$0xff] %v8709_v11 }
 0x39e   : > { %3445 = vmatmul.bf16.gmra.mxu3 %v2858_v10  ;;  %6235 = vmatmul.msk.bf16.gmra.mxu1 %vm278_vm0, %v8536_v29  ;;  %v8723_v29 = vpop.f32.mrf.mxu2 }
 0x3a0   : > { %v6748_v3 = vpop.eup %6747 }
 0x3a1   : > { %v6750_v6 = vpop.eup %6749  ;;  %v2024_v59 = vadd.f32 1.0, %v6748_v3 }
 0x3a2   : > { %v2087_v43 = vmul.f32 %v6750_v6, %v1893_v13 }
 0x3a3   : > { %6751 = vrcp.f32 %v2024_v59  ;;  %v8718_v38 = vpop.f32.mrf.mxu1  ;;  %v4041_v59 = vld [vmem:[#allocation2 + $0x9] sm:$0xff] }
 0x3a4   : > { %10133 = vst [vmem:[#allocation9_spill] sm:$0xff] %v8718_v38  ;;  %v4077_v12 = vpack.c.bf16 %v4041_v59, %v4041_v59  ;;  %v2636_v59 = vpop.permute.xlu2 %2635 }
 0x3a5   : > { %2120 = vst.msk [vmem:[#allocation2 + $0x181] sm:$0xff] %vm278_vm0, %v2087_v43 }
 0x3a6   : > { %3371 = vmatmul.bf16.gmra.mxu2 %v2806_v1  ;;  %v8732_v10 = vpop.f32.mrf.mxu2 }
 0x3a9   : > { %v6752_v46 = vpop.eup %6751 }
 0x3aa   : > { %v2088_v26 = vmul.f32 %v6752_v46, %v1895_v9  ;;  %v4040_v9 = vld [vmem:[#allocation2 + $0x1] sm:$0xff] }
 0x3ab   : > { %v8725_v13 = vpop.f32.mrf.mxu1  ;;  %v4076_v46 = vpack.c.bf16 %v4040_v9, %v4040_v9 }
 0x3ac   : > { %10134 = vst [vmem:[#allocation16_spill] sm:$0xff] %v8725_v13  ;;  %v2154_v57 = vld [vmem:[#allocation2 + $0x180] sm:$0xff] }
 0x3ad   : > { %2121 = vst.msk [vmem:[#allocation2 + $0x189] sm:$0xff] %vm278_vm0, %v2088_v26  ;;  %v2190_v3 = vpack.c.bf16 %v2154_v57, %v2154_v57  ;;  %v4296_v57 = vunpack.c.l.b16 %v4076_v46  ;;  %v2226_v9 = vld [vmem:[#allocation2 + $0x181] sm:$0xff] }
 0x3ae   : > { %3450 = vmatmul.bf16.gmra.mxu3 %v2862_v41  ;;  %6236 = vmatmul.msk.bf16.gmra.mxu1 %vm278_vm0, %v8570_v33  ;;  %v2672_v41 = vpop.permute.xlu0 %2671 }
 0x3af   : > { %v2612_v56 = vunpack.c.l.b16 %v2190_v3  ;;  %v2866_v19 = vsel %vm278_vm0, %v8318_v49, %v2672_v41 }
 0x3b3   : > { %v8734_v51 = vpop.f32.mrf.mxu1 }
 0x3b4   : > { %10135 = vst [vmem:[#allocation17_spill] sm:$0xff] %v8734_v51  ;;  %v2155_v6 = vld [vmem:[#allocation2 + $0x188] sm:$0xff]  ;;  %v4297_v51 = vunpack.c.l.b16 %v4077_v12 }
 0x3b5   : > { %v2191_v43 = vpack.c.bf16 %v2155_v6, %v2155_v6  ;;  %v2227_v6 = vld [vmem:[#allocation2 + $0x189] sm:$0xff] }
 0x3b6   : > { %3376 = vmatmul.bf16.gmra.mxu2 %v2810_v63  ;;  %v4328_v3 = vpack.c.b16 %v4297_v51, %v4296_v57  ;;  %v2674_v57 = vpop.permute.xlu2 %2673 }
 0x3b7   : > { %v2613_v1 = vunpack.c.l.b16 %v2191_v43  ;;  %v2263_v43 = vpack.c.bf16 %v2227_v6, %v2227_v6  ;;  %v2870_v6 = vsel %vm278_vm0, %v8343_v25, %v2674_v57  ;;  %v8789_v57 = vld [vmem:[%s10083_s4] ss:$0 sm:$0xff] }
 0x3b9   : > { %v8738_v33 = vpack.c.b16 %v2613_v1, %v2612_v56  ;;  %v8740_v26 = vpop.f32.mrf.mxu2  ;;  %v2262_v56 = vpack.c.bf16 %v2226_v9, %v2226_v9  ;;  %v6522_v1 = vld [vmem:[%s10084_s5 + $0x28] sm:$0xff]  ;;  %v2650_v49 = vunpack.c.l.b16 %v2263_v43  ;;  %v2638_v9 = vpop.permute.xlu1 %2637 }
 0x3ba   : > { %5082 = vmatpush.bf16.msra.mxu2 %v6522_v1  ;;  %v8778_v1 = vpop.f32.mrf.mxu0 }
 0x3bb   : > { %2645 = vrot.lane.b32.xlu0 %v8738_v33, %s7077_s18  ;;  %v8744_v13 = vpop.f32.mrf.mxu1  ;;  %v2649_v51 = vunpack.c.l.b16 %v2262_v56  ;;  %v2818_v56 = vsel %vm278_vm0, %v8596_v35, %v2638_v9 }
 0x3bc   : > { %10136 = vst [vmem:[#allocation11_spill] sm:$0xff] %v8744_v13  ;;  %v3246_v13 = vadd.f32 %v8789_v57, %v8528_v44 }
 0x3bd   : > { %v8760_v12 = vpack.c.b16 %v2650_v49, %v2649_v51 }
 0x3be   : > { %3455 = vmatmul.bf16.gmra.mxu3 %v2866_v19  ;;  %6237 = vmatmul.msk.bf16.gmra.mxu1 %vm278_vm0, %v8522_v5  ;;  %v2814_v5 = vsel %vm278_vm0, %v8553_v34, %v2636_v59 }
 0x3bf   : > { %10138 = vst [vmem:[#allocation7_spill] sm:$0xff] %v8760_v12 }
 0x3c1   : > { %v8750_v63 = vpop.f32.mrf.mxu2  ;;  %v2676_v25 = vpop.permute.xlu1 %2675 }
 0x3c3   : > { %4344 = vrot.lane.b32.xlu0 %v4328_v3, %s7077_s18  ;;  %v8756_v46 = vpop.f32.mrf.mxu1 }
 0x3c4   : > { %10137 = vst [vmem:[#allocation12_spill] sm:$0xff] %v8756_v46 }
 0x3c6   : > { %3381 = vmatmul.bf16.gmra.mxu2 %v2814_v5 }
 0x3c9   : > { %v8762_v41 = vpop.f32.mrf.mxu2  ;;  %v3421_v3 = vpop.f32.mrf.mxu3 }
 0x3cb   : > { %2699 = vrot.lane.b32.xlu0 %v8760_v12, %s7077_s18  ;;  %v8766_v19 = vpop.f32.mrf.mxu1  ;;  %v3244_v12 = vadd.f32 %v8789_v57, %v8510_v23 }
 0x3cc   : > { %10139 = vst [vmem:[#allocation13_spill] sm:$0xff] %v8766_v19 }
 0x3ce   : > { %3460 = vmatmul.bf16.gmra.mxu3 %v2870_v6  ;;  %6238 = vmatmul.msk.bf16.gmra.mxu1 %vm278_vm0, %v8566_v17  ;;  %v2874_v17 = vsel %vm278_vm0, %v8366_v52, %v2676_v25  ;;  %v2640_v6 = vpop.permute.xlu0 %2639  ;;  %v3333_v52 = vadd.f32 %v8723_v29, %v3244_v12 }
 0x3cf   : > { %v2822_v25 = vsel %vm278_vm0, %v8617_v18, %v2640_v6 }
 0x3d1   : > { %v8772_v59 = vpop.f32.mrf.mxu2  ;;  %v3423_v49 = vpop.f32.mrf.mxu3 }
 0x3d3   : > { %v8774_v43 = vpop.f32.mrf.mxu1 }
 0x3d4   : > { %10140 = vst [vmem:[#allocation14_spill] sm:$0xff] %v8774_v43  ;;  %v8797_v43 = vpop.f32.mrf.mxu0 }
 0x3d6   : > { %3386 = vmatmul.bf16.gmra.mxu2 %v2818_v56 }
 0x3d9   : > { %v8780_v5 = vpop.f32.mrf.mxu2 }
 0x3db   : > { %v8782_v51 = vpop.f32.mrf.mxu1 }
 0x3dc   : > { %10141 = vst [vmem:[#allocation15_spill] sm:$0xff] %v8782_v51  ;;  %v2678_v51 = vpop.permute.xlu0 %2677  ;;  %v8809_v11 = vpop.f32.mrf.mxu0 }
 0x3dd   : > { %v2878_v12 = vsel %vm278_vm0, %v8396_v40, %v2678_v51 }
 0x3de   : > { %3465 = vmatmul.bf16.gmra.mxu3 %v2874_v17  ;;  %6239 = vmatmul.msk.bf16.gmra.mxu1 %vm278_vm0, %v8600_v20  ;;  %v3422_v17 = vadd.f32 %v3421_v3, %v3333_v52  ;;  %v2642_v52 = vpop.permute.xlu2 %2641 }
 0x3e0   : > { %v3511_v23 = vadd.f32 %v8641_v55, %v3422_v17  ;;  %v3249_v17 = vadd.f32 %v8789_v57, %v8548_v45 }
 0x3e1   : > { %v8793_v9 = vpop.f32.mrf.mxu2  ;;  %v3426_v56 = vpop.f32.mrf.mxu3 }
 0x3e2   : > { %v3338_v40 = vadd.f32 %v8740_v26, %v3249_v17 }
 0x3e3   : > { %v8799_v19 = vpop.f32.mrf.mxu1 }
 0x3e4   : > { %10142 = vst [vmem:[#allocation18_spill] sm:$0xff] %v8799_v19  ;;  %v3335_v19 = vadd.f32 %v8732_v10, %v3246_v13 }
 0x3e6   : > { %3391 = vmatmul.bf16.gmra.mxu2 %v2822_v25  ;;  %v3424_v3 = vadd.f32 %v3423_v49, %v3335_v19  ;;  %v2826_v19 = vsel %vm278_vm0, %v8587_v4, %v2642_v52  ;;  %v8824_v49 = vpop.f32.mrf.mxu0  ;;  %v2680_v52 = vpop.permute.xlu2 %2679 }
 0x3e9   : > { %v8804_v46 = vpop.f32.mrf.mxu2  ;;  %v3428_v20 = vpop.f32.mrf.mxu3 }
 0x3eb   : > { %v3599_v38 = vpop.f32.mrf.mxu1 }
 0x3ec   : > { %v3600_v29 = vadd.f32 %v3599_v38, %v3511_v23  ;;  %v3513_v38 = vadd.f32 %v8649_v48, %v3424_v3  ;;  %v6521_v23 = vld [vmem:[%s10084_s5 + $0x20] sm:$0xff] }
 0x3ed   : > { %5083 = vmatpush.bf16.msra.mxu2 %v6521_v23  ;;  %v2644_v23 = vpop.permute.xlu1 %2643 }
 0x3ee   : > { %v3679_v6 = vsub.f32 0.0, %v3600_v29  ;;  %3470 = vmatmul.bf16.gmra.mxu3 %v2878_v12  ;;  %6240 = vmatmul.msk.bf16.gmra.mxu1 %vm278_vm0, %v8553_v34  ;;  %v3427_v34 = vadd.f32 %v3426_v56, %v3338_v40 }
 0x3f0   : > { %v3711_v44 = vmul.f32 1.442695, %v3679_v6  ;;  %v3251_v6 = vadd.f32 %v8789_v57, %v8560_v14  ;;  %v3516_v56 = vadd.f32 %v8656_v21, %v3427_v34  ;;  %v6248_v34 = vld [vmem:[%s7174_s17 + $0x19] sm:$0xff] }
 0x3f1   : > { %v8816_v25 = vpop.f32.mrf.mxu2  ;;  %v3431_v55 = vpop.f32.mrf.mxu3 }
 0x3f2   : > { %6753 = vpow2.f32 %v3711_v44  ;;  %v3340_v17 = vadd.f32 %v8750_v63, %v3251_v6 }
 0x3f3   : > { %v3601_v13 = vpop.f32.mrf.mxu1 }
 0x3f4   : > { %v3602_v10 = vadd.f32 %v3601_v13, %v3513_v38  ;;  %v2882_v13 = vsel %vm278_vm0, %v8420_v22, %v2680_v52  ;;  %v3429_v40 = vadd.f32 %v3428_v20, %v3340_v17  ;;  %v3254_v22 = vadd.f32 %v8789_v57, %v8578_v58 }
 0x3f5   : > { %v2830_v17 = vsel %vm278_vm0, %v8627_v7, %v2644_v23  ;;  %v2682_v23 = vpop.permute.xlu1 %2681 }
 0x3f6   : > { %v3680_v51 = vsub.f32 0.0, %v3602_v10  ;;  %3396 = vmatmul.bf16.gmra.mxu2 %v2826_v19  ;;  %v3518_v6 = vadd.f32 %v8666_v60, %v3429_v40  ;;  %v3343_v52 = vadd.f32 %v8762_v41, %v3254_v22  ;;  %v6249_v60 = vld [vmem:[%s7174_s17 + $0x21] sm:$0xff] }
 0x3f8   : > { %v6754_v45 = vpop.eup %6753  ;;  %v3713_v12 = vmul.f32 1.442695, %v3680_v51  ;;  %v8839_v51 = vpop.f32.mrf.mxu0 }
 0x3f9   : > { %v3775_v48 = vadd.f32 1.0, %v6754_v45  ;;  %v8829_v3 = vpop.f32.mrf.mxu2  ;;  %v3433_v26 = vpop.f32.mrf.mxu3 }
 0x3fa   : > { %6755 = vpow2.f32 %v3713_v12 }
 0x3fb   : > { %6757 = vrcp.f32 %v3775_v48  ;;  %v3604_v44 = vpop.f32.mrf.mxu1 }
 0x3fc   : > { %v3605_v38 = vadd.f32 %v3604_v44, %v3516_v56 }
 0x3fe   : > { %v3681_v19 = vsub.f32 0.0, %v3605_v38  ;;  %3475 = vmatmul.bf16.gmra.mxu3 %v2882_v13  ;;  %6241 = vmatmul.msk.bf16.gmra.mxu1 %vm278_vm0, %v8596_v35  ;;  %v3432_v13 = vadd.f32 %v3431_v55, %v3343_v52  ;;  %v2886_v52 = vsel %vm278_vm0, %v8454_v31, %v2682_v23  ;;  %v3259_v31 = vadd.f32 %v8789_v57, %v8608_v42 }
 0x400   : > { %v6756_v14 = vpop.eup %6755  ;;  %v3715_v45 = vmul.f32 1.442695, %v3681_v19  ;;  %v3521_v55 = vadd.f32 %v8778_v1, %v3432_v13  ;;  %v6250_v13 = vld [vmem:[%s7174_s17 + $0x31] sm:$0xff] }
 0x401   : > { %v6758_v21 = vpop.eup %6757  ;;  %v3776_v12 = vadd.f32 1.0, %v6756_v14  ;;  %v8842_v48 = vpop.f32.mrf.mxu2 }
 0x402   : > { %v3436_v63 = vpop.f32.mrf.mxu3  ;;  %v3839_v20 = vmul.f32 %v6758_v21, %v3600_v29  ;;  %6759 = vpow2.f32 %v3715_v45  ;;  %v3256_v21 = vadd.f32 %v8789_v57, %v8594_v32 }
 0x403   : > { %6761 = vrcp.f32 %v3776_v12  ;;  %v3606_v35 = vpop.f32.mrf.mxu1 }
 0x404   : > { %v3904_v56 = vadd.f32 %v6248_v34, %v3839_v20  ;;  %v8848_v44 = vadd.f32 %v3606_v35, %v3518_v6  ;;  %v8861_v34 = vpop.f32.mrf.mxu0  ;;  %v3345_v20 = vadd.f32 %v8772_v59, %v3256_v21 }
 0x406   : > { %3936 = vst.msk [vmem:[#allocation2 + $0x19] sm:$0xff] %vm278_vm0, %v3904_v56  ;;  %v3682_v58 = vsub.f32 0.0, %v8848_v44  ;;  %3401 = vmatmul.bf16.gmra.mxu2 %v2830_v17  ;;  %v3434_v32 = vadd.f32 %v3433_v26, %v3345_v20 }
 0x408   : > { %v6760_v29 = vpop.eup %6759  ;;  %v3717_v19 = vmul.f32 1.442695, %v3682_v58  ;;  %v3523_v26 = vadd.f32 %v8797_v43, %v3434_v32  ;;  %v6520_v43 = vld [vmem:[%s10084_s5 + $0x18] sm:$0xff] }
 0x409   : > { %v6762_v14 = vpop.eup %6761  ;;  %v3777_v40 = vadd.f32 1.0, %v6760_v29  ;;  %v8855_v45 = vpop.f32.mrf.mxu2  ;;  %5084 = vmatpush.bf16.msra.mxu2 %v6520_v43  ;;  %v6251_v32 = vld [vmem:[%s7174_s17 + $0x39] sm:$0xff]  ;;  %v3264_v43 = vadd.f32 %v8789_v57, %v8621_v47 }
 0x40a   : > { %v8857_v41 = vpop.f32.mrf.mxu3  ;;  %v3840_v12 = vmul.f32 %v6762_v14, %v3602_v10  ;;  %6763 = vpow2.f32 %v3717_v19 }
 0x40b   : > { %6765 = vrcp.f32 %v3777_v40  ;;  %v3609_v22 = vpop.f32.mrf.mxu1  ;;  %v3348_v40 = vadd.f32 %v8780_v5, %v3259_v31 }
 0x40c   : > { %v3905_v6 = vadd.f32 %v6249_v60, %v3840_v12  ;;  %v8865_v35 = vadd.f32 %v3609_v22, %v3521_v55 }
 0x40d   : > { %v4042_v14 = vld [vmem:[#allocation2 + $0x19] sm:$0xff]  ;;  %v3437_v42 = vadd.f32 %v3436_v63, %v3348_v40  ;;  %v3261_v63 = vadd.f32 %v8789_v57, %v8615_v61 }
 0x40e   : > { %3937 = vst.msk [vmem:[#allocation2 + $0x21] sm:$0xff] %vm278_vm0, %v3905_v6  ;;  %v3683_v56 = vsub.f32 0.0, %v8865_v35  ;;  %3480 = vmatmul.bf16.gmra.mxu3 %v2886_v52  ;;  %6242 = vmatmul.msk.bf16.gmra.mxu1 %vm278_vm0, %v8617_v18  ;;  %v8881_v18 = vpop.f32.mrf.mxu0  ;;  %v4078_v55 = vpack.c.bf16 %v4042_v14, %v4042_v14 }
 0x40f   : > { %v3526_v31 = vadd.f32 %v8809_v11, %v3437_v42  ;;  %v3350_v14 = vadd.f32 %v8793_v9, %v3261_v63  ;;  %v6252_v42 = vld [vmem:[%s7174_s17 + $0x49] sm:$0xff] }
 0x410   : > { %v6764_v1 = vpop.eup %6763  ;;  %v3719_v10 = vmul.f32 1.442695, %v3683_v56 }
 0x411   : > { %v6766_v17 = vpop.eup %6765  ;;  %v3778_v59 = vadd.f32 1.0, %v6764_v1  ;;  %v8874_v58 = vpop.f32.mrf.mxu2  ;;  %v3439_v11 = vadd.f32 %v8857_v41, %v3350_v14  ;;  %v6253_v14 = vld [vmem:[%s7174_s17 + $0x51] sm:$0xff] }
 0x412   : > { %v8876_v29 = vpop.f32.mrf.mxu3  ;;  %v3841_v19 = vmul.f32 %v6766_v17, %v3605_v38  ;;  %6767 = vpow2.f32 %v3719_v10  ;;  %v4298_v17 = vunpack.c.l.b16 %v4078_v55 }
 0x413   : > { %6769 = vrcp.f32 %v3778_v59  ;;  %v3611_v60 = vpop.f32.mrf.mxu1 }
 0x414   : > { %v3906_v21 = vadd.f32 %v6250_v13, %v3841_v19  ;;  %v8884_v23 = vadd.f32 %v3611_v60, %v3523_v26  ;;  %v2684_v13 = vpop.permute.xlu2 %2683 }
 0x415   : > { %v4043_v12 = vld [vmem:[#allocation2 + $0x21] sm:$0xff]  ;;  %v2890_v61 = vsel %vm278_vm0, %v8481_v39, %v2684_v13 }
 0x416   : > { %3938 = vst.msk [vmem:[#allocation2 + $0x31] sm:$0xff] %vm278_vm0, %v3906_v21  ;;  %v3684_v38 = vsub.f32 0.0, %v8884_v23  ;;  %v4079_v22 = vpack.c.bf16 %v4043_v12, %v4043_v12 }
 0x418   : > { %v6768_v20 = vpop.eup %6767  ;;  %v3721_v6 = vmul.f32 1.442695, %v3684_v38  ;;  %v4299_v52 = vunpack.c.l.b16 %v4079_v22 }
 0x419   : > { %v6770_v5 = vpop.eup %6769  ;;  %v3779_v56 = vadd.f32 1.0, %v6768_v20  ;;  %v8892_v1 = vpop.f32.mrf.mxu2  ;;  %v3528_v20 = vadd.f32 %v8824_v49, %v3439_v11 }
 0x41a   : > { %v8894_v10 = vpop.f32.mrf.mxu3  ;;  %v3842_v59 = vmul.f32 %v6770_v5, %v8848_v44  ;;  %6771 = vpow2.f32 %v3721_v6  ;;  %v8900_v26 = vpack.c.b16 %v4299_v52, %v4298_v17  ;;  %v8909_v44 = vpop.f32.mrf.mxu0  ;;  %v3353_v52 = vadd.f32 %v8804_v46, %v3264_v43 }
 0x41b   : > { %6773 = vrcp.f32 %v3779_v56  ;;  %v3614_v19 = vpop.f32.mrf.mxu1 }
 0x41c   : > { %v3907_v60 = vadd.f32 %v6251_v32, %v3842_v59  ;;  %v8903_v40 = vadd.f32 %v3614_v19, %v3526_v31  ;;  %4346 = vrot.lane.b32.xlu2 %v8900_v26, %s7077_s18  ;;  %v3442_v47 = vadd.f32 %v8876_v29, %v3353_v52  ;;  %v2686_v29 = vpop.permute.xlu1 %2685 }
 0x41d   : > { %v4044_v6 = vld [vmem:[#allocation2 + $0x31] sm:$0xff] }
 0x41e   : > { %3939 = vst.msk [vmem:[#allocation2 + $0x39] sm:$0xff] %vm278_vm0, %v3907_v60  ;;  %v3685_v21 = vsub.f32 0.0, %v8903_v40  ;;  %3485 = vmatmul.bf16.gmra.mxu3 %v2890_v61  ;;  %6243 = vmatmul.msk.bf16.gmra.mxu1 %vm278_vm0, %v8587_v4  ;;  %v4080_v17 = vpack.c.bf16 %v4044_v6, %v4044_v6  ;;  %v3968_v6 = vld [vmem:[#allocation2] sm:$0xff] }
 0x420   : > { %v6772_v9 = vpop.eup %6771  ;;  %v3723_v12 = vmul.f32 1.442695, %v3685_v21  ;;  %v4300_v11 = vunpack.c.l.b16 %v4080_v17  ;;  %v3266_v21 = vadd.f32 %v8789_v57, %v8631_v24 }
 0x421   : > { %v6774_v55 = vpop.eup %6773  ;;  %v3780_v38 = vadd.f32 1.0, %v6772_v9  ;;  %v8917_v22 = vpop.f32.mrf.mxu2 }
 0x422   : > { %v8919_v39 = vpop.f32.mrf.mxu3  ;;  %v3843_v41 = vmul.f32 %v6774_v55, %v8865_v35  ;;  %6775 = vpow2.f32 %v3723_v12  ;;  %v8931_v49 = vpop.f32.mrf.mxu0  ;;  %v3531_v12 = vadd.f32 %v8839_v51, %v3442_v47  ;;  %v2894_v51 = vsel %vm278_vm0, %v8508_v15, %v2686_v29 }
 0x423   : > { %6777 = vrcp.f32 %v3780_v38  ;;  %v3616_v4 = vpop.f32.mrf.mxu1  ;;  %v3355_v38 = vadd.f32 %v8816_v25, %v3266_v21  ;;  %v3269_v15 = vadd.f32 %v8789_v57, %v8637_v36 }
 0x424   : > { %v3908_v5 = vadd.f32 %v6252_v42, %v3843_v41  ;;  %v8926_v32 = vadd.f32 %v3616_v4, %v3528_v20  ;;  %v3969_v4 = vld [vmem:[#allocation2 + $0x8] sm:$0xff] }
 0x425   : > { %v4045_v56 = vld [vmem:[#allocation2 + $0x39] sm:$0xff]  ;;  %v4005_v17 = vpack.c.bf16 %v3969_v4, %v3969_v4  ;;  %v3358_v36 = vadd.f32 %v8829_v3, %v3269_v15  ;;  %v6518_v3 = vld [vmem:[%s10084_s5 + $0x8] sm:$0xff] }
 0x426   : > { %3940 = vst.msk [vmem:[#allocation2 + $0x49] sm:$0xff] %vm278_vm0, %v3908_v5  ;;  %v3686_v35 = vsub.f32 0.0, %v8926_v32  ;;  %v4081_v63 = vpack.c.bf16 %v4045_v56, %v4045_v56  ;;  %v4004_v56 = vpack.c.bf16 %v3968_v6, %v3968_v6  ;;  %v6255_v6 = vld [vmem:[%s7174_s17 + $0x69] sm:$0xff] }
 0x428   : > { %v6776_v13 = vpop.eup %6775  ;;  %v3725_v59 = vmul.f32 1.442695, %v3686_v35  ;;  %v4301_v31 = vunpack.c.l.b16 %v4081_v63  ;;  %v6254_v35 = vld [vmem:[%s7174_s17 + $0x61] sm:$0xff]  ;;  %v4216_v29 = vunpack.c.l.b16 %v4004_v56 }
 0x429   : > { %v6778_v19 = vpop.eup %6777  ;;  %v3781_v46 = vadd.f32 1.0, %v6776_v13  ;;  %v8934_v60 = vpop.f32.mrf.mxu2 }
 0x42a   : > { %v8936_v61 = vpop.f32.mrf.mxu3  ;;  %v3844_v9 = vmul.f32 %v6778_v19, %v8884_v23  ;;  %6779 = vpow2.f32 %v3725_v59  ;;  %v8942_v42 = vpack.c.b16 %v4301_v31, %v4300_v11  ;;  %v3444_v23 = vadd.f32 %v8894_v10, %v3355_v38  ;;  %v8965_v59 = vpop.f32.mrf.mxu0 }
 0x42b   : > { %6781 = vrcp.f32 %v3781_v46  ;;  %v3619_v55 = vpop.f32.mrf.mxu1 }
 0x42c   : > { %v3909_v43 = vadd.f32 %v6253_v14, %v3844_v9  ;;  %v8945_v41 = vadd.f32 %v3619_v55, %v3531_v12  ;;  %4348 = vrot.lane.b32.xlu1 %v8942_v42, %s7077_s18  ;;  %v6519_v14 = vld [vmem:[%s10084_s5 + $0x10] sm:$0xff]  ;;  %v4217_v9 = vunpack.c.l.b16 %v4005_v17 }
 0x42d   : > { %v2646_v20 = vpop.permute.xlu0 %2645  ;;  %v4046_v19 = vld [vmem:[#allocation2 + $0x49] sm:$0xff]  ;;  %5085 = vmatpush.bf16.msra.mxu2 %v6519_v14 }
 0x42e   : > { %v2834_v24 = vsel %vm278_vm0, %v8598_v62, %v2646_v20  ;;  %3941 = vst.msk [vmem:[#allocation2 + $0x51] sm:$0xff] %vm278_vm0, %v3909_v43  ;;  %v3687_v25 = vsub.f32 0.0, %v8945_v41  ;;  %3490 = vmatmul.bf16.gmra.mxu3 %v2894_v51  ;;  %6244 = vmatmul.msk.bf16.gmra.mxu1 %vm278_vm0, %v8627_v7  ;;  %v3533_v7 = vadd.f32 %v8861_v34, %v3444_v23 }
 0x42f   : > { %3406 = vmatmul.bf16.gmra.mxu2 %v2834_v24  ;;  %v4082_v55 = vpack.c.bf16 %v4046_v19, %v4046_v19  ;;  %v3447_v34 = vadd.f32 %v8919_v39, %v3358_v36  ;;  %v4248_v51 = vpack.c.b16 %v4217_v9, %v4216_v29  ;;  %v3271_v39 = vadd.f32 %v8789_v57, %v8643_v53  ;;  %v6256_v9 = vld [vmem:[%s7174_s17 + $0x79] sm:$0xff] }
 0x430   : > { %v6780_v52 = vpop.eup %6779  ;;  %v3727_v5 = vmul.f32 1.442695, %v3687_v25 }
 0x431   : > { %v6782_v47 = vpop.eup %6781  ;;  %v3782_v63 = vadd.f32 1.0, %v6780_v52  ;;  %v8961_v10 = vpop.f32.mrf.mxu2  ;;  %5086 = vmatpush.bf16.msra.mxu2 %v6518_v3  ;;  %v3536_v17 = vadd.f32 %v8881_v18, %v3447_v34 }
 0x432   : > { %v8963_v13 = vpop.f32.mrf.mxu3  ;;  %v3845_v31 = vmul.f32 %v6782_v47, %v8903_v40  ;;  %6783 = vpow2.f32 %v3727_v5  ;;  %v4302_v5 = vunpack.c.l.b16 %v4082_v55  ;;  %v6517_v47 = vld [vmem:[%s10084_s5] sm:$0xff] }
 0x433   : > { %6785 = vrcp.f32 %v3782_v63  ;;  %v3621_v46 = vpop.f32.mrf.mxu1 }
 0x434   : > { %v3910_v11 = vadd.f32 %v6254_v35, %v3845_v31  ;;  %v8973_v21 = vadd.f32 %v3621_v46, %v3533_v7  ;;  %v8995_v31 = vpop.f32.mrf.mxu0  ;;  %v3360_v7 = vadd.f32 %v8842_v48, %v3271_v39 }
 0x435   : > { %v4345_v12 = vpop.permute.xlu0 %4344  ;;  %v4047_v40 = vld [vmem:[#allocation2 + $0x51] sm:$0xff]  ;;  %5087 = vmatpush.bf16.msra.mxu2 %v6517_v47  ;;  %v6257_v47 = vld [vmem:[%s7174_s17 + $0x81] sm:$0xff] }
 0x436   : > { %3942 = vst.msk [vmem:[#allocation2 + $0x61] sm:$0xff] %vm278_vm0, %v3910_v11  ;;  %v3688_v38 = vsub.f32 0.0, %v8973_v21  ;;  %v4083_v43 = vpack.c.bf16 %v4047_v40, %v4047_v40  ;;  %v3449_v36 = vadd.f32 %v8936_v61, %v3360_v7 }
 0x438   : > { %v6784_v20 = vpop.eup %6783  ;;  %v3729_v24 = vmul.f32 1.442695, %v3688_v38  ;;  %v4303_v23 = vunpack.c.l.b16 %v4083_v43  ;;  %v3538_v61 = vadd.f32 %v8909_v44, %v3449_v36  ;;  %v2298_v38 = vld [vmem:[#allocation2 + $0x182] sm:$0xff]  ;;  %v2299_v43 = vld [vmem:[#allocation2 + $0x18a] sm:$0xff] }
 0x439   : > { %v6786_v25 = vpop.eup %6785  ;;  %v3783_v4 = vadd.f32 1.0, %v6784_v20  ;;  %v8991_v15 = vpop.f32.mrf.mxu2 }
 0x43a   : > { %v8982_v52 = vpop.f32.mrf.mxu3  ;;  %v3846_v56 = vmul.f32 %v6786_v25, %v8926_v32  ;;  %6787 = vpow2.f32 %v3729_v24  ;;  %v8993_v63 = vpack.c.b16 %v4303_v23, %v4302_v5  ;;  %v4556_v32 = vsel %vm278_vm0, %v4248_v51, %v4345_v12 }
 0x43b   : > { %6789 = vrcp.f32 %v3783_v4  ;;  %v3624_v35 = vpop.f32.mrf.mxu1  ;;  %v2334_v25 = vpack.c.bf16 %v2298_v38, %v2298_v38 }
 0x43c   : > { %v3911_v53 = vadd.f32 %v6255_v6, %v3846_v56  ;;  %v8999_v19 = vadd.f32 %v3624_v35, %v3536_v17  ;;  %4350 = vrot.lane.b32.xlu2 %v8993_v63, %s7077_s18  ;;  %v9022_v6 = vpop.f32.mrf.mxu0 }
 0x43d   : > { %v2700_v18 = vpop.permute.xlu0 %2699  ;;  %v4048_v34 = vld [vmem:[#allocation2 + $0x61] sm:$0xff] }
 0x43e   : > { %v2902_v14 = vsel %vm278_vm0, %v8738_v33, %v2700_v18  ;;  %3943 = vst.msk [vmem:[#allocation2 + $0x69] sm:$0xff] %vm278_vm0, %v3911_v53  ;;  %v3689_v48 = vsub.f32 0.0, %v8999_v19  ;;  %6245 = vmatmul.msk.bf16.gmra.mxu1 %vm278_vm0, %v8598_v62  ;;  %v3274_v33 = vadd.f32 %v8789_v57, %v8651_v50  ;;  %v4084_v50 = vpack.c.bf16 %v4048_v34, %v4048_v34  ;;  %v6258_v34 = vld [vmem:[%s7174_s17 + $0x91] sm:$0xff] }
 0x43f   : > { %3579 = vmatmul.bf16.gmra.mxu0 %v2902_v14  ;;  %5088 = vmatmul.bf16.vlgmr.msra.gmra.mxu2 %v4556_v32  ;;  %v2654_v32 = vunpack.c.l.b16 %v2334_v25  ;;  %v3276_v14 = vadd.f32 %v8789_v57, %v8654_v54 }
 0x440   : > { %v6788_v46 = vpop.eup %6787  ;;  %v3731_v11 = vmul.f32 1.442695, %v3689_v48  ;;  %v3363_v3 = vadd.f32 %v8855_v45, %v3274_v33  ;;  %v4304_v53 = vunpack.c.l.b16 %v4084_v50 }
 0x441   : > { %v6790_v29 = vpop.eup %6789  ;;  %v3784_v12 = vadd.f32 1.0, %v6788_v46  ;;  %v9020_v51 = vpop.f32.mrf.mxu2 }
 0x442   : > { %v9011_v40 = vpop.f32.mrf.mxu3  ;;  %v3847_v55 = vmul.f32 %v6790_v29, %v8945_v41  ;;  %6791 = vpow2.f32 %v3731_v11  ;;  %v2335_v41 = vpack.c.bf16 %v2299_v43, %v2299_v43  ;;  %v3452_v44 = vadd.f32 %v8963_v13, %v3363_v3 }
 0x443   : > { %6793 = vrcp.f32 %v3784_v12  ;;  %v3626_v62 = vpop.f32.mrf.mxu1  ;;  %v3365_v11 = vadd.f32 %v8874_v58, %v3276_v14 }
 0x444   : > { %v3912_v20 = vadd.f32 %v6256_v9, %v3847_v55  ;;  %v9018_v24 = vadd.f32 %v3626_v62, %v3538_v61  ;;  %v2655_v18 = vunpack.c.l.b16 %v2335_v41  ;;  %v3541_v13 = vadd.f32 %v8931_v49, %v3452_v44  ;;  %v9050_v33 = vpop.f32.mrf.mxu0 }
 0x445   : > { %v4049_v23 = vld [vmem:[#allocation2 + $0x69] sm:$0xff]  ;;  %v3454_v54 = vadd.f32 %v8982_v52, %v3365_v11  ;;  %v3279_v62 = vadd.f32 %v8789_v57, %v8660_v37 }
 0x446   : > { %3944 = vst.msk [vmem:[#allocation2 + $0x79] sm:$0xff] %vm278_vm0, %v3912_v20  ;;  %v3690_v4 = vsub.f32 0.0, %v9018_v24  ;;  %v4085_v5 = vpack.c.bf16 %v4049_v23, %v4049_v23  ;;  %v9041_v12 = vpack.c.b16 %v2655_v18, %v2654_v32  ;;  %v3281_v32 = vadd.f32 %v8789_v57, %v8668_v0 }
 0x447   : > { %v3543_v3 = vadd.f32 %v8965_v59, %v3454_v54  ;;  %v3368_v50 = vadd.f32 %v8892_v1, %v3279_v62 }
 0x448   : > { %v6792_v45 = vpop.eup %6791  ;;  %v3733_v39 = vmul.f32 1.442695, %v3690_v4  ;;  %v4305_v56 = vunpack.c.l.b16 %v4085_v5 }
 0x449   : > { %v6794_v17 = vpop.eup %6793  ;;  %v3785_v35 = vadd.f32 1.0, %v6792_v45  ;;  %v3457_v37 = vadd.f32 %v9011_v40, %v3368_v50 }
 0x44a   : > { %v9028_v7 = vpop.f32.mrf.mxu3  ;;  %v3848_v36 = vmul.f32 %v6794_v17, %v8973_v21  ;;  %6795 = vpow2.f32 %v3733_v39  ;;  %v9034_v46 = vpack.c.b16 %v4305_v56, %v4304_v53  ;;  %v9046_v21 = vpop.f32.mrf.mxu2  ;;  %v6259_v17 = vld [vmem:[%s7174_s17 + $0x99] sm:$0xff] }
 0x44b   : > { %6797 = vrcp.f32 %v3785_v35  ;;  %v3629_v48 = vpop.f32.mrf.mxu1  ;;  %v3546_v14 = vadd.f32 %v8995_v31, %v3457_v37 }
 0x44c   : > { %v3913_v29 = vadd.f32 %v6257_v47, %v3848_v36  ;;  %v9037_v9 = vadd.f32 %v3629_v48, %v3541_v13  ;;  %4352 = vrot.lane.b32.xlu0 %v9034_v46, %s7077_s18  ;;  %v9072_v18 = vpop.f32.mrf.mxu0  ;;  %v3370_v48 = vadd.f32 %v8917_v22, %v3281_v32  ;;  %v6260_v22 = vld [vmem:[%s7174_s17 + $0xa9] sm:$0xff] }
 0x44d   : > { %v4050_v20 = vld [vmem:[#allocation2 + $0x79] sm:$0xff] }
 0x44e   : > { %3945 = vst.msk [vmem:[#allocation2 + $0x81] sm:$0xff] %vm278_vm0, %v3913_v29  ;;  %v3691_v49 = vsub.f32 0.0, %v9037_v9  ;;  %6246 = vmatmul.msk.bf16.gmra.mxu1 %vm278_vm0, %v9041_v12  ;;  %v4086_v4 = vpack.c.bf16 %v4050_v20, %v4050_v20  ;;  %v3459_v0 = vadd.f32 %v9028_v7, %v3370_v48 }
 0x450   : > { %v6796_v58 = vpop.eup %6795  ;;  %v3735_v55 = vmul.f32 1.442695, %v3691_v49  ;;  %v4306_v53 = vunpack.c.l.b16 %v4086_v4  ;;  %v6548_v49 = vld [vmem:[%s10084_s5 + $0xf8] sm:$0xff]  ;;  %v3548_v7 = vadd.f32 %v9022_v6, %v3459_v0 }
 0x451   : > { %v6798_v61 = vpop.eup %6797  ;;  %v3786_v38 = vadd.f32 1.0, %v6796_v58  ;;  %5347 = vmatpush.bf16.msrb.mxu1 %v6548_v49  ;;  %v3970_v49 = vld [vmem:[#allocation2 + $0x18] sm:$0xff] }
 0x452   : > { %v9053_v43 = vpop.f32.mrf.mxu3  ;;  %v3849_v52 = vmul.f32 %v6798_v61, %v8999_v19  ;;  %6799 = vpow2.f32 %v3735_v55  ;;  %v9066_v35 = vpop.f32.mrf.mxu2 }
 0x453   : > { %6801 = vrcp.f32 %v3786_v38  ;;  %v3631_v23 = vpop.f32.mrf.mxu1 }
 0x454   : > { %v3914_v25 = vadd.f32 %v6258_v34, %v3849_v52  ;;  %v9060_v41 = vadd.f32 %v3631_v23, %v3543_v3  ;;  %v3284_v34 = vadd.f32 %v8789_v57, %v8672_v8  ;;  %v9098_v20 = vpop.f32.mrf.mxu0  ;;  %v6547_v8 = vld [vmem:[%s10084_s5 + $0xf0] sm:$0xff] }
 0x455   : > { %v4051_v44 = vld [vmem:[#allocation2 + $0x81] sm:$0xff]  ;;  %5348 = vmatpush.bf16.msrb.mxu1 %v6547_v8 }
 0x456   : > { %3946 = vst.msk [vmem:[#allocation2 + $0x91] sm:$0xff] %vm278_vm0, %v3914_v25  ;;  %v3692_v19 = vsub.f32 0.0, %v9060_v41  ;;  %v4087_v5 = vpack.c.bf16 %v4051_v44, %v4051_v44  ;;  %v3373_v23 = vadd.f32 %v8934_v60, %v3284_v34 }
 0x458   : > { %v6800_v45 = vpop.eup %6799  ;;  %v3737_v59 = vmul.f32 1.442695, %v3692_v19  ;;  %v4307_v39 = vunpack.c.l.b16 %v4087_v5  ;;  %v3462_v44 = vadd.f32 %v9053_v43, %v3373_v23  ;;  %v4006_v23 = vpack.c.bf16 %v3970_v49, %v3970_v49 }
 0x459   : > { %v6802_v56 = vpop.eup %6801  ;;  %v3787_v47 = vadd.f32 1.0, %v6800_v45  ;;  %v6546_v45 = vld [vmem:[%s10084_s5 + $0xe8] sm:$0xff] }
 0x45a   : > { %v9068_v1 = vpop.f32.mrf.mxu3  ;;  %v3850_v40 = vmul.f32 %v6802_v56, %v9018_v24  ;;  %6803 = vpow2.f32 %v3737_v59  ;;  %v9076_v13 = vpack.c.b16 %v4307_v39, %v4306_v53  ;;  %v9096_v52 = vpop.f32.mrf.mxu2  ;;  %v6261_v39 = vld [vmem:[%s7174_s17 + $0xb1] sm:$0xff]  ;;  %v3551_v32 = vadd.f32 %v9050_v33, %v3462_v44  ;;  %5349 = vmatpush.bf16.msrb.mxu1 %v6546_v45 }
 0x45b   : > { %6805 = vrcp.f32 %v3787_v47  ;;  %v3634_v36 = vpop.f32.mrf.mxu1  ;;  %v3286_v47 = vadd.f32 %v8789_v57, %v8678_v27 }
 0x45c   : > { %v3915_v11 = vadd.f32 %v6259_v17, %v3850_v40  ;;  %v9079_v29 = vadd.f32 %v3634_v36, %v3546_v14  ;;  %4354 = vrot.lane.b32.xlu1 %v9076_v13, %s7077_s18  ;;  %v2300_v40 = vld [vmem:[#allocation2 + $0x19a] sm:$0xff]  ;;  %v2301_v14 = vld [vmem:[#allocation2 + $0x1a2] sm:$0xff] }
 0x45d   : > { %v4052_v62 = vld [vmem:[#allocation2 + $0x91] sm:$0xff]  ;;  %v2336_v0 = vpack.c.bf16 %v2300_v40, %v2300_v40 }
 0x45e   : > { %3947 = vst.msk [vmem:[#allocation2 + $0x99] sm:$0xff] %vm278_vm0, %v3915_v11  ;;  %v3693_v24 = vsub.f32 0.0, %v9079_v29  ;;  %v4088_v6 = vpack.c.bf16 %v4052_v62, %v4052_v62  ;;  %v3971_v11 = vld [vmem:[#allocation2 + $0x20] sm:$0xff] }
 0x460   : > { %v6804_v54 = vpop.eup %6803  ;;  %v3739_v31 = vmul.f32 1.442695, %v3693_v24  ;;  %v4308_v17 = vunpack.c.l.b16 %v4088_v6  ;;  %v2337_v24 = vpack.c.bf16 %v2301_v14, %v2301_v14  ;;  %v6262_v6 = vld [vmem:[%s7174_s17 + $0xc1] sm:$0xff] }
 0x461   : > { %v6806_v58 = vpop.eup %6805  ;;  %v3788_v55 = vadd.f32 1.0, %v6804_v54  ;;  %v3375_v54 = vadd.f32 %v8961_v10, %v3286_v47 }
 0x462   : > { %v9090_v61 = vpop.f32.mrf.mxu3  ;;  %v3851_v38 = vmul.f32 %v6806_v58, %v9037_v9  ;;  %6807 = vpow2.f32 %v3739_v31  ;;  %v9127_v33 = vpop.f32.mrf.mxu2  ;;  %v2705_v58 = vunpack.c.l.b16 %v2336_v0 }
 0x463   : > { %6809 = vrcp.f32 %v3788_v55  ;;  %v3636_v3 = vpop.f32.mrf.mxu1  ;;  %v9131_v55 = vpop.f32.mrf.mxu0  ;;  %v3464_v10 = vadd.f32 %v9068_v1, %v3375_v54 }
 0x464   : > { %v3916_v50 = vadd.f32 %v6260_v22, %v3851_v38  ;;  %v9101_v25 = vadd.f32 %v3636_v3, %v3548_v7  ;;  %v2706_v22 = vunpack.c.l.b16 %v2337_v24  ;;  %v4007_v38 = vpack.c.bf16 %v3971_v11, %v3971_v11 }
 0x465   : > { %v4053_v9 = vld [vmem:[#allocation2 + $0x99] sm:$0xff] }
 0x466   : > { %3948 = vst.msk [vmem:[#allocation2 + $0xa9] sm:$0xff] %vm278_vm0, %v3916_v50  ;;  %v3694_v4 = vsub.f32 0.0, %v9101_v25  ;;  %v4089_v37 = vpack.c.bf16 %v4053_v9, %v4053_v9  ;;  %v2707_v7 = vpack.c.b16 %v2706_v22, %v2705_v58  ;;  %v6544_v50 = vld [vmem:[%s10084_s5 + $0xd8] sm:$0xff]  ;;  %v3289_v9 = vadd.f32 %v8789_v57, %v8682_v28 }
 0x467   : > { %v3291_v58 = vadd.f32 %v8789_v57, %v8688_v2  ;;  %v6541_v2 = vld [vmem:[%s10084_s5 + $0xc0] sm:$0xff] }
 0x468   : > { %v6808_v19 = vpop.eup %6807  ;;  %v3741_v60 = vmul.f32 1.442695, %v3694_v4  ;;  %v4309_v5 = vunpack.c.l.b16 %v4089_v37  ;;  %6247 = vmatmul.msk.bf16.gmra.mxu1 %vm278_vm0, %v2707_v7  ;;  %v3553_v4 = vadd.f32 %v9072_v18, %v3464_v10  ;;  %v4219_v37 = vunpack.c.l.b16 %v4007_v38 }
 0x469   : > { %v6810_v59 = vpop.eup %6809  ;;  %v3789_v56 = vadd.f32 1.0, %v6808_v19  ;;  %v3380_v7 = vadd.f32 %v9020_v51, %v3291_v58 }
 0x46a   : > { %v3852_v43 = vmul.f32 %v6810_v59, %v9060_v41  ;;  %6811 = vpow2.f32 %v3741_v60  ;;  %v9116_v53 = vpop.f32.mrf.mxu3  ;;  %v9119_v48 = vpack.c.b16 %v4309_v5, %v4308_v17  ;;  %v6545_v41 = vld [vmem:[%s10084_s5 + $0xe0] sm:$0xff]  ;;  %v3378_v5 = vadd.f32 %v8991_v15, %v3289_v9 }
 0x46b   : > { %6813 = vrcp.f32 %v3789_v56  ;;  %v3639_v36 = vpop.f32.mrf.mxu1  ;;  %5350 = vmatpush.bf16.msrb.mxu1 %v6545_v41  ;;  %v3469_v57 = vadd.f32 %v9116_v53, %v3380_v7  ;;  %v6266_v7 = vld [vmem:[%s7174_s17 + $0xf1] sm:$0xff] }
 0x46c   : > { %v3917_v27 = vadd.f32 %v6261_v39, %v3852_v43  ;;  %v9122_v31 = vadd.f32 %v3639_v36, %v3551_v32  ;;  %4356 = vrot.lane.b32.xlu2 %v9119_v48, %s7077_s18  ;;  %v4218_v39 = vunpack.c.l.b16 %v4006_v23  ;;  %v3467_v18 = vadd.f32 %v9090_v61, %v3378_v5  ;;  %v9158_v32 = vpop.f32.mrf.mxu2  ;;  %v9160_v36 = vpop.f32.mrf.mxu0  ;;  %v6542_v61 = vld [vmem:[%s10084_s5 + $0xc8] sm:$0xff] }
 0x46d   : > { %v4054_v19 = vld [vmem:[#allocation2 + $0xa9] sm:$0xff] }
 0x46e   : > { %3949 = vst.msk [vmem:[#allocation2 + $0xb1] sm:$0xff] %vm278_vm0, %v3917_v27  ;;  %v3695_v34 = vsub.f32 0.0, %v9122_v31  ;;  %v4090_v17 = vpack.c.bf16 %v4054_v19, %v4054_v19  ;;  %v9156_v15 = vpack.c.b16 %v4219_v37, %v4218_v39  ;;  %v6263_v27 = vld [vmem:[%s7174_s17 + $0xc9] sm:$0xff]  ;;  %v3556_v10 = vadd.f32 %v9098_v20, %v3467_v18 }
 0x46f   : > { %5351 = vmatpush.bf16.msrb.mxu1 %v6544_v50  ;;  %v3558_v37 = vadd.f32 %v9131_v55, %v3469_v57  ;;  %v10143_v57 = vld [vmem:[#allocation19_spill] sm:$0xff] }
 0x470   : > { %v6812_v62 = vpop.eup %6811  ;;  %v3743_v3 = vmul.f32 1.442695, %v3695_v34  ;;  %v4310_v49 = vunpack.c.l.b16 %v4090_v17 }
 0x471   : > { %v6814_v8 = vpop.eup %6813  ;;  %v3790_v44 = vadd.f32 1.0, %v6812_v62 }
 0x472   : > { %v3853_v1 = vmul.f32 %v6814_v8, %v9079_v29  ;;  %6815 = vpow2.f32 %v3743_v3  ;;  %v9146_v59 = vpop.f32.mrf.mxu3  ;;  %v6543_v29 = vld [vmem:[%s10084_s5 + $0xd0] sm:$0xff]  ;;  %v6264_v8 = vld [vmem:[%s7174_s17 + $0xd9] sm:$0xff] }
 0x473   : > { %6817 = vrcp.f32 %v3790_v44  ;;  %v3641_v60 = vpop.f32.mrf.mxu1  ;;  %5352 = vmatpush.bf16.msrb.mxu1 %v6543_v29  ;;  %v9191_v44 = vld [vmem:[%s10083_s4] ss:$0 sm:$0xff] }
 0x474   : > { %v3918_v45 = vadd.f32 %v6262_v6, %v3853_v1  ;;  %v9148_v28 = vadd.f32 %v3641_v60, %v3553_v4  ;;  %v9186_v9 = vpop.f32.mrf.mxu2  ;;  %v3294_v1 = vadd.f32 %v9191_v44, %v8693_v16  ;;  %v3562_v53 = vpop.f32.mrf.mxu0 }
 0x475   : > { %v4055_v56 = vld [vmem:[#allocation2 + $0xb1] sm:$0xff] }
 0x476   : > { %3950 = vst.msk [vmem:[#allocation2 + $0xc1] sm:$0xff] %vm278_vm0, %v3918_v45  ;;  %v3696_v47 = vsub.f32 0.0, %v9148_v28  ;;  %v4091_v43 = vpack.c.bf16 %v4055_v56, %v4055_v56  ;;  %v4347_v40 = vpop.permute.xlu2 %4346  ;;  %v3383_v5 = vadd.f32 %v9046_v21, %v3294_v1 }
 0x477   : > { %v4560_v0 = vsel %vm278_vm0, %v9156_v15, %v4347_v40  ;;  %5353 = vmatpush.bf16.msrb.mxu1 %v6542_v61 }
 0x478   : > { %v6816_v14 = vpop.eup %6815  ;;  %v3745_v11 = vmul.f32 1.442695, %v3696_v47  ;;  %v4311_v24 = vunpack.c.l.b16 %v4091_v43  ;;  %5093 = vmatmul.bf16.gmra.mxu2 %v4560_v0  ;;  %v3472_v16 = vadd.f32 %v9146_v59, %v3383_v5  ;;  %v3296_v0 = vadd.f32 %v9191_v44, %v8704_v30 }
 0x479   : > { %v6818_v54 = vpop.eup %6817  ;;  %v3791_v41 = vadd.f32 1.0, %v6816_v14  ;;  %v6265_v14 = vld [vmem:[%s7174_s17 + $0xe1] sm:$0xff] }
 0x47a   : > { %v3854_v22 = vmul.f32 %v6818_v54, %v9101_v25  ;;  %6819 = vpow2.f32 %v3745_v11  ;;  %v9172_v38 = vpack.c.b16 %v4311_v24, %v4310_v49  ;;  %v3473_v20 = vpop.f32.mrf.mxu3  ;;  %v3561_v61 = vadd.f32 %v9160_v36, %v3472_v16 }
 0x47b   : > { %6821 = vrcp.f32 %v3791_v41  ;;  %v3644_v34 = vpop.f32.mrf.mxu1  ;;  %5354 = vmatpush.bf16.msrb.mxu1 %v6541_v2  ;;  %v3385_v49 = vadd.f32 %v9066_v35, %v3296_v0  ;;  %v3299_v35 = vadd.f32 %v9191_v44, %v10143_v57 }
 0x47c   : > { %v3919_v62 = vadd.f32 %v6263_v27, %v3854_v22  ;;  %v9175_v3 = vadd.f32 %v3644_v34, %v3556_v10  ;;  %4358 = vrot.lane.b32.xlu0 %v9172_v38, %s7077_s18  ;;  %v9208_v59 = vpop.f32.mrf.mxu2  ;;  %v3565_v41 = vpop.f32.mrf.mxu0 }
 0x47d   : > { %v4056_v19 = vld [vmem:[#allocation2 + $0xc1] sm:$0xff]  ;;  %v3474_v30 = vadd.f32 %v3473_v20, %v3385_v49  ;;  %v3388_v20 = vadd.f32 %v9096_v52, %v3299_v35  ;;  %v6532_v52 = vld [vmem:[%s10084_s5 + $0x78] sm:$0xff] }
 0x47e   : > { %3951 = vst.msk [vmem:[#allocation2 + $0xc9] sm:$0xff] %vm278_vm0, %v3919_v62  ;;  %v3697_v25 = vsub.f32 0.0, %v9175_v3  ;;  %v4092_v56 = vpack.c.bf16 %v4056_v19, %v4056_v19  ;;  %5169 = vmatpush.bf16.msrb.mxu3 %v6532_v52 }
 0x480   : > { %v6820_v23 = vpop.eup %6819  ;;  %v3747_v51 = vmul.f32 1.442695, %v3697_v25  ;;  %v4312_v21 = vunpack.c.l.b16 %v4092_v56  ;;  %v6552_v56 = vld [vmem:[%s10084_s5 + $0x118] sm:$0xff] }
 0x481   : > { %v6822_v50 = vpop.eup %6821  ;;  %v3792_v6 = vadd.f32 1.0, %v6820_v23  ;;  %5440 = vmatpush.bf16.msrb.mxu2 %v6552_v56  ;;  %v3974_v56 = vld [vmem:[#allocation2 + $0x48] sm:$0xff] }
 0x482   : > { %v3855_v4 = vmul.f32 %v6822_v50, %v9122_v31  ;;  %6823 = vpow2.f32 %v3747_v51  ;;  %v3476_v55 = vpop.f32.mrf.mxu3  ;;  %v3563_v51 = vadd.f32 %v3562_v53, %v3474_v30  ;;  %v3973_v50 = vld [vmem:[#allocation2 + $0x38] sm:$0xff] }
 0x483   : > { %6825 = vrcp.f32 %v3792_v6  ;;  %v3646_v60 = vpop.f32.mrf.mxu1  ;;  %v4009_v5 = vpack.c.bf16 %v3973_v50, %v3973_v50 }
 0x484   : > { %v3920_v45 = vadd.f32 %v6264_v8, %v3855_v4  ;;  %v9198_v39 = vadd.f32 %v3646_v60, %v3558_v37  ;;  %v9226_v37 = vpop.f32.mrf.mxu2  ;;  %v3972_v60 = vld [vmem:[#allocation2 + $0x30] sm:$0xff] }
 0x485   : > { %v4057_v29 = vld [vmem:[#allocation2 + $0xc9] sm:$0xff] }
 0x486   : > { %3952 = vst.msk [vmem:[#allocation2 + $0xd9] sm:$0xff] %vm278_vm0, %v3920_v45  ;;  %v3698_v31 = vsub.f32 0.0, %v9198_v39  ;;  %v4093_v17 = vpack.c.bf16 %v4057_v29, %v4057_v29  ;;  %v3567_v45 = vpop.f32.mrf.mxu0 }
 0x488   : > { %v6824_v18 = vpop.eup %6823  ;;  %v3749_v47 = vmul.f32 1.442695, %v3698_v31  ;;  %v4313_v43 = vunpack.c.l.b16 %v4093_v17 }
 0x489   : > { %v6826_v40 = vpop.eup %6825  ;;  %v3793_v11 = vadd.f32 1.0, %v6824_v18 }
 0x48a   : > { %v3856_v24 = vmul.f32 %v6826_v40, %v9148_v28  ;;  %6827 = vpow2.f32 %v3749_v47  ;;  %v9210_v27 = vpack.c.b16 %v4313_v43, %v4312_v21  ;;  %v3478_v23 = vpop.f32.mrf.mxu3  ;;  %v4008_v47 = vpack.c.bf16 %v3972_v60, %v3972_v60  ;;  %v3975_v60 = vld [vmem:[#allocation2 + $0x50] sm:$0xff] }
 0x48b   : > { %6829 = vrcp.f32 %v3793_v11  ;;  %v3649_v54 = vpop.f32.mrf.mxu1  ;;  %v4221_v21 = vunpack.c.l.b16 %v4009_v5 }
 0x48c   : > { %v3921_v58 = vadd.f32 %v6265_v14, %v3856_v24  ;;  %v9213_v22 = vadd.f32 %v3649_v54, %v3561_v61  ;;  %4360 = vrot.lane.b32.xlu1 %v9210_v27, %s7077_s18  ;;  %v6267_v14 = vld [vmem:[%s7174_s17 + $0xf9] sm:$0xff] }
 0x48d   : > { %v4058_v2 = vld [vmem:[#allocation2 + $0xd9] sm:$0xff] }
 0x48e   : > { %3953 = vst.msk [vmem:[#allocation2 + $0xe1] sm:$0xff] %vm278_vm0, %v3921_v58  ;;  %v3699_v28 = vsub.f32 0.0, %v9213_v22  ;;  %v4094_v4 = vpack.c.bf16 %v4058_v2, %v4058_v2  ;;  %v3570_v2 = vpop.f32.mrf.mxu0 }
 0x490   : > { %v6828_v36 = vpop.eup %6827  ;;  %v3751_v10 = vmul.f32 1.442695, %v3699_v28  ;;  %v4314_v17 = vunpack.c.l.b16 %v4094_v4 }
 0x491   : > { %v6830_v34 = vpop.eup %6829  ;;  %v3794_v62 = vadd.f32 1.0, %v6828_v36  ;;  %v4220_v36 = vunpack.c.l.b16 %v4008_v47 }
 0x492   : > { %v3857_v25 = vmul.f32 %v6830_v34, %v9175_v3  ;;  %6831 = vpow2.f32 %v3751_v10  ;;  %v3477_v3 = vadd.f32 %v3476_v55, %v3388_v20  ;;  %v10144_v55 = vld [vmem:[#allocation9_spill] sm:$0xff]  ;;  %v3481_v30 = vpop.f32.mrf.mxu3  ;;  %v9254_v34 = vpop.f32.mrf.mxu2 }
 0x493   : > { %6833 = vrcp.f32 %v3794_v62  ;;  %v3651_v8 = vpop.f32.mrf.mxu1  ;;  %v3301_v40 = vadd.f32 %v9191_v44, %v10144_v55  ;;  %v9249_v10 = vpack.c.b16 %v4221_v21, %v4220_v36 }
 0x494   : > { %v3922_v6 = vadd.f32 %v6266_v7, %v3857_v25  ;;  %v9224_v1 = vadd.f32 %v3651_v8, %v3563_v51  ;;  %v3566_v24 = vadd.f32 %v3565_v41, %v3477_v3 }
 0x495   : > { %v4059_v19 = vld [vmem:[#allocation2 + $0xe1] sm:$0xff]  ;;  %v3390_v49 = vadd.f32 %v9127_v33, %v3301_v40  ;;  %v6540_v33 = vld [vmem:[%s10084_s5 + $0xb8] sm:$0xff]  ;;  %v4010_v40 = vpack.c.bf16 %v3974_v56, %v3974_v56 }
 0x496   : > { %3954 = vst.msk [vmem:[#allocation2 + $0xf1] sm:$0xff] %vm278_vm0, %v3922_v6  ;;  %v3700_v53 = vsub.f32 0.0, %v9224_v1  ;;  %v4095_v29 = vpack.c.bf16 %v4059_v19, %v4059_v19  ;;  %5258 = vmatpush.bf16.msrb.mxu0 %v6540_v33  ;;  %v10145_v6 = vld [vmem:[#allocation16_spill] sm:$0xff] }
 0x497   : > { %v3304_v4 = vadd.f32 %v9191_v44, %v10145_v6  ;;  %v4222_v33 = vunpack.c.l.b16 %v4010_v40 }
 0x498   : > { %v6832_v16 = vpop.eup %6831  ;;  %v3753_v31 = vmul.f32 1.442695, %v3700_v53  ;;  %v4315_v18 = vunpack.c.l.b16 %v4095_v29 }
 0x499   : > { %v6834_v43 = vpop.eup %6833  ;;  %v3795_v11 = vadd.f32 1.0, %v6832_v16  ;;  %v3393_v52 = vadd.f32 %v9158_v32, %v3304_v4  ;;  %v6269_v32 = vld [vmem:[%s7174_s17 + $0x111] sm:$0xff] }
 0x49a   : > { %v3858_v0 = vmul.f32 %v6834_v43, %v9198_v39  ;;  %6835 = vpow2.f32 %v3753_v31  ;;  %v9240_v61 = vpack.c.b16 %v4315_v18, %v4314_v17  ;;  %v3479_v39 = vadd.f32 %v3478_v23, %v3390_v49  ;;  %v6268_v23 = vld [vmem:[%s7174_s17 + $0x109] sm:$0xff] }
 0x49b   : > { %6837 = vrcp.f32 %v3795_v11  ;;  %v3654_v54 = vpop.f32.mrf.mxu1  ;;  %v4011_v31 = vpack.c.bf16 %v3975_v60, %v3975_v60  ;;  %v3482_v17 = vadd.f32 %v3481_v30, %v3393_v52  ;;  %v9267_v11 = vpop.f32.mrf.mxu2  ;;  %v10148_v52 = vld [vmem:[#allocation11_spill] sm:$0xff] }
 0x49c   : > { %v3923_v58 = vadd.f32 %v6267_v14, %v3858_v0  ;;  %v9243_v28 = vadd.f32 %v3654_v54, %v3566_v24  ;;  %4362 = vrot.lane.b32.xlu2 %v9240_v61, %s7077_s18  ;;  %v3568_v20 = vadd.f32 %v3567_v45, %v3479_v39  ;;  %v3572_v0 = vpop.f32.mrf.mxu0 }
 0x49d   : > { %v4060_v50 = vld [vmem:[#allocation2 + $0xf1] sm:$0xff]  ;;  %v4223_v49 = vunpack.c.l.b16 %v4011_v31  ;;  %v3571_v36 = vadd.f32 %v3570_v2, %v3482_v17 }
 0x49e   : > { %3955 = vst.msk [vmem:[#allocation2 + $0xf9] sm:$0xff] %vm278_vm0, %v3923_v58  ;;  %v3701_v41 = vsub.f32 0.0, %v9243_v28  ;;  %v4349_v7 = vpop.permute.xlu1 %4348  ;;  %v4096_v53 = vpack.c.bf16 %v4060_v50, %v4060_v50  ;;  %v10146_v58 = vld [vmem:[#allocation17_spill] sm:$0xff] }
 0x49f   : > { %v4564_v35 = vsel %vm278_vm0, %v9249_v10, %v4349_v7  ;;  %v3306_v30 = vadd.f32 %v9191_v44, %v10146_v58 }
 0x4a0   : > { %v6836_v62 = vpop.eup %6835  ;;  %v3755_v57 = vmul.f32 1.442695, %v3701_v41  ;;  %5098 = vmatmul.bf16.gmra.mxu2 %v4564_v35  ;;  %5355 = vmatmul.bf16.vlgmr.msrb.gmra.mxu1 %v4564_v35  ;;  %v4316_v43 = vunpack.c.l.b16 %v4096_v53 }
 0x4a1   : > { %v6838_v25 = vpop.eup %6837  ;;  %v3796_v51 = vadd.f32 1.0, %v6836_v62  ;;  %v3395_v7 = vadd.f32 %v9186_v9, %v3306_v30  ;;  %v4351_v62 = vpop.permute.xlu2 %4350  ;;  %v6270_v9 = vld [vmem:[%s7174_s17 + $0x121] sm:$0xff] }
 0x4a2   : > { %v3859_v8 = vmul.f32 %v6838_v25, %v9213_v22  ;;  %6839 = vpow2.f32 %v3755_v57  ;;  %v3483_v22 = vpop.f32.mrf.mxu3  ;;  %v9281_v57 = vpack.c.b16 %v4223_v49, %v4222_v33 }
 0x4a3   : > { %6841 = vrcp.f32 %v3796_v51  ;;  %v3656_v19 = vpop.f32.mrf.mxu1  ;;  %v3484_v35 = vadd.f32 %v3483_v22, %v3395_v7  ;;  %v3977_v22 = vld [vmem:[#allocation2 + $0x68] sm:$0xff] }
 0x4a4   : > { %v3924_v5 = vadd.f32 %v6268_v23, %v3859_v8  ;;  %v9262_v3 = vadd.f32 %v3656_v19, %v3568_v20  ;;  %v10147_v23 = vld [vmem:[#allocation15_spill] sm:$0xff]  ;;  %v4568_v8 = vsel %vm278_vm0, %v9281_v57, %v4351_v62  ;;  %v4013_v40 = vpack.c.bf16 %v3977_v22, %v3977_v22  ;;  %v10149_v62 = vld [vmem:[#allocation12_spill] sm:$0xff] }
 0x4a5   : > { %v4061_v29 = vld [vmem:[#allocation2 + $0xf9] sm:$0xff]  ;;  %v3319_v51 = vadd.f32 %v9191_v44, %v10147_v23  ;;  %v3573_v56 = vadd.f32 %v3572_v0, %v3484_v35  ;;  %v3311_v35 = vadd.f32 %v9191_v44, %v10149_v62 }
 0x4a6   : > { %3956 = vst.msk [vmem:[#allocation2 + $0x109] sm:$0xff] %vm278_vm0, %v3924_v5  ;;  %v3702_v45 = vsub.f32 0.0, %v9262_v3  ;;  %v4097_v16 = vpack.c.bf16 %v4061_v29, %v4061_v29  ;;  %v3309_v29 = vadd.f32 %v9191_v44, %v10148_v52  ;;  %v4225_v7 = vunpack.c.l.b16 %v4013_v40 }
 0x4a8   : > { %v6840_v18 = vpop.eup %6839  ;;  %v3757_v47 = vmul.f32 1.442695, %v3702_v45  ;;  %v4317_v55 = vunpack.c.l.b16 %v4097_v16  ;;  %v3575_v45 = vpop.f32.mrf.mxu0 }
 0x4a9   : > { %v6842_v14 = vpop.eup %6841  ;;  %v3797_v21 = vadd.f32 1.0, %v6840_v18  ;;  %v3398_v18 = vadd.f32 %v9208_v59, %v3309_v29  ;;  %v6271_v59 = vld [vmem:[%s7174_s17 + $0x129] sm:$0xff] }
 0x4aa   : > { %v3860_v24 = vmul.f32 %v6842_v14, %v9224_v1  ;;  %6843 = vpow2.f32 %v3757_v47  ;;  %v9271_v54 = vpack.c.b16 %v4317_v55, %v4316_v43  ;;  %v3486_v50 = vpop.f32.mrf.mxu3 }
 0x4ab   : > { %6845 = vrcp.f32 %v3797_v21  ;;  %v3659_v41 = vpop.f32.mrf.mxu1  ;;  %v3487_v14 = vadd.f32 %v3486_v50, %v3398_v18  ;;  %v6531_v21 = vld [vmem:[%s10084_s5 + $0x70] sm:$0xff] }
 0x4ac   : > { %v3925_v39 = vadd.f32 %v6269_v32, %v3860_v24  ;;  %4364 = vrot.lane.b32.xlu0 %v9271_v54, %s7077_s18  ;;  %v9278_v1 = vadd.f32 %v3659_v41, %v3571_v36  ;;  %5170 = vmatpush.bf16.msrb.mxu3 %v6531_v21  ;;  %v3978_v21 = vld [vmem:[#allocation2 + $0x78] sm:$0xff] }
 0x4ad   : > { %v4062_v60 = vld [vmem:[#allocation2 + $0x109] sm:$0xff] }
 0x4ae   : > { %3957 = vst.msk [vmem:[#allocation2 + $0x111] sm:$0xff] %vm278_vm0, %v3925_v39  ;;  %v3703_v25 = vsub.f32 0.0, %v9278_v1  ;;  %v4098_v17 = vpack.c.bf16 %v4062_v60, %v4062_v60  ;;  %v6539_v60 = vld [vmem:[%s10084_s5 + $0xb0] sm:$0xff] }
 0x4af   : > { %5259 = vmatpush.bf16.msrb.mxu0 %v6539_v60 }
 0x4b0   : > { %v6844_v2 = vpop.eup %6843  ;;  %v3759_v4 = vmul.f32 1.442695, %v3703_v25  ;;  %5103 = vmatmul.bf16.gmra.mxu2 %v4568_v8  ;;  %5360 = vmatmul.bf16.gmra.mxu1 %v4568_v8  ;;  %v4318_v0 = vunpack.c.l.b16 %v4098_v17  ;;  %v3400_v8 = vadd.f32 %v9226_v37, %v3311_v35 }
 0x4b1   : > { %v6846_v20 = vpop.eup %6845  ;;  %v3798_v6 = vadd.f32 1.0, %v6844_v2  ;;  %v3576_v2 = vadd.f32 %v3575_v45, %v3487_v14  ;;  %v6272_v45 = vld [vmem:[%s7174_s17 + $0x139] sm:$0xff] }
 0x4b2   : > { %v3407_v19 = vpop.f32.mrf.mxu2  ;;  %v3861_v5 = vmul.f32 %v6846_v20, %v9243_v28  ;;  %v3976_v28 = vld [vmem:[#allocation2 + $0x60] sm:$0xff]  ;;  %v3488_v41 = vpop.f32.mrf.mxu3 }
 0x4b3   : > { %v9290_v53 = vadd.f32 %v3407_v19, %v3319_v51  ;;  %6847 = vrcp.f32 %v3798_v6  ;;  %v3661_v31 = vpop.f32.mrf.mxu1  ;;  %v4012_v49 = vpack.c.bf16 %v3976_v28, %v3976_v28  ;;  %v3577_v20 = vpop.f32.mrf.mxu0  ;;  %v3489_v6 = vadd.f32 %v3488_v41, %v3400_v8 }
 0x4b4   : > { %v3926_v16 = vadd.f32 %v6270_v9, %v3861_v5  ;;  %6849 = vpow2.f32 %v3759_v4  ;;  %v9295_v47 = vadd.f32 %v3661_v31, %v3573_v56  ;;  %v3979_v31 = vld [vmem:[#allocation2 + $0x80] sm:$0xff] }
 0x4b5   : > { %v4063_v43 = vld [vmem:[#allocation2 + $0x111] sm:$0xff]  ;;  %v4224_v50 = vunpack.c.l.b16 %v4012_v49 }
 0x4b6   : > { %3958 = vst.msk [vmem:[#allocation2 + $0x121] sm:$0xff] %vm278_vm0, %v3926_v16  ;;  %v4099_v55 = vpack.c.bf16 %v4063_v43, %v4063_v43  ;;  %v3704_v32 = vsub.f32 0.0, %v9295_v47  ;;  %v3578_v16 = vadd.f32 %v3577_v20, %v3489_v6  ;;  %v10151_v6 = vld [vmem:[#allocation14_spill] sm:$0xff] }
 0x4b7   : > { %v9314_v9 = vpack.c.b16 %v4225_v7, %v4224_v50 }
 0x4b8   : > { %v4319_v24 = vunpack.c.l.b16 %v4099_v55  ;;  %v3761_v30 = vmul.f32 1.442695, %v3704_v32  ;;  %v10150_v55 = vld [vmem:[#allocation13_spill] sm:$0xff] }
 0x4b9   : > { %v6848_v58 = vpop.eup %6847  ;;  %v3314_v40 = vadd.f32 %v9191_v44, %v10150_v55 }
 0x4ba   : > { %v6850_v36 = vpop.eup %6849  ;;  %v3862_v39 = vmul.f32 %v6848_v58, %v9262_v3  ;;  %v9304_v33 = vpack.c.b16 %v4319_v24, %v4318_v0  ;;  %6851 = vpow2.f32 %v3761_v30  ;;  %v3491_v18 = vpop.f32.mrf.mxu3  ;;  %v4015_v58 = vpack.c.bf16 %v3979_v31, %v3979_v31 }
 0x4bb   : > { %v3799_v25 = vadd.f32 1.0, %v6850_v36  ;;  %v3664_v51 = vpop.f32.mrf.mxu1 }
 0x4bc   : > { %v3927_v23 = vadd.f32 %v6271_v59, %v3862_v39  ;;  %4366 = vrot.lane.b32.xlu1 %v9304_v33, %s7077_s18  ;;  %v9311_v3 = vadd.f32 %v3664_v51, %v3576_v2  ;;  %v3580_v24 = vpop.f32.mrf.mxu0  ;;  %v3403_v59 = vadd.f32 %v9254_v34, %v3314_v40  ;;  %v4014_v39 = vpack.c.bf16 %v3978_v21, %v3978_v21  ;;  %v3981_v21 = vld [vmem:[#allocation2 + $0x98] sm:$0xff] }
 0x4bd   : > { %6853 = vrcp.f32 %v3799_v25  ;;  %v4064_v29 = vld [vmem:[#allocation2 + $0x121] sm:$0xff]  ;;  %v4227_v51 = vunpack.c.l.b16 %v4015_v58 }
 0x4be   : > { %3959 = vst.msk [vmem:[#allocation2 + $0x129] sm:$0xff] %vm278_vm0, %v3927_v23  ;;  %v3705_v4 = vsub.f32 0.0, %v9311_v3  ;;  %v4353_v19 = vpop.permute.xlu0 %4352  ;;  %v4100_v28 = vpack.c.bf16 %v4064_v29, %v4064_v29  ;;  %v3492_v7 = vadd.f32 %v3491_v18, %v3403_v59  ;;  %v6273_v25 = vld [vmem:[%s7174_s17 + $0x141] sm:$0xff]  ;;  %v4226_v20 = vunpack.c.l.b16 %v4014_v39  ;;  %v3980_v59 = vld [vmem:[#allocation2 + $0x90] sm:$0xff] }
 0x4bf   : > { %v4572_v37 = vsel %vm278_vm0, %v9314_v9, %v4353_v19  ;;  %v4116_v39 = vld [vmem:[#allocation2 + $0x32] sm:$0xff] }
 0x4c0   : > { %v6852_v5 = vpop.eup %6851  ;;  %v3763_v52 = vmul.f32 1.442695, %v3705_v4  ;;  %5108 = vmatmul.bf16.gmra.mxu2 %v4572_v37  ;;  %5365 = vmatmul.bf16.gmra.mxu1 %v4572_v37  ;;  %v4320_v30 = vunpack.c.l.b16 %v4100_v28  ;;  %v3581_v8 = vadd.f32 %v3580_v24, %v3492_v7  ;;  %v3316_v4 = vadd.f32 %v9191_v44, %v10151_v6  ;;  %v6551_v44 = vld [vmem:[%s10084_s5 + $0x110] sm:$0xff] }
 0x4c1   : > { %v3800_v56 = vadd.f32 1.0, %v6852_v5  ;;  %v9341_v5 = vpack.c.b16 %v4227_v51, %v4226_v20  ;;  %5441 = vmatpush.bf16.msrb.mxu2 %v6551_v44  ;;  %v4016_v7 = vpack.c.bf16 %v3980_v59, %v3980_v59  ;;  %v6275_v51 = vld [vmem:[%s7174_s17 + $0x159] sm:$0xff]  ;;  %v4123_v59 = vld [vmem:[#allocation2 + $0x82] sm:$0xff] }
 0x4c2   : > { %6855 = vpow2.f32 %v3763_v52  ;;  %v3493_v37 = vpop.f32.mrf.mxu3 }
 0x4c3   : > { %v6854_v22 = vpop.eup %6853  ;;  %6857 = vrcp.f32 %v3800_v56  ;;  %v3666_v43 = vpop.f32.mrf.mxu1  ;;  %v6530_v56 = vld [vmem:[%s10084_s5 + $0x68] sm:$0xff] }
 0x4c4   : > { %v3863_v17 = vmul.f32 %v6854_v22, %v9278_v1  ;;  %v9326_v14 = vadd.f32 %v3666_v43, %v3578_v16  ;;  %v3582_v22 = vpop.f32.mrf.mxu0  ;;  %v6274_v43 = vld [vmem:[%s7174_s17 + $0x151] sm:$0xff]  ;;  %5171 = vmatpush.bf16.msrb.mxu3 %v6530_v56 }
 0x4c5   : > { %v4065_v32 = vld [vmem:[#allocation2 + $0x129] sm:$0xff] }
 0x4c6   : > { %v3928_v0 = vadd.f32 %v6272_v45, %v3863_v17  ;;  %v4101_v49 = vpack.c.bf16 %v4065_v32, %v4065_v32  ;;  %v3706_v1 = vsub.f32 0.0, %v9326_v14 }
 0x4c8   : > { %3960 = vst.msk [vmem:[#allocation2 + $0x139] sm:$0xff] %vm278_vm0, %v3928_v0  ;;  %v4321_v36 = vunpack.c.l.b16 %v4101_v49  ;;  %v6856_v41 = vpop.eup %6855  ;;  %v3765_v62 = vmul.f32 1.442695, %v3706_v1 }
 0x4c9   : > { %v6858_v35 = vpop.eup %6857  ;;  %v3801_v2 = vadd.f32 1.0, %v6856_v41  ;;  %v4117_v41 = vld [vmem:[#allocation2 + $0x3a] sm:$0xff] }
 0x4ca   : > { %v9332_v23 = vpack.c.b16 %v4321_v36, %v4320_v30  ;;  %v3864_v50 = vmul.f32 %v6858_v35, %v9295_v47  ;;  %6859 = vpow2.f32 %v3765_v62  ;;  %v3405_v47 = vadd.f32 %v9267_v11, %v3316_v4  ;;  %v6538_v11 = vld [vmem:[%s10084_s5 + $0xa8] sm:$0xff] }
 0x4cb   : > { %6861 = vrcp.f32 %v3801_v2  ;;  %v3669_v34 = vpop.f32.mrf.mxu1  ;;  %5260 = vmatpush.bf16.msrb.mxu0 %v6538_v11  ;;  %v4017_v30 = vpack.c.bf16 %v3981_v21, %v3981_v21  ;;  %v4153_v20 = vpack.c.bf16 %v4117_v41, %v4117_v41 }
 0x4cc   : > { %4368 = vrot.lane.b32.xlu2 %v9332_v23, %s7077_s18  ;;  %v3929_v19 = vadd.f32 %v6273_v25, %v3864_v50  ;;  %v9339_v60 = vadd.f32 %v3669_v34, %v3581_v8  ;;  %v3494_v31 = vadd.f32 %v3493_v37, %v3405_v47  ;;  %v4152_v34 = vpack.c.bf16 %v4116_v39, %v4116_v39  ;;  %v4357_v47 = vpop.permute.xlu2 %4356 }
 0x4cd   : > { %v4229_v8 = vunpack.c.l.b16 %v4017_v30  ;;  %v4413_v56 = vunpack.c.l.b16 %v4153_v20 }
 0x4ce   : > { %3961 = vst.msk [vmem:[#allocation2 + $0x141] sm:$0xff] %vm278_vm0, %v3929_v19  ;;  %v3707_v52 = vsub.f32 0.0, %v9339_v60  ;;  %v4355_v29 = vpop.permute.xlu1 %4354  ;;  %v3583_v32 = vadd.f32 %v3582_v22, %v3494_v31  ;;  %v4228_v19 = vunpack.c.l.b16 %v4016_v7  ;;  %v6277_v7 = vld [vmem:[%s7174_s17 + $0x171] sm:$0xff] }
 0x4cf   : > { %v4576_v45 = vsel %vm278_vm0, %v9341_v5, %v4355_v29  ;;  %v4066_v55 = vld [vmem:[#allocation2 + $0x139] sm:$0xff] }
 0x4d0   : > { %v6860_v16 = vpop.eup %6859  ;;  %v3767_v17 = vmul.f32 1.442695, %v3707_v52  ;;  %5113 = vmatmul.bf16.gmra.mxu2 %v4576_v45  ;;  %5370 = vmatmul.bf16.gmra.mxu1 %v4576_v45  ;;  %v4102_v58 = vpack.c.bf16 %v4066_v55, %v4066_v55  ;;  %v6529_v52 = vld [vmem:[%s10084_s5 + $0x60] sm:$0xff]  ;;  %v9376_v29 = vpack.c.b16 %v4229_v8, %v4228_v19  ;;  %v6276_v45 = vld [vmem:[%s7174_s17 + $0x169] sm:$0xff] }
 0x4d1   : > { %v6862_v18 = vpop.eup %6861  ;;  %v3802_v28 = vadd.f32 1.0, %v6860_v16  ;;  %5172 = vmatpush.bf16.msrb.mxu3 %v6529_v52  ;;  %v3982_v55 = vld [vmem:[#allocation2 + $0xa8] sm:$0xff] }
 0x4d2   : > { %v3865_v40 = vmul.f32 %v6862_v18, %v9311_v3  ;;  %6863 = vpow2.f32 %v3767_v17  ;;  %v4322_v25 = vunpack.c.l.b16 %v4102_v58  ;;  %v3983_v18 = vld [vmem:[#allocation2 + $0xb0] sm:$0xff]  ;;  %v4122_v58 = vld [vmem:[#allocation2 + $0x7a] sm:$0xff] }
 0x4d3   : > { %6865 = vrcp.f32 %v3802_v28  ;;  %v3671_v0 = vpop.f32.mrf.mxu1  ;;  %v4019_v21 = vpack.c.bf16 %v3983_v18, %v3983_v18  ;;  %v4129_v18 = vld [vmem:[#allocation2 + $0xca] sm:$0xff] }
 0x4d4   : > { %2687 = vrot.lane.b32.xlu2 %v9041_v12, %s7077_s18  ;;  %v3930_v24 = vadd.f32 %v6274_v43, %v3865_v40  ;;  %v9361_v49 = vadd.f32 %v3671_v0, %v3583_v32  ;;  %v6537_v40 = vld [vmem:[%s10084_s5 + $0xa0] sm:$0xff] }
 0x4d5   : > { %v4067_v1 = vld [vmem:[#allocation2 + $0x141] sm:$0xff]  ;;  %v2228_v0 = vld [vmem:[#allocation2 + $0x199] sm:$0xff]  ;;  %5261 = vmatpush.bf16.msrb.mxu0 %v6537_v40  ;;  %v4118_v40 = vld [vmem:[#allocation2 + $0x4a] sm:$0xff] }
 0x4d6   : > { %3962 = vst.msk [vmem:[#allocation2 + $0x151] sm:$0xff] %vm278_vm0, %v3930_v24  ;;  %v3708_v3 = vsub.f32 0.0, %v9361_v49  ;;  %v4103_v36 = vpack.c.bf16 %v4067_v1, %v4067_v1  ;;  %v2229_v24 = vld [vmem:[#allocation2 + $0x1a1] sm:$0xff]  ;;  %v4018_v1 = vpack.c.bf16 %v3982_v55, %v3982_v55 }
 0x4d7   : > { %v2265_v39 = vpack.c.bf16 %v2229_v24, %v2229_v24  ;;  %v4115_v55 = vld [vmem:[#allocation2 + $0x22] sm:$0xff] }
 0x4d8   : > { %v6864_v62 = vpop.eup %6863  ;;  %v3769_v35 = vmul.f32 1.442695, %v3708_v3  ;;  %v4323_v12 = vunpack.c.l.b16 %v4103_v36  ;;  %v2264_v36 = vpack.c.bf16 %v2228_v0, %v2228_v0 }
 0x4d9   : > { %v6866_v2 = vpop.eup %6865  ;;  %v3803_v50 = vadd.f32 1.0, %v6864_v62  ;;  %v4231_v62 = vunpack.c.l.b16 %v4019_v21 }
 0x4da   : > { %v3866_v6 = vmul.f32 %v6866_v2, %v9326_v14  ;;  %6867 = vpow2.f32 %v3769_v35  ;;  %v9367_v4 = vpack.c.b16 %v4323_v12, %v4322_v25  ;;  %v4412_v14 = vunpack.c.l.b16 %v4152_v34 }
 0x4db   : > { %6869 = vrcp.f32 %v3803_v50  ;;  %v4158_v35 = vpack.c.bf16 %v4122_v58, %v4122_v58  ;;  %v4159_v25 = vpack.c.bf16 %v4123_v59, %v4123_v59  ;;  %v2696_v8 = vunpack.c.l.b16 %v2264_v36 }
 0x4dc   : > { %4461 = vrot.lane.b32.xlu2 %v9156_v15, %s7077_s18  ;;  %v3931_v37 = vadd.f32 %v6275_v51, %v3866_v6  ;;  %4370 = vrot.lane.b32.xlu0 %v9367_v4, %s7077_s18  ;;  %v4580_v15 = vsel %vm278_vm0, %v9376_v29, %v4357_v47  ;;  %v9382_v16 = vpack.c.b16 %v4413_v56, %v4412_v14  ;;  %v4230_v51 = vunpack.c.l.b16 %v4018_v1  ;;  %v3985_v14 = vld [vmem:[#allocation2 + $0xc8] sm:$0xff] }
 0x4dd   : > { %v4068_v31 = vld [vmem:[#allocation2 + $0x151] sm:$0xff]  ;;  %v2697_v34 = vunpack.c.l.b16 %v2265_v39  ;;  %v4418_v6 = vunpack.c.l.b16 %v4158_v35  ;;  %v4419_v19 = vunpack.c.l.b16 %v4159_v25  ;;  %v4165_v59 = vpack.c.bf16 %v4129_v18, %v4129_v18 }
 0x4de   : > { %3963 = vst.msk [vmem:[#allocation2 + $0x159] sm:$0xff] %vm278_vm0, %v3931_v37  ;;  %v4104_v28 = vpack.c.bf16 %v4068_v31, %v4068_v31  ;;  %v4255_v20 = vpack.c.b16 %v4231_v62, %v4230_v51  ;;  %v4114_v31 = vld [vmem:[#allocation2 + $0x1a] sm:$0xff] }
 0x4df   : > { %v2698_v47 = vpack.c.b16 %v2697_v34, %v2696_v8  ;;  %v9401_v52 = vpack.c.b16 %v4419_v19, %v4418_v6  ;;  %v4425_v62 = vunpack.c.l.b16 %v4165_v59  ;;  %v3989_v8 = vld [vmem:[#allocation2 + $0xf8] sm:$0xff]  ;;  %v3988_v6 = vld [vmem:[#allocation2 + $0xf0] sm:$0xff] }
 0x4e0   : > { %v6868_v44 = vpop.eup %6867  ;;  %5118 = vmatmul.bf16.gmra.mxu2 %v4580_v15  ;;  %5375 = vmatmul.bf16.gmra.mxu1 %v4580_v15  ;;  %v4324_v30 = vunpack.c.l.b16 %v4104_v28  ;;  %v3984_v15 = vld [vmem:[#allocation2 + $0xc0] sm:$0xff] }
 0x4e1   : > { %v6870_v22 = vpop.eup %6869  ;;  %v3804_v11 = vadd.f32 1.0, %v6868_v44  ;;  %v6528_v44 = vld [vmem:[%s10084_s5 + $0x58] sm:$0xff]  ;;  %v4020_v28 = vpack.c.bf16 %v3984_v15, %v3984_v15 }
 0x4e2   : > { %v3867_v17 = vmul.f32 %v6870_v22, %v9339_v60  ;;  %5173 = vmatpush.bf16.msrb.mxu3 %v6528_v44  ;;  %v6536_v15 = vld [vmem:[%s10084_s5 + $0x98] sm:$0xff] }
 0x4e3   : > { %6871 = vrcp.f32 %v3804_v11  ;;  %v4232_v39 = vunpack.c.l.b16 %v4020_v28  ;;  %5262 = vmatpush.bf16.msrb.mxu0 %v6536_v15  ;;  %v4121_v28 = vld [vmem:[#allocation2 + $0x6a] sm:$0xff] }
 0x4e4   : > { %4505 = vrot.lane.b32.xlu2 %v9382_v16, %s7077_s18  ;;  %v3932_v43 = vadd.f32 %v6276_v45, %v3867_v17  ;;  %v4021_v45 = vpack.c.bf16 %v3985_v14, %v3985_v14  ;;  %v4128_v17 = vld [vmem:[#allocation2 + $0xc2] sm:$0xff]  ;;  %v4024_v14 = vpack.c.bf16 %v3988_v6, %v3988_v6  ;;  %v4157_v59 = vpack.c.bf16 %v4121_v28, %v4121_v28  ;;  %v3994_v6 = vld [vmem:[#allocation2 + $0x138] sm:$0xff] }
 0x4e5   : > { %v4069_v32 = vld [vmem:[#allocation2 + $0x159] sm:$0xff]  ;;  %v4164_v58 = vpack.c.bf16 %v4128_v17, %v4128_v17  ;;  %v4131_v28 = vld [vmem:[#allocation2 + $0xe2] sm:$0xff] }
 0x4e6   : > { %3964 = vst.msk [vmem:[#allocation2 + $0x169] sm:$0xff] %vm278_vm0, %v3932_v43  ;;  %v4105_v60 = vpack.c.bf16 %v4069_v32, %v4069_v32  ;;  %v9409_v43 = vpop.f32.mrf.mxu2  ;;  %v4119_v32 = vld [vmem:[#allocation2 + $0x52] sm:$0xff]  ;;  %v4233_v24 = vunpack.c.l.b16 %v4021_v45  ;;  %v4120_v45 = vld [vmem:[#allocation2 + $0x62] sm:$0xff]  ;;  %v4236_v17 = vunpack.c.l.b16 %v4024_v14  ;;  %v4030_v14 = vpack.c.bf16 %v3994_v6, %v3994_v6 }
 0x4e7   : > { %v4155_v36 = vpack.c.bf16 %v4119_v32, %v4119_v32 }
 0x4e8   : > { %v4325_v3 = vunpack.c.l.b16 %v4105_v60  ;;  %v4150_v60 = vpack.c.bf16 %v4114_v31, %v4114_v31  ;;  %v4135_v31 = vld [vmem:[#allocation2 + $0x112] sm:$0xff] }
 0x4e9   : > { %v6872_v41 = vpop.eup %6871 }
 0x4ea   : > { %v3868_v12 = vmul.f32 %v6872_v41, %v9361_v49  ;;  %v9393_v2 = vpack.c.b16 %v4325_v3, %v4324_v30  ;;  %v4151_v30 = vpack.c.bf16 %v4115_v55, %v4115_v55  ;;  %v4154_v3 = vpack.c.bf16 %v4118_v40, %v4118_v40  ;;  %v4124_v55 = vld [vmem:[#allocation2 + $0x92] sm:$0xff]  ;;  %v4125_v40 = vld [vmem:[#allocation2 + $0x9a] sm:$0xff] }
 0x4eb   : > { %v9418_v41 = vpack.c.b16 %v4233_v24, %v4232_v39  ;;  %v4410_v25 = vunpack.c.l.b16 %v4150_v60  ;;  %v4171_v60 = vpack.c.bf16 %v4135_v31, %v4135_v31  ;;  %v4242_v31 = vunpack.c.l.b16 %v4030_v14 }
 0x4ec   : > { %4467 = vrot.lane.b32.xlu2 %v9314_v9, %s7077_s18  ;;  %v3933_v50 = vadd.f32 %v6277_v7, %v3868_v12  ;;  %4372 = vrot.lane.b32.xlu1 %v9393_v2, %s7077_s18  ;;  %v4424_v7 = vunpack.c.l.b16 %v4164_v58  ;;  %v4411_v12 = vunpack.c.l.b16 %v4151_v30  ;;  %v4414_v51 = vunpack.c.l.b16 %v4154_v3 }
 0x4ed   : > { %v4070_v9 = vld [vmem:[#allocation2 + $0x169] sm:$0xff]  ;;  %v4156_v58 = vpack.c.bf16 %v4120_v45, %v4120_v45  ;;  %v4160_v30 = vpack.c.bf16 %v4124_v55, %v4124_v55  ;;  %v4161_v3 = vpack.c.bf16 %v4125_v40, %v4125_v40  ;;  %v4141_v45 = vld [vmem:[#allocation2 + $0x15a] sm:$0xff] }
 0x4ee   : > { %3965 = vst.msk [vmem:[#allocation2 + $0x171] sm:$0xff] %vm278_vm0, %v3933_v50  ;;  %v4359_v37 = vpop.permute.xlu0 %4358  ;;  %v4106_v56 = vpack.c.bf16 %v4070_v9, %v4070_v9  ;;  %v4415_v50 = vunpack.c.l.b16 %v4155_v36  ;;  %v9420_v34 = vpop.f32.mrf.mxu2  ;;  %v9427_v19 = vpack.c.b16 %v4425_v62, %v4424_v7  ;;  %v3987_v9 = vld [vmem:[#allocation2 + $0xe0] sm:$0xff] }
 0x4ef   : > { %v4584_v49 = vsel %vm278_vm0, %v4255_v20, %v4359_v37  ;;  %v4025_v37 = vpack.c.bf16 %v3989_v8, %v3989_v8  ;;  %v3995_v8 = vld [vmem:[#allocation2 + $0x140] sm:$0xff] }
 0x4f0   : > { %5123 = vmatmul.bf16.gmra.mxu2 %v4584_v49  ;;  %5380 = vmatmul.bf16.gmra.mxu1 %v4584_v49  ;;  %v4326_v21 = vunpack.c.l.b16 %v4106_v56  ;;  %v9429_v49 = vpack.c.b16 %v4411_v12, %v4410_v25  ;;  %v3986_v56 = vld [vmem:[#allocation2 + $0xd8] sm:$0xff]  ;;  %v4416_v25 = vunpack.c.l.b16 %v4156_v58  ;;  %v4417_v12 = vunpack.c.l.b16 %v4157_v59 }
 0x4f1   : > { %v4237_v44 = vunpack.c.l.b16 %v4025_v37  ;;  %v4022_v18 = vpack.c.bf16 %v3986_v56, %v3986_v56  ;;  %v6527_v56 = vld [vmem:[%s10084_s5 + $0x50] sm:$0xff]  ;;  %v4167_v59 = vpack.c.bf16 %v4131_v28, %v4131_v28 }
 0x4f2   : > { %v9460_v37 = vpack.c.b16 %v4417_v12, %v4416_v25  ;;  %5174 = vmatpush.bf16.msrb.mxu3 %v6527_v56  ;;  %v6535_v56 = vld [vmem:[%s10084_s5 + $0x90] sm:$0xff] }
 0x4f3   : > { %v4234_v36 = vunpack.c.l.b16 %v4022_v18  ;;  %v4130_v18 = vld [vmem:[#allocation2 + $0xda] sm:$0xff]  ;;  %5263 = vmatpush.bf16.msrb.mxu0 %v6535_v56  ;;  %v3996_v56 = vld [vmem:[#allocation2 + $0x150] sm:$0xff] }
 0x4f4   : > { %4511 = vrot.lane.b32.xlu2 %v9401_v52, %s7077_s18  ;;  %2701 = vrot.lane.b32.xlu1 %v2698_v47, %s7077_s18  ;;  %v9431_v47 = vpack.c.b16 %v4415_v50, %v4414_v51  ;;  %v4420_v51 = vunpack.c.l.b16 %v4160_v30  ;;  %v4421_v50 = vunpack.c.l.b16 %v4161_v3  ;;  %v4166_v58 = vpack.c.bf16 %v4130_v18, %v4130_v18  ;;  %v6525_v3 = vld [vmem:[%s10084_s5 + $0x40] sm:$0xff] }
 0x4f5   : > { %v4071_v22 = vld [vmem:[#allocation2 + $0x171] sm:$0xff] }
 0x4f6   : > { %v4107_v11 = vpack.c.bf16 %v4071_v22, %v4071_v22  ;;  %v4023_v22 = vpack.c.bf16 %v3987_v9, %v3987_v9  ;;  %v9442_v32 = vpop.f32.mrf.mxu2  ;;  %v4363_v39 = vpop.permute.xlu2 %4362  ;;  %v9462_v9 = vpack.c.b16 %v4421_v50, %v4420_v51  ;;  %v4426_v51 = vunpack.c.l.b16 %v4166_v58 }
 0x4f7   : > { %v4427_v50 = vunpack.c.l.b16 %v4167_v59 }
 0x4f8   : > { %v4327_v0 = vunpack.c.l.b16 %v4107_v11  ;;  %v4134_v11 = vld [vmem:[#allocation2 + $0x10a] sm:$0xff] }
 0x4f9   : > { %v4170_v24 = vpack.c.bf16 %v4134_v11, %v4134_v11  ;;  %v6526_v11 = vld [vmem:[%s10084_s5 + $0x48] sm:$0xff]  ;;  %v9495_v6 = vpack.c.b16 %v4427_v50, %v4426_v51 }
 0x4fa   : > { %v9411_v1 = vpack.c.b16 %v4327_v0, %v4326_v21  ;;  %v9444_v21 = vpack.c.b16 %v4237_v44, %v4236_v17  ;;  %v4235_v0 = vunpack.c.l.b16 %v4023_v22  ;;  %v4126_v44 = vld [vmem:[#allocation2 + $0xaa] sm:$0xff]  ;;  %v4140_v22 = vld [vmem:[#allocation2 + $0x152] sm:$0xff]  ;;  %5175 = vmatpush.bf16.msrb.mxu3 %v6526_v11  ;;  %v4136_v11 = vld [vmem:[#allocation2 + $0x122] sm:$0xff] }
 0x4fb   : > { %v4430_v62 = vunpack.c.l.b16 %v4170_v24  ;;  %v4127_v17 = vld [vmem:[#allocation2 + $0xb2] sm:$0xff]  ;;  %v4162_v40 = vpack.c.bf16 %v4126_v44, %v4126_v44  ;;  %v4177_v24 = vpack.c.bf16 %v4141_v45, %v4141_v45  ;;  %v4133_v45 = vld [vmem:[#allocation2 + $0xfa] sm:$0xff]  ;;  %v4112_v50 = vld [vmem:[#allocation2 + $0x2] sm:$0xff] }
 0x4fc   : > { %10152 = vst [vmem:[#allocation8_spill] sm:$0xff] %v9411_v1  ;;  %4473 = vrot.lane.b32.xlu2 %v4255_v20, %s7077_s18  ;;  %4374 = vrot.lane.b32.xlu0 %v9411_v1, %s7077_s18  ;;  %v9452_v7 = vpack.c.b16 %v4235_v0, %v4234_v36  ;;  %v4176_v0 = vpack.c.bf16 %v4140_v22, %v4140_v22  ;;  %v4132_v22 = vld [vmem:[#allocation2 + $0xf2] sm:$0xff] }
 0x4fd   : > { %4463 = vrot.lane.b32.xlu1 %v9249_v10, %s7077_s18  ;;  %v6550_v10 = vld [vmem:[%s10084_s5 + $0x108] sm:$0xff]  ;;  %v4168_v18 = vpack.c.bf16 %v4132_v22, %v4132_v22  ;;  %v4169_v28 = vpack.c.bf16 %v4133_v45, %v4133_v45  ;;  %v4148_v22 = vpack.c.bf16 %v4112_v50, %v4112_v50 }
 0x4fe   : > { %v4361_v35 = vpop.permute.xlu1 %4360  ;;  %5442 = vmatpush.bf16.msrb.mxu2 %v6550_v10  ;;  %v9456_v10 = vpop.f32.mrf.mxu2  ;;  %5176 = vmatpush.bf16.msrb.mxu3 %v6525_v3 }
 0x4ff   : > { %v4588_v20 = vsel %vm278_vm0, %v9418_v41, %v4361_v35  ;;  %v4431_v35 = vunpack.c.l.b16 %v4171_v60  ;;  %v4163_v60 = vpack.c.bf16 %v4127_v17, %v4127_v17  ;;  %v4428_v59 = vunpack.c.l.b16 %v4168_v18 }
 0x500   : > { %5128 = vmatmul.bf16.gmra.mxu2 %v4588_v20  ;;  %5385 = vmatmul.bf16.gmra.mxu1 %v4588_v20  ;;  %v4592_v20 = vsel %vm278_vm0, %v9452_v7, %v4363_v39  ;;  %v4422_v39 = vunpack.c.l.b16 %v4162_v40  ;;  %v4429_v3 = vunpack.c.l.b16 %v4169_v28  ;;  %v4032_v18 = vpack.c.bf16 %v3996_v56, %v3996_v56 }
 0x501   : > { %v4423_v12 = vunpack.c.l.b16 %v4163_v60 }
 0x504   : > { %4517 = vrot.lane.b32.xlu2 %v9427_v19, %s7077_s18  ;;  %4503 = vrot.lane.b32.xlu0 %v9429_v49, %s7077_s18 }
 0x505   : > { %4507 = vrot.lane.b32.xlu1 %v9431_v47, %s7077_s18 }
 0x506   : > { %v9478_v30 = vpop.f32.mrf.mxu2 }
 0x50c   : > { %4479 = vrot.lane.b32.xlu2 %v9444_v21, %s7077_s18  ;;  %4465 = vrot.lane.b32.xlu0 %v9281_v57, %s7077_s18  ;;  %v9458_v57 = vpack.c.b16 %v4431_v35, %v4430_v62  ;;  %v4436_v62 = vunpack.c.l.b16 %v4176_v0  ;;  %v4437_v35 = vunpack.c.l.b16 %v4177_v24  ;;  %v4172_v0 = vpack.c.bf16 %v4136_v11, %v4136_v11 }
 0x50d   : > { %4469 = vrot.lane.b32.xlu1 %v9341_v5, %s7077_s18  ;;  %v4031_v5 = vpack.c.bf16 %v3995_v8, %v3995_v8  ;;  %v3991_v8 = vld [vmem:[#allocation2 + $0x110] sm:$0xff] }
 0x50f   : > { %v4243_v15 = vunpack.c.l.b16 %v4031_v5  ;;  %v4027_v5 = vpack.c.bf16 %v3991_v8, %v3991_v8  ;;  %v4113_v8 = vld [vmem:[#allocation2 + $0xa] sm:$0xff] }
 0x510   : > { %5133 = vmatmul.bf16.gmra.mxu2 %v4592_v20  ;;  %5390 = vmatmul.bf16.gmra.mxu1 %v4592_v20  ;;  %v9493_v20 = vpack.c.b16 %v4423_v12, %v4422_v39  ;;  %v10153_v39 = vld [vmem:[#allocation7_spill] sm:$0xff]  ;;  %v3993_v12 = vld [vmem:[#allocation2 + $0x128] sm:$0xff]  ;;  %v4149_v45 = vpack.c.bf16 %v4113_v8, %v4113_v8 }
 0x511   : > { %v9476_v55 = vpack.c.b16 %v4243_v15, %v4242_v31  ;;  %v4239_v44 = vunpack.c.l.b16 %v4027_v5  ;;  %v4137_v31 = vld [vmem:[#allocation2 + $0x12a] sm:$0xff]  ;;  %v9518_v5 = vpack.c.b16 %v4429_v3, %v4428_v59  ;;  %v4139_v59 = vld [vmem:[#allocation2 + $0x142] sm:$0xff] }
 0x512   : > { %v4173_v24 = vpack.c.bf16 %v4137_v31, %v4137_v31 }
 0x514   : > { %4523 = vrot.lane.b32.xlu2 %v9458_v57, %s7077_s18  ;;  %4509 = vrot.lane.b32.xlu0 %v9460_v37, %s7077_s18 }
 0x515   : > { %4513 = vrot.lane.b32.xlu1 %v9462_v9, %s7077_s18 }
 0x51c   : > { %4485 = vrot.lane.b32.xlu2 %v9476_v55, %s7077_s18  ;;  %4471 = vrot.lane.b32.xlu0 %v9376_v29, %s7077_s18  ;;  %v9491_v29 = vpack.c.b16 %v4437_v35, %v4436_v62  ;;  %v4432_v35 = vunpack.c.l.b16 %v4172_v0  ;;  %v4409_v0 = vunpack.c.l.b16 %v4149_v45 }
 0x51d   : > { %4475 = vrot.lane.b32.xlu1 %v9418_v41, %s7077_s18  ;;  %v3990_v41 = vld [vmem:[#allocation2 + $0x108] sm:$0xff] }
 0x51e   : > { %v4365_v36 = vpop.permute.xlu0 %4364 }
 0x51f   : > { %v4596_v25 = vsel %vm278_vm0, %v9444_v21, %v4365_v36  ;;  %v4026_v21 = vpack.c.bf16 %v3990_v41, %v3990_v41  ;;  %v3997_v41 = vld [vmem:[#allocation2 + $0x158] sm:$0xff] }
 0x520   : > { %5138 = vmatmul.bf16.gmra.mxu2 %v4596_v25  ;;  %5395 = vmatmul.bf16.gmra.mxu1 %v4596_v25  ;;  %v4433_v25 = vunpack.c.l.b16 %v4173_v24  ;;  %v4033_v11 = vpack.c.bf16 %v3997_v41, %v3997_v41 }
 0x521   : > { %v4238_v17 = vunpack.c.l.b16 %v4026_v21  ;;  %v4029_v21 = vpack.c.bf16 %v3993_v12, %v3993_v12  ;;  %v4175_v12 = vpack.c.bf16 %v4139_v59, %v4139_v59 }
 0x522   : > { %v4245_v24 = vunpack.c.l.b16 %v4033_v11 }
 0x523   : > { %v9497_v14 = vpop.f32.mrf.mxu2  ;;  %v4259_v40 = vpack.c.b16 %v4239_v44, %v4238_v17  ;;  %v9520_v44 = vpack.c.b16 %v4433_v25, %v4432_v35  ;;  %v4241_v28 = vunpack.c.l.b16 %v4029_v21 }
 0x524   : > { %4529 = vrot.lane.b32.xlu2 %v9491_v29, %s7077_s18  ;;  %4515 = vrot.lane.b32.xlu0 %v9493_v20, %s7077_s18 }
 0x525   : > { %4519 = vrot.lane.b32.xlu1 %v9495_v6, %s7077_s18 }
 0x526   : > { %v9508_v15 = vpop.permute.xlu2 %4368 }
 0x52b   : > { %v9510_v60 = vpop.f32.mrf.mxu2 }
 0x52c   : > { %4477 = vrot.lane.b32.xlu0 %v9452_v7, %s7077_s18  ;;  %v3992_v7 = vld [vmem:[#allocation2 + $0x120] sm:$0xff] }
 0x52d   : > { %4481 = vrot.lane.b32.xlu1 %v4259_v40, %s7077_s18  ;;  %v4028_v17 = vpack.c.bf16 %v3992_v7, %v3992_v7 }
 0x52e   : > { %v2688_v58 = vpop.permute.xlu2 %2687  ;;  %v4367_v36 = vpop.permute.xlu1 %4366 }
 0x52f   : > { %v2898_v62 = vsel %vm278_vm0, %v10153_v39, %v2688_v58  ;;  %v4600_v51 = vsel %vm278_vm0, %v4259_v40, %v4367_v36  ;;  %v4408_v40 = vunpack.c.l.b16 %v4148_v22  ;;  %v4138_v58 = vld [vmem:[#allocation2 + $0x13a] sm:$0xff]  ;;  %v4240_v3 = vunpack.c.l.b16 %v4028_v17  ;;  %v4142_v36 = vld [vmem:[#allocation2 + $0x16a] sm:$0xff]  ;;  %v4143_v39 = vld [vmem:[#allocation2 + $0x172] sm:$0xff]  ;;  %v9533_v17 = vpop.f32.mrf.mxu1 }
 0x530   : > { %3495 = vmatmul.bf16.gmra.mxu3 %v2898_v62  ;;  %5143 = vmatmul.bf16.gmra.mxu2 %v4600_v51  ;;  %v4244_v62 = vunpack.c.l.b16 %v4032_v18  ;;  %v4174_v25 = vpack.c.bf16 %v4138_v58, %v4138_v58  ;;  %v4178_v8 = vpack.c.bf16 %v4142_v36, %v4142_v36  ;;  %v4179_v41 = vpack.c.bf16 %v4143_v39, %v4143_v39  ;;  %v6534_v36 = vld [vmem:[%s10084_s5 + $0x88] sm:$0xff] }
 0x531   : > { %5400 = vmatmul.bf16.gmra.mxu1 %v4600_v51  ;;  %v4260_v35 = vpack.c.b16 %v4241_v28, %v4240_v3  ;;  %v4440_v51 = vpack.c.b16 %v4409_v0, %v4408_v40  ;;  %v4435_v22 = vunpack.c.l.b16 %v4175_v12  ;;  %v3999_v28 = vld [vmem:[#allocation2 + $0x170] sm:$0xff]  ;;  %v6549_v40 = vld [vmem:[%s10084_s5 + $0x100] sm:$0xff]  ;;  %v3998_v0 = vld [vmem:[#allocation2 + $0x168] sm:$0xff]  ;;  %5264 = vmatpush.bf16.msrb.mxu0 %v6534_v36 }
 0x532   : > { %v4262_v50 = vpack.c.b16 %v4245_v24, %v4244_v62  ;;  %v4434_v21 = vunpack.c.l.b16 %v4174_v25  ;;  %v4438_v45 = vunpack.c.l.b16 %v4178_v8  ;;  %v4439_v11 = vunpack.c.l.b16 %v4179_v41  ;;  %5443 = vmatpush.bf16.msrb.mxu2 %v6549_v40 }
 0x533   : > { %v9522_v31 = vpop.f32.mrf.mxu2  ;;  %v4604_v18 = vsel %vm278_vm0, %v4260_v35, %v9508_v15  ;;  %v4035_v59 = vpack.c.bf16 %v3999_v28, %v3999_v28  ;;  %v4034_v15 = vpack.c.bf16 %v3998_v0, %v3998_v0 }
 0x534   : > { %4521 = vrot.lane.b32.xlu0 %v9518_v5, %s7077_s18  ;;  %v9540_v24 = vpack.c.b16 %v4435_v22, %v4434_v21  ;;  %v9542_v58 = vpack.c.b16 %v4439_v11, %v4438_v45  ;;  %v6533_v21 = vld [vmem:[%s10084_s5 + $0x80] sm:$0xff] }
 0x535   : > { %4525 = vrot.lane.b32.xlu1 %v9520_v44, %s7077_s18  ;;  %v4247_v39 = vunpack.c.l.b16 %v4035_v59  ;;  %v4246_v62 = vunpack.c.l.b16 %v4034_v15  ;;  %5265 = vmatpush.bf16.msrb.mxu0 %v6533_v21  ;;  %v2157_v22 = vld [vmem:[#allocation2 + $0x1a0] sm:$0xff] }
 0x536   : > { %v4462_v7 = vpop.permute.xlu2 %4461 }
 0x537   : > { %v4620_v56 = vsel %vm278_vm0, %v4440_v51, %v4462_v7  ;;  %v4263_v25 = vpack.c.b16 %v4247_v39, %v4246_v62 }
 0x53b   : > { %v9528_v1 = vpop.f32.mrf.mxu2 }
 0x53c   : > { %4483 = vrot.lane.b32.xlu0 %v4260_v35, %s7077_s18  ;;  %v9553_v35 = vpop.f32.mrf.mxu1 }
 0x53d   : > { %4487 = vrot.lane.b32.xlu1 %v4262_v50, %s7077_s18 }
 0x540   : > { %5177 = vmatmul.bf16.vlgmr.msrb.gmra.mxu3 %v4620_v56  ;;  %5148 = vmatmul.bf16.gmra.mxu2 %v4604_v18  ;;  %v2156_v56 = vld [vmem:[#allocation2 + $0x198] sm:$0xff] }
 0x541   : > { %5405 = vmatmul.bf16.gmra.mxu1 %v4604_v18  ;;  %v2192_v11 = vpack.c.bf16 %v2156_v56, %v2156_v56  ;;  %v2193_v18 = vpack.c.bf16 %v2157_v22, %v2157_v22 }
 0x543   : > { %v9544_v3 = vpop.f32.mrf.mxu2  ;;  %v2691_v0 = vunpack.c.l.b16 %v2192_v11  ;;  %v2692_v59 = vunpack.c.l.b16 %v2193_v18 }
 0x544   : > { %4527 = vrot.lane.b32.xlu0 %v9540_v24, %s7077_s18  ;;  %v9560_v41 = vpop.f32.mrf.mxu1 }
 0x545   : > { %4531 = vrot.lane.b32.xlu1 %v9542_v58, %s7077_s18  ;;  %v2693_v36 = vpack.c.b16 %v2692_v59, %v2691_v0 }
 0x54b   : > { %v9555_v12 = vpop.f32.mrf.mxu2 }
 0x54c   : > { %4489 = vrot.lane.b32.xlu0 %v4263_v25, %s7077_s18  ;;  %v9569_v28 = vpop.f32.mrf.mxu1 }
 0x54e   : > { %v4371_v51 = vpop.permute.xlu0 %4370 }
 0x54f   : > { %v4608_v8 = vsel %vm278_vm0, %v9476_v55, %v4371_v51 }
 0x550   : > { %5153 = vmatmul.bf16.gmra.mxu2 %v4608_v8 }
 0x551   : > { %5410 = vmatmul.bf16.gmra.mxu1 %v4608_v8 }
 0x553   : > { %v9562_v7 = vpop.f32.mrf.mxu2 }
 0x554   : > { %v9574_v62 = vpop.f32.mrf.mxu1 }
 0x55b   : > { %v9567_v45 = vpop.f32.mrf.mxu2 }
 0x55c   : > { %v9582_v11 = vpop.f32.mrf.mxu1 }
 0x55e   : > { %v4373_v55 = vpop.permute.xlu1 %4372 }
 0x55f   : > { %v4612_v40 = vsel %vm278_vm0, %v4262_v50, %v4373_v55 }
 0x560   : > { %5158 = vmatmul.bf16.gmra.mxu2 %v4612_v40 }
 0x561   : > { %5415 = vmatmul.bf16.gmra.mxu1 %v4612_v40 }
 0x563   : > { %v9572_v15 = vpop.f32.mrf.mxu2 }
 0x566   : > { %v2702_v39 = vpop.permute.xlu1 %2701 }
 0x567   : > { %v2906_v51 = vsel %vm278_vm0, %v2693_v36, %v2702_v39 }
 0x568   : > { %3584 = vmatmul.bf16.gmra.mxu0 %v2906_v51 }
 0x56b   : > { %v9577_v8 = vpop.f32.mrf.mxu2 }
 0x56e   : > { %v4375_v21 = vpop.permute.xlu0 %4374 }
 0x56f   : > { %v4464_v56 = vpop.permute.xlu1 %4463  ;;  %v4616_v22 = vsel %vm278_vm0, %v4263_v25, %v4375_v21 }
 0x570   : > { %v4624_v50 = vsel %vm278_vm0, %v9429_v49, %v4464_v56  ;;  %5163 = vmatmul.bf16.gmra.mxu2 %v4616_v22  ;;  %v4506_v49 = vpop.permute.xlu2 %4505 }
 0x571   : > { %5182 = vmatmul.bf16.gmra.mxu3 %v4624_v50  ;;  %5420 = vmatmul.bf16.gmra.mxu1 %v4616_v22  ;;  %v4688_v39 = vsel %vm278_vm0, %v8942_v42, %v4506_v49 }
 0x573   : > { %v9584_v18 = vpop.f32.mrf.mxu2 }
 0x576   : > { %v4504_v55 = vpop.permute.xlu0 %4503 }
 0x577   : > { %v4684_v40 = vsel %vm278_vm0, %v8900_v26, %v4504_v55  ;;  %v4508_v56 = vpop.permute.xlu1 %4507 }
 0x578   : > { %5266 = vmatmul.bf16.vlgmr.msrb.gmra.mxu0 %v4684_v40  ;;  %v4468_v26 = vpop.permute.xlu2 %4467 }
 0x579   : > { %v4632_v21 = vsel %vm278_vm0, %v9431_v47, %v4468_v26 }
 0x57b   : > { %v9588_v0 = vpop.f32.mrf.mxu2 }
 0x57e   : > { %v4466_v59 = vpop.permute.xlu0 %4465 }
 0x57f   : > { %v4628_v25 = vsel %vm278_vm0, %v9382_v16, %v4466_v59  ;;  %v4470_v42 = vpop.permute.xlu1 %4469 }
 0x580   : > { %6424 = vmatmul.msk.bf16.vlgmr.msrb.gmra.mxu2 %vm278_vm0, %v9382_v16  ;;  %v4692_v16 = vsel %vm278_vm0, %v8993_v63, %v4508_v56  ;;  %v4636_v55 = vsel %vm278_vm0, %v9460_v37, %v4470_v42 }
 0x581   : > { %5187 = vmatmul.bf16.gmra.mxu3 %v4628_v25 }
 0x583   : > { %v9594_v36 = vpop.f32.mrf.mxu2 }
 0x586   : > { %v4510_v40 = vpop.permute.xlu0 %4509 }
 0x588   : > { %5271 = vmatmul.bf16.gmra.mxu0 %v4688_v39  ;;  %v4512_v39 = vpop.permute.xlu2 %4511 }
 0x58b   : > { %v9598_v51 = vpop.f32.mrf.mxu2 }
 0x58e   : > { %v4472_v63 = vpop.permute.xlu0 %4471 }
 0x58f   : > { %v4640_v49 = vsel %vm278_vm0, %v9401_v52, %v4472_v63 }
 0x590   : > { %6425 = vmatmul.msk.bf16.gmra.mxu2 %vm278_vm0, %v9431_v47  ;;  %v4696_v47 = vsel %vm278_vm0, %v9034_v46, %v4510_v40  ;;  %v4474_v46 = vpop.permute.xlu2 %4473 }
 0x591   : > { %5192 = vmatmul.bf16.gmra.mxu3 %v4632_v21  ;;  %v4644_v56 = vsel %vm278_vm0, %v9462_v9, %v4474_v46 }
 0x593   : > { %v9604_v22 = vpop.f32.mrf.mxu2 }
 0x596   : > { %v4516_v63 = vpop.permute.xlu0 %4515 }
 0x598   : > { %5276 = vmatmul.bf16.gmra.mxu0 %v4692_v16  ;;  %v4514_v16 = vpop.permute.xlu1 %4513 }
 0x59b   : > { %v9608_v50 = vpop.f32.mrf.mxu2 }
 0x5a0   : > { %6426 = vmatmul.msk.bf16.gmra.mxu2 %vm278_vm0, %v9460_v37  ;;  %v4700_v37 = vsel %vm278_vm0, %v9076_v13, %v4512_v39  ;;  %v4476_v13 = vpop.permute.xlu1 %4475  ;;  %v4708_v39 = vsel %vm278_vm0, %v9172_v38, %v4516_v63  ;;  %v7011_v63 = vld [vmem:[%s10083_s4] ss:$0 sm:$0xff] }
 0x5a1   : > { %5197 = vmatmul.bf16.gmra.mxu3 %v4636_v55 }
 0x5a3   : > { %v9614_v59 = vpop.f32.mrf.mxu2 }
 0x5a4   : > { %10154 = vst [vmem:[#allocation10_spill] sm:$0xff] %v9614_v59 }
 0x5a8   : > { %5281 = vmatmul.bf16.gmra.mxu0 %v4696_v47  ;;  %v4648_v47 = vsel %vm278_vm0, %v9493_v20, %v4476_v13 }
 0x5ab   : > { %v9618_v25 = vpop.f32.mrf.mxu2 }
 0x5ac   : > { %10155 = vst [vmem:[#allocation19_spill] sm:$0xff] %v9618_v25 }
 0x5b0   : > { %6427 = vmatmul.msk.bf16.gmra.mxu2 %vm278_vm0, %v9401_v52  ;;  %v4704_v52 = vsel %vm278_vm0, %v9119_v48, %v4514_v16 }
 0x5b1   : > { %5202 = vmatmul.bf16.gmra.mxu3 %v4640_v49 }
 0x5b3   : > { %v9624_v26 = vpop.f32.mrf.mxu2  ;;  %v3496_v40 = vpop.f32.mrf.mxu3 }
 0x5b4   : > { %10156 = vst [vmem:[#allocation9_spill] sm:$0xff] %v9624_v26 }
 0x5b8   : > { %5286 = vmatmul.bf16.gmra.mxu0 %v4700_v37  ;;  %v4478_v37 = vpop.permute.xlu0 %4477 }
 0x5b9   : > { %v4652_v46 = vsel %vm278_vm0, %v9427_v19, %v4478_v37 }
 0x5bb   : > { %v9628_v21 = vpop.f32.mrf.mxu2  ;;  %v3498_v49 = vpop.f32.mrf.mxu3 }
 0x5bc   : > { %10157 = vst [vmem:[#allocation16_spill] sm:$0xff] %v9628_v21 }
 0x5c0   : > { %6428 = vmatmul.msk.bf16.gmra.mxu2 %vm278_vm0, %v9462_v9 }
 0x5c1   : > { %5207 = vmatmul.bf16.gmra.mxu3 %v4644_v56 }
 0x5c3   : > { %v9634_v42 = vpop.f32.mrf.mxu2  ;;  %v5178_v56 = vpop.f32.mrf.mxu3 }
 0x5c4   : > { %10158 = vst [vmem:[#allocation17_spill] sm:$0xff] %v9634_v42  ;;  %v6279_v42 = vld [vmem:[%s7174_s17 + $0x189] sm:$0xff] }
 0x5c8   : > { %5291 = vmatmul.bf16.gmra.mxu0 %v4704_v52  ;;  %v3497_v52 = vadd.f32 %v3496_v40, %v9290_v53 }
 0x5cb   : > { %v9638_v55 = vpop.f32.mrf.mxu2 }
 0x5cc   : > { %10159 = vst [vmem:[#allocation15_spill] sm:$0xff] %v9638_v55 }
 0x5d0   : > { %6429 = vmatmul.msk.bf16.gmra.mxu2 %vm278_vm0, %v9493_v20  ;;  %v4518_v20 = vpop.permute.xlu2 %4517 }
 0x5d1   : > { %5212 = vmatmul.bf16.gmra.mxu3 %v4648_v47  ;;  %v4712_v38 = vsel %vm278_vm0, %v9210_v27, %v4518_v20 }
 0x5d3   : > { %v9644_v9 = vpop.f32.mrf.mxu2 }
 0x5d4   : > { %10160 = vst [vmem:[#allocation11_spill] sm:$0xff] %v9644_v9 }
 0x5d8   : > { %5296 = vmatmul.bf16.gmra.mxu0 %v4708_v39  ;;  %v10163_v39 = vld [vmem:[#allocation18_spill] sm:$0xff]  ;;  %v4480_v53 = vpop.permute.xlu2 %4479 }
 0x5d9   : > { %v3321_v37 = vadd.f32 %v7011_v63, %v10163_v39  ;;  %v4656_v20 = vsel %vm278_vm0, %v9495_v6, %v4480_v53 }
 0x5db   : > { %v9648_v48 = vpop.f32.mrf.mxu2 }
 0x5dc   : > { %10161 = vst [vmem:[#allocation12_spill] sm:$0xff] %v9648_v48 }
 0x5e0   : > { %6430 = vmatmul.msk.bf16.gmra.mxu2 %vm278_vm0, %v9427_v19  ;;  %v3410_v19 = vadd.f32 %v9409_v43, %v3321_v37  ;;  %v4520_v43 = vpop.permute.xlu1 %4519 }
 0x5e1   : > { %5217 = vmatmul.bf16.gmra.mxu3 %v4652_v46 }
 0x5e2   : > { %v3499_v40 = vadd.f32 %v3498_v49, %v3410_v19  ;;  %v9674_v49 = vpop.f32.mrf.mxu1 }
 0x5e3   : > { %v9654_v16 = vpop.f32.mrf.mxu2 }
 0x5e4   : > { %10162 = vst [vmem:[#allocation13_spill] sm:$0xff] %v9654_v16  ;;  %v5180_v16 = vpop.f32.mrf.mxu3 }
 0x5e5   : > { %v3585_v13 = vpop.f32.mrf.mxu0 }
 0x5e6   : > { %v3586_v47 = vadd.f32 %v3585_v13, %v3497_v52 }
 0x5e8   : > { %v3675_v46 = vadd.f32 %v9533_v17, %v3586_v47  ;;  %5301 = vmatmul.bf16.gmra.mxu0 %v4712_v38 }
 0x5ea   : > { %v3709_v48 = vsub.f32 0.0, %v3675_v46 }
 0x5eb   : > { %v9665_v9 = vpop.f32.mrf.mxu2 }
 0x5ec   : > { %10164 = vst [vmem:[#allocation14_spill] sm:$0xff] %v9665_v9  ;;  %v3771_v52 = vmul.f32 1.442695, %v3709_v48  ;;  %v4522_v9 = vpop.permute.xlu0 %4521 }
 0x5ed   : > { %v3587_v13 = vpop.f32.mrf.mxu0 }
 0x5ee   : > { %6873 = vpow2.f32 %v3771_v52  ;;  %v3588_v27 = vadd.f32 %v3587_v13, %v3499_v40  ;;  %v4482_v13 = vpop.permute.xlu1 %4481 }
 0x5f0   : > { %v3677_v63 = vadd.f32 %v9553_v35, %v3588_v27  ;;  %6431 = vmatmul.msk.bf16.gmra.mxu2 %vm278_vm0, %v9495_v6  ;;  %v4716_v35 = vsel %vm278_vm0, %v9240_v61, %v4520_v43  ;;  %v9681_v6 = vld [vmem:[%s10085_s6] ss:$0 sm:$0xff]  ;;  %v9688_v61 = vpop.f32.mrf.mxu1 }
 0x5f1   : > { %5222 = vmatmul.bf16.gmra.mxu3 %v4656_v20  ;;  %v5090_v20 = vadd.f32 %v9681_v6, %v9420_v34 }
 0x5f2   : > { %v3710_v17 = vsub.f32 0.0, %v3677_v63 }
 0x5f3   : > { %v9672_v47 = vpop.f32.mrf.mxu2 }
 0x5f4   : > { %10165 = vst [vmem:[#allocation7_spill] sm:$0xff] %v9672_v47  ;;  %v5183_v38 = vpop.f32.mrf.mxu3  ;;  %v6874_v39 = vpop.eup %6873  ;;  %v3773_v48 = vmul.f32 1.442695, %v3710_v17  ;;  %v6278_v17 = vld [vmem:[%s7174_s17 + $0x181] sm:$0xff]  ;;  %s269_s17 = sand.u32 1, %s7067_s25  }
 0x5f5   : > { %v3805_v37 = vadd.f32 1.0, %v6874_v39  ;;  %v5267_v19 = vpop.f32.mrf.mxu0  ;;  %s5845_s14 = scalar_lea.sflag [#allocation5], %s269_s17 }
 0x5f6   : > { %6875 = vpow2.f32 %v3773_v48 }
 0x5f7   : > { %6877 = vrcp.f32 %v3805_v37  ;;  %v5179_v37 = vadd.f32 %v5178_v56, %v5090_v20 }
 0x5f8   : > { %5306 = vmatmul.bf16.gmra.mxu0 %v4716_v35  ;;  %v4660_v35 = vsel %vm278_vm0, %v9518_v5, %v4482_v13  ;;  %v5092_v13 = vadd.f32 %v9681_v6, %v9442_v32 }
 0x5f9   : > { %v5268_v47 = vadd.f32 %v5267_v19, %v5179_v37  ;;  %v9705_v19 = vpop.f32.mrf.mxu1 }
 0x5fb   : > { %v9683_v53 = vpop.f32.mrf.mxu2  ;;  %v5357_v56 = vadd.f32 %v9560_v41, %v5268_v47 }
 0x5fc   : > { %10166 = vst [vmem:[#allocation18_spill] sm:$0xff] %v9683_v53  ;;  %v5185_v40 = vpop.f32.mrf.mxu3  ;;  %v6876_v52 = vpop.eup %6875 }
 0x5fd   : > { %v6878_v27 = vpop.eup %6877  ;;  %v3806_v39 = vadd.f32 1.0, %v6876_v52  ;;  %v5269_v48 = vpop.f32.mrf.mxu0 }
 0x5fe   : > { %v3869_v43 = vmul.f32 %v6878_v27, %v3675_v46 }
 0x5ff   : > { %6879 = vrcp.f32 %v3806_v39  ;;  %v5095_v39 = vadd.f32 %v9681_v6, %v9456_v10 }
 0x600   : > { %v3934_v53 = vadd.f32 %v6278_v17, %v3869_v43  ;;  %6432 = vmatmul.msk.bf16.gmra.mxu2 %vm278_vm0, %v9518_v5  ;;  %v4720_v5 = vsel %vm278_vm0, %v9271_v54, %v4522_v9 }
 0x601   : > { %5227 = vmatmul.bf16.gmra.mxu3 %v4660_v35  ;;  %v5184_v43 = vadd.f32 %v5183_v38, %v5095_v39 }
 0x602   : > { %3966 = vst.msk [vmem:[#allocation2 + $0x181] sm:$0xff] %vm278_vm0, %v3934_v53  ;;  %v5181_v53 = vadd.f32 %v5180_v16, %v5092_v13 }
 0x603   : > { %v5445_v52 = vpop.f32.mrf.mxu2 }
 0x604   : > { %v9695_v34 = vpop.f32.mrf.mxu3  ;;  %v9701_v20 = vadd.f32 %v5445_v52, %v5357_v56  ;;  %v5270_v41 = vadd.f32 %v5269_v48, %v5181_v53 }
 0x605   : > { %v6880_v55 = vpop.eup %6879  ;;  %v5272_v46 = vpop.f32.mrf.mxu0 }
 0x606   : > { %v3870_v27 = vmul.f32 %v6880_v55, %v3677_v63  ;;  %v5525_v47 = vsub.f32 0.0, %v9701_v20  ;;  %v4484_v63 = vpop.permute.xlu0 %4483  ;;  %v5273_v16 = vadd.f32 %v5272_v46, %v5184_v43  ;;  %v5359_v35 = vadd.f32 %v9569_v28, %v5270_v41  ;;  %v4524_v46 = vpop.permute.xlu2 %4523 }
 0x607   : > { %v4664_v48 = vsel %vm278_vm0, %v9458_v57, %v4484_v63  ;;  %v4074_v63 = vld [vmem:[#allocation2 + $0x199] sm:$0xff] }
 0x608   : > { %v3935_v17 = vadd.f32 %v6279_v42, %v3870_v27  ;;  %5311 = vmatmul.bf16.gmra.mxu0 %v4720_v5  ;;  %v5097_v42 = vadd.f32 %v9681_v6, %v9478_v30  ;;  %v5557_v10 = vmul.f32 1.442695, %v5525_v47  ;;  %v9722_v30 = vpop.f32.mrf.mxu1  ;;  %v5362_v28 = vadd.f32 %v9574_v62, %v5273_v16 }
 0x609   : > { %v4072_v37 = vld [vmem:[#allocation2 + $0x181] sm:$0xff] }
 0x60a   : > { %3967 = vst.msk [vmem:[#allocation2 + $0x189] sm:$0xff] %vm278_vm0, %v3935_v17  ;;  %v4000_v54 = vld [vmem:[#allocation2 + $0x180] sm:$0xff]  ;;  %v4108_v52 = vpack.c.bf16 %v4072_v37, %v4072_v37  ;;  %v5186_v38 = vadd.f32 %v5185_v40, %v5097_v42  ;;  %6881 = vpow2.f32 %v5557_v10 }
 0x60b   : > { %v5447_v55 = vpop.f32.mrf.mxu2  ;;  %v4036_v56 = vpack.c.bf16 %v4000_v54, %v4000_v54 }
 0x60c   : > { %v9711_v32 = vpop.f32.mrf.mxu3  ;;  %v9718_v13 = vadd.f32 %v5447_v55, %v5359_v35  ;;  %v4075_v55 = vld [vmem:[#allocation2 + $0x1a1] sm:$0xff] }
 0x60d   : > { %v5274_v9 = vpop.f32.mrf.mxu0  ;;  %v4458_v40 = vunpack.c.l.b16 %v4036_v56 }
 0x60e   : > { %v5526_v42 = vsub.f32 0.0, %v9718_v13  ;;  %v5275_v26 = vadd.f32 %v5274_v9, %v5186_v38 }
 0x610   : > { %6433 = vmatmul.msk.bf16.gmra.mxu2 %vm278_vm0, %v9458_v57  ;;  %v4495_v57 = vunpack.c.l.b16 %v4108_v52  ;;  %v5559_v56 = vmul.f32 1.442695, %v5526_v42  ;;  %v6882_v9 = vpop.eup %6881 }
 0x611   : > { %5232 = vmatmul.bf16.gmra.mxu3 %v4664_v48  ;;  %v4073_v27 = vld [vmem:[#allocation2 + $0x189] sm:$0xff] }
 0x612   : > { %v4001_v5 = vld [vmem:[#allocation2 + $0x188] sm:$0xff]  ;;  %v4109_v17 = vpack.c.bf16 %v4073_v27, %v4073_v27 }
 0x613   : > { %v4144_v53 = vld [vmem:[#allocation2 + $0x182] sm:$0xff]  ;;  %v4037_v39 = vpack.c.bf16 %v4001_v5, %v4001_v5  ;;  %v4145_v41 = vld [vmem:[#allocation2 + $0x18a] sm:$0xff]  ;;  %v5450_v37 = vpop.f32.mrf.mxu2  ;;  %v4110_v5 = vpack.c.bf16 %v4074_v63, %v4074_v63  ;;  %v9748_v63 = vpop.f32.mrf.mxu1 }
 0x614   : > { %v4180_v47 = vpack.c.bf16 %v4144_v53, %v4144_v53  ;;  %v9725_v43 = vpop.f32.mrf.mxu3  ;;  %v4181_v54 = vpack.c.bf16 %v4145_v41, %v4145_v41  ;;  %v9728_v35 = vadd.f32 %v5450_v37, %v5362_v28  ;;  %v4496_v48 = vunpack.c.l.b16 %v4109_v17 }
 0x615   : > { %v4459_v21 = vunpack.c.l.b16 %v4037_v39  ;;  %v5277_v62 = vpop.f32.mrf.mxu0  ;;  %v4111_v53 = vpack.c.bf16 %v4075_v55, %v4075_v55  ;;  %v4724_v28 = vsel %vm278_vm0, %v9304_v33, %v4524_v46  ;;  %v5364_v17 = vadd.f32 %v9582_v11, %v5275_v26  ;;  %v4486_v55 = vpop.permute.xlu2 %4485 }
 0x616   : > { %v4500_v16 = vunpack.c.l.b16 %v4180_v47  ;;  %v4501_v27 = vunpack.c.l.b16 %v4181_v54  ;;  %v5527_v10 = vsub.f32 0.0, %v9728_v35  ;;  %v9731_v25 = vpack.c.b16 %v4496_v48, %v4495_v57 }
 0x617   : > { %v9733_v59 = vpack.c.b16 %v4459_v21, %v4458_v40  ;;  %v4542_v21 = vunpack.c.l.b16 %v4110_v5  ;;  %v4543_v38 = vunpack.c.l.b16 %v4111_v53  ;;  %v5621_v57 = vadd.f32 1.0, %v6882_v9  ;;  %v4526_v5 = vpop.permute.xlu1 %4525 }
 0x618   : > { %v9735_v52 = vpack.c.b16 %v4501_v27, %v4500_v16  ;;  %v5561_v41 = vmul.f32 1.442695, %v5527_v10  ;;  %4545 = vrot.lane.b32.xlu2 %v9731_v25, %s7077_s18  ;;  %5316 = vmatmul.bf16.gmra.mxu0 %v4724_v28  ;;  %v5100_v40 = vadd.f32 %v9681_v6, %v9497_v14  ;;  %v4668_v42 = vsel %vm278_vm0, %v9520_v44, %v4486_v55 }
 0x619   : > { %4491 = vrot.lane.b32.xlu0 %v9733_v59, %s7077_s18  ;;  %v4544_v46 = vpack.c.b16 %v4543_v38, %v4542_v21 }
 0x61a   : > { %4533 = vrot.lane.b32.xlu1 %v9735_v52, %s7077_s18  ;;  %6883 = vpow2.f32 %v5561_v41  ;;  %v5189_v11 = vadd.f32 %v9695_v34, %v5100_v40  ;;  %v5102_v34 = vadd.f32 %v9681_v6, %v9510_v60  ;;  %v5105_v60 = vadd.f32 %v9681_v6, %v9522_v31 }
 0x61b   : > { %v5452_v47 = vpop.f32.mrf.mxu2  ;;  %6885 = vpow2.f32 %v5559_v56  ;;  %v9762_v28 = vpop.f32.mrf.mxu1 }
 0x61c   : > { %v9746_v39 = vpop.f32.mrf.mxu3  ;;  %v5453_v37 = vadd.f32 %v5452_v47, %v5364_v17  ;;  %6887 = vrcp.f32 %v5621_v57  ;;  %v5278_v53 = vadd.f32 %v5277_v62, %v5189_v11  ;;  %v5191_v38 = vadd.f32 %v9711_v32, %v5102_v34 }
 0x61d   : > { %v5279_v33 = vpop.f32.mrf.mxu0  ;;  %v4728_v62 = vsel %vm278_vm0, %v9332_v23, %v4526_v5  ;;  %v5194_v23 = vadd.f32 %v9725_v43, %v5105_v60  ;;  %v5107_v5 = vadd.f32 %v9681_v6, %v9528_v1 }
 0x61e   : > { %v5528_v54 = vsub.f32 0.0, %v5453_v37 }
 0x620   : > { %v6884_v48 = vpop.eup %6883  ;;  %v5563_v26 = vmul.f32 1.442695, %v5528_v54  ;;  %6434 = vmatmul.msk.bf16.gmra.mxu2 %vm278_vm0, %v9520_v44  ;;  %4547 = vrot.lane.b32.xlu2 %v4544_v46, %s7077_s18  ;;  %v5367_v44 = vadd.f32 %v9674_v49, %v5278_v53  ;;  %v5280_v46 = vadd.f32 %v5279_v33, %v5191_v38  ;;  %v4488_v54 = vpop.permute.xlu1 %4487  ;;  %s5926_s18 = sshll.u32 %s269_s17, 6 }
 0x621   : > { %5237 = vmatmul.bf16.gmra.mxu3 %v4668_v42  ;;  %v5623_v16 = vadd.f32 1.0, %v6884_v48  ;;  %v6886_v27 = vpop.eup %6885  ;;  %v4528_v53 = vpop.permute.xlu0 %4527  ;;  %s9828_s19 = scalar_lea.vmem [#allocation4], %s5926_s18 }
 0x622   : > { %6889 = vpow2.f32 %v5563_v26  ;;  %v5622_v56 = vadd.f32 1.0, %v6886_v27  ;;  %v6888_v9 = vpop.eup %6887  ;;  %s5857_s9 = sshll.u32 %s9828_s19, 4  ;;  %s5858_s9 = int_to_ptr.vmem [resolvable:$true] %s5857_s9 }
 0x623   : > { %6891 = vrcp.f32 %v5623_v16  ;;  %v5455_v10 = vpop.f32.mrf.mxu2  ;;  %v5685_v57 = vmul.f32 %v6888_v9, %v9701_v20  ;;  %v5369_v20 = vadd.f32 %v9688_v61, %v5280_v46  ;;  %v9784_v33 = vpop.f32.mrf.mxu1 }
 0x624   : > { %v9758_v14 = vpop.f32.mrf.mxu3  ;;  %v9766_v17 = vadd.f32 %v5455_v10, %v5367_v44  ;;  %6893 = vrcp.f32 %v5622_v56 }
 0x625   : > { %v5282_v41 = vpop.f32.mrf.mxu0 }
 0x626   : > { %v5529_v48 = vsub.f32 0.0, %v9766_v17  ;;  %v5283_v31 = vadd.f32 %v5282_v41, %v5194_v23  ;;  %v5196_v41 = vadd.f32 %v9746_v39, %v5107_v5  ;;  %v4732_v39 = vsel %vm278_vm0, %v9367_v4, %v4528_v53 }
 0x628   : > { %v6890_v21 = vpop.eup %6889  ;;  %5321 = vmatmul.bf16.gmra.mxu0 %v4728_v62  ;;  %v5565_v16 = vmul.f32 1.442695, %v5529_v48  ;;  %v5372_v56 = vadd.f32 %v9705_v19, %v5283_v31  ;;  %v5110_v48 = vadd.f32 %v9681_v6, %v9544_v3 }
 0x629   : > { %v6892_v47 = vpop.eup %6891  ;;  %v5624_v55 = vadd.f32 1.0, %v6890_v21  ;;  %v4490_v46 = vpop.permute.xlu0 %4489 }
 0x62a   : > { %v9774_v49 = vmul.f32 %v6892_v47, %v9728_v35  ;;  %v6894_v26 = vpop.eup %6893  ;;  %v4672_v35 = vsel %vm278_vm0, %v9540_v24, %v4488_v54 }
 0x62b   : > { %6895 = vrcp.f32 %v5624_v55  ;;  %v5457_v40 = vpop.f32.mrf.mxu2  ;;  %v5686_v61 = vmul.f32 %v6894_v26, %v9718_v13  ;;  %v9806_v47 = vpop.f32.mrf.mxu1 }
 0x62c   : > { %v9776_v32 = vpop.f32.mrf.mxu3  ;;  %v5717_v42 = vadd.f32 %v9774_v49, %v5685_v57  ;;  %v9786_v27 = vadd.f32 %v5457_v40, %v5369_v20  ;;  %6897 = vpow2.f32 %v5565_v16  ;;  %v4676_v20 = vsel %vm278_vm0, %v9491_v29, %v4490_v46 }
 0x62d   : > { %v5284_v11 = vpop.f32.mrf.mxu0  ;;  %v5199_v16 = vadd.f32 %v9758_v14, %v5110_v48  ;;  %v4530_v14 = vpop.permute.xlu2 %4529 }
 0x62e   : > { %5749 = vst [vmem:[#allocation3 + $0x1] sm:$0xff] %v5717_v42  ;;  %v5285_v13 = vadd.f32 %v5284_v11, %v5196_v41 }
 0x630   : > { %6435 = vmatmul.msk.bf16.gmra.mxu2 %vm278_vm0, %v9540_v24  ;;  %v5530_v24 = vsub.f32 0.0, %v9786_v27  ;;  %v5374_v55 = vadd.f32 %v9722_v30, %v5285_v13 }
 0x631   : > { %5242 = vmatmul.bf16.gmra.mxu3 %v4672_v35  ;;  %v6896_v43 = vpop.eup %6895 }
 0x632   : > { %v9793_v10 = vmul.f32 %v6896_v43, %v5453_v37  ;;  %v5567_v38 = vmul.f32 1.442695, %v5530_v24  ;;  %v6898_v62 = vpop.eup %6897 }
 0x633   : > { %v5460_v44 = vpop.f32.mrf.mxu2  ;;  %v5625_v42 = vadd.f32 1.0, %v6898_v62 }
 0x634   : > { %v9797_v34 = vpop.f32.mrf.mxu3  ;;  %v5718_v9 = vadd.f32 %v9793_v10, %v5686_v61  ;;  %v9801_v21 = vadd.f32 %v5460_v44, %v5372_v56  ;;  %v9826_v44 = vpop.f32.mrf.mxu1 }
 0x635   : > { %v5287_v1 = vpop.f32.mrf.mxu0 }
 0x636   : > { %5750 = vst [vmem:[#allocation3 + $0x9] sm:$0xff] %v5718_v9  ;;  %v5531_v37 = vsub.f32 0.0, %v9801_v21  ;;  %v5288_v61 = vadd.f32 %v5287_v1, %v5199_v16 }
 0x638   : > { %v5569_v19 = vmul.f32 1.442695, %v5531_v37  ;;  %5326 = vmatmul.bf16.gmra.mxu0 %v4732_v39  ;;  %v5377_v13 = vadd.f32 %v9748_v63, %v5288_v61  ;;  %v4736_v39 = vsel %vm278_vm0, %v9393_v2, %v4530_v14  ;;  %v4532_v61 = vpop.permute.xlu1 %4531 }
 0x63a   : > { %6899 = vpow2.f32 %v5569_v19 }
 0x63b   : > { %v5462_v57 = vpop.f32.mrf.mxu2  ;;  %6901 = vpow2.f32 %v5567_v38 }
 0x63c   : > { %v9809_v60 = vpop.f32.mrf.mxu3  ;;  %v9812_v40 = vadd.f32 %v5462_v57, %v5374_v55  ;;  %6903 = vrcp.f32 %v5625_v42  ;;  %v5115_v57 = vadd.f32 %v9681_v6, %v9562_v7 }
 0x63d   : > { %v5765_v54 = vld [vmem:[#allocation3] ss:$2 sm:$0xff]  ;;  %v5781_v23 = vld [vmem:[#allocation3 + $0x1] ss:$2 sm:$0xff]  ;;  %v5289_v4 = vpop.f32.mrf.mxu0 }
 0x63e   : > { %v5796_v11 = vadd.f32 %v5781_v23, %v5765_v54  ;;  %v5532_v31 = vsub.f32 0.0, %v9812_v40  ;;  %v5805_v30 = vld [vmem:[#allocation3 + $0x2] ss:$2 sm:$0xff]  ;;  %v5204_v23 = vadd.f32 %v9797_v34, %v5115_v57 }
 0x640   : > { %v6900_v26 = vpop.eup %6899  ;;  %v5820_v35 = vadd.f32 %v5805_v30, %v5796_v11  ;;  %v5571_v43 = vmul.f32 1.442695, %v5532_v31  ;;  %6436 = vmatmul.msk.bf16.gmra.mxu2 %vm278_vm0, %v9491_v29  ;;  %v5112_v29 = vadd.f32 %v9681_v6, %v9555_v12  ;;  %v9850_v11 = vpop.f32.mrf.mxu1 }
 0x641   : > { %5247 = vmatmul.bf16.gmra.mxu3 %v4676_v20  ;;  %v5627_v3 = vadd.f32 1.0, %v6900_v26  ;;  %v6902_v5 = vpop.eup %6901  ;;  %v5117_v20 = vadd.f32 %v9681_v6, %v9567_v45 }
 0x642   : > { %v5828_v53 = vmul.f32 0.11111111, %v5820_v35  ;;  %6905 = vpow2.f32 %v5571_v43  ;;  %v5626_v9 = vadd.f32 1.0, %v6902_v5  ;;  %v6904_v1 = vpop.eup %6903  ;;  %v5201_v38 = vadd.f32 %v9776_v32, %v5112_v29 }
 0x643   : > { %6907 = vrcp.f32 %v5627_v3  ;;  %v5465_v41 = vpop.f32.mrf.mxu2  ;;  %v5689_v12 = vmul.f32 %v6904_v1, %v9766_v17 }
 0x644   : > { %v9824_v56 = vpop.f32.mrf.mxu3  ;;  %5836 = vst [vmem:[%s9828_s19] sm:$0xff] %v5828_v53  ;;  %v9835_v19 = vadd.f32 %v5465_v41, %v5377_v13  ;;  %6909 = vrcp.f32 %v5626_v9  ;;  %v5290_v46 = vadd.f32 %v5289_v4, %v5201_v38  ;;  %v10167_v9 = vld [vmem:[#allocation8_spill] sm:$0xff] }
 0x645   : > { %v5292_v24 = vpop.f32.mrf.mxu0 }
 0x646   : > { %v5533_v42 = vsub.f32 0.0, %v9835_v19  ;;  %v5293_v17 = vadd.f32 %v5292_v24, %v5204_v23  ;;  %v4740_v24 = vsel %vm278_vm0, %v10167_v9, %v4532_v61 }
 0x648   : > { %v6906_v37 = vpop.eup %6905  ;;  %5331 = vmatmul.bf16.gmra.mxu0 %v4736_v39  ;;  %v5573_v4 = vmul.f32 1.442695, %v5533_v42  ;;  %v9871_v14 = vpop.f32.mrf.mxu1 }
 0x649   : > { %v6908_v62 = vpop.eup %6907  ;;  %v5628_v55 = vadd.f32 1.0, %v6906_v37 }
 0x64a   : > { %v9843_v63 = vmul.f32 %v6908_v62, %v9801_v21  ;;  %v5379_v21 = vadd.f32 %v9762_v28, %v5290_v46  ;;  %v6910_v31 = vpop.eup %6909  ;;  %v5206_v28 = vadd.f32 %v9809_v60, %v5117_v20  ;;  %v5120_v62 = vadd.f32 %v9681_v6, %v9572_v15 }
 0x64b   : > { %6911 = vrcp.f32 %v5628_v55  ;;  %v5467_v54 = vpop.f32.mrf.mxu2  ;;  %v5690_v26 = vmul.f32 %v6910_v31, %v9786_v27 }
 0x64c   : > { %v9845_v32 = vpop.f32.mrf.mxu3  ;;  %v5719_v2 = vadd.f32 %v9843_v63, %v5689_v12  ;;  %v9854_v30 = vadd.f32 %v5467_v54, %v5379_v21  ;;  %6913 = vpow2.f32 %v5573_v4  ;;  %v5209_v23 = vadd.f32 %v9824_v56, %v5120_v62 }
 0x64d   : > { %v5294_v48 = vpop.f32.mrf.mxu0 }
 0x64e   : > { %v5735_v7 = vadd.f32 %v5719_v2, %v9774_v49  ;;  %v5382_v49 = vadd.f32 %v9784_v33, %v5293_v17  ;;  %v5534_v5 = vsub.f32 0.0, %v9854_v30  ;;  %v5295_v41 = vadd.f32 %v5294_v48, %v5206_v28 }
 0x650   : > { %5751 = vst [vmem:[#allocation3 + $0x19] sm:$0xff] %v5735_v7  ;;  %6437 = vmatmul.msk.bf16.gmra.mxu2 %vm278_vm0, %v9542_v58  ;;  %v5575_v33 = vmul.f32 1.442695, %v5534_v5  ;;  %v5384_v13 = vadd.f32 %v9806_v47, %v5295_v41  ;;  %v9886_v7 = vpop.f32.mrf.mxu1 }
 0x651   : > { %v6912_v34 = vpop.eup %6911 }
 0x652   : > { %v9862_v35 = vmul.f32 %v6912_v34, %v9812_v40  ;;  %v6914_v29 = vpop.eup %6913 }
 0x653   : > { %v5470_v43 = vpop.f32.mrf.mxu2  ;;  %v5629_v38 = vadd.f32 1.0, %v6914_v29 }
 0x654   : > { %v9866_v16 = vpop.f32.mrf.mxu3  ;;  %v5720_v3 = vadd.f32 %v9862_v35, %v5690_v26  ;;  %v5471_v53 = vadd.f32 %v5470_v43, %v5382_v49  ;;  %v4146_v26 = vld [vmem:[#allocation2 + $0x19a] sm:$0xff]  ;;  %v4147_v49 = vld [vmem:[#allocation2 + $0x1a2] sm:$0xff] }
 0x655   : > { %v5297_v45 = vpop.f32.mrf.mxu0  ;;  %v4182_v43 = vpack.c.bf16 %v4146_v26, %v4146_v26 }
 0x656   : > { %v5736_v27 = vadd.f32 %v5720_v3, %v9793_v10  ;;  %v5535_v40 = vsub.f32 0.0, %v5471_v53  ;;  %v5298_v17 = vadd.f32 %v5297_v45, %v5209_v23  ;;  %v4183_v3 = vpack.c.bf16 %v4147_v49, %v4147_v49 }
 0x658   : > { %5752 = vst [vmem:[#allocation3 + $0x21] sm:$0xff] %v5736_v27  ;;  %v5577_v60 = vmul.f32 1.442695, %v5535_v40  ;;  %5336 = vmatmul.bf16.gmra.mxu0 %v4740_v24  ;;  %v5387_v20 = vadd.f32 %v9826_v44, %v5298_v17  ;;  %v4551_v40 = vunpack.c.l.b16 %v4182_v43  ;;  %v9902_v29 = vpop.f32.mrf.mxu1 }
 0x65a   : > { %6915 = vpow2.f32 %v5577_v60 }
 0x65b   : > { %v5472_v37 = vpop.f32.mrf.mxu2  ;;  %6917 = vpow2.f32 %v5575_v33  ;;  %v4552_v33 = vunpack.c.l.b16 %v4183_v3 }
 0x65c   : > { %v9876_v1 = vpop.f32.mrf.mxu3  ;;  %v9878_v10 = vadd.f32 %v5472_v37, %v5384_v13  ;;  %6919 = vrcp.f32 %v5629_v38 }
 0x65d   : > { %v5299_v39 = vpop.f32.mrf.mxu0  ;;  %v4553_v38 = vpack.c.b16 %v4552_v33, %v4551_v40  ;;  %v5130_v33 = vadd.f32 %v9681_v6, %v9594_v36 }
 0x65e   : > { %v5536_v55 = vsub.f32 0.0, %v9878_v10 }
 0x65f   : > { %v5767_v57 = vld [vmem:[#allocation3 + $0x18] ss:$2 sm:$0xff]  ;;  %v5783_v12 = vld [vmem:[#allocation3 + $0x19] ss:$2 sm:$0xff] }
 0x660   : > { %v6916_v46 = vpop.eup %6915  ;;  %v5797_v54 = vadd.f32 %v5783_v12, %v5767_v57  ;;  %v5579_v47 = vmul.f32 1.442695, %v5536_v55  ;;  %6438 = vmatmul.msk.bf16.gmra.mxu2 %vm278_vm0, %v9735_v52  ;;  %v5807_v2 = vld [vmem:[#allocation3 + $0x1a] ss:$2 sm:$0xff]  ;;  %v5122_v52 = vadd.f32 %v9681_v6, %v9577_v8  ;;  %v5125_v8 = vadd.f32 %v9681_v6, %v9584_v18 }
 0x661   : > { %v5631_v42 = vadd.f32 1.0, %v6916_v46  ;;  %v6918_v48 = vpop.eup %6917  ;;  %v5127_v46 = vadd.f32 %v9681_v6, %v9588_v0 }
 0x662   : > { %v5821_v15 = vadd.f32 %v5807_v2, %v5797_v54  ;;  %6921 = vpow2.f32 %v5579_v47  ;;  %v5630_v56 = vadd.f32 1.0, %v6918_v48  ;;  %v6920_v28 = vpop.eup %6919  ;;  %v5211_v61 = vadd.f32 %v9845_v32, %v5122_v52  ;;  %v4003_v2 = vld [vmem:[#allocation2 + $0x1a0] sm:$0xff] }
 0x663   : > { %6923 = vrcp.f32 %v5631_v42  ;;  %v5475_v31 = vpop.f32.mrf.mxu2  ;;  %v5693_v44 = vmul.f32 %v6920_v28, %v9835_v19  ;;  %v5214_v32 = vadd.f32 %v9866_v16, %v5125_v8  ;;  %v5216_v42 = vadd.f32 %v9876_v1, %v5127_v46 }
 0x664   : > { %v9888_v21 = vpop.f32.mrf.mxu3  ;;  %v5829_v4 = vmul.f32 0.11111111, %v5821_v15  ;;  %v9895_v45 = vadd.f32 %v5475_v31, %v5387_v20  ;;  %6925 = vrcp.f32 %v5630_v56  ;;  %v5300_v9 = vadd.f32 %v5299_v39, %v5211_v61  ;;  %v9926_v56 = vpop.f32.mrf.mxu1 }
 0x665   : > { %v5302_v34 = vpop.f32.mrf.mxu0 }
 0x666   : > { %5837 = vst [vmem:[%s9828_s19 + $0x8] sm:$0xff] %v5829_v4  ;;  %v5537_v37 = vsub.f32 0.0, %v9895_v45  ;;  %v5303_v19 = vadd.f32 %v5302_v34, %v5214_v32  ;;  %v4039_v4 = vpack.c.bf16 %v4003_v2, %v4003_v2 }
 0x668   : > { %v6922_v5 = vpop.eup %6921  ;;  %v5581_v57 = vmul.f32 1.442695, %v5537_v37  ;;  %v5392_v47 = vadd.f32 %v9871_v14, %v5303_v19  ;;  %v4538_v49 = vunpack.c.l.b16 %v4039_v4  ;;  %v5219_v37 = vadd.f32 %v9888_v21, %v5130_v33 }
 0x669   : > { %v6924_v27 = vpop.eup %6923  ;;  %v5632_v41 = vadd.f32 1.0, %v6922_v5 }
 0x66a   : > { %v9900_v60 = vmul.f32 %v6924_v27, %v5471_v53  ;;  %v5389_v53 = vadd.f32 %v9850_v11, %v5300_v9  ;;  %v6926_v39 = vpop.eup %6925  ;;  %v4002_v11 = vld [vmem:[#allocation2 + $0x198] sm:$0xff] }
 0x66b   : > { %6927 = vrcp.f32 %v5632_v41  ;;  %v5477_v24 = vpop.f32.mrf.mxu2  ;;  %v5694_v54 = vmul.f32 %v6926_v39, %v9854_v30  ;;  %v4038_v31 = vpack.c.bf16 %v4002_v11, %v4002_v11 }
 0x66c   : > { %v5721_v13 = vadd.f32 %v9900_v60, %v5693_v44  ;;  %v9907_v62 = vpop.f32.mrf.mxu3  ;;  %v9911_v12 = vadd.f32 %v5477_v24, %v5389_v53  ;;  %6929 = vpow2.f32 %v5581_v57  ;;  %v5401_v24 = vpop.f32.mrf.mxu1 }
 0x66d   : > { %v5304_v55 = vpop.f32.mrf.mxu0  ;;  %v4537_v26 = vunpack.c.l.b16 %v4038_v31 }
 0x66e   : > { %v5737_v18 = vadd.f32 %v5721_v13, %v9843_v63  ;;  %v5538_v0 = vsub.f32 0.0, %v9911_v12  ;;  %v5305_v34 = vadd.f32 %v5304_v55, %v5216_v42 }
 0x670   : > { %5753 = vst [vmem:[#allocation3 + $0x31] sm:$0xff] %v5737_v18  ;;  %6439 = vmatmul.msk.bf16.gmra.mxu2 %vm278_vm0, %v4553_v38  ;;  %v5394_v43 = vadd.f32 %v9886_v7, %v5305_v34 }
 0x671   : > { %v6928_v16 = vpop.eup %6927 }
 0x672   : > { %v9918_v23 = vmul.f32 %v6928_v16, %v9878_v10  ;;  %v4546_v63 = vpop.permute.xlu2 %4545  ;;  %v6930_v28 = vpop.eup %6929 }
 0x673   : > { %v5480_v48 = vpop.f32.mrf.mxu2  ;;  %v4748_v15 = vsel %vm278_vm0, %v9733_v59, %v4546_v63  ;;  %v5583_v59 = vmul.f32 1.442695, %v5538_v0  ;;  %v5633_v61 = vadd.f32 1.0, %v6930_v28 }
 0x674   : > { %v5722_v17 = vadd.f32 %v9918_v23, %v5694_v54  ;;  %v5481_v30 = vadd.f32 %v5480_v48, %v5392_v47  ;;  %5425 = vmatmul.bf16.gmra.mxu1 %v4748_v15  ;;  %v9929_v52 = vpop.f32.mrf.mxu3  ;;  %v5132_v47 = vadd.f32 %v9681_v6, %v9598_v51  ;;  %v5403_v48 = vpop.f32.mrf.mxu1 }
 0x675   : > { %v5307_v10 = vpop.f32.mrf.mxu0 }
 0x676   : > { %v5738_v14 = vadd.f32 %v5722_v17, %v9862_v35  ;;  %v5539_v1 = vsub.f32 0.0, %v5481_v30  ;;  %v4539_v35 = vpack.c.b16 %v4538_v49, %v4537_v26  ;;  %v5308_v36 = vadd.f32 %v5307_v10, %v5219_v37 }
 0x677   : > { %v5221_v17 = vadd.f32 %v9907_v62, %v5132_v47 }
 0x678   : > { %5754 = vst [vmem:[#allocation3 + $0x39] sm:$0xff] %v5738_v14  ;;  %v5585_v20 = vmul.f32 1.442695, %v5539_v1  ;;  %v5397_v63 = vadd.f32 %v9902_v29, %v5308_v36  ;;  %v5135_v29 = vadd.f32 %v9681_v6, %v9604_v22 }
 0x67a   : > { %6931 = vpow2.f32 %v5585_v20  ;;  %v4548_v40 = vpop.permute.xlu2 %4547  ;;  %v5224_v62 = vadd.f32 %v9929_v52, %v5135_v29  ;;  %v5137_v52 = vadd.f32 %v9681_v6, %v9608_v50 }
 0x67b   : > { %v5482_v3 = vpop.f32.mrf.mxu2  ;;  %6933 = vpow2.f32 %v5583_v59  ;;  %v4752_v18 = vsel %vm278_vm0, %v4539_v35, %v4548_v40 }
 0x67c   : > { %v9932_v5 = vadd.f32 %v5482_v3, %v5394_v43  ;;  %6935 = vrcp.f32 %v5633_v61  ;;  %v5225_v55 = vpop.f32.mrf.mxu3 }
 0x67d   : > { %v5309_v27 = vpop.f32.mrf.mxu0 }
 0x67e   : > { %v5540_v41 = vsub.f32 0.0, %v9932_v5  ;;  %v5310_v34 = vadd.f32 %v5309_v27, %v5221_v17  ;;  %v5406_v27 = vpop.f32.mrf.mxu1 }
 0x67f   : > { %v5769_v8 = vld [vmem:[#allocation3 + $0x30] ss:$2 sm:$0xff]  ;;  %v5785_v44 = vld [vmem:[#allocation3 + $0x31] ss:$2 sm:$0xff] }
 0x680   : > { %v6932_v9 = vpop.eup %6931  ;;  %v5798_v32 = vadd.f32 %v5785_v44, %v5769_v8  ;;  %v5587_v13 = vmul.f32 1.442695, %v5540_v41  ;;  %v5809_v7 = vld [vmem:[#allocation3 + $0x32] ss:$2 sm:$0xff]  ;;  %v5226_v41 = vadd.f32 %v5225_v55, %v5137_v52 }
 0x681   : > { %v5635_v38 = vadd.f32 1.0, %v6932_v9  ;;  %v6934_v19 = vpop.eup %6933 }
 0x682   : > { %v5822_v53 = vadd.f32 %v5809_v7, %v5798_v32  ;;  %6937 = vpow2.f32 %v5587_v13  ;;  %v5634_v16 = vadd.f32 1.0, %v6934_v19  ;;  %v6936_v54 = vpop.eup %6935 }
 0x683   : > { %6939 = vrcp.f32 %v5635_v38  ;;  %v5485_v39 = vpop.f32.mrf.mxu2  ;;  %v5697_v15 = vmul.f32 %v6936_v54, %v9895_v45 }
 0x684   : > { %v5830_v57 = vmul.f32 0.11111111, %v5822_v53  ;;  %5430 = vmatmul.bf16.gmra.mxu1 %v4752_v18  ;;  %6941 = vrcp.f32 %v5634_v16  ;;  %v9943_v42 = vadd.f32 %v5485_v39, %v5397_v63  ;;  %v5228_v31 = vpop.f32.mrf.mxu3  ;;  %v10168_v18 = vld [vmem:[#allocation10_spill] sm:$0xff] }
 0x685   : > { %v5312_v46 = vpop.f32.mrf.mxu0 }
 0x686   : > { %5838 = vst [vmem:[%s9828_s19 + $0x10] sm:$0xff] %v5830_v57  ;;  %v5313_v26 = vadd.f32 %v5312_v46, %v5224_v62  ;;  %v5408_v37 = vpop.f32.mrf.mxu1 }
 0x688   : > { %v6938_v21 = vpop.eup %6937  ;;  %v5402_v61 = vadd.f32 %v5401_v24, %v5313_v26 }
 0x689   : > { %v6940_v11 = vpop.eup %6939  ;;  %v5636_v2 = vadd.f32 1.0, %v6938_v21 }
 0x68a   : > { %v9947_v0 = vmul.f32 %v6940_v11, %v5481_v30  ;;  %v5541_v30 = vsub.f32 0.0, %v9943_v42  ;;  %v6942_v20 = vpop.eup %6941 }
 0x68b   : > { %v4492_v10 = vpop.permute.xlu0 %4491  ;;  %6943 = vrcp.f32 %v5636_v2  ;;  %v5487_v1 = vpop.f32.mrf.mxu2  ;;  %v5698_v43 = vmul.f32 %v6942_v20, %v9911_v12 }
 0x68c   : > { %v4534_v4 = vpop.permute.xlu1 %4533  ;;  %v4680_v51 = vsel %vm278_vm0, %v9542_v58, %v4492_v10  ;;  %v5723_v14 = vadd.f32 %v9947_v0, %v5697_v15  ;;  %v5399_v58 = vadd.f32 %v9926_v56, %v5310_v34  ;;  %v5589_v28 = vmul.f32 1.442695, %v5541_v30  ;;  %v5230_v56 = vpop.f32.mrf.mxu3  ;;  %v10169_v10 = vld [vmem:[#allocation19_spill] sm:$0xff]  ;;  %v10170_v30 = vld [vmem:[#allocation9_spill] sm:$0xff] }
 0x68d   : > { %5252 = vmatmul.bf16.gmra.mxu3 %v4680_v51  ;;  %v4744_v45 = vsel %vm278_vm0, %v9731_v25, %v4534_v4  ;;  %v5314_v22 = vpop.f32.mrf.mxu0  ;;  %v5142_v29 = vadd.f32 %v9681_v6, %v10169_v10 }
 0x68e   : > { %5341 = vmatmul.bf16.gmra.mxu0 %v4744_v45  ;;  %v5739_v59 = vadd.f32 %v5723_v14, %v9900_v60  ;;  %v9964_v25 = vadd.f32 %v5487_v1, %v5399_v58  ;;  %6945 = vpow2.f32 %v5589_v28  ;;  %v5315_v8 = vadd.f32 %v5314_v22, %v5226_v41  ;;  %v5411_v34 = vpop.f32.mrf.mxu1 }
 0x68f   : > { %v5145_v22 = vadd.f32 %v9681_v6, %v10170_v30  ;;  %v10173_v30 = vld [vmem:[#allocation15_spill] sm:$0xff] }
 0x690   : > { %5755 = vst [vmem:[#allocation3 + $0x49] sm:$0xff] %v5739_v59  ;;  %v5542_v12 = vsub.f32 0.0, %v9964_v25  ;;  %v5404_v24 = vadd.f32 %v5403_v48, %v5315_v8 }
 0x691   : > { %v6944_v49 = vpop.eup %6943 }
 0x692   : > { %v9962_v3 = vmul.f32 %v6944_v49, %v9932_v5  ;;  %v5591_v32 = vmul.f32 1.442695, %v5542_v12 }
 0x693   : > { %v5490_v35 = vpop.f32.mrf.mxu2 }
 0x694   : > { %v5724_v60 = vadd.f32 %v9962_v3, %v5698_v43  ;;  %v5491_v40 = vadd.f32 %v5490_v35, %v5402_v61  ;;  %v6946_v50 = vpop.eup %6945  ;;  %v5233_v36 = vpop.f32.mrf.mxu3 }
 0x695   : > { %v5317_v5 = vpop.f32.mrf.mxu0  ;;  %v5637_v38 = vadd.f32 1.0, %v6946_v50  ;;  %v5234_v43 = vadd.f32 %v5233_v36, %v5145_v22 }
 0x696   : > { %v5740_v33 = vadd.f32 %v5724_v60, %v9918_v23  ;;  %v5543_v44 = vsub.f32 0.0, %v5491_v40  ;;  %v5140_v23 = vadd.f32 %v9681_v6, %v10168_v18 }
 0x698   : > { %5756 = vst [vmem:[#allocation3 + $0x51] sm:$0xff] %v5740_v33  ;;  %v5593_v9 = vmul.f32 1.442695, %v5543_v44  ;;  %v5229_v54 = vadd.f32 %v5228_v31, %v5140_v23  ;;  %v5231_v31 = vadd.f32 %v5230_v56, %v5142_v29  ;;  %v10171_v33 = vld [vmem:[#allocation16_spill] sm:$0xff] }
 0x69a   : > { %6947 = vpow2.f32 %v5593_v9  ;;  %v5318_v11 = vadd.f32 %v5317_v5, %v5229_v54  ;;  %v5413_v5 = vpop.f32.mrf.mxu1 }
 0x69b   : > { %v5492_v13 = vpop.f32.mrf.mxu2  ;;  %6949 = vpow2.f32 %v5591_v32 }
 0x69c   : > { %v9971_v7 = vadd.f32 %v5492_v13, %v5404_v24  ;;  %6951 = vrcp.f32 %v5637_v38  ;;  %v5407_v51 = vadd.f32 %v5406_v27, %v5318_v11  ;;  %v5235_v1 = vpop.f32.mrf.mxu3 }
 0x69d   : > { %v5319_v55 = vpop.f32.mrf.mxu0 }
 0x69e   : > { %v5544_v57 = vsub.f32 0.0, %v9971_v7  ;;  %v5320_v58 = vadd.f32 %v5319_v55, %v5231_v31 }
 0x69f   : > { %v5771_v19 = vld [vmem:[#allocation3 + $0x48] ss:$2 sm:$0xff]  ;;  %v5787_v53 = vld [vmem:[#allocation3 + $0x49] ss:$2 sm:$0xff] }
 0x6a0   : > { %v5799_v39 = vadd.f32 %v5787_v53, %v5771_v19  ;;  %v6948_v16 = vpop.eup %6947  ;;  %v5811_v46 = vld [vmem:[#allocation3 + $0x4a] ss:$2 sm:$0xff]  ;;  %v5595_v47 = vmul.f32 1.442695, %v5544_v57  ;;  %v5409_v6 = vadd.f32 %v5408_v37, %v5320_v58 }
 0x6a1   : > { %v5639_v21 = vadd.f32 1.0, %v6948_v16  ;;  %v6950_v2 = vpop.eup %6949 }
 0x6a2   : > { %v5823_v63 = vadd.f32 %v5811_v46, %v5799_v39  ;;  %v5638_v4 = vadd.f32 1.0, %v6950_v2  ;;  %v6952_v14 = vpop.eup %6951  ;;  %v5416_v57 = vpop.f32.mrf.mxu1 }
 0x6a3   : > { %6953 = vrcp.f32 %v5639_v21  ;;  %v5495_v15 = vpop.f32.mrf.mxu2  ;;  %v5701_v20 = vmul.f32 %v6952_v14, %v9943_v42 }
 0x6a4   : > { %v5831_v48 = vmul.f32 0.11111111, %v5823_v63  ;;  %6955 = vpow2.f32 %v5595_v47  ;;  %v9979_v45 = vadd.f32 %v5495_v15, %v5407_v51  ;;  %v5238_v8 = vpop.f32.mrf.mxu3  ;;  %v10172_v63 = vld [vmem:[#allocation17_spill] sm:$0xff] }
 0x6a5   : > { %v5322_v17 = vpop.f32.mrf.mxu0  ;;  %6957 = vrcp.f32 %v5638_v4 }
 0x6a6   : > { %5839 = vst [vmem:[%s9828_s19 + $0x18] sm:$0xff] %v5831_v48  ;;  %v5545_v61 = vsub.f32 0.0, %v9979_v45  ;;  %v5323_v35 = vadd.f32 %v5322_v17, %v5234_v43 }
 0x6a8   : > { %v5597_v42 = vmul.f32 1.442695, %v5545_v61  ;;  %v5412_v44 = vadd.f32 %v5411_v34, %v5323_v35  ;;  %v10174_v35 = vld [vmem:[#allocation11_spill] sm:$0xff] }
 0x6a9   : > { %v6954_v62 = vpop.eup %6953 }
 0x6aa   : > { %v6956_v59 = vpop.eup %6955  ;;  %v9984_v26 = vmul.f32 %v6954_v62, %v5491_v40  ;;  %v9994_v40 = vld [vmem:[%s10085_s6] ss:$0 sm:$0xff] }
 0x6ab   : > { %v5640_v49 = vadd.f32 1.0, %v6956_v59  ;;  %v5497_v28 = vpop.f32.mrf.mxu2  ;;  %v6958_v41 = vpop.eup %6957  ;;  %v5147_v12 = vadd.f32 %v9994_v40, %v10171_v33  ;;  %v5150_v21 = vadd.f32 %v9994_v40, %v10172_v63  ;;  %v5152_v22 = vadd.f32 %v9994_v40, %v10173_v30 }
 0x6ac   : > { %v5725_v52 = vadd.f32 %v9984_v26, %v5701_v20  ;;  %v9989_v56 = vadd.f32 %v5497_v28, %v5409_v6  ;;  %v5240_v16 = vpop.f32.mrf.mxu3  ;;  %v5155_v6 = vadd.f32 %v9994_v40, %v10174_v35 }
 0x6ad   : > { %6959 = vrcp.f32 %v5640_v49  ;;  %v5324_v27 = vpop.f32.mrf.mxu0  ;;  %v5236_v32 = vadd.f32 %v5235_v1, %v5147_v12  ;;  %v5239_v48 = vadd.f32 %v5238_v8, %v5150_v21  ;;  %v5418_v1 = vpop.f32.mrf.mxu1  ;;  %v5241_v43 = vadd.f32 %v5240_v16, %v5152_v22 }
 0x6ae   : > { %v5741_v60 = vadd.f32 %v5725_v52, %v9947_v0  ;;  %v5702_v0 = vmul.f32 %v6958_v41, %v9964_v25  ;;  %6961 = vpow2.f32 %v5597_v42  ;;  %v5546_v13 = vsub.f32 0.0, %v9989_v56 }
 0x6af   : > { %v5325_v18 = vadd.f32 %v5324_v27, %v5236_v32 }
 0x6b0   : > { %5757 = vst [vmem:[#allocation3 + $0x61] sm:$0xff] %v5741_v60  ;;  %v5599_v53 = vmul.f32 1.442695, %v5546_v13 }
 0x6b1   : > { %v5414_v25 = vadd.f32 %v5413_v5, %v5325_v18 }
 0x6b3   : > { %v6960_v9 = vpop.eup %6959  ;;  %v5500_v50 = vpop.f32.mrf.mxu2 }
 0x6b4   : > { %v10000_v24 = vmul.f32 %v6960_v9, %v9971_v7  ;;  %v5501_v37 = vadd.f32 %v5500_v50, %v5412_v44  ;;  %v6962_v39 = vpop.eup %6961  ;;  %v5243_v20 = vpop.f32.mrf.mxu3 }
 0x6b5   : > { %v5327_v38 = vpop.f32.mrf.mxu0  ;;  %v5641_v54 = vadd.f32 1.0, %v6962_v39  ;;  %v5244_v5 = vadd.f32 %v5243_v20, %v5155_v6  ;;  %v5421_v50 = vpop.f32.mrf.mxu1 }
 0x6b6   : > { %v5726_v55 = vadd.f32 %v10000_v24, %v5702_v0  ;;  %v5547_v23 = vsub.f32 0.0, %v5501_v37  ;;  %v5328_v51 = vadd.f32 %v5327_v38, %v5239_v48 }
 0x6b8   : > { %v5742_v19 = vadd.f32 %v5726_v55, %v9962_v3  ;;  %v5601_v36 = vmul.f32 1.442695, %v5547_v23  ;;  %v5417_v58 = vadd.f32 %v5416_v57, %v5328_v51 }
 0x6ba   : > { %5758 = vst [vmem:[#allocation3 + $0x69] sm:$0xff] %v5742_v19  ;;  %6963 = vpow2.f32 %v5601_v36 }
 0x6bb   : > { %v5502_v7 = vpop.f32.mrf.mxu2  ;;  %6965 = vpow2.f32 %v5599_v53 }
 0x6bc   : > { %v5503_v46 = vadd.f32 %v5502_v7, %v5414_v25  ;;  %6967 = vrcp.f32 %v5641_v54  ;;  %v5245_v38 = vpop.f32.mrf.mxu3 }
 0x6bd   : > { %v5329_v11 = vpop.f32.mrf.mxu0 }
 0x6be   : > { %v5548_v47 = vsub.f32 0.0, %v5503_v46  ;;  %v5330_v41 = vadd.f32 %v5329_v11, %v5241_v43 }
 0x6c0   : > { %v6964_v2 = vpop.eup %6963  ;;  %v5603_v3 = vmul.f32 1.442695, %v5548_v47  ;;  %v5419_v0 = vadd.f32 %v5418_v1, %v5330_v41 }
 0x6c1   : > { %v5773_v15 = vld [vmem:[#allocation3 + $0x60] ss:$2 sm:$0xff]  ;;  %v5789_v17 = vld [vmem:[#allocation3 + $0x61] ss:$2 sm:$0xff]  ;;  %v6966_v10 = vpop.eup %6965  ;;  %v5643_v4 = vadd.f32 1.0, %v6964_v2  ;;  %v5423_v2 = vpop.f32.mrf.mxu1 }
 0x6c2   : > { %v5800_v29 = vadd.f32 %v5789_v17, %v5773_v15  ;;  %6969 = vpow2.f32 %v5603_v3  ;;  %v5813_v14 = vld [vmem:[#allocation3 + $0x62] ss:$2 sm:$0xff]  ;;  %v5642_v62 = vadd.f32 1.0, %v6966_v10  ;;  %v6968_v49 = vpop.eup %6967 }
 0x6c3   : > { %v5505_v34 = vpop.f32.mrf.mxu2  ;;  %6971 = vrcp.f32 %v5643_v4  ;;  %v5705_v42 = vmul.f32 %v6968_v49, %v9979_v45  ;;  %v10175_v45 = vld [vmem:[#allocation12_spill] sm:$0xff] }
 0x6c4   : > { %v5824_v31 = vadd.f32 %v5813_v14, %v5800_v29  ;;  %v10009_v52 = vadd.f32 %v5505_v34, %v5417_v58  ;;  %6973 = vrcp.f32 %v5642_v62 }
 0x6c5   : > { %v5332_v27 = vpop.f32.mrf.mxu0 }
 0x6c6   : > { %v5832_v59 = vmul.f32 0.11111111, %v5824_v31  ;;  %v5549_v8 = vsub.f32 0.0, %v10009_v52  ;;  %v5333_v9 = vadd.f32 %v5332_v27, %v5244_v5 }
 0x6c8   : > { %v6970_v28 = vpop.eup %6969  ;;  %5840 = vst [vmem:[%s9828_s19 + $0x20] sm:$0xff] %v5832_v59  ;;  %v5605_v55 = vmul.f32 1.442695, %v5549_v8  ;;  %v5422_v36 = vadd.f32 %v5421_v50, %v5333_v9  ;;  %v10176_v8 = vld [vmem:[#allocation13_spill] sm:$0xff] }
 0x6c9   : > { %v5644_v61 = vadd.f32 1.0, %v6970_v28  ;;  %v6972_v60 = vpop.eup %6971 }
 0x6ca   : > { %v10015_v33 = vmul.f32 %v6972_v60, %v5501_v37  ;;  %v6974_v32 = vpop.eup %6973  ;;  %v5157_v37 = vadd.f32 %v9994_v40, %v10175_v45 }
 0x6cb   : > { %6975 = vrcp.f32 %v5644_v61  ;;  %v5507_v12 = vpop.f32.mrf.mxu2  ;;  %v5706_v19 = vmul.f32 %v6974_v32, %v9989_v56 }
 0x6cc   : > { %v5727_v44 = vadd.f32 %v10015_v33, %v5705_v42  ;;  %v5508_v18 = vadd.f32 %v5507_v12, %v5419_v0  ;;  %v5246_v39 = vadd.f32 %v5245_v38, %v5157_v37  ;;  %6977 = vpow2.f32 %v5605_v55  ;;  %v5248_v12 = vpop.f32.mrf.mxu3 }
 0x6cd   : > { %v5334_v25 = vpop.f32.mrf.mxu0 }
 0x6ce   : > { %v5743_v13 = vadd.f32 %v5727_v44, %v9984_v26  ;;  %v5550_v16 = vsub.f32 0.0, %v5508_v18  ;;  %v5335_v63 = vadd.f32 %v5334_v25, %v5246_v39  ;;  %v5160_v44 = vadd.f32 %v9994_v40, %v10176_v8 }
 0x6d0   : > { %5759 = vst [vmem:[#allocation3 + $0x79] sm:$0xff] %v5743_v13  ;;  %v5607_v47 = vmul.f32 1.442695, %v5550_v16  ;;  %v5424_v56 = vadd.f32 %v5423_v2, %v5335_v63  ;;  %v5249_v50 = vadd.f32 %v5248_v12, %v5160_v44  ;;  %v10178_v16 = vld [vmem:[#allocation7_spill] sm:$0xff] }
 0x6d1   : > { %v6976_v23 = vpop.eup %6975 }
 0x6d2   : > { %v5708_v53 = vmul.f32 %v6976_v23, %v5503_v46  ;;  %v6978_v48 = vpop.eup %6977 }
 0x6d3   : > { %v5510_v57 = vpop.f32.mrf.mxu2  ;;  %v5645_v15 = vadd.f32 1.0, %v6978_v48 }
 0x6d4   : > { %v5728_v7 = vadd.f32 %v5708_v53, %v5706_v19  ;;  %v5511_v54 = vadd.f32 %v5510_v57, %v5422_v36  ;;  %v5250_v45 = vpop.f32.mrf.mxu3  ;;  %v10177_v19 = vld [vmem:[#allocation14_spill] sm:$0xff] }
 0x6d6   : > { %v5744_v26 = vadd.f32 %v5728_v7, %v10000_v24  ;;  %v5551_v21 = vsub.f32 0.0, %v5511_v54 }
 0x6d8   : > { %5760 = vst [vmem:[#allocation3 + $0x81] sm:$0xff] %v5744_v26  ;;  %v5609_v11 = vmul.f32 1.442695, %v5551_v21 }
 0x6da   : > { %6979 = vpow2.f32 %v5609_v11 }
 0x6db   : > { %v5512_v46 = vpop.f32.mrf.mxu2  ;;  %6981 = vpow2.f32 %v5607_v47 }
 0x6dc   : > { %v5513_v3 = vadd.f32 %v5512_v46, %v5424_v56  ;;  %6983 = vrcp.f32 %v5645_v15 }
 0x6de   : > { %v5552_v17 = vsub.f32 0.0, %v5513_v3 }
 0x6df   : > { %v5775_v10 = vld [vmem:[#allocation3 + $0x78] ss:$2 sm:$0xff]  ;;  %v5791_v29 = vld [vmem:[#allocation3 + $0x79] ss:$2 sm:$0xff] }
 0x6e0   : > { %v6980_v4 = vpop.eup %6979  ;;  %v5801_v51 = vadd.f32 %v5791_v29, %v5775_v10  ;;  %v5611_v24 = vmul.f32 1.442695, %v5552_v17  ;;  %v5815_v14 = vld [vmem:[#allocation3 + $0x7a] ss:$2 sm:$0xff] }
 0x6e1   : > { %v5647_v34 = vadd.f32 1.0, %v6980_v4  ;;  %v6982_v31 = vpop.eup %6981  ;;  %v10179_v17 = vld [vmem:[#allocation18_spill] sm:$0xff] }
 0x6e2   : > { %v5825_v1 = vadd.f32 %v5815_v14, %v5801_v51  ;;  %6985 = vpow2.f32 %v5611_v24  ;;  %v5646_v30 = vadd.f32 1.0, %v6982_v31  ;;  %v6984_v22 = vpop.eup %6983  ;;  %v5167_v10 = vadd.f32 %v9994_v40, %v10179_v17 }
 0x6e3   : > { %6987 = vrcp.f32 %v5647_v34  ;;  %v5709_v49 = vmul.f32 %v6984_v22, %v10009_v52  ;;  %v5337_v52 = vpop.f32.mrf.mxu0  ;;  %v5515_v32 = vpop.f32.mrf.mxu2 }
 0x6e4   : > { %v5833_v62 = vmul.f32 0.11111111, %v5825_v1  ;;  %6989 = vrcp.f32 %v5646_v30  ;;  %v5338_v55 = vadd.f32 %v5337_v52, %v5249_v50 }
 0x6e6   : > { %5841 = vst [vmem:[%s9828_s19 + $0x28] sm:$0xff] %v5833_v62 }
 0x6e8   : > { %v6986_v59 = vpop.eup %6985 }
 0x6e9   : > { %v6988_v20 = vpop.eup %6987  ;;  %v5648_v58 = vadd.f32 1.0, %v6986_v59 }
 0x6ea   : > { %v10026_v28 = vmul.f32 %v6988_v20, %v5511_v54  ;;  %v6990_v27 = vpop.eup %6989  ;;  %v5165_v54 = vadd.f32 %v9994_v40, %v10178_v16 }
 0x6eb   : > { %6991 = vrcp.f32 %v5648_v58  ;;  %v5710_v35 = vmul.f32 %v6990_v27, %v5508_v18  ;;  %v5339_v37 = vpop.f32.mrf.mxu0  ;;  %v5517_v57 = vpop.f32.mrf.mxu2 }
 0x6ec   : > { %v5729_v43 = vadd.f32 %v10026_v28, %v5709_v49 }
 0x6ee   : > { %v5745_v61 = vadd.f32 %v5729_v43, %v10015_v33 }
 0x6f0   : > { %5761 = vst [vmem:[#allocation3 + $0x91] sm:$0xff] %v5745_v61 }
 0x6f1   : > { %v6992_v60 = vpop.eup %6991  ;;  %v5426_v5 = vpop.f32.mrf.mxu1 }
 0x6f2   : > { %v10030_v6 = vmul.f32 %v6992_v60, %v5513_v3  ;;  %v5427_v23 = vadd.f32 %v5426_v5, %v5338_v55 }
 0x6f3   : > { %v5520_v3 = vpop.f32.mrf.mxu2 }
 0x6f4   : > { %v5730_v41 = vadd.f32 %v10030_v6, %v5710_v35  ;;  %v5516_v25 = vadd.f32 %v5515_v32, %v5427_v23 }
 0x6f6   : > { %v5746_v42 = vadd.f32 %v5730_v41, %v5708_v53  ;;  %v5162_v53 = vadd.f32 %v9994_v40, %v10177_v19  ;;  %v5553_v26 = vsub.f32 0.0, %v5516_v25 }
 0x6f8   : > { %5762 = vst [vmem:[#allocation3 + $0x99] sm:$0xff] %v5746_v42  ;;  %v5251_v39 = vadd.f32 %v5250_v45, %v5162_v53  ;;  %v5613_v48 = vmul.f32 1.442695, %v5553_v26 }
 0x6f9   : > { %v5428_v36 = vpop.f32.mrf.mxu1 }
 0x6fa   : > { %v5340_v7 = vadd.f32 %v5339_v37, %v5251_v39  ;;  %6993 = vpow2.f32 %v5613_v48 }
 0x6fb   : > { %v5522_v20 = vpop.f32.mrf.mxu2 }
 0x6fc   : > { %v5429_v63 = vadd.f32 %v5428_v36, %v5340_v7 }
 0x6fe   : > { %v5518_v56 = vadd.f32 %v5517_v57, %v5429_v63 }
 0x6ff   : > { %v5777_v9 = vld [vmem:[#allocation3 + $0x90] ss:$2 sm:$0xff]  ;;  %v5793_v0 = vld [vmem:[#allocation3 + $0x91] ss:$2 sm:$0xff] }
 0x700   : > { %v5802_v33 = vadd.f32 %v5793_v0, %v5777_v9  ;;  %v5817_v13 = vld [vmem:[#allocation3 + $0x92] ss:$2 sm:$0xff]  ;;  %v5554_v29 = vsub.f32 0.0, %v5518_v56  ;;  %v6994_v22 = vpop.eup %6993 }
 0x701   : > { %v5431_v2 = vpop.f32.mrf.mxu1  ;;  %v5649_v49 = vadd.f32 1.0, %v6994_v22 }
 0x702   : > { %v5826_v38 = vadd.f32 %v5817_v13, %v5802_v33  ;;  %v5615_v31 = vmul.f32 1.442695, %v5554_v29 }
 0x704   : > { %v5834_v18 = vmul.f32 0.11111111, %v5826_v38 }
 0x706   : > { %5842 = vst [vmem:[%s9828_s19 + $0x30] sm:$0xff] %v5834_v18 }
 0x709   : > { %v5433_v30 = vpop.f32.mrf.mxu1 }
 0x70b   : > { %v5342_v21 = vpop.f32.mrf.mxu0 }
 0x710   : > { %v5253_v47 = vpop.f32.mrf.mxu3 }
 0x711   : > { %v5254_v11 = vadd.f32 %v5253_v47, %v5165_v54 }
 0x713   : > { %v5343_v46 = vadd.f32 %v5342_v21, %v5254_v11  ;;  %v5344_v34 = vpop.f32.mrf.mxu0 }
 0x715   : > { %v5432_v15 = vadd.f32 %v5431_v2, %v5343_v46 }
 0x717   : > { %v5521_v4 = vadd.f32 %v5520_v3, %v5432_v15 }
 0x718   : > { %v5255_v51 = vpop.f32.mrf.mxu3 }
 0x719   : > { %v5555_v24 = vsub.f32 0.0, %v5521_v4  ;;  %v5256_v14 = vadd.f32 %v5255_v51, %v5167_v10 }
 0x71b   : > { %v5617_v1 = vmul.f32 1.442695, %v5555_v24  ;;  %v5345_v62 = vadd.f32 %v5344_v34, %v5256_v14 }
 0x71d   : > { %6995 = vpow2.f32 %v5617_v1  ;;  %v5434_v59 = vadd.f32 %v5433_v30, %v5345_v62 }
 0x71e   : > { %6997 = vpow2.f32 %v5615_v31 }
 0x71f   : > { %v5523_v58 = vadd.f32 %v5522_v20, %v5434_v59  ;;  %6999 = vrcp.f32 %v5649_v49 }
 0x721   : > { %v5556_v43 = vsub.f32 0.0, %v5523_v58 }
 0x723   : > { %v6996_v40 = vpop.eup %6995  ;;  %v5619_v61 = vmul.f32 1.442695, %v5556_v43 }
 0x724   : > { %v5651_v27 = vadd.f32 1.0, %v6996_v40  ;;  %v6998_v60 = vpop.eup %6997 }
 0x725   : > { %7001 = vpow2.f32 %v5619_v61  ;;  %v5650_v35 = vadd.f32 1.0, %v6998_v60  ;;  %v7000_v41 = vpop.eup %6999 }
 0x726   : > { %7003 = vrcp.f32 %v5651_v27  ;;  %v5713_v5 = vmul.f32 %v7000_v41, %v5516_v25 }
 0x727   : > { %7005 = vrcp.f32 %v5650_v35 }
 0x72b   : > { %v7002_v42 = vpop.eup %7001 }
 0x72c   : > { %v7004_v12 = vpop.eup %7003  ;;  %v5652_v52 = vadd.f32 1.0, %v7002_v42 }
 0x72d   : > { %v5715_v8 = vmul.f32 %v7004_v12, %v5521_v4  ;;  %v7006_v0 = vpop.eup %7005 }
 0x72e   : > { %7007 = vrcp.f32 %v5652_v52  ;;  %v5714_v32 = vmul.f32 %v7006_v0, %v5518_v56 }
 0x72f   : > { %v5731_v44 = vadd.f32 %v5715_v8, %v5713_v5 }
 0x731   : > { %v5747_v9 = vadd.f32 %v5731_v44, %v10026_v28 }
 0x733   : > { %5763 = vst [vmem:[#allocation3 + $0xa9] sm:$0xff] %v5747_v9 }
 0x734   : > { %v7008_v33 = vpop.eup %7007 }
 0x735   : > { %v5716_v50 = vmul.f32 %v7008_v33, %v5523_v58 }
 0x737   : > { %v5732_v13 = vadd.f32 %v5716_v50, %v5714_v32 }
 0x739   : > { %v5748_v38 = vadd.f32 %v5732_v13, %v10030_v6 }
 0x73b   : > { %5764 = vst [vmem:[#allocation3 + $0xb1] sm:$0xff] %v5748_v38 }
 0x742   : > { %v5779_v55 = vld [vmem:[#allocation3 + $0xa8] ss:$2 sm:$0xff]  ;;  %v5795_v18 = vld [vmem:[#allocation3 + $0xa9] ss:$2 sm:$0xff] }
 0x743   : > { %v5803_v28 = vadd.f32 %v5795_v18, %v5779_v55  ;;  %v5819_v23 = vld [vmem:[#allocation3 + $0xaa] ss:$2 sm:$0xff] }
 0x745   : > { %v5827_v45 = vadd.f32 %v5819_v23, %v5803_v28 }
 0x747   : > { %v5835_v37 = vmul.f32 0.11111111, %v5827_v45 }
 0x749   : > { %5843 = vst [vmem:[%s9828_s19 + $0x38] sm:$0xff] %v5835_v37 }
 0x74a   : > { %7040 = shalt.err (!%p7037_p3)
}
 0x74b   : > { %s7079_s17 = smov 128   ;;  %s7080_s19 = smov 8  }
 0x74c   : > { %6579 = dma.vmem_to_hbm [thread:$0]  (%p7159_p5), %s5858_s9, 1024, %s5860_s13, %s5845_s14, %s7079_s17, %s7079_s17, %s7080_s19  }
 0x74d PF: > { %p6585_p4 = scmp.ge.s32.totalorder %s7075_s27, 2  ;;  %s5874_s23 = sand.u32 1, %s7063_s24  }
 0x74e   : > { %s5875_s29 = scalar_lea.sflag [#allocation5], %s5874_s23 }
 0x74f   : > { %p6582_p7 = pnand %p6585_p4, %p7163_p6 }
 0x751   : > { %p6583_p8 = pneg %p6582_p7 }
 0x753   : > { %7058 = dma.done.wait (%p6583_p8), %s5875_s29, 1024  }
 0x754   : > { %7060 = vsyncadd (%p6583_p8), %s5875_s29, 4294966272  ;;  %p17_p9 = scmp.ge.s32.totalorder %s7146_s30, 4   ;;  %s10180_s24 = smov %s7067_s25 }
 0x755   : > { %s10181_s25 = smov %s7071_s26  ;;  %s10182_s26 = smov %s7157_s10 }
 0x756   : > { %s10183_s27 = smov %s7146_s30  ;;  %19 = sbr.rel (!%p17_p9) target bundleno = 3 (0x3), region = 109 }
 0x75b   :  { %5881 = vsyncpa [#allocation5], 1 }
 0x75c   :  { %5883 = vsyncpa [#allocation5 + $0x1], 1 }

</bundles_post_ra>
